<compile_context>
chip_gen: v6e
topology: v6e:2x2x1
jax: 0.10.0
libtpu: 0.0.40
codegen_flags: <defaults>
</compile_context>

<pallas_src>
import jax
import jax.numpy as jnp
from jax.experimental import pallas as pl
from jax.experimental.pallas import tpu as pltpu


def _vgg_fused_kernel(x_ref, cw1_ref, cb1_ref, cw2_ref, cb2_ref,
                      fw1_ref, fb1_ref, fw2_ref, fb2_ref,
                      o_ref,
                      pad1, act1, pad2, act2):
    B, H1, W1, C0 = x_ref.shape              # 2, 16, 16, 3
    C1 = cw1_ref.shape[2]                    # 8
    C2 = cw2_ref.shape[2]                    # 16
    H2, W2 = H1 // 2, W1 // 2                # 8, 8  (after 2x2 pool1)
    S = 2                                    # adaptive max pool output (S, S)
    P = H2 // S                              # 4     (pool2 o adaptive == P x P window)
    M1 = B * H1 * W1                         # 512   conv1 matmul rows (batch folded in)
    M2 = B * H2 * W2                         # 128   conv2 matmul rows
    HID = fw1_ref.shape[2]                   # 32
    f32 = jnp.float32
    taps = [(dy, dx) for dy in range(3) for dx in range(3)]

    # -------- conv1: 3x3 pad 1, C0 -> C1, + bias + ReLU  (9 accumulated matmuls) -----
    pad1[...] = jnp.zeros_like(pad1)                           # in-kernel halo pad
    pad1[:, 1:H1 + 1, 1:W1 + 1, :] = x_ref[...]
    y1 = jnp.zeros((M1, C1), f32) + cb1_ref[...]               # start from bias
    for t, (dy, dx) in enumerate(taps):
        patch = pad1[:, dy:dy + H1, dx:dx + W1, :].reshape(M1, C0)
        y1 = y1 + jnp.dot(patch, cw1_ref[t], preferred_element_type=f32)
    act1[...] = jnp.maximum(y1, 0.0)                           # (M1, C1), rows = (b, h, w)

    # -------- maxpool 2x2 stride 2 --------------------------------------------------
    # w is the fastest row index -> even/odd w are stride-2 sublane reads.
    m1 = jnp.maximum(act1[pl.ds(0, M1 // 2, stride=2), :],
                     act1[pl.ds(1, M1 // 2, stride=2), :])     # (B*H1*W2, C1) rows (b,h,wo)
    # adjacent h live in consecutive W2-row blocks -> fold the pair onto a leading axis
    p1 = jnp.max(m1.reshape(B * H2, 2, W2, C1), axis=1)        # (B*H2, W2, C1)

    # -------- conv2: 3x3 pad 1, C1 -> C2, + bias + ReLU ------------------------------
    pad2[...] = jnp.zeros_like(pad2)
    pad2[:, 1:H2 + 1, 1:W2 + 1, :] = p1.reshape(B, H2, W2, C1)
    y2 = jnp.zeros((M2, C2), f32) + cb2_ref[...]
    for t, (dy, dx) in enumerate(taps):
        patch = pad2[:, dy:dy + H2, dx:dx + W2, :].reshape(M2, C1)
        y2 = y2 + jnp.dot(patch, cw2_ref[t], preferred_element_type=f32)
    act2[...] = jnp.maximum(y2, 0.0)                           # (M2, C2), rows = (b, h, w)

    # -------- maxpool 2x2 + adaptive maxpool to (2,2)  ==  one P x P (4x4) pool ------
    m2 = act2[pl.ds(0, M2 // P, stride=P), :]                  # w-groups of P via stride-P reads
    for k in range(1, P):
        m2 = jnp.maximum(m2, act2[pl.ds(k, M2 // P, stride=P), :])
    # m2: (B*H2*S, C2), rows = (b, h, wo)
    m2r = m2.reshape(B * S, P * S, C2)                         # inner index = (h % P)*S + wo
    p2 = m2r[:, 0:S, :]
    for hl in range(1, P):                                     # h-groups of P
        p2 = jnp.maximum(p2, m2r[:, hl * S:(hl + 1) * S, :])
    r = p2.reshape(B, S, S, C2)                                # (b, ho, wo, c), register value

    # -------- classifier: Linear(S*S*C2 -> HID)+ReLU, Linear(HID -> NCLS) ------------
    # PyTorch's x.view(N, -1) flattens NCHW as (c, ho, wo); the fc1 weight rows were
    # pre-split/permuted in the wrapper into a (S*S, C2, HID) stack so the contraction
    # is 4 accumulated matmuls over the spatial taps -- no flatten buffer, no
    # activation transpose, no lane-narrow stores.
    # TODO(synk): nn.Dropout layers of the classifier are identity at inference; omitted.
    hid = jnp.zeros((B, HID), f32) + fb1_ref[...]
    for ho in range(S):
        for wo in range(S):
            hid = hid + jnp.dot(r[:, ho, wo, :], fw1_ref[ho * S + wo],
                                preferred_element_type=f32)
    hid = jnp.maximum(hid, 0.0)                                # (B, HID)
    logits = jnp.dot(hid, fw2_ref[...], preferred_element_type=f32) + fb2_ref[...]
    o_ref[...] = logits.astype(o_ref.dtype)                    # (B, 10)


def vgg_forward(x_nchw, params):
    """Forward pass of the scaled-down VGG.  x_nchw: (B, 3, 16, 16) float32, NCHW."""
    B, C0, H, W = x_nchw.shape
    (w1, b1), (w2, b2) = params["conv"]        # PyTorch layout (Cout, Cin, 3, 3)
    (fw1, fb1), (fw2, fb2) = params["fc"]      # PyTorch layout (Dout, Din)
    C1, C2 = w1.shape[0], w2.shape[0]
    S = 2
    HID, NCLS = fw1.shape[0], fw2.shape[0]
    Hh, Wh = H // 2, W // 2

    x_nhwc = jnp.transpose(x_nchw, (0, 2, 3, 1))               # tiny one-time relayout

    # conv weights -> per-tap stack (9, Cin, Cout), tap index = (ky, kx)
    w1k = jnp.transpose(w1, (2, 3, 1, 0)).reshape(9, C0, C1)
    w2k = jnp.transpose(w2, (2, 3, 1, 0)).reshape(9, C1, C2)
    # fc1 expects an NCHW-flattened input (c, ho, wo); split its weight rows into a
    # per-spatial-tap stack (S*S, C2, HID) once here so the kernel can contract the
    # NHWC-ordered pooled features tap-by-tap with no activation transpose.
    fw1k = jnp.transpose(fw1.reshape(HID, C2, S, S), (2, 3, 1, 0)).reshape(S * S, C2, HID)
    fw2k = jnp.transpose(fw2, (1, 0))

    return pl.pallas_call(
        _vgg_fused_kernel,
        out_shape=jax.ShapeDtypeStruct((B, NCLS), jnp.float32),
        scratch_shapes=[
            pltpu.VMEM((B, H + 2, W + 2, C0), jnp.float32),      # pad1 (halo-padded input)
            pltpu.VMEM((B * H * W, C1), jnp.float32),            # act1 (conv1+ReLU out)
            pltpu.VMEM((B, Hh + 2, Wh + 2, C1), jnp.float32),    # pad2 (halo-padded pool1)
            pltpu.VMEM((B * Hh * Wh, C2), jnp.float32),          # act2 (conv2+ReLU out)
        ],
    )(x_nhwc, w1k, b1.reshape(1, C1), w2k, b2.reshape(1, C2),
      fw1k, fb1.reshape(1, HID), fw2k, fb2.reshape(1, NCLS))


def init_vgg_params(key):
    """Weights in PyTorch layout, matching VGG._initialize_weights()."""
    k1, k2, k3, k4 = jax.random.split(key, 4)
    C0, C1, C2, S, HID, NCLS = 3, 8, 16, 2, 32, 10
    std1 = (2.0 / (C1 * 3 * 3)) ** 0.5          # kaiming_normal, fan_out, relu
    std2 = (2.0 / (C2 * 3 * 3)) ** 0.5
    conv = [
        (std1 * jax.random.normal(k1, (C1, C0, 3, 3), jnp.float32),
         jnp.zeros((C1,), jnp.float32)),
        (std2 * jax.random.normal(k2, (C2, C1, 3, 3), jnp.float32),
         jnp.zeros((C2,), jnp.float32)),
    ]
    fc = [
        (0.01 * jax.random.normal(k3, (HID, C2 * S * S), jnp.float32),
         jnp.zeros((HID,), jnp.float32)),
        (0.01 * jax.random.normal(k4, (NCLS, HID), jnp.float32),
         jnp.zeros((NCLS,), jnp.float32)),
    ]
    return {"conv": conv, "fc": fc}


if __name__ == "__main__":
    key = jax.random.PRNGKey(0)
    kx, kp = jax.random.split(key)

    B, C0, H, W = 2, 3, 16, 16                  # batch=2, img_size=[3, 16, 16]
    x = jax.random.normal(kx, (B, C0, H, W), jnp.float32)
    params = init_vgg_params(kp)

    fwd = jax.jit(vgg_forward)
    out = fwd(x, params)
    jax.block_until_ready(out)
    assert out.shape == (B, 10) and out.dtype == jnp.float32
    print("KERNEL_OK")
</pallas_src>

<mosaic_0001>
module attributes {stable_mosaic.version = 11 : i64} {
  func.func @_vgg_fused_kernel(%arg0: memref<2x16x16x3xf32, #tpu.memory_space<vmem>>, %arg1: memref<9x3x8xf32, #tpu.memory_space<vmem>>, %arg2: memref<1x8xf32, #tpu.memory_space<vmem>>, %arg3: memref<9x8x16xf32, #tpu.memory_space<vmem>>, %arg4: memref<1x16xf32, #tpu.memory_space<vmem>>, %arg5: memref<4x16x32xf32, #tpu.memory_space<vmem>>, %arg6: memref<1x32xf32, #tpu.memory_space<vmem>>, %arg7: memref<32x10xf32, #tpu.memory_space<vmem>>, %arg8: memref<1x10xf32, #tpu.memory_space<vmem>>, %arg9: memref<2x10xf32, #tpu.memory_space<vmem>>, %arg10: memref<2x18x18x3xf32, #tpu.memory_space<vmem>>, %arg11: memref<512x8xf32, #tpu.memory_space<vmem>>, %arg12: memref<2x10x10x8xf32, #tpu.memory_space<vmem>>, %arg13: memref<128x16xf32, #tpu.memory_space<vmem>>) attributes {dimension_semantics = [], scalar_prefetch = 0 : i64, scratch_operands = 4 : i64, tpu.core_type = #tpu.core_type<tc>} {
    %cst = arith.constant 0.000000e+00 : f32
    %0 = vector.broadcast %cst : f32 to vector<2x18x18x3xf32>
    %c0 = arith.constant 0 : index
    %c0_0 = arith.constant 0 : index
    %c0_1 = arith.constant 0 : index
    %c0_2 = arith.constant 0 : index
    %1 = vector.load %arg10[%c0, %c0_0, %c0_1, %c0_2] : memref<2x18x18x3xf32, #tpu.memory_space<vmem>>, vector<2x18x18x3xf32>
    tpu.vector_store %arg10[%c0, %c0_0, %c0_1, %c0_2], %0 {strides = array<i32>} : memref<2x18x18x3xf32, #tpu.memory_space<vmem>>, vector<2x18x18x3xf32>,
    %c0_3 = arith.constant 0 : index
    %c0_4 = arith.constant 0 : index
    %c0_5 = arith.constant 0 : index
    %c0_6 = arith.constant 0 : index
    %2 = vector.load %arg0[%c0_3, %c0_4, %c0_5, %c0_6] : memref<2x16x16x3xf32, #tpu.memory_space<vmem>>, vector<2x16x16x3xf32>
    %c0_7 = arith.constant 0 : index
    %c1 = arith.constant 1 : index
    %c1_8 = arith.constant 1 : index
    %c0_9 = arith.constant 0 : index
    %3 = vector.load %arg10[%c0_7, %c1, %c1_8, %c0_9] : memref<2x18x18x3xf32, #tpu.memory_space<vmem>>, vector<2x16x16x3xf32>
    tpu.vector_store %arg10[%c0_7, %c1, %c1_8, %c0_9], %2 {strides = array<i32>} : memref<2x18x18x3xf32, #tpu.memory_space<vmem>>, vector<2x16x16x3xf32>,
    %cst_10 = arith.constant 0.000000e+00 : f32
    %4 = vector.broadcast %cst_10 : f32 to vector<512x8xf32>
    %c0_11 = arith.constant 0 : index
    %c0_12 = arith.constant 0 : index
    %5 = vector.load %arg2[%c0_11, %c0_12] : memref<1x8xf32, #tpu.memory_space<vmem>>, vector<1x8xf32>
    %6 = vector.broadcast %5 : vector<1x8xf32> to vector<512x8xf32>
    %7 = arith.addf %4, %6 : vector<512x8xf32>
    %c0_13 = arith.constant 0 : index
    %c0_14 = arith.constant 0 : index
    %c0_15 = arith.constant 0 : index
    %c0_16 = arith.constant 0 : index
    %8 = vector.load %arg10[%c0_13, %c0_14, %c0_15, %c0_16] : memref<2x18x18x3xf32, #tpu.memory_space<vmem>>, vector<2x16x16x3xf32>
    %9 = vector.shape_cast %8 : vector<2x16x16x3xf32> to vector<512x3xf32>
    %c0_17 = arith.constant 0 : index
    %c0_18 = arith.constant 0 : index
    %c0_19 = arith.constant 0 : index
    %10 = vector.load %arg1[%c0_17, %c0_18, %c0_19] : memref<9x3x8xf32, #tpu.memory_space<vmem>>, vector<1x3x8xf32>
    %11 = vector.shape_cast %10 : vector<1x3x8xf32> to vector<3x8xf32>
    %cst_20 = arith.constant dense<0.000000e+00> : vector<512x8xf32>
    %12 = tpu.matmul %9, %11, %cst_20 {dimension_numbers = #tpu.dot_dimension_numbers<[1], [0], [0], [1], [0, 0, 1, 1], [], []>} : vector<512x3xf32>, vector<3x8xf32>, vector<512x8xf32> -> vector<512x8xf32>
    %13 = arith.addf %7, %12 : vector<512x8xf32>
    %c0_21 = arith.constant 0 : index
    %c0_22 = arith.constant 0 : index
    %c1_23 = arith.constant 1 : index
    %c0_24 = arith.constant 0 : index
    %14 = vector.load %arg10[%c0_21, %c0_22, %c1_23, %c0_24] : memref<2x18x18x3xf32, #tpu.memory_space<vmem>>, vector<2x16x16x3xf32>
    %15 = vector.shape_cast %14 : vector<2x16x16x3xf32> to vector<512x3xf32>
    %c1_25 = arith.constant 1 : index
    %c0_26 = arith.constant 0 : index
    %c0_27 = arith.constant 0 : index
    %16 = vector.load %arg1[%c1_25, %c0_26, %c0_27] : memref<9x3x8xf32, #tpu.memory_space<vmem>>, vector<1x3x8xf32>
    %17 = vector.shape_cast %16 : vector<1x3x8xf32> to vector<3x8xf32>
    %cst_28 = arith.constant dense<0.000000e+00> : vector<512x8xf32>
    %18 = tpu.matmul %15, %17, %cst_28 {dimension_numbers = #tpu.dot_dimension_numbers<[1], [0], [0], [1], [0, 0, 1, 1], [], []>} : vector<512x3xf32>, vector<3x8xf32>, vector<512x8xf32> -> vector<512x8xf32>
    %19 = arith.addf %13, %18 : vector<512x8xf32>
    %c0_29 = arith.constant 0 : index
    %c0_30 = arith.constant 0 : index
    %c2 = arith.constant 2 : index
    %c0_31 = arith.constant 0 : index
    %20 = vector.load %arg10[%c0_29, %c0_30, %c2, %c0_31] : memref<2x18x18x3xf32, #tpu.memory_space<vmem>>, vector<2x16x16x3xf32>
    %21 = vector.shape_cast %20 : vector<2x16x16x3xf32> to vector<512x3xf32>
    %c2_32 = arith.constant 2 : index
    %c0_33 = arith.constant 0 : index
    %c0_34 = arith.constant 0 : index
    %22 = vector.load %arg1[%c2_32, %c0_33, %c0_34] : memref<9x3x8xf32, #tpu.memory_space<vmem>>, vector<1x3x8xf32>
    %23 = vector.shape_cast %22 : vector<1x3x8xf32> to vector<3x8xf32>
    %cst_35 = arith.constant dense<0.000000e+00> : vector<512x8xf32>
    %24 = tpu.matmul %21, %23, %cst_35 {dimension_numbers = #tpu.dot_dimension_numbers<[1], [0], [0], [1], [0, 0, 1, 1], [], []>} : vector<512x3xf32>, vector<3x8xf32>, vector<512x8xf32> -> vector<512x8xf32>
    %25 = arith.addf %19, %24 : vector<512x8xf32>
    %c0_36 = arith.constant 0 : index
    %c1_37 = arith.constant 1 : index
    %c0_38 = arith.constant 0 : index
    %c0_39 = arith.constant 0 : index
    %26 = vector.load %arg10[%c0_36, %c1_37, %c0_38, %c0_39] : memref<2x18x18x3xf32, #tpu.memory_space<vmem>>, vector<2x16x16x3xf32>
    %27 = vector.shape_cast %26 : vector<2x16x16x3xf32> to vector<512x3xf32>
    %c3 = arith.constant 3 : index
    %c0_40 = arith.constant 0 : index
    %c0_41 = arith.constant 0 : index
    %28 = vector.load %arg1[%c3, %c0_40, %c0_41] : memref<9x3x8xf32, #tpu.memory_space<vmem>>, vector<1x3x8xf32>
    %29 = vector.shape_cast %28 : vector<1x3x8xf32> to vector<3x8xf32>
    %cst_42 = arith.constant dense<0.000000e+00> : vector<512x8xf32>
    %30 = tpu.matmul %27, %29, %cst_42 {dimension_numbers = #tpu.dot_dimension_numbers<[1], [0], [0], [1], [0, 0, 1, 1], [], []>} : vector<512x3xf32>, vector<3x8xf32>, vector<512x8xf32> -> vector<512x8xf32>
    %31 = arith.addf %25, %30 : vector<512x8xf32>
    %c0_43 = arith.constant 0 : index
    %c1_44 = arith.constant 1 : index
    %c1_45 = arith.constant 1 : index
    %c0_46 = arith.constant 0 : index
    %32 = vector.load %arg10[%c0_43, %c1_44, %c1_45, %c0_46] : memref<2x18x18x3xf32, #tpu.memory_space<vmem>>, vector<2x16x16x3xf32>
    %33 = vector.shape_cast %32 : vector<2x16x16x3xf32> to vector<512x3xf32>
    %c4 = arith.constant 4 : index
    %c0_47 = arith.constant 0 : index
    %c0_48 = arith.constant 0 : index
    %34 = vector.load %arg1[%c4, %c0_47, %c0_48] : memref<9x3x8xf32, #tpu.memory_space<vmem>>, vector<1x3x8xf32>
    %35 = vector.shape_cast %34 : vector<1x3x8xf32> to vector<3x8xf32>
    %cst_49 = arith.constant dense<0.000000e+00> : vector<512x8xf32>
    %36 = tpu.matmul %33, %35, %cst_49 {dimension_numbers = #tpu.dot_dimension_numbers<[1], [0], [0], [1], [0, 0, 1, 1], [], []>} : vector<512x3xf32>, vector<3x8xf32>, vector<512x8xf32> -> vector<512x8xf32>
    %37 = arith.addf %31, %36 : vector<512x8xf32>
    %c0_50 = arith.constant 0 : index
    %c1_51 = arith.constant 1 : index
    %c2_52 = arith.constant 2 : index
    %c0_53 = arith.constant 0 : index
    %38 = vector.load %arg10[%c0_50, %c1_51, %c2_52, %c0_53] : memref<2x18x18x3xf32, #tpu.memory_space<vmem>>, vector<2x16x16x3xf32>
    %39 = vector.shape_cast %38 : vector<2x16x16x3xf32> to vector<512x3xf32>
    %c5 = arith.constant 5 : index
    %c0_54 = arith.constant 0 : index
    %c0_55 = arith.constant 0 : index
    %40 = vector.load %arg1[%c5, %c0_54, %c0_55] : memref<9x3x8xf32, #tpu.memory_space<vmem>>, vector<1x3x8xf32>
    %41 = vector.shape_cast %40 : vector<1x3x8xf32> to vector<3x8xf32>
    %cst_56 = arith.constant dense<0.000000e+00> : vector<512x8xf32>
    %42 = tpu.matmul %39, %41, %cst_56 {dimension_numbers = #tpu.dot_dimension_numbers<[1], [0], [0], [1], [0, 0, 1, 1], [], []>} : vector<512x3xf32>, vector<3x8xf32>, vector<512x8xf32> -> vector<512x8xf32>
    %43 = arith.addf %37, %42 : vector<512x8xf32>
    %c0_57 = arith.constant 0 : index
    %c2_58 = arith.constant 2 : index
    %c0_59 = arith.constant 0 : index
    %c0_60 = arith.constant 0 : index
    %44 = vector.load %arg10[%c0_57, %c2_58, %c0_59, %c0_60] : memref<2x18x18x3xf32, #tpu.memory_space<vmem>>, vector<2x16x16x3xf32>
    %45 = vector.shape_cast %44 : vector<2x16x16x3xf32> to vector<512x3xf32>
    %c6 = arith.constant 6 : index
    %c0_61 = arith.constant 0 : index
    %c0_62 = arith.constant 0 : index
    %46 = vector.load %arg1[%c6, %c0_61, %c0_62] : memref<9x3x8xf32, #tpu.memory_space<vmem>>, vector<1x3x8xf32>
    %47 = vector.shape_cast %46 : vector<1x3x8xf32> to vector<3x8xf32>
    %cst_63 = arith.constant dense<0.000000e+00> : vector<512x8xf32>
    %48 = tpu.matmul %45, %47, %cst_63 {dimension_numbers = #tpu.dot_dimension_numbers<[1], [0], [0], [1], [0, 0, 1, 1], [], []>} : vector<512x3xf32>, vector<3x8xf32>, vector<512x8xf32> -> vector<512x8xf32>
    %49 = arith.addf %43, %48 : vector<512x8xf32>
    %c0_64 = arith.constant 0 : index
    %c2_65 = arith.constant 2 : index
    %c1_66 = arith.constant 1 : index
    %c0_67 = arith.constant 0 : index
    %50 = vector.load %arg10[%c0_64, %c2_65, %c1_66, %c0_67] : memref<2x18x18x3xf32, #tpu.memory_space<vmem>>, vector<2x16x16x3xf32>
    %51 = vector.shape_cast %50 : vector<2x16x16x3xf32> to vector<512x3xf32>
    %c7 = arith.constant 7 : index
    %c0_68 = arith.constant 0 : index
    %c0_69 = arith.constant 0 : index
    %52 = vector.load %arg1[%c7, %c0_68, %c0_69] : memref<9x3x8xf32, #tpu.memory_space<vmem>>, vector<1x3x8xf32>
    %53 = vector.shape_cast %52 : vector<1x3x8xf32> to vector<3x8xf32>
    %cst_70 = arith.constant dense<0.000000e+00> : vector<512x8xf32>
    %54 = tpu.matmul %51, %53, %cst_70 {dimension_numbers = #tpu.dot_dimension_numbers<[1], [0], [0], [1], [0, 0, 1, 1], [], []>} : vector<512x3xf32>, vector<3x8xf32>, vector<512x8xf32> -> vector<512x8xf32>
    %55 = arith.addf %49, %54 : vector<512x8xf32>
    %c0_71 = arith.constant 0 : index
    %c2_72 = arith.constant 2 : index
    %c2_73 = arith.constant 2 : index
    %c0_74 = arith.constant 0 : index
    %56 = vector.load %arg10[%c0_71, %c2_72, %c2_73, %c0_74] : memref<2x18x18x3xf32, #tpu.memory_space<vmem>>, vector<2x16x16x3xf32>
    %57 = vector.shape_cast %56 : vector<2x16x16x3xf32> to vector<512x3xf32>
    %c8 = arith.constant 8 : index
    %c0_75 = arith.constant 0 : index
    %c0_76 = arith.constant 0 : index
    %58 = vector.load %arg1[%c8, %c0_75, %c0_76] : memref<9x3x8xf32, #tpu.memory_space<vmem>>, vector<1x3x8xf32>
    %59 = vector.shape_cast %58 : vector<1x3x8xf32> to vector<3x8xf32>
    %cst_77 = arith.constant dense<0.000000e+00> : vector<512x8xf32>
    %60 = tpu.matmul %57, %59, %cst_77 {dimension_numbers = #tpu.dot_dimension_numbers<[1], [0], [0], [1], [0, 0, 1, 1], [], []>} : vector<512x3xf32>, vector<3x8xf32>, vector<512x8xf32> -> vector<512x8xf32>
    %61 = arith.addf %55, %60 : vector<512x8xf32>
    %cst_78 = arith.constant 0.000000e+00 : f32
    %62 = vector.broadcast %cst_78 : f32 to vector<512x8xf32>
    %63 = arith.maximumf %61, %62 : vector<512x8xf32>
    %c0_79 = arith.constant 0 : index
    %c0_80 = arith.constant 0 : index
    %64 = vector.load %arg11[%c0_79, %c0_80] : memref<512x8xf32, #tpu.memory_space<vmem>>, vector<512x8xf32>
    tpu.vector_store %arg11[%c0_79, %c0_80], %63 {strides = array<i32>} : memref<512x8xf32, #tpu.memory_space<vmem>>, vector<512x8xf32>,
    %c0_81 = arith.constant 0 : index
    %c0_82 = arith.constant 0 : index
    %65 = tpu.strided_load %arg11[%c0_81, %c0_82] {strides = array<i32: 2, 1>} : memref<512x8xf32, #tpu.memory_space<vmem>>, vector<256x8xf32>
    %c1_83 = arith.constant 1 : index
    %c0_84 = arith.constant 0 : index
    %66 = tpu.strided_load %arg11[%c1_83, %c0_84] {strides = array<i32: 2, 1>} : memref<512x8xf32, #tpu.memory_space<vmem>>, vector<256x8xf32>
    %67 = arith.maximumf %65, %66 : vector<256x8xf32>
    %68 = vector.shape_cast %67 : vector<256x8xf32> to vector<16x2x8x8xf32>
    %cst_85 = arith.constant dense<0xFF800000> : vector<16x8x8xf32>
    %69 = vector.multi_reduction <maximumf>, %68, %cst_85 [1] : vector<16x2x8x8xf32> to vector<16x8x8xf32>
    %cst_86 = arith.constant 0.000000e+00 : f32
    %70 = vector.broadcast %cst_86 : f32 to vector<2x10x10x8xf32>
    %c0_87 = arith.constant 0 : index
    %c0_88 = arith.constant 0 : index
    %c0_89 = arith.constant 0 : index
    %c0_90 = arith.constant 0 : index
    %71 = vector.load %arg12[%c0_87, %c0_88, %c0_89, %c0_90] : memref<2x10x10x8xf32, #tpu.memory_space<vmem>>, vector<2x10x10x8xf32>
    tpu.vector_store %arg12[%c0_87, %c0_88, %c0_89, %c0_90], %70 {strides = array<i32>} : memref<2x10x10x8xf32, #tpu.memory_space<vmem>>, vector<2x10x10x8xf32>,
    %72 = vector.shape_cast %69 : vector<16x8x8xf32> to vector<2x8x8x8xf32>
    %c0_91 = arith.constant 0 : index
    %c1_92 = arith.constant 1 : index
    %c1_93 = arith.constant 1 : index
    %c0_94 = arith.constant 0 : index
    %73 = vector.load %arg12[%c0_91, %c1_92, %c1_93, %c0_94] : memref<2x10x10x8xf32, #tpu.memory_space<vmem>>, vector<2x8x8x8xf32>
    tpu.vector_store %arg12[%c0_91, %c1_92, %c1_93, %c0_94], %72 {strides = array<i32>} : memref<2x10x10x8xf32, #tpu.memory_space<vmem>>, vector<2x8x8x8xf32>,
    %cst_95 = arith.constant 0.000000e+00 : f32
    %74 = vector.broadcast %cst_95 : f32 to vector<128x16xf32>
    %c0_96 = arith.constant 0 : index
    %c0_97 = arith.constant 0 : index
    %75 = vector.load %arg4[%c0_96, %c0_97] : memref<1x16xf32, #tpu.memory_space<vmem>>, vector<1x16xf32>
    %76 = vector.broadcast %75 : vector<1x16xf32> to vector<128x16xf32>
    %77 = arith.addf %74, %76 : vector<128x16xf32>
    %c0_98 = arith.constant 0 : index
    %c0_99 = arith.constant 0 : index
    %c0_100 = arith.constant 0 : index
    %c0_101 = arith.constant 0 : index
    %78 = vector.load %arg12[%c0_98, %c0_99, %c0_100, %c0_101] : memref<2x10x10x8xf32, #tpu.memory_space<vmem>>, vector<2x8x8x8xf32>
    %79 = vector.shape_cast %78 : vector<2x8x8x8xf32> to vector<128x8xf32>
    %c0_102 = arith.constant 0 : index
    %c0_103 = arith.constant 0 : index
    %c0_104 = arith.constant 0 : index
    %80 = vector.load %arg3[%c0_102, %c0_103, %c0_104] : memref<9x8x16xf32, #tpu.memory_space<vmem>>, vector<1x8x16xf32>
    %81 = vector.shape_cast %80 : vector<1x8x16xf32> to vector<8x16xf32>
    %cst_105 = arith.constant dense<0.000000e+00> : vector<128x16xf32>
    %82 = tpu.matmul %79, %81, %cst_105 {dimension_numbers = #tpu.dot_dimension_numbers<[1], [0], [0], [1], [0, 0, 1, 1], [], []>} : vector<128x8xf32>, vector<8x16xf32>, vector<128x16xf32> -> vector<128x16xf32>
    %83 = arith.addf %77, %82 : vector<128x16xf32>
    %c0_106 = arith.constant 0 : index
    %c0_107 = arith.constant 0 : index
    %c1_108 = arith.constant 1 : index
    %c0_109 = arith.constant 0 : index
    %84 = vector.load %arg12[%c0_106, %c0_107, %c1_108, %c0_109] : memref<2x10x10x8xf32, #tpu.memory_space<vmem>>, vector<2x8x8x8xf32>
    %85 = vector.shape_cast %84 : vector<2x8x8x8xf32> to vector<128x8xf32>
    %c1_110 = arith.constant 1 : index
    %c0_111 = arith.constant 0 : index
    %c0_112 = arith.constant 0 : index
    %86 = vector.load %arg3[%c1_110, %c0_111, %c0_112] : memref<9x8x16xf32, #tpu.memory_space<vmem>>, vector<1x8x16xf32>
    %87 = vector.shape_cast %86 : vector<1x8x16xf32> to vector<8x16xf32>
    %cst_113 = arith.constant dense<0.000000e+00> : vector<128x16xf32>
    %88 = tpu.matmul %85, %87, %cst_113 {dimension_numbers = #tpu.dot_dimension_numbers<[1], [0], [0], [1], [0, 0, 1, 1], [], []>} : vector<128x8xf32>, vector<8x16xf32>, vector<128x16xf32> -> vector<128x16xf32>
    %89 = arith.addf %83, %88 : vector<128x16xf32>
    %c0_114 = arith.constant 0 : index
    %c0_115 = arith.constant 0 : index
    %c2_116 = arith.constant 2 : index
    %c0_117 = arith.constant 0 : index
    %90 = vector.load %arg12[%c0_114, %c0_115, %c2_116, %c0_117] : memref<2x10x10x8xf32, #tpu.memory_space<vmem>>, vector<2x8x8x8xf32>
    %91 = vector.shape_cast %90 : vector<2x8x8x8xf32> to vector<128x8xf32>
    %c2_118 = arith.constant 2 : index
    %c0_119 = arith.constant 0 : index
    %c0_120 = arith.constant 0 : index
    %92 = vector.load %arg3[%c2_118, %c0_119, %c0_120] : memref<9x8x16xf32, #tpu.memory_space<vmem>>, vector<1x8x16xf32>
    %93 = vector.shape_cast %92 : vector<1x8x16xf32> to vector<8x16xf32>
    %cst_121 = arith.constant dense<0.000000e+00> : vector<128x16xf32>
    %94 = tpu.matmul %91, %93, %cst_121 {dimension_numbers = #tpu.dot_dimension_numbers<[1], [0], [0], [1], [0, 0, 1, 1], [], []>} : vector<128x8xf32>, vector<8x16xf32>, vector<128x16xf32> -> vector<128x16xf32>
    %95 = arith.addf %89, %94 : vector<128x16xf32>
    %c0_122 = arith.constant 0 : index
    %c1_123 = arith.constant 1 : index
    %c0_124 = arith.constant 0 : index
    %c0_125 = arith.constant 0 : index
    %96 = vector.load %arg12[%c0_122, %c1_123, %c0_124, %c0_125] : memref<2x10x10x8xf32, #tpu.memory_space<vmem>>, vector<2x8x8x8xf32>
    %97 = vector.shape_cast %96 : vector<2x8x8x8xf32> to vector<128x8xf32>
    %c3_126 = arith.constant 3 : index
    %c0_127 = arith.constant 0 : index
    %c0_128 = arith.constant 0 : index
    %98 = vector.load %arg3[%c3_126, %c0_127, %c0_128] : memref<9x8x16xf32, #tpu.memory_space<vmem>>, vector<1x8x16xf32>
    %99 = vector.shape_cast %98 : vector<1x8x16xf32> to vector<8x16xf32>
    %cst_129 = arith.constant dense<0.000000e+00> : vector<128x16xf32>
    %100 = tpu.matmul %97, %99, %cst_129 {dimension_numbers = #tpu.dot_dimension_numbers<[1], [0], [0], [1], [0, 0, 1, 1], [], []>} : vector<128x8xf32>, vector<8x16xf32>, vector<128x16xf32> -> vector<128x16xf32>
    %101 = arith.addf %95, %100 : vector<128x16xf32>
    %c0_130 = arith.constant 0 : index
    %c1_131 = arith.constant 1 : index
    %c1_132 = arith.constant 1 : index
    %c0_133 = arith.constant 0 : index
    %102 = vector.load %arg12[%c0_130, %c1_131, %c1_132, %c0_133] : memref<2x10x10x8xf32, #tpu.memory_space<vmem>>, vector<2x8x8x8xf32>
    %103 = vector.shape_cast %102 : vector<2x8x8x8xf32> to vector<128x8xf32>
    %c4_134 = arith.constant 4 : index
    %c0_135 = arith.constant 0 : index
    %c0_136 = arith.constant 0 : index
    %104 = vector.load %arg3[%c4_134, %c0_135, %c0_136] : memref<9x8x16xf32, #tpu.memory_space<vmem>>, vector<1x8x16xf32>
    %105 = vector.shape_cast %104 : vector<1x8x16xf32> to vector<8x16xf32>
    %cst_137 = arith.constant dense<0.000000e+00> : vector<128x16xf32>
    %106 = tpu.matmul %103, %105, %cst_137 {dimension_numbers = #tpu.dot_dimension_numbers<[1], [0], [0], [1], [0, 0, 1, 1], [], []>} : vector<128x8xf32>, vector<8x16xf32>, vector<128x16xf32> -> vector<128x16xf32>
    %107 = arith.addf %101, %106 : vector<128x16xf32>
    %c0_138 = arith.constant 0 : index
    %c1_139 = arith.constant 1 : index
    %c2_140 = arith.constant 2 : index
    %c0_141 = arith.constant 0 : index
    %108 = vector.load %arg12[%c0_138, %c1_139, %c2_140, %c0_141] : memref<2x10x10x8xf32, #tpu.memory_space<vmem>>, vector<2x8x8x8xf32>
    %109 = vector.shape_cast %108 : vector<2x8x8x8xf32> to vector<128x8xf32>
    %c5_142 = arith.constant 5 : index
    %c0_143 = arith.constant 0 : index
    %c0_144 = arith.constant 0 : index
    %110 = vector.load %arg3[%c5_142, %c0_143, %c0_144] : memref<9x8x16xf32, #tpu.memory_space<vmem>>, vector<1x8x16xf32>
    %111 = vector.shape_cast %110 : vector<1x8x16xf32> to vector<8x16xf32>
    %cst_145 = arith.constant dense<0.000000e+00> : vector<128x16xf32>
    %112 = tpu.matmul %109, %111, %cst_145 {dimension_numbers = #tpu.dot_dimension_numbers<[1], [0], [0], [1], [0, 0, 1, 1], [], []>} : vector<128x8xf32>, vector<8x16xf32>, vector<128x16xf32> -> vector<128x16xf32>
    %113 = arith.addf %107, %112 : vector<128x16xf32>
    %c0_146 = arith.constant 0 : index
    %c2_147 = arith.constant 2 : index
    %c0_148 = arith.constant 0 : index
    %c0_149 = arith.constant 0 : index
    %114 = vector.load %arg12[%c0_146, %c2_147, %c0_148, %c0_149] : memref<2x10x10x8xf32, #tpu.memory_space<vmem>>, vector<2x8x8x8xf32>
    %115 = vector.shape_cast %114 : vector<2x8x8x8xf32> to vector<128x8xf32>
    %c6_150 = arith.constant 6 : index
    %c0_151 = arith.constant 0 : index
    %c0_152 = arith.constant 0 : index
    %116 = vector.load %arg3[%c6_150, %c0_151, %c0_152] : memref<9x8x16xf32, #tpu.memory_space<vmem>>, vector<1x8x16xf32>
    %117 = vector.shape_cast %116 : vector<1x8x16xf32> to vector<8x16xf32>
    %cst_153 = arith.constant dense<0.000000e+00> : vector<128x16xf32>
    %118 = tpu.matmul %115, %117, %cst_153 {dimension_numbers = #tpu.dot_dimension_numbers<[1], [0], [0], [1], [0, 0, 1, 1], [], []>} : vector<128x8xf32>, vector<8x16xf32>, vector<128x16xf32> -> vector<128x16xf32>
    %119 = arith.addf %113, %118 : vector<128x16xf32>
    %c0_154 = arith.constant 0 : index
    %c2_155 = arith.constant 2 : index
    %c1_156 = arith.constant 1 : index
    %c0_157 = arith.constant 0 : index
    %120 = vector.load %arg12[%c0_154, %c2_155, %c1_156, %c0_157] : memref<2x10x10x8xf32, #tpu.memory_space<vmem>>, vector<2x8x8x8xf32>
    %121 = vector.shape_cast %120 : vector<2x8x8x8xf32> to vector<128x8xf32>
    %c7_158 = arith.constant 7 : index
    %c0_159 = arith.constant 0 : index
    %c0_160 = arith.constant 0 : index
    %122 = vector.load %arg3[%c7_158, %c0_159, %c0_160] : memref<9x8x16xf32, #tpu.memory_space<vmem>>, vector<1x8x16xf32>
    %123 = vector.shape_cast %122 : vector<1x8x16xf32> to vector<8x16xf32>
    %cst_161 = arith.constant dense<0.000000e+00> : vector<128x16xf32>
    %124 = tpu.matmul %121, %123, %cst_161 {dimension_numbers = #tpu.dot_dimension_numbers<[1], [0], [0], [1], [0, 0, 1, 1], [], []>} : vector<128x8xf32>, vector<8x16xf32>, vector<128x16xf32> -> vector<128x16xf32>
    %125 = arith.addf %119, %124 : vector<128x16xf32>
    %c0_162 = arith.constant 0 : index
    %c2_163 = arith.constant 2 : index
    %c2_164 = arith.constant 2 : index
    %c0_165 = arith.constant 0 : index
    %126 = vector.load %arg12[%c0_162, %c2_163, %c2_164, %c0_165] : memref<2x10x10x8xf32, #tpu.memory_space<vmem>>, vector<2x8x8x8xf32>
    %127 = vector.shape_cast %126 : vector<2x8x8x8xf32> to vector<128x8xf32>
    %c8_166 = arith.constant 8 : index
    %c0_167 = arith.constant 0 : index
    %c0_168 = arith.constant 0 : index
    %128 = vector.load %arg3[%c8_166, %c0_167, %c0_168] : memref<9x8x16xf32, #tpu.memory_space<vmem>>, vector<1x8x16xf32>
    %129 = vector.shape_cast %128 : vector<1x8x16xf32> to vector<8x16xf32>
    %cst_169 = arith.constant dense<0.000000e+00> : vector<128x16xf32>
    %130 = tpu.matmul %127, %129, %cst_169 {dimension_numbers = #tpu.dot_dimension_numbers<[1], [0], [0], [1], [0, 0, 1, 1], [], []>} : vector<128x8xf32>, vector<8x16xf32>, vector<128x16xf32> -> vector<128x16xf32>
    %131 = arith.addf %125, %130 : vector<128x16xf32>
    %cst_170 = arith.constant 0.000000e+00 : f32
    %132 = vector.broadcast %cst_170 : f32 to vector<128x16xf32>
    %133 = arith.maximumf %131, %132 : vector<128x16xf32>
    %c0_171 = arith.constant 0 : index
    %c0_172 = arith.constant 0 : index
    %134 = vector.load %arg13[%c0_171, %c0_172] : memref<128x16xf32, #tpu.memory_space<vmem>>, vector<128x16xf32>
    tpu.vector_store %arg13[%c0_171, %c0_172], %133 {strides = array<i32>} : memref<128x16xf32, #tpu.memory_space<vmem>>, vector<128x16xf32>,
    %c0_173 = arith.constant 0 : index
    %c0_174 = arith.constant 0 : index
    %135 = tpu.strided_load %arg13[%c0_173, %c0_174] {strides = array<i32: 4, 1>} : memref<128x16xf32, #tpu.memory_space<vmem>>, vector<32x16xf32>
    %c1_175 = arith.constant 1 : index
    %c0_176 = arith.constant 0 : index
    %136 = tpu.strided_load %arg13[%c1_175, %c0_176] {strides = array<i32: 4, 1>} : memref<128x16xf32, #tpu.memory_space<vmem>>, vector<32x16xf32>
    %137 = arith.maximumf %135, %136 : vector<32x16xf32>
    %c2_177 = arith.constant 2 : index
    %c0_178 = arith.constant 0 : index
    %138 = tpu.strided_load %arg13[%c2_177, %c0_178] {strides = array<i32: 4, 1>} : memref<128x16xf32, #tpu.memory_space<vmem>>, vector<32x16xf32>
    %139 = arith.maximumf %137, %138 : vector<32x16xf32>
    %c3_179 = arith.constant 3 : index
    %c0_180 = arith.constant 0 : index
    %140 = tpu.strided_load %arg13[%c3_179, %c0_180] {strides = array<i32: 4, 1>} : memref<128x16xf32, #tpu.memory_space<vmem>>, vector<32x16xf32>
    %141 = arith.maximumf %139, %140 : vector<32x16xf32>
    %142 = vector.shape_cast %141 : vector<32x16xf32> to vector<4x8x16xf32>
    %143 = vector.extract_strided_slice %142 {offsets = [0, 0, 0], sizes = [4, 2, 16], strides = [1, 1, 1]} : vector<4x8x16xf32> to vector<4x2x16xf32>
    %144 = vector.extract_strided_slice %142 {offsets = [0, 2, 0], sizes = [4, 2, 16], strides = [1, 1, 1]} : vector<4x8x16xf32> to vector<4x2x16xf32>
    %145 = arith.maximumf %143, %144 : vector<4x2x16xf32>
    %146 = vector.extract_strided_slice %142 {offsets = [0, 4, 0], sizes = [4, 2, 16], strides = [1, 1, 1]} : vector<4x8x16xf32> to vector<4x2x16xf32>
    %147 = arith.maximumf %145, %146 : vector<4x2x16xf32>
    %148 = vector.extract_strided_slice %142 {offsets = [0, 6, 0], sizes = [4, 2, 16], strides = [1, 1, 1]} : vector<4x8x16xf32> to vector<4x2x16xf32>
    %149 = arith.maximumf %147, %148 : vector<4x2x16xf32>
    %150 = vector.shape_cast %149 : vector<4x2x16xf32> to vector<2x2x2x16xf32>
    %cst_181 = arith.constant 0.000000e+00 : f32
    %151 = vector.broadcast %cst_181 : f32 to vector<2x32xf32>
    %c0_182 = arith.constant 0 : index
    %c0_183 = arith.constant 0 : index
    %152 = vector.load %arg6[%c0_182, %c0_183] : memref<1x32xf32, #tpu.memory_space<vmem>>, vector<1x32xf32>
    %153 = vector.broadcast %152 : vector<1x32xf32> to vector<2x32xf32>
    %154 = arith.addf %151, %153 : vector<2x32xf32>
    %155 = vector.extract_strided_slice %150 {offsets = [0, 0, 0, 0], sizes = [2, 1, 1, 16], strides = [1, 1, 1, 1]} : vector<2x2x2x16xf32> to vector<2x1x1x16xf32>
    %156 = vector.shape_cast %155 : vector<2x1x1x16xf32> to vector<2x16xf32>
    %c0_184 = arith.constant 0 : index
    %c0_185 = arith.constant 0 : index
    %c0_186 = arith.constant 0 : index
    %157 = vector.load %arg5[%c0_184, %c0_185, %c0_186] : memref<4x16x32xf32, #tpu.memory_space<vmem>>, vector<1x16x32xf32>
    %158 = vector.shape_cast %157 : vector<1x16x32xf32> to vector<16x32xf32>
    %cst_187 = arith.constant dense<0.000000e+00> : vector<2x32xf32>
    %159 = tpu.matmul %156, %158, %cst_187 {dimension_numbers = #tpu.dot_dimension_numbers<[1], [0], [0], [1], [0, 0, 1, 1], [], []>} : vector<2x16xf32>, vector<16x32xf32>, vector<2x32xf32> -> vector<2x32xf32>
    %160 = arith.addf %154, %159 : vector<2x32xf32>
    %161 = vector.extract_strided_slice %150 {offsets = [0, 0, 1, 0], sizes = [2, 1, 1, 16], strides = [1, 1, 1, 1]} : vector<2x2x2x16xf32> to vector<2x1x1x16xf32>
    %162 = vector.shape_cast %161 : vector<2x1x1x16xf32> to vector<2x16xf32>
    %c1_188 = arith.constant 1 : index
    %c0_189 = arith.constant 0 : index
    %c0_190 = arith.constant 0 : index
    %163 = vector.load %arg5[%c1_188, %c0_189, %c0_190] : memref<4x16x32xf32, #tpu.memory_space<vmem>>, vector<1x16x32xf32>
    %164 = vector.shape_cast %163 : vector<1x16x32xf32> to vector<16x32xf32>
    %cst_191 = arith.constant dense<0.000000e+00> : vector<2x32xf32>
    %165 = tpu.matmul %162, %164, %cst_191 {dimension_numbers = #tpu.dot_dimension_numbers<[1], [0], [0], [1], [0, 0, 1, 1], [], []>} : vector<2x16xf32>, vector<16x32xf32>, vector<2x32xf32> -> vector<2x32xf32>
    %166 = arith.addf %160, %165 : vector<2x32xf32>
    %167 = vector.extract_strided_slice %150 {offsets = [0, 1, 0, 0], sizes = [2, 1, 1, 16], strides = [1, 1, 1, 1]} : vector<2x2x2x16xf32> to vector<2x1x1x16xf32>
    %168 = vector.shape_cast %167 : vector<2x1x1x16xf32> to vector<2x16xf32>
    %c2_192 = arith.constant 2 : index
    %c0_193 = arith.constant 0 : index
    %c0_194 = arith.constant 0 : index
    %169 = vector.load %arg5[%c2_192, %c0_193, %c0_194] : memref<4x16x32xf32, #tpu.memory_space<vmem>>, vector<1x16x32xf32>
    %170 = vector.shape_cast %169 : vector<1x16x32xf32> to vector<16x32xf32>
    %cst_195 = arith.constant dense<0.000000e+00> : vector<2x32xf32>
    %171 = tpu.matmul %168, %170, %cst_195 {dimension_numbers = #tpu.dot_dimension_numbers<[1], [0], [0], [1], [0, 0, 1, 1], [], []>} : vector<2x16xf32>, vector<16x32xf32>, vector<2x32xf32> -> vector<2x32xf32>
    %172 = arith.addf %166, %171 : vector<2x32xf32>
    %173 = vector.extract_strided_slice %150 {offsets = [0, 1, 1, 0], sizes = [2, 1, 1, 16], strides = [1, 1, 1, 1]} : vector<2x2x2x16xf32> to vector<2x1x1x16xf32>
    %174 = vector.shape_cast %173 : vector<2x1x1x16xf32> to vector<2x16xf32>
    %c3_196 = arith.constant 3 : index
    %c0_197 = arith.constant 0 : index
    %c0_198 = arith.constant 0 : index
    %175 = vector.load %arg5[%c3_196, %c0_197, %c0_198] : memref<4x16x32xf32, #tpu.memory_space<vmem>>, vector<1x16x32xf32>
    %176 = vector.shape_cast %175 : vector<1x16x32xf32> to vector<16x32xf32>
    %cst_199 = arith.constant dense<0.000000e+00> : vector<2x32xf32>
    %177 = tpu.matmul %174, %176, %cst_199 {dimension_numbers = #tpu.dot_dimension_numbers<[1], [0], [0], [1], [0, 0, 1, 1], [], []>} : vector<2x16xf32>, vector<16x32xf32>, vector<2x32xf32> -> vector<2x32xf32>
    %178 = arith.addf %172, %177 : vector<2x32xf32>
    %cst_200 = arith.constant 0.000000e+00 : f32
    %179 = vector.broadcast %cst_200 : f32 to vector<2x32xf32>
    %180 = arith.maximumf %178, %179 : vector<2x32xf32>
    %c0_201 = arith.constant 0 : index
    %c0_202 = arith.constant 0 : index
    %181 = vector.load %arg7[%c0_201, %c0_202] : memref<32x10xf32, #tpu.memory_space<vmem>>, vector<32x10xf32>
    %cst_203 = arith.constant dense<0.000000e+00> : vector<2x10xf32>
    %182 = tpu.matmul %180, %181, %cst_203 {dimension_numbers = #tpu.dot_dimension_numbers<[1], [0], [0], [1], [0, 0, 1, 1], [], []>} : vector<2x32xf32>, vector<32x10xf32>, vector<2x10xf32> -> vector<2x10xf32>
    %c0_204 = arith.constant 0 : index
    %c0_205 = arith.constant 0 : index
    %183 = vector.load %arg8[%c0_204, %c0_205] : memref<1x10xf32, #tpu.memory_space<vmem>>, vector<1x10xf32>
    %184 = vector.broadcast %183 : vector<1x10xf32> to vector<2x10xf32>
    %185 = arith.addf %182, %184 : vector<2x10xf32>
    %c0_206 = arith.constant 0 : index
    %c0_207 = arith.constant 0 : index
    %186 = vector.load %arg9[%c0_206, %c0_207] : memref<2x10xf32, #tpu.memory_space<vmem>>, vector<2x10xf32>
    tpu.vector_store %arg9[%c0_206, %c0_207], %185 {strides = array<i32>} : memref<2x10xf32, #tpu.memory_space<vmem>>, vector<2x10xf32>,
    return
  }
}

</mosaic_0001>

<bundles_post_ra>
// kernel: vgg_forward.1
= control target key start
LH: loop header
LB: loop body
LE: loop exit
PB: predicated region body
PF: predicated region fallthrough
CT: control target
= control target key end

     0   :  { %vm537_vm0 = vcmask 1042432   ;;  %vm33_vm1 = vcmask 23552   ;;  %v15820_v2 = vmov 0.0   ;;  %vm36_vm2 = vcmask 17408   ;;  %s15810_s0 = inlined_call_operand.vmem [shape: f32[2,16,16,3], index: 0, kind: input, shape index: {}]   ;;  %s15811_s1 = inlined_call_operand.vmem [shape: f32[9,3,8], index: 1, kind: input, shape index: {}]   ;;  %s15812_s2 = inlined_call_operand.vmem [shape: f32[1,8], index: 2, kind: input, shape index: {}]   ;;  %s15813_s3 = inlined_call_operand.vmem [shape: f32[9,8,16], index: 3, kind: input, shape index: {}]   ;;  %s15814_s4 = inlined_call_operand.vmem [shape: f32[1,16], index: 4, kind: input, shape index: {}]   ;;  %s15815_s5 = inlined_call_operand.vmem [shape: f32[4,16,32], index: 5, kind: input, shape index: {}]   ;;  %s15816_s6 = inlined_call_operand.vmem [shape: f32[1,32], index: 6, kind: input, shape index: {}]   ;;  %s15817_s7 = inlined_call_operand.vmem [shape: f32[32,10], index: 7, kind: input, shape index: {}]   ;;  %s15818_s8 = inlined_call_operand.vmem [shape: f32[1,10], index: 8, kind: input, shape index: {}]   ;;  %s15819_s9 = inlined_call_operand.hbm [shape: f32[2,10], index: 9, kind: output, shape index: {}]  }
   0x1   :  { %v12415_v0 = vld [vmem:[%s15811_s1] sm:$0x7]  ;;  %34 = vst.msk [vmem:[#allocation2] sm:$0xff] %vm33_vm1, %v15820_v2  ;;  %35 = vst.msk [vmem:[#allocation2 + $0x8] sm:$0xff] %vm33_vm1, %v15820_v2  ;;  %v12573_v3 = vld [vmem:[%s15811_s1 + $0x8] sm:$0x7] }
   0x2   :  { %v12420_v1 = vld [vmem:[%s15810_s0 + $0x1e0] sm:$0xff]  ;;  %11173 = vmatprep.subr.msk.mxu0 %vm537_vm0, %v12415_v0  ;;  %12328 = vmatprep.subr.msk.mxu1 %vm537_vm0, %v12415_v0  ;;  %38 = vst.msk [vmem:[#allocation2 + $0x18] sm:$0xff] %vm33_vm1, %v15820_v2  ;;  %39 = vst.msk [vmem:[#allocation2 + $0x20] sm:$0xff] %vm33_vm1, %v15820_v2  ;;  %v204_v4 = vld [vmem:[%s15810_s0 + $0x1e8] sm:$0xff] }
   0x3   :  { %41 = vst.msk [vmem:[#allocation2 + $0x30] sm:$0xff] %vm33_vm1, %v15820_v2  ;;  %42 = vst.msk [vmem:[#allocation2 + $0x38] sm:$0xff] %vm33_vm1, %v15820_v2  ;;  %v143_v5 = vld [vmem:[%s15810_s0] sm:$0xff]  ;;  %11174 = vmatpush3.msk.msra.mxu0 %vm537_vm0, %v12415_v0  ;;  %12329 = vmatpush3.msk.msra.mxu1 %vm537_vm0, %v12415_v0  ;;  %v144_v7 = vld [vmem:[%s15810_s0 + $0x8] sm:$0xff] }
   0x4   :  { %44 = vst.msk [vmem:[#allocation2 + $0x48] sm:$0xff] %vm33_vm1, %v15820_v2  ;;  %45 = vst.msk [vmem:[#allocation2 + $0x50] sm:$0xff] %vm33_vm1, %v15820_v2  ;;  %v9724_v6 = vld [vmem:[%s15811_s1 + $0x4] sm:$0x7]  ;;  %v145_v8 = vld [vmem:[%s15810_s0 + $0x10] sm:$0xff]  ;;  %11369 = vmatprep.subr.msk.mxu0 %vm537_vm0, %v12573_v3 }
   0x5   :  { %47 = vst.msk [vmem:[#allocation2 + $0x60] sm:$0xff] %vm33_vm1, %v15820_v2  ;;  %48 = vst.msk [vmem:[#allocation2 + $0x68] sm:$0xff] %vm33_vm1, %v15820_v2  ;;  %11271 = vmatprep.subr.msk.mxu1 %vm537_vm0, %v9724_v6  ;;  %v146_v9 = vld [vmem:[%s15810_s0 + $0x18] sm:$0xff]  ;;  %v147_v10 = vld [vmem:[%s15810_s0 + $0x20] sm:$0xff] }
   0x6   :  { %50 = vst.msk [vmem:[#allocation2 + $0x78] sm:$0xff] %vm33_vm1, %v15820_v2  ;;  %51 = vst.msk [vmem:[#allocation2 + $0x80] sm:$0xff] %vm33_vm1, %v15820_v2  ;;  %v148_v11 = vld [vmem:[%s15810_s0 + $0x28] sm:$0xff]  ;;  %v149_v12 = vld [vmem:[%s15810_s0 + $0x30] sm:$0xff] }
   0x7   :  { %53 = vst.msk [vmem:[#allocation2 + $0x90] sm:$0xff] %vm33_vm1, %v15820_v2  ;;  %54 = vst.msk [vmem:[#allocation2 + $0x98] sm:$0xff] %vm33_vm1, %v15820_v2  ;;  %v150_v13 = vld [vmem:[%s15810_s0 + $0x38] sm:$0xff]  ;;  %v151_v14 = vld [vmem:[%s15810_s0 + $0x40] sm:$0xff] }
   0x8   :  { %56 = vst.msk [vmem:[#allocation2 + $0xa8] sm:$0xff] %vm33_vm1, %v15820_v2  ;;  %57 = vst.msk [vmem:[#allocation2 + $0xb0] sm:$0xff] %vm33_vm1, %v15820_v2  ;;  %v152_v15 = vld [vmem:[%s15810_s0 + $0x48] sm:$0xff]  ;;  %v153_v16 = vld [vmem:[%s15810_s0 + $0x50] sm:$0xff] }
   0x9   :  { %59 = vst.msk [vmem:[#allocation2 + $0xc0] sm:$0xff] %vm33_vm1, %v15820_v2  ;;  %60 = vst.msk [vmem:[#allocation2 + $0xc8] sm:$0xff] %vm33_vm1, %v15820_v2  ;;  %v154_v17 = vld [vmem:[%s15810_s0 + $0x58] sm:$0xff]  ;;  %v155_v18 = vld [vmem:[%s15810_s0 + $0x60] sm:$0xff] }
   0xa   :  { %62 = vst.msk [vmem:[#allocation2 + $0xd8] sm:$0xff] %vm33_vm1, %v15820_v2  ;;  %63 = vst.msk [vmem:[#allocation2 + $0xe0] sm:$0xff] %vm33_vm1, %v15820_v2  ;;  %v156_v19 = vld [vmem:[%s15810_s0 + $0x68] sm:$0xff]  ;;  %v157_v20 = vld [vmem:[%s15810_s0 + $0x70] sm:$0xff] }
   0xb   :  { %65 = vst.msk [vmem:[#allocation2 + $0xf0] sm:$0xff] %vm33_vm1, %v15820_v2  ;;  %66 = vst.msk [vmem:[#allocation2 + $0xf8] sm:$0xff] %vm33_vm1, %v15820_v2  ;;  %v158_v21 = vld [vmem:[%s15810_s0 + $0x78] sm:$0xff]  ;;  %v159_v22 = vld [vmem:[%s15810_s0 + $0x80] sm:$0xff] }
   0xc   :  { %68 = vst.msk [vmem:[#allocation2 + $0x108] sm:$0xff] %vm33_vm1, %v15820_v2  ;;  %69 = vst.msk [vmem:[#allocation2 + $0x110] sm:$0xff] %vm33_vm1, %v15820_v2  ;;  %v160_v23 = vld [vmem:[%s15810_s0 + $0x88] sm:$0xff]  ;;  %v280_v24 = vld [vmem:[#allocation2] sm:$0xff] }
   0xd   :  { %71 = vst.msk [vmem:[#allocation2 + $0x120] sm:$0xff] %vm33_vm1, %v15820_v2  ;;  %72 = vst.msk [vmem:[#allocation2 + $0x128] sm:$0xff] %vm33_vm1, %v15820_v2  ;;  %v281_v25 = vld [vmem:[#allocation2 + $0x8] sm:$0xff]  ;;  %11175 = vmatprep.mubr.msk.f32.mxu0 %vm33_vm1, %v280_v24  ;;  %v161_v43 = vld [vmem:[%s15810_s0 + $0x90] sm:$0xff] }
   0xe   :  { %74 = vst.msk [vmem:[#allocation2 + $0x138] sm:$0xff] %vm33_vm1, %v15820_v2  ;;  %75 = vst.msk [vmem:[#allocation2 + $0x140] sm:$0xff] %vm33_vm1, %v15820_v2  ;;  %11176 = vmatmul.mubr.msk.f32.vlgmr.msra.gmra.mxu0 %vm33_vm1, %v281_v25  ;;  %v990_v29 = vld [vmem:[#allocation2 + $0x1] sm:$0xff]  ;;  %v162_v44 = vld [vmem:[%s15810_s0 + $0x98] sm:$0xff] }
   0xf   :  { %77 = vst.msk [vmem:[#allocation2 + $0x150] sm:$0xff] %vm33_vm1, %v15820_v2  ;;  %78 = vst.msk [vmem:[#allocation2 + $0x158] sm:$0xff] %vm33_vm1, %v15820_v2  ;;  %11370 = vmatpush3.msk.msra.mxu0 %vm537_vm0, %v12573_v3  ;;  %v163_v47 = vld [vmem:[%s15810_s0 + $0xa0] sm:$0xff]  ;;  %v164_v49 = vld [vmem:[%s15810_s0 + $0xa8] sm:$0xff] }
  0x10   :  { %80 = vst.msk [vmem:[#allocation2 + $0x168] sm:$0xff] %vm33_vm1, %v15820_v2  ;;  %81 = vst.msk [vmem:[#allocation2 + $0x170] sm:$0xff] %vm33_vm1, %v15820_v2  ;;  %v165_v50 = vld [vmem:[%s15810_s0 + $0xb0] sm:$0xff]  ;;  %v166_v51 = vld [vmem:[%s15810_s0 + $0xb8] sm:$0xff] }
  0x11   :  { %83 = vst.msk [vmem:[#allocation2 + $0x180] sm:$0xff] %vm33_vm1, %v15820_v2  ;;  %84 = vst.msk [vmem:[#allocation2 + $0x188] sm:$0xff] %vm33_vm1, %v15820_v2  ;;  %v167_v52 = vld [vmem:[%s15810_s0 + $0xc0] sm:$0xff]  ;;  %v168_v53 = vld [vmem:[%s15810_s0 + $0xc8] sm:$0xff] }
  0x12   :  { %86 = vst.msk [vmem:[#allocation2 + $0x198] sm:$0xff] %vm33_vm1, %v15820_v2  ;;  %87 = vst.msk [vmem:[#allocation2 + $0x1a0] sm:$0xff] %vm33_vm1, %v15820_v2  ;;  %v169_v54 = vld [vmem:[%s15810_s0 + $0xd0] sm:$0xff]  ;;  %v170_v55 = vld [vmem:[%s15810_s0 + $0xd8] sm:$0xff] }
  0x13   :  { %89 = vst.msk [vmem:[#allocation2 + $0x1b0] sm:$0xff] %vm33_vm1, %v15820_v2  ;;  %90 = vst.msk [vmem:[#allocation2 + $0x1b8] sm:$0xff] %vm33_vm1, %v15820_v2  ;;  %v171_v56 = vld [vmem:[%s15810_s0 + $0xe0] sm:$0xff]  ;;  %v172_v57 = vld [vmem:[%s15810_s0 + $0xe8] sm:$0xff] }
  0x14   :  { %92 = vst.msk [vmem:[#allocation2 + $0x1c8] sm:$0xff] %vm33_vm1, %v15820_v2  ;;  %93 = vst.msk [vmem:[#allocation2 + $0x1d0] sm:$0xff] %vm33_vm1, %v15820_v2  ;;  %v175_v59 = vld [vmem:[%s15810_s0 + $0x100] sm:$0xff]  ;;  %v176_v62 = vld [vmem:[%s15810_s0 + $0x108] sm:$0xff] }
  0x15   :  { %95 = vst.msk [vmem:[#allocation2 + $0x1e0] sm:$0xff] %vm33_vm1, %v15820_v2  ;;  %96 = vst.msk [vmem:[#allocation2 + $0x1e8] sm:$0xff] %vm33_vm1, %v15820_v2  ;;  %v177_v63 = vld [vmem:[%s15810_s0 + $0x110] sm:$0xff]  ;;  %v178_v0 = vld [vmem:[%s15810_s0 + $0x118] sm:$0xff] }
  0x16   :  { %98 = vst.msk [vmem:[#allocation2 + $0x1f8] sm:$0xff] %vm33_vm1, %v15820_v2  ;;  %99 = vst.msk [vmem:[#allocation2 + $0x200] sm:$0xff] %vm33_vm1, %v15820_v2  ;;  %v185_v24 = vld [vmem:[%s15810_s0 + $0x150] sm:$0xff]  ;;  %v186_v25 = vld [vmem:[%s15810_s0 + $0x158] sm:$0xff] }
  0x17   :  { %101 = vst.msk [vmem:[#allocation2 + $0x210] sm:$0xff] %vm33_vm1, %v15820_v2  ;;  %102 = vst.msk [vmem:[#allocation2 + $0x218] sm:$0xff] %vm33_vm1, %v15820_v2 }
  0x18   :  { %104 = vst.msk [vmem:[#allocation2 + $0x228] sm:$0xff] %vm33_vm1, %v15820_v2  ;;  %105 = vst.msk [vmem:[#allocation2 + $0x230] sm:$0xff] %vm33_vm1, %v15820_v2 }
  0x19   :  { %107 = vst.msk [vmem:[#allocation2 + $0x240] sm:$0xff] %vm33_vm1, %v15820_v2  ;;  %108 = vst.msk [vmem:[#allocation2 + $0x248] sm:$0xff] %vm33_vm1, %v15820_v2 }
  0x1a   :  { %110 = vst.msk [vmem:[#allocation2 + $0x258] sm:$0xff] %vm33_vm1, %v15820_v2  ;;  %111 = vst.msk [vmem:[#allocation2 + $0x260] sm:$0xff] %vm33_vm1, %v15820_v2 }
  0x1b   :  { %113 = vst.msk [vmem:[#allocation2 + $0x270] sm:$0xff] %vm33_vm1, %v15820_v2  ;;  %114 = vst.msk [vmem:[#allocation2 + $0x278] sm:$0xff] %vm33_vm1, %v15820_v2 }
  0x1c   :  { %116 = vst.msk [vmem:[#allocation2 + $0x288] sm:$0xff] %vm33_vm1, %v15820_v2  ;;  %117 = vst.msk [vmem:[#allocation2 + $0x290] sm:$0xff] %vm33_vm1, %v15820_v2 }
  0x1d   :  { %119 = vst.msk [vmem:[#allocation2 + $0x2a0] sm:$0xff] %vm33_vm1, %v15820_v2  ;;  %120 = vst.msk [vmem:[#allocation2 + $0x2a8] sm:$0xff] %vm33_vm1, %v15820_v2 }
  0x1e   :  { %122 = vst.msk [vmem:[#allocation2 + $0x2b8] sm:$0xff] %vm33_vm1, %v15820_v2  ;;  %123 = vst.msk [vmem:[#allocation2 + $0x2c0] sm:$0xff] %vm33_vm1, %v15820_v2 }
  0x1f   :  { %125 = vst.msk [vmem:[#allocation2 + $0x2d0] sm:$0xff] %vm33_vm1, %v15820_v2  ;;  %126 = vst.msk [vmem:[#allocation2 + $0x2d8] sm:$0xff] %vm33_vm1, %v15820_v2 }
  0x20   :  { %128 = vst.msk [vmem:[#allocation2 + $0x2e8] sm:$0xff] %vm33_vm1, %v15820_v2  ;;  %129 = vst.msk [vmem:[#allocation2 + $0x2f0] sm:$0xff] %vm33_vm1, %v15820_v2 }
  0x21   :  { %131 = vst.msk [vmem:[#allocation2 + $0x300] sm:$0xff] %vm33_vm1, %v15820_v2  ;;  %132 = vst.msk [vmem:[#allocation2 + $0x308] sm:$0xff] %vm33_vm1, %v15820_v2 }
  0x22   :  { %134 = vst.msk [vmem:[#allocation2 + $0x318] sm:$0xff] %vm33_vm1, %v15820_v2  ;;  %135 = vst.msk [vmem:[#allocation2 + $0x320] sm:$0xff] %vm33_vm1, %v15820_v2 }
  0x23   :  { %137 = vst.msk [vmem:[#allocation2 + $0x330] sm:$0xff] %vm33_vm1, %v15820_v2  ;;  %138 = vst.msk [vmem:[#allocation2 + $0x338] sm:$0xff] %vm33_vm1, %v15820_v2 }
  0x24   :  { %140 = vst.msk [vmem:[#allocation2 + $0x348] sm:$0xff] %vm33_vm1, %v15820_v2  ;;  %141 = vst.msk [vmem:[#allocation2 + $0x350] sm:$0xff] %vm33_vm1, %v15820_v2 }
  0x25   :  { %268 = vst.msk [vmem:[#allocation2 + $0x319] sm:$0xff] %vm33_vm1, %v12420_v1  ;;  %208 = vst.msk [vmem:[#allocation2 + $0x19] sm:$0xff] %vm33_vm1, %v143_v5  ;;  %v179_v1 = vld [vmem:[%s15810_s0 + $0x120] sm:$0xff] }
  0x26   :  { %136 = vst.msk [vmem:[#allocation2 + $0x328] sm:$0x3] %vm36_vm2, %v15820_v2  ;;  %37 = vst.msk [vmem:[#allocation2 + $0x10] sm:$0x3] %vm36_vm2, %v15820_v2 }
  0x27   :  { %40 = vst.msk [vmem:[#allocation2 + $0x28] sm:$0x3] %vm36_vm2, %v15820_v2  ;;  %43 = vst.msk [vmem:[#allocation2 + $0x40] sm:$0x3] %vm36_vm2, %v15820_v2 }
  0x28   :  { %46 = vst.msk [vmem:[#allocation2 + $0x58] sm:$0x3] %vm36_vm2, %v15820_v2  ;;  %49 = vst.msk [vmem:[#allocation2 + $0x70] sm:$0x3] %vm36_vm2, %v15820_v2 }
  0x29   :  { %52 = vst.msk [vmem:[#allocation2 + $0x88] sm:$0x3] %vm36_vm2, %v15820_v2  ;;  %55 = vst.msk [vmem:[#allocation2 + $0xa0] sm:$0x3] %vm36_vm2, %v15820_v2 }
  0x2a   :  { %58 = vst.msk [vmem:[#allocation2 + $0xb8] sm:$0x3] %vm36_vm2, %v15820_v2  ;;  %61 = vst.msk [vmem:[#allocation2 + $0xd0] sm:$0x3] %vm36_vm2, %v15820_v2 }
  0x2b   :  { %64 = vst.msk [vmem:[#allocation2 + $0xe8] sm:$0x3] %vm36_vm2, %v15820_v2  ;;  %67 = vst.msk [vmem:[#allocation2 + $0x100] sm:$0x3] %vm36_vm2, %v15820_v2 }
  0x2c   :  { %70 = vst.msk [vmem:[#allocation2 + $0x118] sm:$0x3] %vm36_vm2, %v15820_v2  ;;  %73 = vst.msk [vmem:[#allocation2 + $0x130] sm:$0x3] %vm36_vm2, %v15820_v2  ;;  %v342_v26 = vld [vmem:[#allocation2 + $0x318] sm:$0xff] }
  0x2d   :  { %76 = vst.msk [vmem:[#allocation2 + $0x148] sm:$0x3] %vm36_vm2, %v15820_v2  ;;  %79 = vst.msk [vmem:[#allocation2 + $0x160] sm:$0x3] %vm36_vm2, %v15820_v2  ;;  %v12736_v27 = vld [vmem:[#allocation2 + $0x18] sm:$0xff]  ;;  %11268 = vmatprep.mubr.msk.f32.mxu1 %vm33_vm1, %v342_v26  ;;  %v991_v31 = vld [vmem:[#allocation2 + $0x9] sm:$0xff] }
  0x2e   :  { %82 = vst.msk [vmem:[#allocation2 + $0x178] sm:$0x3] %vm36_vm2, %v15820_v2  ;;  %85 = vst.msk [vmem:[#allocation2 + $0x190] sm:$0x3] %vm36_vm2, %v15820_v2  ;;  %11178 = vmatprep.mubr.msk.f32.mxu0 %vm33_vm1, %v12736_v27  ;;  %v992_v33 = vld [vmem:[#allocation2 + $0x19] sm:$0xff] }
  0x2f   :  { %88 = vst.msk [vmem:[#allocation2 + $0x1a8] sm:$0x3] %vm36_vm2, %v15820_v2  ;;  %91 = vst.msk [vmem:[#allocation2 + $0x1c0] sm:$0x3] %vm36_vm2, %v15820_v2  ;;  %v187_v26 = vld [vmem:[%s15810_s0 + $0x160] sm:$0xff] }
  0x30   :  { %94 = vst.msk [vmem:[#allocation2 + $0x1d8] sm:$0x3] %vm36_vm2, %v15820_v2  ;;  %97 = vst.msk [vmem:[#allocation2 + $0x1f0] sm:$0x3] %vm36_vm2, %v15820_v2 }
  0x31   :  { %100 = vst.msk [vmem:[#allocation2 + $0x208] sm:$0x3] %vm36_vm2, %v15820_v2  ;;  %103 = vst.msk [vmem:[#allocation2 + $0x220] sm:$0x3] %vm36_vm2, %v15820_v2 }
  0x32   :  { %106 = vst.msk [vmem:[#allocation2 + $0x238] sm:$0x3] %vm36_vm2, %v15820_v2  ;;  %109 = vst.msk [vmem:[#allocation2 + $0x250] sm:$0x3] %vm36_vm2, %v15820_v2 }
  0x33   :  { %112 = vst.msk [vmem:[#allocation2 + $0x268] sm:$0x3] %vm36_vm2, %v15820_v2  ;;  %115 = vst.msk [vmem:[#allocation2 + $0x280] sm:$0x3] %vm36_vm2, %v15820_v2 }
  0x34   :  { %118 = vst.msk [vmem:[#allocation2 + $0x298] sm:$0x3] %vm36_vm2, %v15820_v2  ;;  %121 = vst.msk [vmem:[#allocation2 + $0x2b0] sm:$0x3] %vm36_vm2, %v15820_v2 }
  0x35   :  { %124 = vst.msk [vmem:[#allocation2 + $0x2c8] sm:$0x3] %vm36_vm2, %v15820_v2  ;;  %127 = vst.msk [vmem:[#allocation2 + $0x2e0] sm:$0x3] %vm36_vm2, %v15820_v2 }
  0x36   :  { %130 = vst.msk [vmem:[#allocation2 + $0x2f8] sm:$0x3] %vm36_vm2, %v15820_v2  ;;  %133 = vst.msk [vmem:[#allocation2 + $0x310] sm:$0x3] %vm36_vm2, %v15820_v2 }
  0x37   :  { %139 = vst.msk [vmem:[#allocation2 + $0x340] sm:$0x3] %vm36_vm2, %v15820_v2  ;;  %142 = vst.msk [vmem:[#allocation2 + $0x358] sm:$0x3] %vm36_vm2, %v15820_v2 }
  0x38   :  { %269 = vst.msk [vmem:[#allocation2 + $0x321] sm:$0xff] %vm33_vm1, %v204_v4  ;;  %209 = vst.msk [vmem:[#allocation2 + $0x21] sm:$0xff] %vm33_vm1, %v144_v7 }
  0x39   :  { %210 = vst.msk [vmem:[#allocation2 + $0x31] sm:$0xff] %vm33_vm1, %v145_v8  ;;  %211 = vst.msk [vmem:[#allocation2 + $0x39] sm:$0xff] %vm33_vm1, %v146_v9 }
  0x3a   :  { %212 = vst.msk [vmem:[#allocation2 + $0x49] sm:$0xff] %vm33_vm1, %v147_v10  ;;  %213 = vst.msk [vmem:[#allocation2 + $0x51] sm:$0xff] %vm33_vm1, %v148_v11 }
  0x3b   :  { %214 = vst.msk [vmem:[#allocation2 + $0x61] sm:$0xff] %vm33_vm1, %v149_v12  ;;  %215 = vst.msk [vmem:[#allocation2 + $0x69] sm:$0xff] %vm33_vm1, %v150_v13 }
  0x3c   :  { %216 = vst.msk [vmem:[#allocation2 + $0x79] sm:$0xff] %vm33_vm1, %v151_v14  ;;  %217 = vst.msk [vmem:[#allocation2 + $0x81] sm:$0xff] %vm33_vm1, %v152_v15  ;;  %v180_v14 = vld [vmem:[%s15810_s0 + $0x128] sm:$0xff] }
  0x3d   :  { %218 = vst.msk [vmem:[#allocation2 + $0x91] sm:$0xff] %vm33_vm1, %v153_v16  ;;  %219 = vst.msk [vmem:[#allocation2 + $0x99] sm:$0xff] %vm33_vm1, %v154_v17  ;;  %v181_v16 = vld [vmem:[%s15810_s0 + $0x130] sm:$0xff]  ;;  %v182_v17 = vld [vmem:[%s15810_s0 + $0x138] sm:$0xff] }
  0x3e   :  { %220 = vst.msk [vmem:[#allocation2 + $0xa9] sm:$0xff] %vm33_vm1, %v155_v18  ;;  %221 = vst.msk [vmem:[#allocation2 + $0xb1] sm:$0xff] %vm33_vm1, %v156_v19 }
  0x3f   :  { %222 = vst.msk [vmem:[#allocation2 + $0xc1] sm:$0xff] %vm33_vm1, %v157_v20  ;;  %223 = vst.msk [vmem:[#allocation2 + $0xc9] sm:$0xff] %vm33_vm1, %v158_v21  ;;  %v343_v28 = vld [vmem:[#allocation2 + $0x320] sm:$0xff]  ;;  %v184_v21 = vld [vmem:[%s15810_s0 + $0x148] sm:$0xff] }
  0x40   :  { %224 = vst.msk [vmem:[#allocation2 + $0xd9] sm:$0xff] %vm33_vm1, %v159_v22  ;;  %225 = vst.msk [vmem:[#allocation2 + $0xe1] sm:$0xff] %vm33_vm1, %v160_v23  ;;  %11269 = vmatmul.mubr.msk.f32.vlgmr.msra.gmra.mxu1 %vm33_vm1, %v343_v28  ;;  %v12743_v30 = vld [vmem:[#allocation2 + $0x20] sm:$0xff]  ;;  %v12748_v32 = vld [vmem:[#allocation2 + $0x30] sm:$0xff] }
  0x41   :  { %11272 = vmatpush3.msk.msra.mxu1 %vm537_vm0, %v9724_v6  ;;  %11273 = vmatprep.mubr.msk.f32.mxu1 %vm33_vm1, %v990_v29  ;;  %v12756_v34 = vld [vmem:[#allocation2 + $0x38] sm:$0xff]  ;;  %v993_v35 = vld [vmem:[#allocation2 + $0x21] sm:$0xff]  ;;  %v12766_v38 = vld [vmem:[#allocation2 + $0x50] sm:$0xff]  ;;  %226 = vst.msk [vmem:[#allocation2 + $0xf1] sm:$0xff] %vm33_vm1, %v161_v43 }
  0x42   :  { %11179 = vmatmul.mubr.msk.f32.gmra.mxu0 %vm33_vm1, %v12743_v30  ;;  %v12759_v36 = vld [vmem:[#allocation2 + $0x48] sm:$0xff]  ;;  %v994_v37 = vld [vmem:[#allocation2 + $0x31] sm:$0xff]  ;;  %v995_v39 = vld [vmem:[#allocation2 + $0x39] sm:$0xff]  ;;  %227 = vst.msk [vmem:[#allocation2 + $0xf9] sm:$0xff] %vm33_vm1, %v162_v44 }
  0x43   :  { %11181 = vmatprep.mubr.msk.f32.mxu0 %vm33_vm1, %v12748_v32  ;;  %v12769_v40 = vld [vmem:[#allocation2 + $0x60] sm:$0xff]  ;;  %v12771_v41 = vld [vmem:[#allocation2 + $0x68] sm:$0xff]  ;;  %v997_v45 = vld [vmem:[#allocation2 + $0x51] sm:$0xff]  ;;  %228 = vst.msk [vmem:[#allocation2 + $0x109] sm:$0xff] %vm33_vm1, %v163_v47 }
  0x44   :  { %11274 = vmatmul.mubr.msk.f32.vlgmr.msra.gmra.mxu1 %vm33_vm1, %v991_v31  ;;  %v996_v42 = vld [vmem:[#allocation2 + $0x49] sm:$0xff]  ;;  %v12781_v46 = vld [vmem:[#allocation2 + $0x78] sm:$0xff]  ;;  %v998_v48 = vld [vmem:[#allocation2 + $0x61] sm:$0xff]  ;;  %229 = vst.msk [vmem:[#allocation2 + $0x111] sm:$0xff] %vm33_vm1, %v164_v49 }
  0x45   :  { %11276 = vmatprep.mubr.msk.f32.mxu1 %vm33_vm1, %v992_v33  ;;  %230 = vst.msk [vmem:[#allocation2 + $0x121] sm:$0xff] %vm33_vm1, %v165_v50  ;;  %231 = vst.msk [vmem:[#allocation2 + $0x129] sm:$0xff] %vm33_vm1, %v166_v51  ;;  %v12828_v58 = vld [vmem:[#allocation2 + $0x80] sm:$0xff]  ;;  %v999_v60 = vld [vmem:[#allocation2 + $0x69] sm:$0xff] }
  0x46   :  { %11182 = vmatmul.mubr.msk.f32.gmra.mxu0 %vm33_vm1, %v12756_v34  ;;  %232 = vst.msk [vmem:[#allocation2 + $0x139] sm:$0xff] %vm33_vm1, %v167_v52  ;;  %233 = vst.msk [vmem:[#allocation2 + $0x141] sm:$0xff] %vm33_vm1, %v168_v53  ;;  %v12839_v61 = vld [vmem:[#allocation2 + $0x90] sm:$0xff]  ;;  %v1000_v3 = vld [vmem:[#allocation2 + $0x79] sm:$0xff] }
  0x47   :  { %11184 = vmatprep.mubr.msk.f32.mxu0 %vm33_vm1, %v12759_v36  ;;  %234 = vst.msk [vmem:[#allocation2 + $0x151] sm:$0xff] %vm33_vm1, %v169_v54  ;;  %235 = vst.msk [vmem:[#allocation2 + $0x159] sm:$0xff] %vm33_vm1, %v170_v55  ;;  %v12864_v4 = vld [vmem:[#allocation2 + $0x98] sm:$0xff]  ;;  %v1001_v5 = vld [vmem:[#allocation2 + $0x81] sm:$0xff] }
  0x48   :  { %11277 = vmatmul.mubr.msk.f32.gmra.mxu1 %vm33_vm1, %v993_v35  ;;  %236 = vst.msk [vmem:[#allocation2 + $0x169] sm:$0xff] %vm33_vm1, %v171_v56  ;;  %237 = vst.msk [vmem:[#allocation2 + $0x171] sm:$0xff] %vm33_vm1, %v172_v57  ;;  %v12867_v6 = vld [vmem:[#allocation2 + $0xa8] sm:$0xff]  ;;  %v1002_v7 = vld [vmem:[#allocation2 + $0x91] sm:$0xff] }
  0x49   :  { %11279 = vmatprep.mubr.msk.f32.mxu1 %vm33_vm1, %v994_v37  ;;  %240 = vst.msk [vmem:[#allocation2 + $0x1c9] sm:$0xff] %vm33_vm1, %v175_v59  ;;  %241 = vst.msk [vmem:[#allocation2 + $0x1d1] sm:$0xff] %vm33_vm1, %v176_v62  ;;  %v12874_v8 = vld [vmem:[#allocation2 + $0xb0] sm:$0xff]  ;;  %v1003_v9 = vld [vmem:[#allocation2 + $0x99] sm:$0xff] }
  0x4a   :  { %11185 = vmatmul.mubr.msk.f32.gmra.mxu0 %vm33_vm1, %v12766_v38  ;;  %242 = vst.msk [vmem:[#allocation2 + $0x1e1] sm:$0xff] %vm33_vm1, %v177_v63  ;;  %243 = vst.msk [vmem:[#allocation2 + $0x1e9] sm:$0xff] %vm33_vm1, %v178_v0  ;;  %v12877_v10 = vld [vmem:[#allocation2 + $0xc0] sm:$0xff]  ;;  %v1004_v11 = vld [vmem:[#allocation2 + $0xa9] sm:$0xff] }
  0x4b   :  { %11187 = vmatprep.mubr.msk.f32.mxu0 %vm33_vm1, %v12769_v40  ;;  %244 = vst.msk [vmem:[#allocation2 + $0x1f9] sm:$0xff] %vm33_vm1, %v179_v1  ;;  %v12884_v12 = vld [vmem:[#allocation2 + $0xc8] sm:$0xff]  ;;  %v1005_v13 = vld [vmem:[#allocation2 + $0xb1] sm:$0xff]  ;;  %245 = vst.msk [vmem:[#allocation2 + $0x201] sm:$0xff] %vm33_vm1, %v180_v14 }
  0x4c   :  { %11280 = vmatmul.mubr.msk.f32.gmra.mxu1 %vm33_vm1, %v995_v39  ;;  %v12890_v15 = vld [vmem:[#allocation2 + $0xd8] sm:$0xff]  ;;  %v12899_v18 = vld [vmem:[#allocation2 + $0xe0] sm:$0xff]  ;;  %246 = vst.msk [vmem:[#allocation2 + $0x211] sm:$0xff] %vm33_vm1, %v181_v16  ;;  %247 = vst.msk [vmem:[#allocation2 + $0x219] sm:$0xff] %vm33_vm1, %v182_v17 }
  0x4d   :  { %11282 = vmatprep.mubr.msk.f32.mxu1 %vm33_vm1, %v996_v42  ;;  %v1006_v19 = vld [vmem:[#allocation2 + $0xc1] sm:$0xff]  ;;  %v1007_v22 = vld [vmem:[#allocation2 + $0xc9] sm:$0xff]  ;;  %249 = vst.msk [vmem:[#allocation2 + $0x231] sm:$0xff] %vm33_vm1, %v184_v21  ;;  %v1008_v28 = vld [vmem:[#allocation2 + $0xd9] sm:$0xff] }
  0x4e   :  { %11188 = vmatmul.mubr.msk.f32.gmra.mxu0 %vm33_vm1, %v12771_v41  ;;  %v183_v20 = vld [vmem:[%s15810_s0 + $0x140] sm:$0xff]  ;;  %v12911_v23 = vld [vmem:[#allocation2 + $0xf0] sm:$0xff]  ;;  %250 = vst.msk [vmem:[#allocation2 + $0x241] sm:$0xff] %vm33_vm1, %v185_v24  ;;  %251 = vst.msk [vmem:[#allocation2 + $0x249] sm:$0xff] %vm33_vm1, %v186_v25 }
  0x4f   :  { %11190 = vmatprep.mubr.msk.f32.mxu0 %vm33_vm1, %v12781_v46  ;;  %248 = vst.msk [vmem:[#allocation2 + $0x229] sm:$0xff] %vm33_vm1, %v183_v20  ;;  %252 = vst.msk [vmem:[#allocation2 + $0x259] sm:$0xff] %vm33_vm1, %v187_v26  ;;  %v188_v29 = vld [vmem:[%s15810_s0 + $0x168] sm:$0xff]  ;;  %v189_v31 = vld [vmem:[%s15810_s0 + $0x170] sm:$0xff] }
  0x50   :  { %11283 = vmatmul.mubr.msk.f32.gmra.mxu1 %vm33_vm1, %v997_v45  ;;  %v190_v33 = vld [vmem:[%s15810_s0 + $0x178] sm:$0xff]  ;;  %253 = vst.msk [vmem:[#allocation2 + $0x261] sm:$0xff] %vm33_vm1, %v188_v29  ;;  %254 = vst.msk [vmem:[#allocation2 + $0x271] sm:$0xff] %vm33_vm1, %v189_v31  ;;  %v191_v35 = vld [vmem:[%s15810_s0 + $0x180] sm:$0xff] }
  0x51   :  { %11285 = vmatprep.mubr.msk.f32.mxu1 %vm33_vm1, %v998_v48  ;;  %255 = vst.msk [vmem:[#allocation2 + $0x279] sm:$0xff] %vm33_vm1, %v190_v33  ;;  %v192_v37 = vld [vmem:[%s15810_s0 + $0x188] sm:$0xff]  ;;  %v193_v39 = vld [vmem:[%s15810_s0 + $0x190] sm:$0xff]  ;;  %256 = vst.msk [vmem:[#allocation2 + $0x289] sm:$0xff] %vm33_vm1, %v191_v35 }
  0x52   :  { %11191 = vmatmul.mubr.msk.f32.gmra.mxu0 %vm33_vm1, %v12828_v58  ;;  %257 = vst.msk [vmem:[#allocation2 + $0x291] sm:$0xff] %vm33_vm1, %v192_v37  ;;  %258 = vst.msk [vmem:[#allocation2 + $0x2a1] sm:$0xff] %vm33_vm1, %v193_v39  ;;  %v194_v42 = vld [vmem:[%s15810_s0 + $0x198] sm:$0xff]  ;;  %v195_v43 = vld [vmem:[%s15810_s0 + $0x1a0] sm:$0xff] }
  0x53   :  { %11193 = vmatprep.mubr.msk.f32.mxu0 %vm33_vm1, %v12839_v61  ;;  %v196_v44 = vld [vmem:[%s15810_s0 + $0x1a8] sm:$0xff]  ;;  %259 = vst.msk [vmem:[#allocation2 + $0x2a9] sm:$0xff] %vm33_vm1, %v194_v42  ;;  %260 = vst.msk [vmem:[#allocation2 + $0x2b9] sm:$0xff] %vm33_vm1, %v195_v43  ;;  %v197_v45 = vld [vmem:[%s15810_s0 + $0x1b0] sm:$0xff] }
  0x54   :  { %11286 = vmatmul.mubr.msk.f32.gmra.mxu1 %vm33_vm1, %v999_v60  ;;  %261 = vst.msk [vmem:[#allocation2 + $0x2c1] sm:$0xff] %vm33_vm1, %v196_v44  ;;  %v198_v47 = vld [vmem:[%s15810_s0 + $0x1b8] sm:$0xff]  ;;  %v199_v48 = vld [vmem:[%s15810_s0 + $0x1c0] sm:$0xff]  ;;  %262 = vst.msk [vmem:[#allocation2 + $0x2d1] sm:$0xff] %vm33_vm1, %v197_v45 }
  0x55   :  { %11288 = vmatprep.mubr.msk.f32.mxu1 %vm33_vm1, %v1000_v3  ;;  %v12981_v49 = vld [vmem:[#allocation2 + $0xf8] sm:$0xff]  ;;  %263 = vst.msk [vmem:[#allocation2 + $0x2d9] sm:$0xff] %vm33_vm1, %v198_v47  ;;  %264 = vst.msk [vmem:[#allocation2 + $0x2e9] sm:$0xff] %vm33_vm1, %v199_v48  ;;  %v200_v50 = vld [vmem:[%s15810_s0 + $0x1c8] sm:$0xff] }
  0x56   :  { %11194 = vmatmul.mubr.msk.f32.gmra.mxu0 %vm33_vm1, %v12864_v4  ;;  %v1009_v51 = vld [vmem:[#allocation2 + $0xe1] sm:$0xff]  ;;  %265 = vst.msk [vmem:[#allocation2 + $0x2f1] sm:$0xff] %vm33_vm1, %v200_v50  ;;  %v1010_v53 = vld [vmem:[#allocation2 + $0xf1] sm:$0xff]  ;;  %v1011_v55 = vld [vmem:[#allocation2 + $0xf9] sm:$0xff] }
  0x57   :  { %11196 = vmatprep.mubr.msk.f32.mxu0 %vm33_vm1, %v12867_v6  ;;  %v12990_v52 = vld [vmem:[#allocation2 + $0x108] sm:$0xff]  ;;  %v12998_v54 = vld [vmem:[#allocation2 + $0x110] sm:$0xff]  ;;  %v13001_v56 = vld [vmem:[#allocation2 + $0x120] sm:$0xff] }
  0x58   :  { %11289 = vmatmul.mubr.msk.f32.gmra.mxu1 %vm33_vm1, %v1001_v5  ;;  %v1012_v57 = vld [vmem:[#allocation2 + $0x109] sm:$0xff]  ;;  %v1013_v60 = vld [vmem:[#allocation2 + $0x111] sm:$0xff]  ;;  %v1014_v63 = vld [vmem:[#allocation2 + $0x121] sm:$0xff] }
  0x59   :  { %11291 = vmatprep.mubr.msk.f32.mxu1 %vm33_vm1, %v1002_v7  ;;  %v13008_v59 = vld [vmem:[#allocation2 + $0x128] sm:$0xff]  ;;  %v13011_v62 = vld [vmem:[#allocation2 + $0x138] sm:$0xff]  ;;  %v13018_v0 = vld [vmem:[#allocation2 + $0x140] sm:$0xff] }
  0x5a   :  { %11197 = vmatmul.mubr.msk.f32.gmra.mxu0 %vm33_vm1, %v12874_v8  ;;  %v1015_v1 = vld [vmem:[#allocation2 + $0x129] sm:$0xff]  ;;  %v1016_v7 = vld [vmem:[#allocation2 + $0x139] sm:$0xff]  ;;  %v1017_v16 = vld [vmem:[#allocation2 + $0x141] sm:$0xff] }
  0x5b   :  { %11199 = vmatprep.mubr.msk.f32.mxu0 %vm33_vm1, %v12877_v10  ;;  %v13021_v3 = vld [vmem:[#allocation2 + $0x150] sm:$0xff]  ;;  %v13044_v14 = vld [vmem:[#allocation2 + $0x158] sm:$0xff]  ;;  %v13047_v17 = vld [vmem:[#allocation2 + $0x168] sm:$0xff] }
  0x5c   :  { %11292 = vmatmul.mubr.msk.f32.gmra.mxu1 %vm33_vm1, %v1003_v9  ;;  %v201_v5 = vld [vmem:[%s15810_s0 + $0x1d0] sm:$0xff]  ;;  %v202_v9 = vld [vmem:[%s15810_s0 + $0x1d8] sm:$0xff]  ;;  %v13075_v35 = vld [vmem:[#allocation2 + $0x1e0] sm:$0xff] }
  0x5d   :  { %11294 = vmatprep.mubr.msk.f32.mxu1 %vm33_vm1, %v1004_v11  ;;  %266 = vst.msk [vmem:[#allocation2 + $0x301] sm:$0xff] %vm33_vm1, %v201_v5  ;;  %267 = vst.msk [vmem:[#allocation2 + $0x309] sm:$0xff] %vm33_vm1, %v202_v9  ;;  %v9856_v11 = vld [vmem:[%s15811_s1 + $0xc] sm:$0x7]  ;;  %v13058_v20 = vld [vmem:[#allocation2 + $0x170] sm:$0xff] }
  0x5e   :  { %11200 = vmatmul.mubr.msk.f32.gmra.mxu0 %vm33_vm1, %v12884_v12  ;;  %11467 = vmatprep.subr.msk.mxu1 %vm537_vm0, %v9856_v11  ;;  %v1019_v21 = vld [vmem:[#allocation2 + $0x159] sm:$0xff]  ;;  %v1020_v24 = vld [vmem:[#allocation2 + $0x169] sm:$0xff]  ;;  %v1021_v26 = vld [vmem:[#allocation2 + $0x171] sm:$0xff] }
  0x5f   :  { %11202 = vmatprep.mubr.msk.f32.mxu0 %vm33_vm1, %v12890_v15  ;;  %11468 = vmatpush3.msk.msra.mxu1 %vm537_vm0, %v9856_v11  ;;  %v313_v25 = vld [vmem:[#allocation2 + $0x1b8] sm:$0xff]  ;;  %v13072_v31 = vld [vmem:[#allocation2 + $0x1d0] sm:$0xff] }
  0x60   :  { %11295 = vmatmul.mubr.msk.f32.gmra.mxu1 %vm33_vm1, %v1005_v13  ;;  %v13039_v13 = vld [vmem:[%s15811_s1 + $0x10] sm:$0x7]  ;;  %v1023_v33 = vld [vmem:[#allocation2 + $0x1b9] sm:$0xff] }
  0x61   :  { %11297 = vmatprep.mubr.msk.f32.mxu1 %vm33_vm1, %v1006_v19  ;;  %v1018_v19 = vld [vmem:[#allocation2 + $0x151] sm:$0xff]  ;;  %11565 = vmatprep.subr.msk.mxu0 %vm537_vm0, %v13039_v13  ;;  %v1024_v37 = vld [vmem:[#allocation2 + $0x1c9] sm:$0xff] }
  0x62   :  { %11203 = vmatmul.mubr.msk.f32.gmra.mxu0 %vm33_vm1, %v12899_v18  ;;  %v1022_v29 = vld [vmem:[#allocation2 + $0x1b1] sm:$0xff] }
  0x63   :  { %11205 = vmatprep.mubr.msk.f32.mxu0 %vm33_vm1, %v12911_v23  ;;  %v173_v39 = vld [vmem:[%s15810_s0 + $0xf0] sm:$0xff]  ;;  %v174_v42 = vld [vmem:[%s15810_s0 + $0xf8] sm:$0xff] }
  0x64   :  { %11298 = vmatmul.mubr.msk.f32.gmra.mxu1 %vm33_vm1, %v1007_v22  ;;  %v312_v22 = vld [vmem:[#allocation2 + $0x1b0] sm:$0xff]  ;;  %238 = vst.msk [vmem:[#allocation2 + $0x181] sm:$0xff] %vm33_vm1, %v173_v39  ;;  %239 = vst.msk [vmem:[#allocation2 + $0x189] sm:$0xff] %vm33_vm1, %v174_v42 }
  0x65   :  { %11300 = vmatprep.mubr.msk.f32.mxu1 %vm33_vm1, %v1008_v28  ;;  %v13066_v28 = vld [vmem:[#allocation2 + $0x1c8] sm:$0xff] }
  0x66   :  { %11206 = vmatmul.mubr.msk.f32.gmra.mxu0 %vm33_vm1, %v12981_v49 }
  0x67   :  { %11208 = vmatprep.mubr.msk.f32.mxu0 %vm33_vm1, %v12990_v52 }
  0x68   :  { %11301 = vmatmul.mubr.msk.f32.gmra.mxu1 %vm33_vm1, %v1009_v51 }
  0x69   :  { %11303 = vmatprep.mubr.msk.f32.mxu1 %vm33_vm1, %v1010_v53 }
  0x6a   :  { %11209 = vmatmul.mubr.msk.f32.gmra.mxu0 %vm33_vm1, %v12998_v54 }
  0x6b   :  { %11211 = vmatprep.mubr.msk.f32.mxu0 %vm33_vm1, %v13001_v56 }
  0x6c   :  { %11304 = vmatmul.mubr.msk.f32.gmra.mxu1 %vm33_vm1, %v1011_v55 }
  0x6d   :  { %11306 = vmatprep.mubr.msk.f32.mxu1 %vm33_vm1, %v1012_v57 }
  0x6e   :  { %11212 = vmatmul.mubr.msk.f32.gmra.mxu0 %vm33_vm1, %v13008_v59 }
  0x6f   :  { %11214 = vmatprep.mubr.msk.f32.mxu0 %vm33_vm1, %v13011_v62 }
  0x70   :  { %11307 = vmatmul.mubr.msk.f32.gmra.mxu1 %vm33_vm1, %v1013_v60 }
  0x71   :  { %11309 = vmatprep.mubr.msk.f32.mxu1 %vm33_vm1, %v1014_v63 }
  0x72   :  { %11215 = vmatmul.mubr.msk.f32.gmra.mxu0 %vm33_vm1, %v13018_v0 }
  0x73   :  { %11217 = vmatprep.mubr.msk.f32.mxu0 %vm33_vm1, %v13021_v3 }
  0x74   :  { %11310 = vmatmul.mubr.msk.f32.gmra.mxu1 %vm33_vm1, %v1015_v1 }
  0x75   :  { %11312 = vmatprep.mubr.msk.f32.mxu1 %vm33_vm1, %v1016_v7 }
  0x76   :  { %11218 = vmatmul.mubr.msk.f32.gmra.mxu0 %vm33_vm1, %v13044_v14 }
  0x77   :  { %11220 = vmatprep.mubr.msk.f32.mxu0 %vm33_vm1, %v13047_v17 }
  0x78   :  { %11313 = vmatmul.mubr.msk.f32.gmra.mxu1 %vm33_vm1, %v1017_v16 }
  0x79   :  { %11315 = vmatprep.mubr.msk.f32.mxu1 %vm33_vm1, %v1018_v19 }
  0x7a   :  { %11221 = vmatmul.mubr.msk.f32.gmra.mxu0 %vm33_vm1, %v13058_v20 }
  0x7b   :  { %11223 = vmatprep.mubr.msk.f32.mxu0 %vm33_vm1, %v312_v22 }
  0x7c   :  { %11316 = vmatmul.mubr.msk.f32.gmra.mxu1 %vm33_vm1, %v1019_v21 }
  0x7d   :  { %11318 = vmatprep.mubr.msk.f32.mxu1 %vm33_vm1, %v1020_v24 }
  0x7e   :  { %11224 = vmatmul.mubr.msk.f32.gmra.mxu0 %vm33_vm1, %v313_v25 }
  0x7f   :  { %11226 = vmatprep.mubr.msk.f32.mxu0 %vm33_vm1, %v13066_v28 }
  0x80   :  { %11319 = vmatmul.mubr.msk.f32.gmra.mxu1 %vm33_vm1, %v1021_v26 }
  0x81   :  { %11321 = vmatprep.mubr.msk.f32.mxu1 %vm33_vm1, %v1022_v29 }
  0x82   :  { %11227 = vmatmul.mubr.msk.f32.gmra.mxu0 %vm33_vm1, %v13072_v31 }
  0x83   :  { %14 = vsyncpa [#allocation7], 0  ;;  %11229 = vmatprep.mubr.msk.f32.mxu0 %vm33_vm1, %v13075_v35  ;;  %v13090_v43 = vld [vmem:[#allocation2 + $0x1e8] sm:$0xff]  ;;  %v1025_v44 = vld [vmem:[#allocation2 + $0x1d1] sm:$0xff]  ;;  %vm6735_vm3 = vcmask 64512   ;;  %vm7008_vm4 = vcmask 58368  }
  0x84   :  { %11322 = vmatmul.mubr.msk.f32.gmra.mxu1 %vm33_vm1, %v1023_v33  ;;  %v13093_v45 = vld [vmem:[#allocation2 + $0x1f8] sm:$0xff]  ;;  %v1026_v47 = vld [vmem:[#allocation2 + $0x1e1] sm:$0xff]  ;;  %v1027_v50 = vld [vmem:[#allocation2 + $0x1e9] sm:$0xff]  ;;  %vm12360_vm5 = vmmov 0   ;;  %vm9132_vm6 = vcmask 130048   ;;  %vm9245_vm7 = vcmask 1041409  }
  0x85   :  { %11324 = vmatprep.mubr.msk.f32.mxu1 %vm33_vm1, %v1024_v37  ;;  %v13100_v48 = vld [vmem:[#allocation2 + $0x200] sm:$0xff]  ;;  %v13103_v51 = vld [vmem:[#allocation2 + $0x210] sm:$0xff]  ;;  %v13110_v55 = vld [vmem:[#allocation2 + $0x218] sm:$0xff]  ;;  %vm9568_vm8 = vcmask 261120   ;;  %vm9642_vm9 = vcmask 74752  }
  0x86   :  { %11230 = vmatmul.mubr.msk.f32.gmra.mxu0 %vm33_vm1, %v13090_v43  ;;  %v1028_v53 = vld [vmem:[#allocation2 + $0x1f9] sm:$0xff]  ;;  %v1029_v57 = vld [vmem:[#allocation2 + $0x201] sm:$0xff]  ;;  %v1030_v63 = vld [vmem:[#allocation2 + $0x211] sm:$0xff] }
  0x87   :  { %11232 = vmatprep.mubr.msk.f32.mxu0 %vm33_vm1, %v13093_v45  ;;  %v13113_v60 = vld [vmem:[#allocation2 + $0x228] sm:$0xff]  ;;  %v13120_v1 = vld [vmem:[#allocation2 + $0x230] sm:$0xff]  ;;  %v1031_v5 = vld [vmem:[#allocation2 + $0x219] sm:$0xff] }
  0x88   :  { %11325 = vmatmul.mubr.msk.f32.gmra.mxu1 %vm33_vm1, %v1025_v44  ;;  %v13123_v7 = vld [vmem:[#allocation2 + $0x240] sm:$0xff]  ;;  %v1032_v9 = vld [vmem:[#allocation2 + $0x229] sm:$0xff]  ;;  %v1033_v16 = vld [vmem:[#allocation2 + $0x231] sm:$0xff] }
  0x89   :  { %11327 = vmatprep.mubr.msk.f32.mxu1 %vm33_vm1, %v1026_v47  ;;  %v13130_v11 = vld [vmem:[#allocation2 + $0x248] sm:$0xff]  ;;  %v13133_v19 = vld [vmem:[#allocation2 + $0x258] sm:$0xff]  ;;  %v13140_v22 = vld [vmem:[#allocation2 + $0x260] sm:$0xff] }
  0x8a   :  { %11233 = vmatmul.mubr.msk.f32.gmra.mxu0 %vm33_vm1, %v13100_v48  ;;  %v1034_v21 = vld [vmem:[#allocation2 + $0x241] sm:$0xff]  ;;  %v1035_v24 = vld [vmem:[#allocation2 + $0x249] sm:$0xff]  ;;  %v1036_v26 = vld [vmem:[#allocation2 + $0x259] sm:$0xff] }
  0x8b   :  { %11235 = vmatprep.mubr.msk.f32.mxu0 %vm33_vm1, %v13103_v51  ;;  %v13143_v25 = vld [vmem:[#allocation2 + $0x270] sm:$0xff]  ;;  %v13150_v29 = vld [vmem:[#allocation2 + $0x278] sm:$0xff]  ;;  %v1037_v33 = vld [vmem:[#allocation2 + $0x261] sm:$0xff] }
  0x8c   :  { %11328 = vmatmul.mubr.msk.f32.gmra.mxu1 %vm33_vm1, %v1027_v50  ;;  %v13153_v37 = vld [vmem:[#allocation2 + $0x288] sm:$0xff]  ;;  %v1038_v39 = vld [vmem:[#allocation2 + $0x271] sm:$0xff]  ;;  %v1039_v44 = vld [vmem:[#allocation2 + $0x279] sm:$0xff] }
  0x8d   :  { %11330 = vmatprep.mubr.msk.f32.mxu1 %vm33_vm1, %v1028_v53  ;;  %v13160_v42 = vld [vmem:[#allocation2 + $0x290] sm:$0xff]  ;;  %v13163_v47 = vld [vmem:[#allocation2 + $0x2a0] sm:$0xff]  ;;  %v13170_v53 = vld [vmem:[#allocation2 + $0x2a8] sm:$0xff] }
  0x8e   :  { %11236 = vmatmul.mubr.msk.f32.gmra.mxu0 %vm33_vm1, %v13110_v55  ;;  %v1040_v50 = vld [vmem:[#allocation2 + $0x289] sm:$0xff] }
  0x8f   :  { %11238 = vmatprep.mubr.msk.f32.mxu0 %vm33_vm1, %v13113_v60  ;;  %v1700_v2 = vld [vmem:[#allocation2 + $0x2] sm:$0xff] }
  0x90   :  { %11331 = vmatmul.mubr.msk.f32.gmra.mxu1 %vm33_vm1, %v1029_v57  ;;  %v1041_v57 = vld [vmem:[#allocation2 + $0x291] sm:$0xff] }
  0x91   :  { %11333 = vmatprep.mubr.msk.f32.mxu1 %vm33_vm1, %v1030_v63  ;;  %v13173_v63 = vld [vmem:[#allocation2 + $0x2b8] sm:$0xff] }
  0x92   :  { %11239 = vmatmul.mubr.msk.f32.gmra.mxu0 %vm33_vm1, %v13120_v1 }
  0x93   :  { %11241 = vmatprep.mubr.msk.f32.mxu0 %vm33_vm1, %v13123_v7 }
  0x94   :  { %11334 = vmatmul.mubr.msk.f32.gmra.mxu1 %vm33_vm1, %v1031_v5  ;;  %v1042_v5 = vld [vmem:[#allocation2 + $0x2a1] sm:$0xff] }
  0x95   :  { %11336 = vmatprep.mubr.msk.f32.mxu1 %vm33_vm1, %v1032_v9  ;;  %v13180_v9 = vld [vmem:[#allocation2 + $0x2c0] sm:$0xff] }
  0x96   :  { %11242 = vmatmul.mubr.msk.f32.gmra.mxu0 %vm33_vm1, %v13130_v11 }
  0x97   :  { %11244 = vmatprep.mubr.msk.f32.mxu0 %vm33_vm1, %v13133_v19 }
  0x98   :  { %11337 = vmatmul.mubr.msk.f32.gmra.mxu1 %vm33_vm1, %v1033_v16  ;;  %v1043_v16 = vld [vmem:[#allocation2 + $0x2a9] sm:$0xff] }
  0x99   :  { %11339 = vmatprep.mubr.msk.f32.mxu1 %vm33_vm1, %v1034_v21  ;;  %v13183_v21 = vld [vmem:[#allocation2 + $0x2d0] sm:$0xff] }
  0x9a   :  { %11245 = vmatmul.mubr.msk.f32.gmra.mxu0 %vm33_vm1, %v13140_v22 }
  0x9b   :  { %11247 = vmatprep.mubr.msk.f32.mxu0 %vm33_vm1, %v13143_v25 }
  0x9c   :  { %11340 = vmatmul.mubr.msk.f32.gmra.mxu1 %vm33_vm1, %v1035_v24  ;;  %v1044_v24 = vld [vmem:[#allocation2 + $0x2b9] sm:$0xff] }
  0x9d   :  { %11342 = vmatprep.mubr.msk.f32.mxu1 %vm33_vm1, %v1036_v26  ;;  %v13190_v26 = vld [vmem:[#allocation2 + $0x2d8] sm:$0xff] }
  0x9e   :  { %11248 = vmatmul.mubr.msk.f32.gmra.mxu0 %vm33_vm1, %v13150_v29 }
  0x9f   :  { %11250 = vmatprep.mubr.msk.f32.mxu0 %vm33_vm1, %v13153_v37 }
  0xa0   :  { %11343 = vmatmul.mubr.msk.f32.gmra.mxu1 %vm33_vm1, %v1037_v33  ;;  %v1045_v33 = vld [vmem:[#allocation2 + $0x2c1] sm:$0xff] }
  0xa1   :  { %11345 = vmatprep.mubr.msk.f32.mxu1 %vm33_vm1, %v1038_v39  ;;  %v13193_v39 = vld [vmem:[#allocation2 + $0x2e8] sm:$0xff] }
  0xa2   :  { %11251 = vmatmul.mubr.msk.f32.gmra.mxu0 %vm33_vm1, %v13160_v42  ;;  %15829 = vst [vmem:[#allocation9_spill] sm:$0xff] %v13193_v39 }
  0xa3   :  { %11253 = vmatprep.mubr.msk.f32.mxu0 %vm33_vm1, %v13163_v47 }
  0xa4   :  { %11346 = vmatmul.mubr.msk.f32.gmra.mxu1 %vm33_vm1, %v1039_v44  ;;  %v1046_v44 = vld [vmem:[#allocation2 + $0x2d1] sm:$0xff] }
  0xa5   :  { %11348 = vmatprep.mubr.msk.f32.mxu1 %vm33_vm1, %v1040_v50  ;;  %v13200_v50 = vld [vmem:[#allocation2 + $0x2f0] sm:$0xff] }
  0xa6   :  { %11254 = vmatmul.mubr.msk.f32.gmra.mxu0 %vm33_vm1, %v13170_v53  ;;  %15830 = vst [vmem:[#allocation10_spill] sm:$0xff] %v13200_v50 }
  0xa7   :  { %11256 = vmatprep.mubr.msk.f32.mxu0 %vm33_vm1, %v13173_v63 }
  0xa8   :  { %11349 = vmatmul.mubr.msk.f32.gmra.mxu1 %vm33_vm1, %v1041_v57  ;;  %v1047_v57 = vld [vmem:[#allocation2 + $0x2d9] sm:$0xff] }
  0xa9   :  { %11351 = vmatprep.mubr.msk.f32.mxu1 %vm33_vm1, %v1042_v5  ;;  %v13203_v5 = vld [vmem:[#allocation2 + $0x300] sm:$0xff] }
  0xaa   :  { %11257 = vmatmul.mubr.msk.f32.gmra.mxu0 %vm33_vm1, %v13180_v9  ;;  %15831 = vst [vmem:[#allocation11_spill] sm:$0xff] %v13203_v5 }
  0xab   :  { %11259 = vmatprep.mubr.msk.f32.mxu0 %vm33_vm1, %v13183_v21 }
  0xac   :  { %11352 = vmatmul.mubr.msk.f32.gmra.mxu1 %vm33_vm1, %v1043_v16  ;;  %v1048_v16 = vld [vmem:[#allocation2 + $0x2e9] sm:$0xff] }
  0xad   :  { %11354 = vmatprep.mubr.msk.f32.mxu1 %vm33_vm1, %v1044_v24  ;;  %v13210_v24 = vld [vmem:[#allocation2 + $0x308] sm:$0xff] }
  0xae   :  { %11260 = vmatmul.mubr.msk.f32.gmra.mxu0 %vm33_vm1, %v13190_v26  ;;  %15832 = vst [vmem:[#allocation12_spill] sm:$0xff] %v13210_v24 }
  0xaf   :  { %11262 = vmatprep.mubr.msk.f32.mxu0 %vm33_vm1, %v13193_v39  ;;  %v1050_v39 = vld [vmem:[#allocation2 + $0x301] sm:$0xff] }
  0xb0   :  { %11355 = vmatmul.mubr.msk.f32.gmra.mxu1 %vm33_vm1, %v1045_v33  ;;  %v1049_v33 = vld [vmem:[#allocation2 + $0x2f1] sm:$0xff] }
  0xb1   :  { %11357 = vmatprep.mubr.msk.f32.mxu1 %vm33_vm1, %v1046_v44  ;;  %v205_v44 = vld [vmem:[%s15810_s0 + $0x1f0] sm:$0xff] }
  0xb2   :  { %11263 = vmatmul.mubr.msk.f32.gmra.mxu0 %vm33_vm1, %v13200_v50  ;;  %270 = vst.msk [vmem:[#allocation2 + $0x331] sm:$0xff] %vm33_vm1, %v205_v44  ;;  %v13229_v50 = vld [vmem:[#allocation2 + $0x1a] sm:$0xff] }
  0xb3   :  { %11265 = vmatprep.mubr.msk.f32.mxu0 %vm33_vm1, %v13203_v5  ;;  %v1051_v5 = vld [vmem:[#allocation2 + $0x309] sm:$0xff]  ;;  %v1052_v44 = vld [vmem:[#allocation2 + $0x319] sm:$0xff] }
  0xb4   :  { %11358 = vmatmul.mubr.msk.f32.gmra.mxu1 %vm33_vm1, %v1047_v57  ;;  %v206_v57 = vld [vmem:[%s15810_s0 + $0x1f8] sm:$0xff] }
  0xb5   :  { %11360 = vmatprep.mubr.msk.f32.mxu1 %vm33_vm1, %v1048_v16  ;;  %v1701_v16 = vld [vmem:[#allocation2 + $0xa] sm:$0xff]  ;;  %271 = vst.msk [vmem:[#allocation2 + $0x339] sm:$0xff] %vm33_vm1, %v206_v57  ;;  %v13246_v57 = vld [vmem:[#allocation2 + $0x32] sm:$0xff] }
  0xb6   :  { %11266 = vmatmul.mubr.msk.f32.gmra.mxu0 %vm33_vm1, %v13210_v24  ;;  %v9988_v24 = vld [vmem:[%s15811_s1 + $0x14] sm:$0x7] }
  0xb7   :  { %11371 = vmatprep.mubr.msk.f32.mxu0 %vm33_vm1, %v1700_v2  ;;  %11663 = vmatprep.subr.msk.mxu1 %vm537_vm0, %v9988_v24  ;;  %v13236_v2 = vld [vmem:[%s15811_s1 + $0x18] sm:$0x7] }
  0xb8   :  { %11361 = vmatmul.mubr.msk.f32.gmra.mxu1 %vm33_vm1, %v1049_v33  ;;  %v1053_v33 = vld [vmem:[#allocation2 + $0x321] sm:$0xff] }
  0xb9   :  { %11363 = vmatprep.mubr.msk.f32.mxu1 %vm33_vm1, %v1050_v39  ;;  %v13241_v39 = vld [vmem:[#allocation2 + $0x22] sm:$0xff] }
  0xba   :  { %11372 = vmatmul.mubr.msk.f32.vlgmr.msra.gmra.mxu0 %vm33_vm1, %v1701_v16  ;;  %v13267_v16 = vld [vmem:[#allocation2 + $0x52] sm:$0xff] }
  0xbb   :  { %11566 = vmatpush3.msk.msra.mxu0 %vm537_vm0, %v13039_v13  ;;  %11374 = vmatprep.mubr.msk.f32.mxu0 %vm33_vm1, %v13229_v50  ;;  %v13255_v13 = vld [vmem:[#allocation2 + $0x3a] sm:$0xff] }
  0xbc   :  { %11364 = vmatmul.mubr.msk.f32.gmra.mxu1 %vm33_vm1, %v1051_v5  ;;  %11761 = vmatprep.subr.msk.mxu0 %vm537_vm0, %v13236_v2  ;;  %v13259_v5 = vld [vmem:[#allocation2 + $0x4a] sm:$0xff] }
  0xbd   :  { %11366 = vmatprep.mubr.msk.f32.mxu1 %vm33_vm1, %v1052_v44  ;;  %v13271_v44 = vld [vmem:[#allocation2 + $0x62] sm:$0xff] }
  0xbe   :  { %11375 = vmatmul.mubr.msk.f32.gmra.mxu0 %vm33_vm1, %v13241_v39 }
  0xbf   :  { %11377 = vmatprep.mubr.msk.f32.mxu0 %vm33_vm1, %v13246_v57 }
  0xc0   :  { %11367 = vmatmul.mubr.msk.f32.gmra.mxu1 %vm33_vm1, %v1053_v33  ;;  %v2441_v33 = vld [vmem:[#allocation2 + $0x188] sm:$0xff] }
  0xc1   :  { %11469 = vmatprep.mubr.msk.f32.mxu1 %vm33_vm1, %v12736_v27  ;;  %v13280_v27 = vld [vmem:[#allocation2 + $0x6a] sm:$0xff] }
  0xc2   :  { %11378 = vmatmul.mubr.msk.f32.gmra.mxu0 %vm33_vm1, %v13255_v13 }
  0xc3   :  { %11380 = vmatprep.mubr.msk.f32.mxu0 %vm33_vm1, %v13259_v5 }
  0xc4   :  { %11470 = vmatmul.mubr.msk.f32.vlgmr.msra.gmra.mxu1 %vm33_vm1, %v12743_v30  ;;  %v13284_v30 = vld [vmem:[#allocation2 + $0x7a] sm:$0xff] }
  0xc5   :  { %11472 = vmatprep.mubr.msk.f32.mxu1 %vm33_vm1, %v12748_v32  ;;  %11664 = vmatpush3.msk.msra.mxu1 %vm537_vm0, %v9988_v24  ;;  %v13292_v32 = vld [vmem:[#allocation2 + $0x82] sm:$0xff]  ;;  %v1730_v24 = vld [vmem:[#allocation2 + $0x16a] sm:$0xff] }
  0xc6   :  { %11381 = vmatmul.mubr.msk.f32.gmra.mxu0 %vm33_vm1, %v13267_v16 }
  0xc7   :  { %11383 = vmatprep.mubr.msk.f32.mxu0 %vm33_vm1, %v13271_v44 }
  0xc8   :  { %11473 = vmatmul.mubr.msk.f32.gmra.mxu1 %vm33_vm1, %v12756_v34  ;;  %v13296_v34 = vld [vmem:[#allocation2 + $0x92] sm:$0xff] }
  0xc9   :  { %11475 = vmatprep.mubr.msk.f32.mxu1 %vm33_vm1, %v12759_v36  ;;  %v13304_v36 = vld [vmem:[#allocation2 + $0x9a] sm:$0xff] }
  0xca   :  { %11384 = vmatmul.mubr.msk.f32.gmra.mxu0 %vm33_vm1, %v13280_v27 }
  0xcb   :  { %11386 = vmatprep.mubr.msk.f32.mxu0 %vm33_vm1, %v13284_v30 }
  0xcc   :  { %11476 = vmatmul.mubr.msk.f32.gmra.mxu1 %vm33_vm1, %v12766_v38  ;;  %v13308_v38 = vld [vmem:[#allocation2 + $0xaa] sm:$0xff] }
  0xcd   :  { %11478 = vmatprep.mubr.msk.f32.mxu1 %vm33_vm1, %v12769_v40  ;;  %v13316_v40 = vld [vmem:[#allocation2 + $0xb2] sm:$0xff] }
  0xce   :  { %11387 = vmatmul.mubr.msk.f32.gmra.mxu0 %vm33_vm1, %v13292_v32 }
  0xcf   :  { %11389 = vmatprep.mubr.msk.f32.mxu0 %vm33_vm1, %v13296_v34 }
  0xd0   :  { %11479 = vmatmul.mubr.msk.f32.gmra.mxu1 %vm33_vm1, %v12771_v41  ;;  %v13320_v41 = vld [vmem:[#allocation2 + $0xc2] sm:$0xff] }
  0xd1   :  { %11481 = vmatprep.mubr.msk.f32.mxu1 %vm33_vm1, %v12781_v46  ;;  %v13328_v46 = vld [vmem:[#allocation2 + $0xca] sm:$0xff] }
  0xd2   :  { %11390 = vmatmul.mubr.msk.f32.gmra.mxu0 %vm33_vm1, %v13304_v36 }
  0xd3   :  { %11392 = vmatprep.mubr.msk.f32.mxu0 %vm33_vm1, %v13308_v38 }
  0xd4   :  { %11482 = vmatmul.mubr.msk.f32.gmra.mxu1 %vm33_vm1, %v12828_v58  ;;  %v13332_v58 = vld [vmem:[#allocation2 + $0xda] sm:$0xff] }
  0xd5   :  { %11484 = vmatprep.mubr.msk.f32.mxu1 %vm33_vm1, %v12839_v61  ;;  %v13340_v61 = vld [vmem:[#allocation2 + $0xe2] sm:$0xff] }
  0xd6   :  { %11393 = vmatmul.mubr.msk.f32.gmra.mxu0 %vm33_vm1, %v13316_v40 }
  0xd7   :  { %11395 = vmatprep.mubr.msk.f32.mxu0 %vm33_vm1, %v13320_v41 }
  0xd8   :  { %11485 = vmatmul.mubr.msk.f32.gmra.mxu1 %vm33_vm1, %v12864_v4  ;;  %v13344_v4 = vld [vmem:[#allocation2 + $0xf2] sm:$0xff] }
  0xd9   :  { %11487 = vmatprep.mubr.msk.f32.mxu1 %vm33_vm1, %v12867_v6  ;;  %v13352_v6 = vld [vmem:[#allocation2 + $0xfa] sm:$0xff] }
  0xda   :  { %11396 = vmatmul.mubr.msk.f32.gmra.mxu0 %vm33_vm1, %v13328_v46 }
  0xdb   :  { %11398 = vmatprep.mubr.msk.f32.mxu0 %vm33_vm1, %v13332_v58 }
  0xdc   :  { %11488 = vmatmul.mubr.msk.f32.gmra.mxu1 %vm33_vm1, %v12874_v8  ;;  %v13356_v8 = vld [vmem:[#allocation2 + $0x10a] sm:$0xff] }
  0xdd   :  { %11490 = vmatprep.mubr.msk.f32.mxu1 %vm33_vm1, %v12877_v10  ;;  %v13364_v10 = vld [vmem:[#allocation2 + $0x112] sm:$0xff] }
  0xde   :  { %11399 = vmatmul.mubr.msk.f32.gmra.mxu0 %vm33_vm1, %v13340_v61 }
  0xdf   :  { %11401 = vmatprep.mubr.msk.f32.mxu0 %vm33_vm1, %v13344_v4 }
  0xe0   :  { %11491 = vmatmul.mubr.msk.f32.gmra.mxu1 %vm33_vm1, %v12884_v12  ;;  %v13368_v12 = vld [vmem:[#allocation2 + $0x122] sm:$0xff] }
  0xe1   :  { %11493 = vmatprep.mubr.msk.f32.mxu1 %vm33_vm1, %v12890_v15  ;;  %v13376_v15 = vld [vmem:[#allocation2 + $0x12a] sm:$0xff] }
  0xe2   :  { %11402 = vmatmul.mubr.msk.f32.gmra.mxu0 %vm33_vm1, %v13352_v6 }
  0xe3   :  { %11404 = vmatprep.mubr.msk.f32.mxu0 %vm33_vm1, %v13356_v8 }
  0xe4   :  { %11494 = vmatmul.mubr.msk.f32.gmra.mxu1 %vm33_vm1, %v12899_v18  ;;  %v1726_v18 = vld [vmem:[#allocation2 + $0x13a] sm:$0xff] }
  0xe5   :  { %11496 = vmatprep.mubr.msk.f32.mxu1 %vm33_vm1, %v12911_v23  ;;  %v1727_v23 = vld [vmem:[#allocation2 + $0x142] sm:$0xff] }
  0xe6   :  { %11405 = vmatmul.mubr.msk.f32.gmra.mxu0 %vm33_vm1, %v13364_v10 }
  0xe7   :  { %11407 = vmatprep.mubr.msk.f32.mxu0 %vm33_vm1, %v13368_v12 }
  0xe8   :  { %11497 = vmatmul.mubr.msk.f32.gmra.mxu1 %vm33_vm1, %v12981_v49  ;;  %v1728_v49 = vld [vmem:[#allocation2 + $0x152] sm:$0xff] }
  0xe9   :  { %11499 = vmatprep.mubr.msk.f32.mxu1 %vm33_vm1, %v12990_v52  ;;  %v1729_v52 = vld [vmem:[#allocation2 + $0x15a] sm:$0xff] }
  0xea   :  { %11408 = vmatmul.mubr.msk.f32.gmra.mxu0 %vm33_vm1, %v13376_v15 }
  0xeb   :  { %11410 = vmatprep.mubr.msk.f32.mxu0 %vm33_vm1, %v1726_v18  ;;  %v11177_v18 = vpop.f32.mrf.mxu0 }
  0xec   :  { %11500 = vmatmul.mubr.msk.f32.gmra.mxu1 %vm33_vm1, %v12998_v54  ;;  %v1731_v54 = vld [vmem:[#allocation2 + $0x172] sm:$0xff] }
  0xed   :  { %11502 = vmatprep.mubr.msk.f32.mxu1 %vm33_vm1, %v13001_v56  ;;  %v1732_v56 = vld [vmem:[#allocation2 + $0x1b2] sm:$0xff] }
  0xee   :  { %11411 = vmatmul.mubr.msk.f32.gmra.mxu0 %vm33_vm1, %v1727_v23 }
  0xef   :  { %11413 = vmatprep.mubr.msk.f32.mxu0 %vm33_vm1, %v1728_v49  ;;  %v607_v49 = vpop.f32.mrf.mxu0 }
  0xf0   :  { %11503 = vmatmul.mubr.msk.f32.gmra.mxu1 %vm33_vm1, %v13008_v59  ;;  %v1733_v59 = vld [vmem:[#allocation2 + $0x1ba] sm:$0xff] }
  0xf1   :  { %11505 = vmatprep.mubr.msk.f32.mxu1 %vm33_vm1, %v13011_v62  ;;  %v1734_v62 = vld [vmem:[#allocation2 + $0x1ca] sm:$0xff] }
  0xf2   :  { %11414 = vmatmul.mubr.msk.f32.gmra.mxu0 %vm33_vm1, %v1729_v52  ;;  %v1738_v52 = vld [vmem:[#allocation2 + $0x1fa] sm:$0xff] }
  0xf3   :  { %11416 = vmatprep.mubr.msk.f32.mxu0 %vm33_vm1, %v1730_v24 }
  0xf4   :  { %11506 = vmatmul.mubr.msk.f32.gmra.mxu1 %vm33_vm1, %v13018_v0  ;;  %v2440_v0 = vld [vmem:[#allocation2 + $0x180] sm:$0xff] }
  0xf5   :  { %11508 = vmatprep.mubr.msk.f32.mxu1 %vm33_vm1, %v13021_v3  ;;  %v1735_v3 = vld [vmem:[#allocation2 + $0x1d2] sm:$0xff] }
  0xf6   :  { %11417 = vmatmul.mubr.msk.f32.gmra.mxu0 %vm33_vm1, %v1731_v54 }
  0xf7   :  { %11419 = vmatprep.mubr.msk.f32.mxu0 %vm33_vm1, %v1732_v56 }
  0xf8   :  { %11509 = vmatmul.mubr.msk.f32.gmra.mxu1 %vm33_vm1, %v13044_v14  ;;  %v1736_v14 = vld [vmem:[#allocation2 + $0x1e2] sm:$0xff] }
  0xf9   :  { %11511 = vmatprep.mubr.msk.f32.mxu1 %vm33_vm1, %v13047_v17  ;;  %v13414_v17 = vld [vmem:[%s15812_s2] ss:$0 sm:$0xff] }
  0xfa   :  { %11420 = vmatmul.mubr.msk.f32.gmra.mxu0 %vm33_vm1, %v1733_v59  ;;  %v927_v54 = vadd.f32 %v11177_v18, %v13414_v17 }
  0xfb   :  { %11422 = vmatprep.mubr.msk.f32.mxu0 %vm33_vm1, %v1734_v62  ;;  %v1739_v62 = vld [vmem:[#allocation2 + $0x202] sm:$0xff] }
  0xfc   :  { %11512 = vmatmul.mubr.msk.f32.gmra.mxu1 %vm33_vm1, %v13058_v20  ;;  %v1737_v20 = vld [vmem:[#allocation2 + $0x1ea] sm:$0xff] }
  0xfd   :  { %11514 = vmatprep.mubr.msk.f32.mxu1 %vm33_vm1, %v2440_v0  ;;  %v926_v0 = vadd.f32 %v13414_v17, %v607_v49  ;;  %v1741_v49 = vld [vmem:[#allocation2 + $0x21a] sm:$0xff] }
  0xfe   :  { %11423 = vmatmul.mubr.msk.f32.gmra.mxu0 %vm33_vm1, %v1735_v3 }
  0xff   :  { %11425 = vmatprep.mubr.msk.f32.mxu0 %vm33_vm1, %v1736_v14 }
 0x100   :  { %v13416_v23 = vpop.f32.mrf.mxu1  ;;  %11515 = vmatmul.mubr.msk.f32.gmra.mxu1 %vm33_vm1, %v2441_v33  ;;  %v1740_v33 = vld [vmem:[#allocation2 + $0x212] sm:$0xff] }
 0x101   :  { %11517 = vmatprep.mubr.msk.f32.mxu1 %vm33_vm1, %v13066_v28 }
 0x102   :  { %v13422_v24 = vpop.f32.mrf.mxu1  ;;  %v11180_v56 = vpop.f32.mrf.mxu0  ;;  %11426 = vmatmul.mubr.msk.f32.gmra.mxu0 %vm33_vm1, %v1737_v20 }
 0x103   :  { %15833 = vst [vmem:[#allocation13_spill] sm:$0xff] %v13422_v24  ;;  %11428 = vmatprep.mubr.msk.f32.mxu0 %vm33_vm1, %v1738_v52  ;;  %v929_v18 = vadd.f32 %v11180_v56, %v13414_v17  ;;  %v1742_v56 = vld [vmem:[#allocation2 + $0x22a] sm:$0xff] }
 0x104   :  { %v11275_v59 = vpop.f32.mrf.mxu1  ;;  %11518 = vmatmul.mubr.msk.f32.gmra.mxu1 %vm33_vm1, %v13072_v31  ;;  %v617_v28 = vpop.f32.mrf.mxu0 }
 0x105   :  { %v13430_v3 = vadd.f32 %v11275_v59, %v927_v54  ;;  %11520 = vmatprep.mubr.msk.f32.mxu1 %vm33_vm1, %v13075_v35  ;;  %v928_v52 = vadd.f32 %v13414_v17, %v617_v28  ;;  %v1743_v28 = vld [vmem:[#allocation2 + $0x232] sm:$0xff] }
 0x106   :  { %v1317_v14 = vpop.f32.mrf.mxu1  ;;  %v11183_v24 = vpop.f32.mrf.mxu0  ;;  %11429 = vmatmul.mubr.msk.f32.gmra.mxu0 %vm33_vm1, %v1739_v62 }
 0x107   :  { %v13435_v20 = vadd.f32 %v1317_v14, %v926_v0  ;;  %11431 = vmatprep.mubr.msk.f32.mxu0 %vm33_vm1, %v1740_v33  ;;  %v931_v0 = vadd.f32 %v11183_v24, %v13414_v17  ;;  %v1744_v24 = vld [vmem:[#allocation2 + $0x242] sm:$0xff] }
 0x108   :  { %v11278_v31 = vpop.f32.mrf.mxu1  ;;  %11521 = vmatmul.mubr.msk.f32.gmra.mxu1 %vm33_vm1, %v13090_v43  ;;  %v627_v35 = vpop.f32.mrf.mxu0 }
 0x109   :  { %v13442_v54 = vadd.f32 %v11278_v31, %v929_v18  ;;  %11523 = vmatprep.mubr.msk.f32.mxu1 %vm33_vm1, %v13093_v45  ;;  %v930_v33 = vadd.f32 %v13414_v17, %v627_v35  ;;  %v1745_v35 = vld [vmem:[#allocation2 + $0x24a] sm:$0xff] }
 0x10a   :  { %v1327_v59 = vpop.f32.mrf.mxu1  ;;  %v11186_v14 = vpop.f32.mrf.mxu0  ;;  %11432 = vmatmul.mubr.msk.f32.gmra.mxu0 %vm33_vm1, %v1741_v49 }
 0x10b   :  { %v13447_v62 = vadd.f32 %v1327_v59, %v928_v52  ;;  %11434 = vmatprep.mubr.msk.f32.mxu0 %vm33_vm1, %v1742_v56  ;;  %v933_v52 = vadd.f32 %v11186_v14, %v13414_v17  ;;  %v1746_v14 = vld [vmem:[#allocation2 + $0x25a] sm:$0xff] }
 0x10c   :  { %v11281_v43 = vpop.f32.mrf.mxu1  ;;  %11524 = vmatmul.mubr.msk.f32.gmra.mxu1 %vm33_vm1, %v13100_v48  ;;  %v637_v45 = vpop.f32.mrf.mxu0 }
 0x10d   :  { %v13454_v18 = vadd.f32 %v11281_v43, %v931_v0  ;;  %11526 = vmatprep.mubr.msk.f32.mxu1 %vm33_vm1, %v13103_v51  ;;  %v932_v56 = vadd.f32 %v13414_v17, %v637_v45  ;;  %v1747_v45 = vld [vmem:[#allocation2 + $0x262] sm:$0xff] }
 0x10e   :  { %v1337_v31 = vpop.f32.mrf.mxu1  ;;  %v11189_v59 = vpop.f32.mrf.mxu0  ;;  %11435 = vmatmul.mubr.msk.f32.gmra.mxu0 %vm33_vm1, %v1743_v28 }
 0x10f   :  { %v13459_v49 = vadd.f32 %v1337_v31, %v930_v33  ;;  %11437 = vmatprep.mubr.msk.f32.mxu0 %vm33_vm1, %v1744_v24  ;;  %v935_v33 = vadd.f32 %v11189_v59, %v13414_v17  ;;  %v1748_v59 = vld [vmem:[#allocation2 + $0x272] sm:$0xff] }
 0x110   :  { %v11284_v48 = vpop.f32.mrf.mxu1  ;;  %11527 = vmatmul.mubr.msk.f32.gmra.mxu1 %vm33_vm1, %v13110_v55  ;;  %v647_v51 = vpop.f32.mrf.mxu0 }
 0x111   :  { %v13466_v0 = vadd.f32 %v11284_v48, %v933_v52  ;;  %11529 = vmatprep.mubr.msk.f32.mxu1 %vm33_vm1, %v13113_v60  ;;  %v934_v24 = vadd.f32 %v13414_v17, %v647_v51  ;;  %v1749_v51 = vld [vmem:[#allocation2 + $0x27a] sm:$0xff] }
 0x112   :  { %v1347_v43 = vpop.f32.mrf.mxu1  ;;  %v11192_v31 = vpop.f32.mrf.mxu0  ;;  %11438 = vmatmul.mubr.msk.f32.gmra.mxu0 %vm33_vm1, %v1745_v35 }
 0x113   :  { %v13471_v28 = vadd.f32 %v1347_v43, %v932_v56  ;;  %11440 = vmatprep.mubr.msk.f32.mxu0 %vm33_vm1, %v1746_v14  ;;  %v937_v56 = vadd.f32 %v11192_v31, %v13414_v17  ;;  %v1750_v31 = vld [vmem:[#allocation2 + $0x28a] sm:$0xff] }
 0x114   :  { %v11287_v55 = vpop.f32.mrf.mxu1  ;;  %11530 = vmatmul.mubr.msk.f32.gmra.mxu1 %vm33_vm1, %v13120_v1  ;;  %v657_v60 = vpop.f32.mrf.mxu0 }
 0x115   :  { %v13478_v52 = vadd.f32 %v11287_v55, %v935_v33  ;;  %11532 = vmatprep.mubr.msk.f32.mxu1 %vm33_vm1, %v13123_v7  ;;  %v936_v14 = vadd.f32 %v13414_v17, %v657_v60  ;;  %v1751_v60 = vld [vmem:[#allocation2 + $0x292] sm:$0xff] }
 0x116   :  { %v1357_v48 = vpop.f32.mrf.mxu1  ;;  %v11195_v43 = vpop.f32.mrf.mxu0  ;;  %11441 = vmatmul.mubr.msk.f32.gmra.mxu0 %vm33_vm1, %v1747_v45 }
 0x117   :  { %v13483_v35 = vadd.f32 %v1357_v48, %v934_v24  ;;  %11443 = vmatprep.mubr.msk.f32.mxu0 %vm33_vm1, %v1748_v59  ;;  %v939_v24 = vadd.f32 %v11195_v43, %v13414_v17  ;;  %v1752_v43 = vld [vmem:[#allocation2 + $0x2a2] sm:$0xff] }
 0x118   :  { %v11290_v1 = vpop.f32.mrf.mxu1  ;;  %11533 = vmatmul.mubr.msk.f32.gmra.mxu1 %vm33_vm1, %v13130_v11  ;;  %v667_v7 = vpop.f32.mrf.mxu0 }
 0x119   :  { %v13490_v33 = vadd.f32 %v11290_v1, %v937_v56  ;;  %11535 = vmatprep.mubr.msk.f32.mxu1 %vm33_vm1, %v13133_v19  ;;  %v938_v59 = vadd.f32 %v13414_v17, %v667_v7  ;;  %v1753_v7 = vld [vmem:[#allocation2 + $0x2aa] sm:$0xff] }
 0x11a   :  { %v1367_v55 = vpop.f32.mrf.mxu1  ;;  %v11198_v48 = vpop.f32.mrf.mxu0  ;;  %11444 = vmatmul.mubr.msk.f32.gmra.mxu0 %vm33_vm1, %v1749_v51 }
 0x11b   :  { %v13495_v45 = vadd.f32 %v1367_v55, %v936_v14  ;;  %11446 = vmatprep.mubr.msk.f32.mxu0 %vm33_vm1, %v1750_v31  ;;  %v941_v14 = vadd.f32 %v11198_v48, %v13414_v17  ;;  %v1754_v48 = vld [vmem:[#allocation2 + $0x2ba] sm:$0xff] }
 0x11c   :  { %v11293_v11 = vpop.f32.mrf.mxu1  ;;  %11536 = vmatmul.mubr.msk.f32.gmra.mxu1 %vm33_vm1, %v13140_v22  ;;  %v677_v19 = vpop.f32.mrf.mxu0 }
 0x11d   :  { %v13502_v56 = vadd.f32 %v11293_v11, %v939_v24  ;;  %11538 = vmatprep.mubr.msk.f32.mxu1 %vm33_vm1, %v13143_v25  ;;  %v940_v31 = vadd.f32 %v13414_v17, %v677_v19  ;;  %v1755_v19 = vld [vmem:[#allocation2 + $0x2c2] sm:$0xff] }
 0x11e   :  { %v1377_v1 = vpop.f32.mrf.mxu1  ;;  %v11201_v55 = vpop.f32.mrf.mxu0  ;;  %11447 = vmatmul.mubr.msk.f32.gmra.mxu0 %vm33_vm1, %v1751_v60 }
 0x11f   :  { %v13507_v51 = vadd.f32 %v1377_v1, %v938_v59  ;;  %11449 = vmatprep.mubr.msk.f32.mxu0 %vm33_vm1, %v1752_v43  ;;  %v943_v59 = vadd.f32 %v11201_v55, %v13414_v17  ;;  %v1756_v55 = vld [vmem:[#allocation2 + $0x2d2] sm:$0xff] }
 0x120   :  { %v11296_v22 = vpop.f32.mrf.mxu1  ;;  %11539 = vmatmul.mubr.msk.f32.gmra.mxu1 %vm33_vm1, %v13150_v29  ;;  %v687_v25 = vpop.f32.mrf.mxu0 }
 0x121   :  { %v13514_v24 = vadd.f32 %v11296_v22, %v941_v14  ;;  %11541 = vmatprep.mubr.msk.f32.mxu1 %vm33_vm1, %v13153_v37  ;;  %v942_v43 = vadd.f32 %v13414_v17, %v687_v25  ;;  %v1757_v25 = vld [vmem:[#allocation2 + $0x2da] sm:$0xff] }
 0x122   :  { %v1387_v11 = vpop.f32.mrf.mxu1  ;;  %v11204_v1 = vpop.f32.mrf.mxu0  ;;  %11450 = vmatmul.mubr.msk.f32.gmra.mxu0 %vm33_vm1, %v1753_v7 }
 0x123   :  { %v13519_v60 = vadd.f32 %v1387_v11, %v940_v31  ;;  %11452 = vmatprep.mubr.msk.f32.mxu0 %vm33_vm1, %v1754_v48  ;;  %v945_v31 = vadd.f32 %v11204_v1, %v13414_v17  ;;  %v1758_v1 = vld [vmem:[#allocation2 + $0x2ea] sm:$0xff] }
 0x124   :  { %v11299_v29 = vpop.f32.mrf.mxu1  ;;  %11542 = vmatmul.mubr.msk.f32.gmra.mxu1 %vm33_vm1, %v13160_v42  ;;  %v697_v37 = vpop.f32.mrf.mxu0 }
 0x125   :  { %v13526_v14 = vadd.f32 %v11299_v29, %v943_v59  ;;  %11544 = vmatprep.mubr.msk.f32.mxu1 %vm33_vm1, %v13163_v47  ;;  %v944_v48 = vadd.f32 %v13414_v17, %v697_v37  ;;  %v1759_v37 = vld [vmem:[#allocation2 + $0x2f2] sm:$0xff] }
 0x126   :  { %v1397_v22 = vpop.f32.mrf.mxu1  ;;  %v11207_v11 = vpop.f32.mrf.mxu0  ;;  %11453 = vmatmul.mubr.msk.f32.gmra.mxu0 %vm33_vm1, %v1755_v19 }
 0x127   :  { %v13531_v7 = vadd.f32 %v1397_v22, %v942_v43  ;;  %11455 = vmatprep.mubr.msk.f32.mxu0 %vm33_vm1, %v1756_v55  ;;  %v947_v43 = vadd.f32 %v11207_v11, %v13414_v17  ;;  %v1760_v11 = vld [vmem:[#allocation2 + $0x302] sm:$0xff] }
 0x128   :  { %v11302_v42 = vpop.f32.mrf.mxu1  ;;  %11545 = vmatmul.mubr.msk.f32.gmra.mxu1 %vm33_vm1, %v13170_v53  ;;  %v707_v47 = vpop.f32.mrf.mxu0 }
 0x129   :  { %v13538_v59 = vadd.f32 %v11302_v42, %v945_v31  ;;  %11547 = vmatprep.mubr.msk.f32.mxu1 %vm33_vm1, %v13173_v63  ;;  %v946_v55 = vadd.f32 %v13414_v17, %v707_v47  ;;  %v1761_v47 = vld [vmem:[#allocation2 + $0x30a] sm:$0xff] }
 0x12a   :  { %v1407_v29 = vpop.f32.mrf.mxu1  ;;  %v11210_v22 = vpop.f32.mrf.mxu0  ;;  %11456 = vmatmul.mubr.msk.f32.gmra.mxu0 %vm33_vm1, %v1757_v25 }
 0x12b   :  { %v13543_v19 = vadd.f32 %v1407_v29, %v944_v48  ;;  %11458 = vmatprep.mubr.msk.f32.mxu0 %vm33_vm1, %v1758_v1  ;;  %v949_v48 = vadd.f32 %v11210_v22, %v13414_v17  ;;  %v1762_v22 = vld [vmem:[#allocation2 + $0x31a] sm:$0xff] }
 0x12c   :  { %v11305_v53 = vpop.f32.mrf.mxu1  ;;  %11548 = vmatmul.mubr.msk.f32.gmra.mxu1 %vm33_vm1, %v13180_v9  ;;  %v717_v63 = vpop.f32.mrf.mxu0 }
 0x12d   :  { %v13550_v31 = vadd.f32 %v11305_v53, %v947_v43  ;;  %11550 = vmatprep.mubr.msk.f32.mxu1 %vm33_vm1, %v13183_v21  ;;  %v948_v1 = vadd.f32 %v13414_v17, %v717_v63  ;;  %v15837_v53 = vld [vmem:[#allocation9_spill] sm:$0xff] }
 0x12e   :  { %v1417_v42 = vpop.f32.mrf.mxu1  ;;  %v11213_v29 = vpop.f32.mrf.mxu0  ;;  %11459 = vmatmul.mubr.msk.f32.gmra.mxu0 %vm33_vm1, %v1759_v37  ;;  %v1763_v63 = vld [vmem:[#allocation2 + $0x322] sm:$0xff] }
 0x12f   :  { %15834 = vst [vmem:[#allocation14_spill] sm:$0xff] %v13550_v31  ;;  %v13555_v25 = vadd.f32 %v1417_v42, %v946_v55  ;;  %11461 = vmatprep.mubr.msk.f32.mxu0 %vm33_vm1, %v1760_v11  ;;  %v951_v42 = vadd.f32 %v11213_v29, %v13414_v17  ;;  %v15839_v11 = vld [vmem:[#allocation10_spill] sm:$0xff]  ;;  %v3120_v29 = vld [vmem:[#allocation2 + $0x19] sm:$0xff] }
 0x130   :  { %v11308_v9 = vpop.f32.mrf.mxu1  ;;  %11551 = vmatmul.mubr.msk.f32.gmra.mxu1 %vm33_vm1, %v13190_v26  ;;  %v727_v21 = vpop.f32.mrf.mxu0 }
 0x131   :  { %15835 = vst [vmem:[#allocation15_spill] sm:$0xff] %v13555_v25  ;;  %v13562_v43 = vadd.f32 %v11308_v9, %v949_v48  ;;  %11553 = vmatprep.mubr.msk.f32.mxu1 %vm33_vm1, %v15837_v53  ;;  %v950_v48 = vadd.f32 %v13414_v17, %v727_v21  ;;  %v3121_v21 = vld [vmem:[#allocation2 + $0x21] sm:$0xff] }
 0x132   :  { %v1427_v55 = vpop.f32.mrf.mxu1  ;;  %v11216_v25 = vpop.f32.mrf.mxu0  ;;  %11462 = vmatmul.mubr.msk.f32.gmra.mxu0 %vm33_vm1, %v1761_v47 }
 0x133   :  { %15836 = vst [vmem:[#allocation16_spill] sm:$0xff] %v13562_v43  ;;  %v13567_v37 = vadd.f32 %v1427_v55, %v948_v1  ;;  %11464 = vmatprep.mubr.msk.f32.mxu0 %vm33_vm1, %v1762_v22  ;;  %v15841_v43 = vld [vmem:[#allocation11_spill] sm:$0xff]  ;;  %v953_v47 = vadd.f32 %v11216_v25, %v13414_v17  ;;  %v2471_v25 = vld [vmem:[#allocation2 + $0x320] sm:$0xff] }
 0x134   :  { %v11311_v26 = vpop.f32.mrf.mxu1  ;;  %11554 = vmatmul.mubr.msk.f32.gmra.mxu1 %vm33_vm1, %v15839_v11  ;;  %v737_v53 = vpop.f32.mrf.mxu0  ;;  %v2470_v55 = vld [vmem:[#allocation2 + $0x318] sm:$0xff] }
 0x135   :  { %15838 = vst [vmem:[#allocation9_spill] sm:$0xff] %v13567_v37  ;;  %v13574_v9 = vadd.f32 %v11311_v26, %v951_v42  ;;  %11556 = vmatprep.mubr.msk.f32.mxu1 %vm33_vm1, %v15841_v43  ;;  %v15843_v11 = vld [vmem:[#allocation12_spill] sm:$0xff]  ;;  %v952_v42 = vadd.f32 %v13414_v17, %v737_v53 }
 0x136   :  { %v1437_v1 = vpop.f32.mrf.mxu1  ;;  %v11219_v31 = vpop.f32.mrf.mxu0  ;;  %11465 = vmatmul.mubr.msk.f32.gmra.mxu0 %vm33_vm1, %v1763_v63 }
 0x137   :  { %15840 = vst [vmem:[#allocation10_spill] sm:$0xff] %v13574_v9  ;;  %v13579_v37 = vadd.f32 %v1437_v1, %v950_v48  ;;  %11567 = vmatprep.mubr.msk.f32.mxu0 %vm33_vm1, %v3120_v29  ;;  %v10120_v48 = vld [vmem:[%s15811_s1 + $0x1c] sm:$0x7]  ;;  %v3122_v1 = vld [vmem:[#allocation2 + $0x31] sm:$0xff]  ;;  %v955_v29 = vadd.f32 %v11219_v31, %v13414_v17 }
 0x138   :  { %v11314_v22 = vpop.f32.mrf.mxu1  ;;  %11557 = vmatmul.mubr.msk.f32.gmra.mxu1 %vm33_vm1, %v15843_v11  ;;  %v747_v26 = vpop.f32.mrf.mxu0  ;;  %11859 = vmatprep.subr.msk.mxu1 %vm537_vm0, %v10120_v48 }
 0x139   :  { %15842 = vst [vmem:[#allocation11_spill] sm:$0xff] %v13579_v37  ;;  %v13586_v43 = vadd.f32 %v11314_v22, %v953_v47  ;;  %11559 = vmatprep.mubr.msk.f32.mxu1 %vm33_vm1, %v2470_v55  ;;  %v2472_v37 = vld [vmem:[#allocation2 + $0x330] sm:$0xff]  ;;  %v13600_v55 = vld [vmem:[%s15811_s1 + $0x20] sm:$0x7] }
 0x13a   :  { %v1447_v63 = vpop.f32.mrf.mxu1  ;;  %v11222_v53 = vpop.f32.mrf.mxu0  ;;  %11568 = vmatmul.mubr.msk.f32.vlgmr.msra.gmra.mxu0 %vm33_vm1, %v3121_v21  ;;  %15846 = vst [vmem:[#allocation18_spill] sm:$0xff] %v13600_v55  ;;  %v3123_v22 = vld [vmem:[#allocation2 + $0x39] sm:$0xff] }
 0x13b   :  { %15844 = vst [vmem:[#allocation12_spill] sm:$0xff] %v13586_v43  ;;  %v13594_v11 = vadd.f32 %v1447_v63, %v952_v42  ;;  %11762 = vmatpush3.msk.msra.mxu0 %vm537_vm0, %v13236_v2  ;;  %v954_v43 = vadd.f32 %v13414_v17, %v747_v26  ;;  %11570 = vmatprep.mubr.msk.f32.mxu0 %vm33_vm1, %v3122_v1  ;;  %v2473_v21 = vld [vmem:[#allocation2 + $0x338] sm:$0xff]  ;;  %v3124_v63 = vld [vmem:[#allocation2 + $0x49] sm:$0xff] }
 0x13c   :  { %v11317_v47 = vpop.f32.mrf.mxu1  ;;  %11560 = vmatmul.mubr.msk.f32.gmra.mxu1 %vm33_vm1, %v2471_v25  ;;  %v757_v42 = vpop.f32.mrf.mxu0  ;;  %11957 = vmatprep.subr.msk.mxu0 %vm537_vm0, %v13600_v55  ;;  %v957_v2 = vadd.f32 %v11222_v53, %v13414_v17  ;;  %v3125_v1 = vld [vmem:[#allocation2 + $0x51] sm:$0xff]  ;;  %v3126_v53 = vld [vmem:[#allocation2 + $0x61] sm:$0xff] }
 0x13d   :  { %15845 = vst [vmem:[#allocation17_spill] sm:$0xff] %v13594_v11  ;;  %v13606_v31 = vadd.f32 %v11317_v47, %v955_v29  ;;  %11562 = vmatprep.mubr.msk.f32.mxu1 %vm33_vm1, %v2472_v37  ;;  %v956_v37 = vadd.f32 %v13414_v17, %v757_v42  ;;  %v3127_v42 = vld [vmem:[#allocation2 + $0x69] sm:$0xff] }
 0x13e   :  { %v1457_v11 = vpop.f32.mrf.mxu1  ;;  %v11225_v25 = vpop.f32.mrf.mxu0  ;;  %11571 = vmatmul.mubr.msk.f32.gmra.mxu0 %vm33_vm1, %v3123_v22 }
 0x13f   :  { %v13613_v9 = vadd.f32 %v1457_v11, %v954_v43  ;;  %11573 = vmatprep.mubr.msk.f32.mxu0 %vm33_vm1, %v3124_v63  ;;  %v959_v11 = vadd.f32 %v11225_v25, %v13414_v17  ;;  %v3128_v25 = vld [vmem:[#allocation2 + $0x79] sm:$0xff] }
 0x140   :  { %v11320_v26 = vpop.f32.mrf.mxu1  ;;  %11563 = vmatmul.mubr.msk.f32.gmra.mxu1 %vm33_vm1, %v2473_v21  ;;  %v767_v47 = vpop.f32.mrf.mxu0 }
 0x141   :  { %v13619_v29 = vadd.f32 %v11320_v26, %v957_v2  ;;  %11665 = vmatprep.mubr.msk.f32.mxu1 %vm33_vm1, %v13229_v50  ;;  %v958_v63 = vadd.f32 %v13414_v17, %v767_v47  ;;  %v3129_v47 = vld [vmem:[#allocation2 + $0x81] sm:$0xff] }
 0x142   :  { %v1467_v43 = vpop.f32.mrf.mxu1  ;;  %v11228_v22 = vpop.f32.mrf.mxu0  ;;  %11574 = vmatmul.mubr.msk.f32.gmra.mxu0 %vm33_vm1, %v3125_v1 }
 0x143   :  { %v13624_v55 = vadd.f32 %v1467_v43, %v956_v37  ;;  %11576 = vmatprep.mubr.msk.f32.mxu0 %vm33_vm1, %v3126_v53  ;;  %v961_v1 = vadd.f32 %v11228_v22, %v13414_v17 }
 0x144   :  { %v11323_v21 = vpop.f32.mrf.mxu1  ;;  %11666 = vmatmul.mubr.msk.f32.vlgmr.msra.gmra.mxu1 %vm33_vm1, %v13241_v39  ;;  %v777_v50 = vpop.f32.mrf.mxu0 }
 0x145   :  { %v13631_v2 = vadd.f32 %v11323_v21, %v959_v11  ;;  %11668 = vmatprep.mubr.msk.f32.mxu1 %vm33_vm1, %v13246_v57  ;;  %11860 = vmatpush3.msk.msra.mxu1 %vm537_vm0, %v10120_v48  ;;  %v960_v57 = vadd.f32 %v13414_v17, %v777_v50  ;;  %v3130_v11 = vld [vmem:[#allocation2 + $0x91] sm:$0xff]  ;;  %v3131_v50 = vld [vmem:[#allocation2 + $0x99] sm:$0xff] }
 0x146   :  { %v1477_v26 = vpop.f32.mrf.mxu1  ;;  %v11231_v39 = vpop.f32.mrf.mxu0  ;;  %11577 = vmatmul.mubr.msk.f32.gmra.mxu0 %vm33_vm1, %v3127_v42 }
 0x147   :  { %v13637_v37 = vadd.f32 %v1477_v26, %v958_v63  ;;  %11579 = vmatprep.mubr.msk.f32.mxu0 %vm33_vm1, %v3128_v25  ;;  %v963_v21 = vadd.f32 %v11231_v39, %v13414_v17 }
 0x148   :  { %v11326_v53 = vpop.f32.mrf.mxu1  ;;  %11669 = vmatmul.mubr.msk.f32.gmra.mxu1 %vm33_vm1, %v13255_v13  ;;  %v787_v48 = vpop.f32.mrf.mxu0 }
 0x149   :  { %v13644_v43 = vadd.f32 %v11326_v53, %v961_v1  ;;  %11671 = vmatprep.mubr.msk.f32.mxu1 %vm33_vm1, %v13259_v5  ;;  %v962_v25 = vadd.f32 %v13414_v17, %v787_v48  ;;  %v3132_v1 = vld [vmem:[#allocation2 + $0xa9] sm:$0xff]  ;;  %v3133_v48 = vld [vmem:[#allocation2 + $0xb1] sm:$0xff] }
 0x14a   :  { %v1487_v22 = vpop.f32.mrf.mxu1  ;;  %v11234_v63 = vpop.f32.mrf.mxu0  ;;  %11580 = vmatmul.mubr.msk.f32.gmra.mxu0 %vm33_vm1, %v3129_v47 }
 0x14b   :  { %v13649_v42 = vadd.f32 %v1487_v22, %v960_v57  ;;  %11582 = vmatprep.mubr.msk.f32.mxu0 %vm33_vm1, %v3130_v11  ;;  %v965_v53 = vadd.f32 %v11234_v63, %v13414_v17 }
 0x14c   :  { %v11329_v13 = vpop.f32.mrf.mxu1  ;;  %11672 = vmatmul.mubr.msk.f32.gmra.mxu1 %vm33_vm1, %v13267_v16  ;;  %v797_v5 = vpop.f32.mrf.mxu0 }
 0x14d   :  { %v13656_v26 = vadd.f32 %v11329_v13, %v963_v21  ;;  %11674 = vmatprep.mubr.msk.f32.mxu1 %vm33_vm1, %v13271_v44  ;;  %v964_v11 = vadd.f32 %v13414_v17, %v797_v5  ;;  %v3134_v21 = vld [vmem:[#allocation2 + $0xc1] sm:$0xff]  ;;  %v3135_v5 = vld [vmem:[#allocation2 + $0xc9] sm:$0xff] }
 0x14e   :  { %v1497_v39 = vpop.f32.mrf.mxu1  ;;  %v11237_v57 = vpop.f32.mrf.mxu0  ;;  %11583 = vmatmul.mubr.msk.f32.gmra.mxu0 %vm33_vm1, %v3131_v50 }
 0x14f   :  { %v13661_v47 = vadd.f32 %v1497_v39, %v962_v25  ;;  %11585 = vmatprep.mubr.msk.f32.mxu0 %vm33_vm1, %v3132_v1  ;;  %v967_v13 = vadd.f32 %v11237_v57, %v13414_v17 }
 0x150   :  { %v11332_v16 = vpop.f32.mrf.mxu1  ;;  %11675 = vmatmul.mubr.msk.f32.gmra.mxu1 %vm33_vm1, %v13280_v27  ;;  %v807_v44 = vpop.f32.mrf.mxu0 }
 0x151   :  { %v13668_v22 = vadd.f32 %v11332_v16, %v965_v53  ;;  %11677 = vmatprep.mubr.msk.f32.mxu1 %vm33_vm1, %v13284_v30  ;;  %v966_v1 = vadd.f32 %v13414_v17, %v807_v44  ;;  %v3136_v53 = vld [vmem:[#allocation2 + $0xd9] sm:$0xff]  ;;  %v3137_v44 = vld [vmem:[#allocation2 + $0xe1] sm:$0xff] }
 0x152   :  { %v1507_v63 = vpop.f32.mrf.mxu1  ;;  %v11240_v25 = vpop.f32.mrf.mxu0  ;;  %11586 = vmatmul.mubr.msk.f32.gmra.mxu0 %vm33_vm1, %v3133_v48 }
 0x153   :  { %v13673_v50 = vadd.f32 %v1507_v63, %v964_v11  ;;  %11588 = vmatprep.mubr.msk.f32.mxu0 %vm33_vm1, %v3134_v21  ;;  %v969_v16 = vadd.f32 %v11240_v25, %v13414_v17 }
 0x154   :  { %v11335_v27 = vpop.f32.mrf.mxu1  ;;  %11678 = vmatmul.mubr.msk.f32.gmra.mxu1 %vm33_vm1, %v13292_v32  ;;  %v817_v30 = vpop.f32.mrf.mxu0 }
 0x155   :  { %v13680_v39 = vadd.f32 %v11335_v27, %v967_v13  ;;  %11680 = vmatprep.mubr.msk.f32.mxu1 %vm33_vm1, %v13296_v34  ;;  %v968_v21 = vadd.f32 %v13414_v17, %v817_v30  ;;  %v3138_v13 = vld [vmem:[#allocation2 + $0xf1] sm:$0xff]  ;;  %v3139_v30 = vld [vmem:[#allocation2 + $0xf9] sm:$0xff] }
 0x156   :  { %v1517_v57 = vpop.f32.mrf.mxu1  ;;  %v11243_v11 = vpop.f32.mrf.mxu0  ;;  %11589 = vmatmul.mubr.msk.f32.gmra.mxu0 %vm33_vm1, %v3135_v5 }
 0x157   :  { %v13685_v48 = vadd.f32 %v1517_v57, %v966_v1  ;;  %11591 = vmatprep.mubr.msk.f32.mxu0 %vm33_vm1, %v3136_v53  ;;  %v971_v27 = vadd.f32 %v11243_v11, %v13414_v17 }
 0x158   :  { %v11338_v32 = vpop.f32.mrf.mxu1  ;;  %11681 = vmatmul.mubr.msk.f32.gmra.mxu1 %vm33_vm1, %v13304_v36  ;;  %v827_v34 = vpop.f32.mrf.mxu0 }
 0x159   :  { %v13692_v63 = vadd.f32 %v11338_v32, %v969_v16  ;;  %11683 = vmatprep.mubr.msk.f32.mxu1 %vm33_vm1, %v13308_v38  ;;  %v970_v53 = vadd.f32 %v13414_v17, %v827_v34  ;;  %v3140_v16 = vld [vmem:[#allocation2 + $0x109] sm:$0xff]  ;;  %v3141_v34 = vld [vmem:[#allocation2 + $0x111] sm:$0xff] }
 0x15a   :  { %v1527_v25 = vpop.f32.mrf.mxu1  ;;  %v11246_v1 = vpop.f32.mrf.mxu0  ;;  %11592 = vmatmul.mubr.msk.f32.gmra.mxu0 %vm33_vm1, %v3137_v44 }
 0x15b   :  { %v13697_v5 = vadd.f32 %v1527_v25, %v968_v21  ;;  %11594 = vmatprep.mubr.msk.f32.mxu0 %vm33_vm1, %v3138_v13  ;;  %v973_v32 = vadd.f32 %v11246_v1, %v13414_v17 }
 0x15c   :  { %v11341_v36 = vpop.f32.mrf.mxu1  ;;  %11684 = vmatmul.mubr.msk.f32.gmra.mxu1 %vm33_vm1, %v13316_v40  ;;  %v837_v38 = vpop.f32.mrf.mxu0 }
 0x15d   :  { %v13704_v57 = vadd.f32 %v11341_v36, %v971_v27  ;;  %11686 = vmatprep.mubr.msk.f32.mxu1 %vm33_vm1, %v13320_v41  ;;  %v972_v13 = vadd.f32 %v13414_v17, %v837_v38  ;;  %v3142_v27 = vld [vmem:[#allocation2 + $0x121] sm:$0xff]  ;;  %v3143_v38 = vld [vmem:[#allocation2 + $0x129] sm:$0xff] }
 0x15e   :  { %v1537_v11 = vpop.f32.mrf.mxu1  ;;  %v11249_v21 = vpop.f32.mrf.mxu0  ;;  %11595 = vmatmul.mubr.msk.f32.gmra.mxu0 %vm33_vm1, %v3139_v30 }
 0x15f   :  { %v13709_v44 = vadd.f32 %v1537_v11, %v970_v53  ;;  %11597 = vmatprep.mubr.msk.f32.mxu0 %vm33_vm1, %v3140_v16  ;;  %v975_v36 = vadd.f32 %v11249_v21, %v13414_v17 }
 0x160   :  { %v11344_v40 = vpop.f32.mrf.mxu1  ;;  %11687 = vmatmul.mubr.msk.f32.gmra.mxu1 %vm33_vm1, %v13328_v46  ;;  %v847_v41 = vpop.f32.mrf.mxu0 }
 0x161   :  { %v13716_v25 = vadd.f32 %v11344_v40, %v973_v32  ;;  %11689 = vmatprep.mubr.msk.f32.mxu1 %vm33_vm1, %v13332_v58  ;;  %v974_v16 = vadd.f32 %v13414_v17, %v847_v41  ;;  %v3144_v32 = vld [vmem:[#allocation2 + $0x139] sm:$0xff]  ;;  %v3145_v41 = vld [vmem:[#allocation2 + $0x141] sm:$0xff] }
 0x162   :  { %v1547_v1 = vpop.f32.mrf.mxu1  ;;  %v11252_v53 = vpop.f32.mrf.mxu0  ;;  %11598 = vmatmul.mubr.msk.f32.gmra.mxu0 %vm33_vm1, %v3141_v34 }
 0x163   :  { %v13721_v30 = vadd.f32 %v1547_v1, %v972_v13  ;;  %11600 = vmatprep.mubr.msk.f32.mxu0 %vm33_vm1, %v3142_v27  ;;  %v977_v40 = vadd.f32 %v11252_v53, %v13414_v17 }
 0x164   :  { %v11347_v46 = vpop.f32.mrf.mxu1  ;;  %11690 = vmatmul.mubr.msk.f32.gmra.mxu1 %vm33_vm1, %v13340_v61  ;;  %v857_v58 = vpop.f32.mrf.mxu0 }
 0x165   :  { %v13728_v11 = vadd.f32 %v11347_v46, %v975_v36  ;;  %11692 = vmatprep.mubr.msk.f32.mxu1 %vm33_vm1, %v13344_v4  ;;  %v976_v27 = vadd.f32 %v13414_v17, %v857_v58  ;;  %v3146_v36 = vld [vmem:[#allocation2 + $0x151] sm:$0xff]  ;;  %v3147_v58 = vld [vmem:[#allocation2 + $0x159] sm:$0xff] }
 0x166   :  { %v1557_v21 = vpop.f32.mrf.mxu1  ;;  %v11255_v13 = vpop.f32.mrf.mxu0  ;;  %11601 = vmatmul.mubr.msk.f32.gmra.mxu0 %vm33_vm1, %v3143_v38 }
 0x167   :  { %v13733_v34 = vadd.f32 %v1557_v21, %v974_v16  ;;  %11603 = vmatprep.mubr.msk.f32.mxu0 %vm33_vm1, %v3144_v32  ;;  %v979_v46 = vadd.f32 %v11255_v13, %v13414_v17 }
 0x168   :  { %v11350_v61 = vpop.f32.mrf.mxu1  ;;  %11693 = vmatmul.mubr.msk.f32.gmra.mxu1 %vm33_vm1, %v13352_v6  ;;  %v867_v4 = vpop.f32.mrf.mxu0 }
 0x169   :  { %v13740_v1 = vadd.f32 %v11350_v61, %v977_v40  ;;  %11695 = vmatprep.mubr.msk.f32.mxu1 %vm33_vm1, %v13356_v8  ;;  %v978_v32 = vadd.f32 %v13414_v17, %v867_v4  ;;  %v3148_v40 = vld [vmem:[#allocation2 + $0x169] sm:$0xff]  ;;  %v3854_v61 = vld [vmem:[#allocation2 + $0x13a] sm:$0xff]  ;;  %v3149_v4 = vld [vmem:[#allocation2 + $0x171] sm:$0xff] }
 0x16a   :  { %v1567_v53 = vpop.f32.mrf.mxu1  ;;  %v11258_v16 = vpop.f32.mrf.mxu0  ;;  %11604 = vmatmul.mubr.msk.f32.gmra.mxu0 %vm33_vm1, %v3145_v41 }
 0x16b   :  { %v13745_v38 = vadd.f32 %v1567_v53, %v976_v27  ;;  %11606 = vmatprep.mubr.msk.f32.mxu0 %vm33_vm1, %v3146_v36  ;;  %v981_v41 = vadd.f32 %v11258_v16, %v13414_v17  ;;  %v3855_v16 = vld [vmem:[#allocation2 + $0x142] sm:$0xff] }
 0x16c   :  { %v11353_v6 = vpop.f32.mrf.mxu1  ;;  %11696 = vmatmul.mubr.msk.f32.gmra.mxu1 %vm33_vm1, %v13364_v10  ;;  %v877_v8 = vpop.f32.mrf.mxu0 }
 0x16d   :  { %v13752_v21 = vadd.f32 %v11353_v6, %v979_v46  ;;  %11698 = vmatprep.mubr.msk.f32.mxu1 %vm33_vm1, %v13368_v12  ;;  %v980_v36 = vadd.f32 %v13414_v17, %v877_v8  ;;  %v3150_v6 = vld [vmem:[#allocation2 + $0x181] sm:$0xff]  ;;  %v3151_v8 = vld [vmem:[#allocation2 + $0x189] sm:$0xff] }
 0x16e   :  { %v1577_v13 = vpop.f32.mrf.mxu1  ;;  %v11261_v53 = vpop.f32.mrf.mxu0  ;;  %11607 = vmatmul.mubr.msk.f32.gmra.mxu0 %vm33_vm1, %v3147_v58 }
 0x16f   :  { %15847 = vst [vmem:[#allocation19_spill] sm:$0xff] %v13752_v21  ;;  %v13757_v27 = vadd.f32 %v1577_v13, %v978_v32  ;;  %11609 = vmatprep.mubr.msk.f32.mxu0 %vm33_vm1, %v3148_v40  ;;  %v3856_v13 = vld [vmem:[#allocation2 + $0x152] sm:$0xff]  ;;  %v983_v58 = vadd.f32 %v11261_v53, %v13414_v17  ;;  %v3152_v53 = vld [vmem:[#allocation2 + $0x1c9] sm:$0xff] }
 0x170   :  { %v11356_v10 = vpop.f32.mrf.mxu1  ;;  %11699 = vmatmul.mubr.msk.f32.gmra.mxu1 %vm33_vm1, %v13376_v15  ;;  %v887_v46 = vpop.f32.mrf.mxu0 }
 0x171   :  { %15848 = vst [vmem:[#allocation20_spill] sm:$0xff] %v13757_v27  ;;  %v13764_v12 = vadd.f32 %v11356_v10, %v981_v41  ;;  %11701 = vmatprep.mubr.msk.f32.mxu1 %vm33_vm1, %v3854_v61  ;;  %v982_v40 = vadd.f32 %v13414_v17, %v887_v46  ;;  %v3857_v10 = vld [vmem:[#allocation2 + $0x15a] sm:$0xff]  ;;  %v3153_v46 = vld [vmem:[#allocation2 + $0x1d1] sm:$0xff] }
 0x172   :  { %v1587_v32 = vpop.f32.mrf.mxu1  ;;  %v11264_v21 = vpop.f32.mrf.mxu0  ;;  %11610 = vmatmul.mubr.msk.f32.gmra.mxu0 %vm33_vm1, %v3149_v4 }
 0x173   :  { %15849 = vst [vmem:[#allocation21_spill] sm:$0xff] %v13764_v12  ;;  %v13768_v27 = vadd.f32 %v1587_v32, %v980_v36  ;;  %11612 = vmatprep.mubr.msk.f32.mxu0 %vm33_vm1, %v3150_v6  ;;  %v3858_v32 = vld [vmem:[#allocation2 + $0x16a] sm:$0xff] }
 0x174   :  { %v11359_v15 = vpop.f32.mrf.mxu1  ;;  %11702 = vmatmul.mubr.msk.f32.gmra.mxu1 %vm33_vm1, %v3855_v16  ;;  %v897_v41 = vpop.f32.mrf.mxu0 }
 0x175   :  { %15850 = vst [vmem:[#allocation22_spill] sm:$0xff] %v13768_v27  ;;  %v13774_v61 = vadd.f32 %v11359_v15, %v983_v58  ;;  %11704 = vmatprep.mubr.msk.f32.mxu1 %vm33_vm1, %v3856_v13  ;;  %v985_v27 = vadd.f32 %v11264_v21, %v13414_v17  ;;  %v984_v6 = vadd.f32 %v13414_v17, %v897_v41  ;;  %v3859_v15 = vld [vmem:[#allocation2 + $0x172] sm:$0xff]  ;;  %v3154_v21 = vld [vmem:[#allocation2 + $0x1e1] sm:$0xff] }
 0x176   :  { %v1597_v36 = vpop.f32.mrf.mxu1  ;;  %v11267_v12 = vpop.f32.mrf.mxu0  ;;  %11613 = vmatmul.mubr.msk.f32.gmra.mxu0 %vm33_vm1, %v3151_v8 }
 0x177   :  { %15851 = vst [vmem:[#allocation23_spill] sm:$0xff] %v13774_v61  ;;  %v13778_v4 = vadd.f32 %v1597_v36, %v982_v40  ;;  %11615 = vmatprep.mubr.msk.f32.mxu0 %vm33_vm1, %v3152_v53  ;;  %v3860_v36 = vld [vmem:[#allocation2 + $0x182] sm:$0xff] }
 0x178   :  { %v11362_v16 = vpop.f32.mrf.mxu1  ;;  %11705 = vmatmul.mubr.msk.f32.gmra.mxu1 %vm33_vm1, %v3857_v10  ;;  %v907_v58 = vpop.f32.mrf.mxu0 }
 0x179   :  { %15852 = vst [vmem:[#allocation24_spill] sm:$0xff] %v13778_v4  ;;  %v13784_v13 = vadd.f32 %v11362_v16, %v985_v27  ;;  %11707 = vmatprep.mubr.msk.f32.mxu1 %vm33_vm1, %v3858_v32  ;;  %v987_v4 = vadd.f32 %v11267_v12, %v13414_v17  ;;  %v3155_v27 = vld [vmem:[#allocation2 + $0x1e9] sm:$0xff]  ;;  %v986_v41 = vadd.f32 %v13414_v17, %v907_v58 }
 0x17a   :  { %v1607_v40 = vpop.f32.mrf.mxu1  ;;  %v11373_v61 = vpop.f32.mrf.mxu0  ;;  %11616 = vmatmul.mubr.msk.f32.gmra.mxu0 %vm33_vm1, %v3153_v46  ;;  %v3861_v12 = vld [vmem:[#allocation2 + $0x18a] sm:$0xff] }
 0x17b   :  { %v13788_v8 = vadd.f32 %v1607_v40, %v984_v6  ;;  %v2347_v10 = vadd.f32 %v11373_v61, %v13430_v3  ;;  %11618 = vmatprep.mubr.msk.f32.mxu0 %vm33_vm1, %v3154_v21  ;;  %v3156_v6 = vld [vmem:[#allocation2 + $0x1f9] sm:$0xff]  ;;  %v989_v3 = vadd.f32 %v13416_v23, %v13414_v17  ;;  %v3157_v21 = vld [vmem:[#allocation2 + $0x201] sm:$0xff] }
 0x17c   :  { %v11365_v53 = vpop.f32.mrf.mxu1  ;;  %11708 = vmatmul.mubr.msk.f32.gmra.mxu1 %vm33_vm1, %v3859_v15  ;;  %v2027_v16 = vpop.f32.mrf.mxu0  ;;  %v3863_v23 = vld [vmem:[#allocation2 + $0x1d2] sm:$0xff] }
 0x17d   :  { %15853 = vst [vmem:[#allocation25_spill] sm:$0xff] %v13788_v8  ;;  %v13795_v32 = vadd.f32 %v11365_v53, %v987_v4  ;;  %11710 = vmatprep.mubr.msk.f32.mxu1 %vm33_vm1, %v3860_v36  ;;  %v2346_v40 = vadd.f32 %v2027_v16, %v13435_v20  ;;  %v3862_v8 = vld [vmem:[#allocation2 + $0x1ca] sm:$0xff]  ;;  %v15855_v36 = vld [vmem:[#allocation13_spill] sm:$0xff] }
 0x17e   :  { %v1617_v46 = vpop.f32.mrf.mxu1  ;;  %v11376_v15 = vpop.f32.mrf.mxu0  ;;  %11619 = vmatmul.mubr.msk.f32.gmra.mxu0 %vm33_vm1, %v3155_v27  ;;  %v988_v20 = vadd.f32 %v13414_v17, %v15855_v36  ;;  %v3159_v17 = vld [vmem:[#allocation2 + $0x219] sm:$0xff] }
 0x17f   :  { %v13801_v61 = vadd.f32 %v1617_v46, %v986_v41  ;;  %v2349_v4 = vadd.f32 %v11376_v15, %v13442_v54  ;;  %11621 = vmatprep.mubr.msk.f32.mxu0 %vm33_vm1, %v3156_v6  ;;  %v3158_v41 = vld [vmem:[#allocation2 + $0x211] sm:$0xff]  ;;  %v3864_v54 = vld [vmem:[#allocation2 + $0x1e2] sm:$0xff] }
 0x180   :  { %v11368_v58 = vpop.f32.mrf.mxu1  ;;  %11711 = vmatmul.mubr.msk.f32.gmra.mxu1 %vm33_vm1, %v3861_v12  ;;  %v2037_v16 = vpop.f32.mrf.mxu0 }
 0x181   :  { %15854 = vst [vmem:[#allocation26_spill] sm:$0xff] %v13801_v61  ;;  %v13809_v53 = vadd.f32 %v11368_v58, %v989_v3  ;;  %11713 = vmatprep.mubr.msk.f32.mxu1 %vm33_vm1, %v3862_v8  ;;  %v2348_v27 = vadd.f32 %v2037_v16, %v13447_v62  ;;  %v3865_v62 = vld [vmem:[#allocation2 + $0x1ea] sm:$0xff]  ;;  %v3866_v16 = vld [vmem:[#allocation2 + $0x1fa] sm:$0xff] }
 0x182   :  { %v1627_v46 = vpop.f32.mrf.mxu1  ;;  %v11379_v12 = vpop.f32.mrf.mxu0  ;;  %11622 = vmatmul.mubr.msk.f32.gmra.mxu0 %vm33_vm1, %v3157_v21  ;;  %v3160_v58 = vld [vmem:[#allocation2 + $0x229] sm:$0xff] }
 0x183   :  { %v13813_v15 = vadd.f32 %v1627_v46, %v988_v20  ;;  %v2351_v6 = vadd.f32 %v11379_v12, %v13454_v18  ;;  %11624 = vmatprep.mubr.msk.f32.mxu0 %vm33_vm1, %v3158_v41 }
 0x184   :  { %v11471_v61 = vpop.f32.mrf.mxu1  ;;  %11714 = vmatmul.mubr.msk.f32.gmra.mxu1 %vm33_vm1, %v3863_v23  ;;  %v2047_v3 = vpop.f32.mrf.mxu0 }
 0x185   :  { %v13819_v8 = vadd.f32 %v11471_v61, %v2347_v10  ;;  %11716 = vmatprep.mubr.msk.f32.mxu1 %vm33_vm1, %v3864_v54  ;;  %v2350_v36 = vadd.f32 %v2047_v3, %v13459_v49  ;;  %v3161_v10 = vld [vmem:[#allocation2 + $0x231] sm:$0xff]  ;;  %v3867_v49 = vld [vmem:[#allocation2 + $0x202] sm:$0xff] }
 0x186   :  { %v2737_v20 = vpop.f32.mrf.mxu1  ;;  %v11382_v18 = vpop.f32.mrf.mxu0  ;;  %11625 = vmatmul.mubr.msk.f32.gmra.mxu0 %vm33_vm1, %v3159_v17  ;;  %v3162_v54 = vld [vmem:[#allocation2 + $0x241] sm:$0xff]  ;;  %v3868_v3 = vld [vmem:[#allocation2 + $0x212] sm:$0xff] }
 0x187   :  { %v13823_v21 = vadd.f32 %v2737_v20, %v2346_v40  ;;  %v2353_v23 = vadd.f32 %v11382_v18, %v13466_v0  ;;  %11627 = vmatprep.mubr.msk.f32.mxu0 %vm33_vm1, %v3160_v58  ;;  %v3164_v18 = vld [vmem:[#allocation2 + $0x259] sm:$0xff] }
 0x188   :  { %v11474_v41 = vpop.f32.mrf.mxu1  ;;  %11717 = vmatmul.mubr.msk.f32.gmra.mxu1 %vm33_vm1, %v3865_v62  ;;  %v2057_v46 = vpop.f32.mrf.mxu0 }
 0x189   :  { %v13829_v61 = vadd.f32 %v11474_v41, %v2349_v4  ;;  %11719 = vmatprep.mubr.msk.f32.mxu1 %vm33_vm1, %v3866_v16  ;;  %v2352_v40 = vadd.f32 %v2057_v46, %v13471_v28  ;;  %v3163_v4 = vld [vmem:[#allocation2 + $0x249] sm:$0xff]  ;;  %v3869_v28 = vld [vmem:[#allocation2 + $0x21a] sm:$0xff] }
 0x18a   :  { %v2747_v12 = vpop.f32.mrf.mxu1  ;;  %v11385_v0 = vpop.f32.mrf.mxu0  ;;  %11628 = vmatmul.mubr.msk.f32.gmra.mxu0 %vm33_vm1, %v3161_v10  ;;  %v3870_v46 = vld [vmem:[#allocation2 + $0x22a] sm:$0xff] }
 0x18b   :  { %v13833_v17 = vadd.f32 %v2747_v12, %v2348_v27  ;;  %v2355_v62 = vadd.f32 %v11385_v0, %v13478_v52  ;;  %11630 = vmatprep.mubr.msk.f32.mxu0 %vm33_vm1, %v3162_v54  ;;  %v3166_v0 = vld [vmem:[#allocation2 + $0x271] sm:$0xff] }
 0x18c   :  { %v11477_v58 = vpop.f32.mrf.mxu1  ;;  %11720 = vmatmul.mubr.msk.f32.gmra.mxu1 %vm33_vm1, %v3867_v49  ;;  %v2067_v16 = vpop.f32.mrf.mxu0 }
 0x18d   :  { %v13839_v20 = vadd.f32 %v11477_v58, %v2351_v6  ;;  %11722 = vmatprep.mubr.msk.f32.mxu1 %vm33_vm1, %v3868_v3  ;;  %v2354_v27 = vadd.f32 %v2067_v16, %v13483_v35  ;;  %v3165_v6 = vld [vmem:[#allocation2 + $0x261] sm:$0xff]  ;;  %v3871_v35 = vld [vmem:[#allocation2 + $0x232] sm:$0xff] }
 0x18e   :  { %v2757_v41 = vpop.f32.mrf.mxu1  ;;  %v11388_v52 = vpop.f32.mrf.mxu0  ;;  %11631 = vmatmul.mubr.msk.f32.gmra.mxu0 %vm33_vm1, %v3163_v4  ;;  %v3872_v16 = vld [vmem:[#allocation2 + $0x242] sm:$0xff] }
 0x18f   :  { %v13843_v10 = vadd.f32 %v2757_v41, %v2350_v36  ;;  %v2357_v49 = vadd.f32 %v11388_v52, %v13490_v33  ;;  %11633 = vmatprep.mubr.msk.f32.mxu0 %vm33_vm1, %v3164_v18  ;;  %v3168_v52 = vld [vmem:[#allocation2 + $0x289] sm:$0xff] }
 0x190   :  { %v11480_v54 = vpop.f32.mrf.mxu1  ;;  %11723 = vmatmul.mubr.msk.f32.gmra.mxu1 %vm33_vm1, %v3869_v28  ;;  %v2077_v3 = vpop.f32.mrf.mxu0 }
 0x191   :  { %v13849_v12 = vadd.f32 %v11480_v54, %v2353_v23  ;;  %11725 = vmatprep.mubr.msk.f32.mxu1 %vm33_vm1, %v3870_v46  ;;  %v2356_v36 = vadd.f32 %v2077_v3, %v13495_v45  ;;  %v3167_v23 = vld [vmem:[#allocation2 + $0x279] sm:$0xff]  ;;  %v3873_v45 = vld [vmem:[#allocation2 + $0x24a] sm:$0xff] }
 0x192   :  { %v2767_v58 = vpop.f32.mrf.mxu1  ;;  %v11391_v33 = vpop.f32.mrf.mxu0  ;;  %11634 = vmatmul.mubr.msk.f32.gmra.mxu0 %vm33_vm1, %v3165_v6  ;;  %v3874_v3 = vld [vmem:[#allocation2 + $0x25a] sm:$0xff] }
 0x193   :  { %v13853_v4 = vadd.f32 %v2767_v58, %v2352_v40  ;;  %v2359_v28 = vadd.f32 %v11391_v33, %v13502_v56  ;;  %11636 = vmatprep.mubr.msk.f32.mxu0 %vm33_vm1, %v3166_v0  ;;  %v3170_v33 = vld [vmem:[#allocation2 + $0x2a1] sm:$0xff] }
 0x194   :  { %v11483_v18 = vpop.f32.mrf.mxu1  ;;  %11726 = vmatmul.mubr.msk.f32.gmra.mxu1 %vm33_vm1, %v3871_v35  ;;  %v2087_v46 = vpop.f32.mrf.mxu0 }
 0x195   :  { %v13859_v41 = vadd.f32 %v11483_v18, %v2355_v62  ;;  %11728 = vmatprep.mubr.msk.f32.mxu1 %vm33_vm1, %v3872_v16  ;;  %v2358_v40 = vadd.f32 %v2087_v46, %v13507_v51  ;;  %v3169_v62 = vld [vmem:[#allocation2 + $0x291] sm:$0xff]  ;;  %v3875_v51 = vld [vmem:[#allocation2 + $0x262] sm:$0xff] }
 0x196   :  { %v2777_v54 = vpop.f32.mrf.mxu1  ;;  %v11394_v56 = vpop.f32.mrf.mxu0  ;;  %11637 = vmatmul.mubr.msk.f32.gmra.mxu0 %vm33_vm1, %v3167_v23  ;;  %v3876_v46 = vld [vmem:[#allocation2 + $0x272] sm:$0xff] }
 0x197   :  { %v13863_v6 = vadd.f32 %v2777_v54, %v2354_v27  ;;  %v2361_v35 = vadd.f32 %v11394_v56, %v13514_v24  ;;  %11639 = vmatprep.mubr.msk.f32.mxu0 %vm33_vm1, %v3168_v52  ;;  %v3172_v56 = vld [vmem:[#allocation2 + $0x2b9] sm:$0xff] }
 0x198   :  { %v11486_v0 = vpop.f32.mrf.mxu1  ;;  %11729 = vmatmul.mubr.msk.f32.gmra.mxu1 %vm33_vm1, %v3873_v45  ;;  %v2097_v16 = vpop.f32.mrf.mxu0 }
 0x199   :  { %v13869_v58 = vadd.f32 %v11486_v0, %v2357_v49  ;;  %11731 = vmatprep.mubr.msk.f32.mxu1 %vm33_vm1, %v3874_v3  ;;  %v2360_v27 = vadd.f32 %v2097_v16, %v13519_v60  ;;  %v3171_v49 = vld [vmem:[#allocation2 + $0x2a9] sm:$0xff]  ;;  %v3877_v60 = vld [vmem:[#allocation2 + $0x27a] sm:$0xff] }
 0x19a   :  { %v2787_v18 = vpop.f32.mrf.mxu1  ;;  %v11397_v24 = vpop.f32.mrf.mxu0  ;;  %11640 = vmatmul.mubr.msk.f32.gmra.mxu0 %vm33_vm1, %v3169_v62  ;;  %v3878_v16 = vld [vmem:[#allocation2 + $0x28a] sm:$0xff] }
 0x19b   :  { %v13873_v23 = vadd.f32 %v2787_v18, %v2356_v36  ;;  %v2363_v45 = vadd.f32 %v11397_v24, %v13526_v14  ;;  %11642 = vmatprep.mubr.msk.f32.mxu0 %vm33_vm1, %v3170_v33  ;;  %v3174_v24 = vld [vmem:[#allocation2 + $0x2d1] sm:$0xff] }
 0x19c   :  { %v11489_v52 = vpop.f32.mrf.mxu1  ;;  %11732 = vmatmul.mubr.msk.f32.gmra.mxu1 %vm33_vm1, %v3875_v51  ;;  %v2107_v3 = vpop.f32.mrf.mxu0 }
 0x19d   :  { %v13879_v54 = vadd.f32 %v11489_v52, %v2359_v28  ;;  %11734 = vmatprep.mubr.msk.f32.mxu1 %vm33_vm1, %v3876_v46  ;;  %v2362_v36 = vadd.f32 %v2107_v3, %v13531_v7  ;;  %v3173_v28 = vld [vmem:[#allocation2 + $0x2c1] sm:$0xff]  ;;  %v3879_v7 = vld [vmem:[#allocation2 + $0x292] sm:$0xff] }
 0x19e   :  { %v2797_v0 = vpop.f32.mrf.mxu1  ;;  %v11400_v14 = vpop.f32.mrf.mxu0  ;;  %11643 = vmatmul.mubr.msk.f32.gmra.mxu0 %vm33_vm1, %v3171_v49  ;;  %v3880_v3 = vld [vmem:[#allocation2 + $0x2a2] sm:$0xff] }
 0x19f   :  { %v13883_v62 = vadd.f32 %v2797_v0, %v2358_v40  ;;  %v2365_v51 = vadd.f32 %v11400_v14, %v13538_v59  ;;  %11645 = vmatprep.mubr.msk.f32.mxu0 %vm33_vm1, %v3172_v56 }
 0x1a0   :  { %v11492_v33 = vpop.f32.mrf.mxu1  ;;  %11735 = vmatmul.mubr.msk.f32.gmra.mxu1 %vm33_vm1, %v3877_v60  ;;  %v2117_v46 = vpop.f32.mrf.mxu0  ;;  %v15857_v60 = vld [vmem:[#allocation14_spill] sm:$0xff] }
 0x1a1   :  { %v13889_v18 = vadd.f32 %v11492_v33, %v2361_v35  ;;  %11737 = vmatprep.mubr.msk.f32.mxu1 %vm33_vm1, %v3878_v16  ;;  %v2364_v40 = vadd.f32 %v2117_v46, %v13543_v19  ;;  %v3175_v35 = vld [vmem:[#allocation2 + $0x2d9] sm:$0xff]  ;;  %v3881_v19 = vld [vmem:[#allocation2 + $0x2aa] sm:$0xff] }
 0x1a2   :  { %v2807_v52 = vpop.f32.mrf.mxu1  ;;  %v11403_v59 = vpop.f32.mrf.mxu0  ;;  %11646 = vmatmul.mubr.msk.f32.gmra.mxu0 %vm33_vm1, %v3173_v28  ;;  %v3176_v33 = vld [vmem:[#allocation2 + $0x2e9] sm:$0xff] }
 0x1a3   :  { %v13893_v49 = vadd.f32 %v2807_v52, %v2360_v27  ;;  %v2367_v0 = vadd.f32 %v11403_v59, %v15857_v60  ;;  %11648 = vmatprep.mubr.msk.f32.mxu0 %vm33_vm1, %v3174_v24  ;;  %v15859_v27 = vld [vmem:[#allocation15_spill] sm:$0xff] }
 0x1a4   :  { %v11495_v56 = vpop.f32.mrf.mxu1  ;;  %11738 = vmatmul.mubr.msk.f32.gmra.mxu1 %vm33_vm1, %v3879_v7  ;;  %v2127_v14 = vpop.f32.mrf.mxu0  ;;  %v15861_v7 = vld [vmem:[#allocation16_spill] sm:$0xff] }
 0x1a5   :  { %15856 = vst [vmem:[#allocation13_spill] sm:$0xff] %v13893_v49  ;;  %v13899_v16 = vadd.f32 %v11495_v56, %v2363_v45  ;;  %11740 = vmatprep.mubr.msk.f32.mxu1 %vm33_vm1, %v3880_v3  ;;  %v2366_v46 = vadd.f32 %v2127_v14, %v15859_v27  ;;  %v3882_v49 = vld [vmem:[#allocation2 + $0x2ba] sm:$0xff]  ;;  %v3177_v45 = vld [vmem:[#allocation2 + $0x2f1] sm:$0xff]  ;;  %v3883_v14 = vld [vmem:[#allocation2 + $0x2c2] sm:$0xff] }
 0x1a6   :  { %v2817_v52 = vpop.f32.mrf.mxu1  ;;  %v11406_v59 = vpop.f32.mrf.mxu0  ;;  %11649 = vmatmul.mubr.msk.f32.gmra.mxu0 %vm33_vm1, %v3175_v35  ;;  %v3178_v27 = vld [vmem:[#allocation2 + $0x301] sm:$0xff] }
 0x1a7   :  { %15858 = vst [vmem:[#allocation14_spill] sm:$0xff] %v13899_v16  ;;  %v13903_v28 = vadd.f32 %v2817_v52, %v2362_v36  ;;  %v2369_v60 = vadd.f32 %v11406_v59, %v15861_v7  ;;  %11651 = vmatprep.mubr.msk.f32.mxu0 %vm33_vm1, %v3176_v33  ;;  %v15863_v36 = vld [vmem:[#allocation9_spill] sm:$0xff]  ;;  %v3884_v16 = vld [vmem:[#allocation2 + $0x2d2] sm:$0xff] }
 0x1a8   :  { %v11498_v24 = vpop.f32.mrf.mxu1  ;;  %11741 = vmatmul.mubr.msk.f32.gmra.mxu1 %vm33_vm1, %v3881_v19  ;;  %v2137_v56 = vpop.f32.mrf.mxu0  ;;  %v15865_v19 = vld [vmem:[#allocation10_spill] sm:$0xff] }
 0x1a9   :  { %15860 = vst [vmem:[#allocation15_spill] sm:$0xff] %v13903_v28  ;;  %v13909_v3 = vadd.f32 %v11498_v24, %v2365_v51  ;;  %11743 = vmatprep.mubr.msk.f32.mxu1 %vm33_vm1, %v3882_v49  ;;  %v2368_v52 = vadd.f32 %v2137_v56, %v15863_v36  ;;  %v3179_v51 = vld [vmem:[#allocation2 + $0x309] sm:$0xff]  ;;  %v3885_v56 = vld [vmem:[#allocation2 + $0x2da] sm:$0xff] }
 0x1aa   :  { %v2827_v28 = vpop.f32.mrf.mxu1  ;;  %v11409_v59 = vpop.f32.mrf.mxu0  ;;  %11652 = vmatmul.mubr.msk.f32.gmra.mxu0 %vm33_vm1, %v3177_v45  ;;  %v3180_v36 = vld [vmem:[#allocation2 + $0x319] sm:$0xff] }
 0x1ab   :  { %15862 = vst [vmem:[#allocation16_spill] sm:$0xff] %v13909_v3  ;;  %v13913_v35 = vadd.f32 %v2827_v28, %v2364_v40  ;;  %v2371_v7 = vadd.f32 %v11409_v59, %v15865_v19  ;;  %11654 = vmatprep.mubr.msk.f32.mxu0 %vm33_vm1, %v3178_v27  ;;  %v15867_v40 = vld [vmem:[#allocation11_spill] sm:$0xff]  ;;  %v3886_v3 = vld [vmem:[#allocation2 + $0x2ea] sm:$0xff] }
 0x1ac   :  { %v11501_v33 = vpop.f32.mrf.mxu1  ;;  %11744 = vmatmul.mubr.msk.f32.gmra.mxu1 %vm33_vm1, %v3883_v14  ;;  %v2147_v24 = vpop.f32.mrf.mxu0  ;;  %v15869_v14 = vld [vmem:[#allocation12_spill] sm:$0xff] }
 0x1ad   :  { %15864 = vst [vmem:[#allocation9_spill] sm:$0xff] %v13913_v35  ;;  %v13919_v49 = vadd.f32 %v11501_v33, %v2367_v0  ;;  %11746 = vmatprep.mubr.msk.f32.mxu1 %vm33_vm1, %v3884_v16  ;;  %v2370_v28 = vadd.f32 %v2147_v24, %v15867_v40  ;;  %v3181_v0 = vld [vmem:[#allocation2 + $0x321] sm:$0xff]  ;;  %v3887_v24 = vld [vmem:[#allocation2 + $0x2f2] sm:$0xff] }
 0x1ae   :  { %v2837_v35 = vpop.f32.mrf.mxu1  ;;  %v11412_v59 = vpop.f32.mrf.mxu0  ;;  %11655 = vmatmul.mubr.msk.f32.gmra.mxu0 %vm33_vm1, %v3179_v51  ;;  %v3182_v40 = vld [vmem:[#allocation2 + $0x331] sm:$0xff] }
 0x1af   :  { %15866 = vst [vmem:[#allocation10_spill] sm:$0xff] %v13919_v49  ;;  %v13923_v45 = vadd.f32 %v2837_v35, %v2366_v46  ;;  %v2373_v19 = vadd.f32 %v11412_v59, %v15869_v14  ;;  %11657 = vmatprep.mubr.msk.f32.mxu0 %vm33_vm1, %v3180_v36  ;;  %v15870_v46 = vld [vmem:[#allocation17_spill] sm:$0xff] }
 0x1b0   :  { %v11504_v27 = vpop.f32.mrf.mxu1  ;;  %11747 = vmatmul.mubr.msk.f32.gmra.mxu1 %vm33_vm1, %v3885_v56  ;;  %v2157_v33 = vpop.f32.mrf.mxu0  ;;  %v3888_v49 = vld [vmem:[#allocation2 + $0x302] sm:$0xff] }
 0x1b1   :  { %15868 = vst [vmem:[#allocation11_spill] sm:$0xff] %v13923_v45  ;;  %v13929_v16 = vadd.f32 %v11504_v27, %v2369_v60  ;;  %11749 = vmatprep.mubr.msk.f32.mxu1 %vm33_vm1, %v3886_v3  ;;  %v2372_v35 = vadd.f32 %v2157_v33, %v15870_v46  ;;  %v3183_v60 = vld [vmem:[#allocation2 + $0x339] sm:$0xff]  ;;  %v3889_v27 = vld [vmem:[#allocation2 + $0x30a] sm:$0xff] }
 0x1b2   :  { %v2847_v45 = vpop.f32.mrf.mxu1  ;;  %v11415_v59 = vpop.f32.mrf.mxu0  ;;  %11658 = vmatmul.mubr.msk.f32.gmra.mxu0 %vm33_vm1, %v3181_v0  ;;  %v4541_v33 = vld [vmem:[#allocation2 + $0x30] sm:$0xff]  ;;  %v3890_v46 = vld [vmem:[#allocation2 + $0x31a] sm:$0xff] }
 0x1b3   :  { %v13933_v51 = vadd.f32 %v2847_v45, %v2368_v52  ;;  %v2375_v56 = vadd.f32 %v11415_v59, %v13606_v31  ;;  %11660 = vmatprep.mubr.msk.f32.mxu0 %vm33_vm1, %v3182_v40 }
 0x1b4   :  { %v11507_v36 = vpop.f32.mrf.mxu1  ;;  %11750 = vmatmul.mubr.msk.f32.gmra.mxu1 %vm33_vm1, %v3887_v24  ;;  %v2167_v14 = vpop.f32.mrf.mxu0 }
 0x1b5   :  { %v13939_v3 = vadd.f32 %v11507_v36, %v2371_v7  ;;  %11752 = vmatprep.mubr.msk.f32.mxu1 %vm33_vm1, %v3888_v49  ;;  %v2374_v52 = vadd.f32 %v2167_v14, %v13613_v9  ;;  %v4542_v7 = vld [vmem:[#allocation2 + $0x38] sm:$0xff]  ;;  %v3891_v9 = vld [vmem:[#allocation2 + $0x322] sm:$0xff] }
 0x1b6   :  { %v2857_v45 = vpop.f32.mrf.mxu1  ;;  %v11418_v31 = vpop.f32.mrf.mxu0  ;;  %11661 = vmatmul.mubr.msk.f32.gmra.mxu0 %vm33_vm1, %v3183_v60  ;;  %v4543_v14 = vld [vmem:[#allocation2 + $0x48] sm:$0xff] }
 0x1b7   :  { %v13943_v0 = vadd.f32 %v2857_v45, %v2370_v28  ;;  %v2377_v24 = vadd.f32 %v11418_v31, %v13619_v29  ;;  %11763 = vmatprep.mubr.msk.f32.mxu0 %vm33_vm1, %v4541_v33  ;;  %v3892_v45 = vld [vmem:[#allocation2 + $0x332] sm:$0xff]  ;;  %v15871_v33 = vld [vmem:[#allocation18_spill] sm:$0xff] }
 0x1b8   :  { %v11510_v40 = vpop.f32.mrf.mxu1  ;;  %11753 = vmatmul.mubr.msk.f32.gmra.mxu1 %vm33_vm1, %v3889_v27  ;;  %v2177_v59 = vpop.f32.mrf.mxu0 }
 0x1b9   :  { %v13949_v49 = vadd.f32 %v11510_v40, %v2373_v19  ;;  %11755 = vmatprep.mubr.msk.f32.mxu1 %vm33_vm1, %v3890_v46  ;;  %v2376_v28 = vadd.f32 %v2177_v59, %v13624_v55  ;;  %v4544_v46 = vld [vmem:[#allocation2 + $0x50] sm:$0xff]  ;;  %v4545_v40 = vld [vmem:[#allocation2 + $0x60] sm:$0xff] }
 0x1ba   :  { %v2867_v36 = vpop.f32.mrf.mxu1  ;;  %v11421_v29 = vpop.f32.mrf.mxu0  ;;  %11764 = vmatmul.mubr.msk.f32.vlgmr.msra.gmra.mxu0 %vm33_vm1, %v4542_v7 }
 0x1bb   :  { %v13953_v60 = vadd.f32 %v2867_v36, %v2372_v35  ;;  %v2379_v27 = vadd.f32 %v11421_v29, %v13631_v2  ;;  %11958 = vmatpush3.msk.msra.mxu0 %vm537_vm0, %v15871_v33  ;;  %11766 = vmatprep.mubr.msk.f32.mxu0 %vm33_vm1, %v4543_v14  ;;  %v3893_v35 = vld [vmem:[#allocation2 + $0x33a] sm:$0xff]  ;;  %v5251_v2 = vld [vmem:[#allocation2 + $0x31] sm:$0xff]  ;;  %v4546_v14 = vld [vmem:[#allocation2 + $0x68] sm:$0xff] }
 0x1bc   :  { %v11513_v19 = vpop.f32.mrf.mxu1  ;;  %11756 = vmatmul.mubr.msk.f32.gmra.mxu1 %vm33_vm1, %v3891_v9  ;;  %v2187_v55 = vpop.f32.mrf.mxu0 }
 0x1bd   :  { %v13960_v31 = vadd.f32 %v11513_v19, %v2375_v56  ;;  %11758 = vmatprep.mubr.msk.f32.mxu1 %vm33_vm1, %v3892_v45  ;;  %v2378_v7 = vadd.f32 %v2187_v55, %v13637_v37  ;;  %v5252_v37 = vld [vmem:[#allocation2 + $0x39] sm:$0xff] }
 0x1be   :  { %v2877_v59 = vpop.f32.mrf.mxu1  ;;  %v11424_v29 = vpop.f32.mrf.mxu0  ;;  %11767 = vmatmul.mubr.msk.f32.gmra.mxu0 %vm33_vm1, %v4544_v46  ;;  %v4547_v19 = vld [vmem:[#allocation2 + $0x78] sm:$0xff] }
 0x1bf   :  { %v13965_v36 = vadd.f32 %v2877_v59, %v2374_v52  ;;  %v2381_v9 = vadd.f32 %v11424_v29, %v13644_v43  ;;  %11769 = vmatprep.mubr.msk.f32.mxu0 %vm33_vm1, %v4545_v40  ;;  %v5253_v59 = vld [vmem:[#allocation2 + $0x49] sm:$0xff] }
 0x1c0   :  { %v11516_v56 = vpop.f32.mrf.mxu1  ;;  %11759 = vmatmul.mubr.msk.f32.gmra.mxu1 %vm33_vm1, %v3893_v35  ;;  %v2197_v33 = vpop.f32.mrf.mxu0 }
 0x1c1   :  { %v13971_v45 = vadd.f32 %v11516_v56, %v2377_v24  ;;  %11861 = vmatprep.mubr.msk.f32.mxu1 %vm33_vm1, %v5251_v2  ;;  %v2380_v52 = vadd.f32 %v2197_v33, %v13649_v42  ;;  %v4548_v24 = vld [vmem:[#allocation2 + $0x80] sm:$0xff]  ;;  %v5254_v42 = vld [vmem:[#allocation2 + $0x51] sm:$0xff] }
 0x1c2   :  { %v2887_v55 = vpop.f32.mrf.mxu1  ;;  %v11427_v43 = vpop.f32.mrf.mxu0  ;;  %11770 = vmatmul.mubr.msk.f32.gmra.mxu0 %vm33_vm1, %v4546_v14  ;;  %v4549_v56 = vld [vmem:[#allocation2 + $0x90] sm:$0xff] }
 0x1c3   :  { %v13975_v46 = vadd.f32 %v2887_v55, %v2376_v28  ;;  %v2383_v35 = vadd.f32 %v11427_v43, %v13656_v26  ;;  %11772 = vmatprep.mubr.msk.f32.mxu0 %vm33_vm1, %v4547_v19  ;;  %v5255_v55 = vld [vmem:[#allocation2 + $0x61] sm:$0xff] }
 0x1c4   :  { %v11519_v40 = vpop.f32.mrf.mxu1  ;;  %11862 = vmatmul.mubr.msk.f32.vlgmr.msra.gmra.mxu1 %vm33_vm1, %v5252_v37  ;;  %v2207_v29 = vpop.f32.mrf.mxu0 }
 0x1c5   :  { %v13981_v2 = vadd.f32 %v11519_v40, %v2379_v27  ;;  %11864 = vmatprep.mubr.msk.f32.mxu1 %vm33_vm1, %v5253_v59  ;;  %v2382_v28 = vadd.f32 %v2207_v29, %v13661_v47  ;;  %v4550_v27 = vld [vmem:[#allocation2 + $0x98] sm:$0xff]  ;;  %v5256_v47 = vld [vmem:[#allocation2 + $0x69] sm:$0xff] }
 0x1c6   :  { %v2897_v33 = vpop.f32.mrf.mxu1  ;;  %v11430_v26 = vpop.f32.mrf.mxu0  ;;  %11773 = vmatmul.mubr.msk.f32.gmra.mxu0 %vm33_vm1, %v4548_v24  ;;  %v4551_v40 = vld [vmem:[#allocation2 + $0xa8] sm:$0xff] }
 0x1c7   :  { %v13985_v14 = vadd.f32 %v2897_v33, %v2378_v7  ;;  %v2385_v37 = vadd.f32 %v11430_v26, %v13668_v22  ;;  %11775 = vmatprep.mubr.msk.f32.mxu0 %vm33_vm1, %v4549_v56  ;;  %v5257_v33 = vld [vmem:[#allocation2 + $0x79] sm:$0xff] }
 0x1c8   :  { %v11522_v19 = vpop.f32.mrf.mxu1  ;;  %11865 = vmatmul.mubr.msk.f32.gmra.mxu1 %vm33_vm1, %v5254_v42  ;;  %v2217_v43 = vpop.f32.mrf.mxu0 }
 0x1c9   :  { %v13991_v59 = vadd.f32 %v11522_v19, %v2381_v9  ;;  %11867 = vmatprep.mubr.msk.f32.mxu1 %vm33_vm1, %v5255_v55  ;;  %v2384_v7 = vadd.f32 %v2217_v43, %v13673_v50  ;;  %v4552_v9 = vld [vmem:[#allocation2 + $0xb0] sm:$0xff]  ;;  %v5258_v50 = vld [vmem:[#allocation2 + $0x81] sm:$0xff] }
 0x1ca   :  { %v2907_v29 = vpop.f32.mrf.mxu1  ;;  %v11433_v22 = vpop.f32.mrf.mxu0  ;;  %11776 = vmatmul.mubr.msk.f32.gmra.mxu0 %vm33_vm1, %v4550_v27  ;;  %v4553_v19 = vld [vmem:[#allocation2 + $0xc0] sm:$0xff] }
 0x1cb   :  { %v13995_v24 = vadd.f32 %v2907_v29, %v2380_v52  ;;  %v2387_v42 = vadd.f32 %v11433_v22, %v13680_v39  ;;  %11778 = vmatprep.mubr.msk.f32.mxu0 %vm33_vm1, %v4551_v40  ;;  %v5259_v29 = vld [vmem:[#allocation2 + $0x91] sm:$0xff] }
 0x1cc   :  { %v11525_v56 = vpop.f32.mrf.mxu1  ;;  %11868 = vmatmul.mubr.msk.f32.gmra.mxu1 %vm33_vm1, %v5256_v47  ;;  %v2227_v26 = vpop.f32.mrf.mxu0 }
 0x1cd   :  { %v14001_v55 = vadd.f32 %v11525_v56, %v2383_v35  ;;  %11870 = vmatprep.mubr.msk.f32.mxu1 %vm33_vm1, %v5257_v33  ;;  %v2386_v52 = vadd.f32 %v2227_v26, %v13685_v48  ;;  %v4554_v35 = vld [vmem:[#allocation2 + $0xc8] sm:$0xff]  ;;  %v5260_v48 = vld [vmem:[#allocation2 + $0x99] sm:$0xff] }
 0x1ce   :  { %v2917_v43 = vpop.f32.mrf.mxu1  ;;  %v11436_v39 = vpop.f32.mrf.mxu0  ;;  %11779 = vmatmul.mubr.msk.f32.gmra.mxu0 %vm33_vm1, %v4552_v9  ;;  %v4555_v56 = vld [vmem:[#allocation2 + $0xd8] sm:$0xff] }
 0x1cf   :  { %v14005_v27 = vadd.f32 %v2917_v43, %v2382_v28  ;;  %v2389_v47 = vadd.f32 %v11436_v39, %v13692_v63  ;;  %11781 = vmatprep.mubr.msk.f32.mxu0 %vm33_vm1, %v4553_v19  ;;  %v5261_v43 = vld [vmem:[#allocation2 + $0xa9] sm:$0xff] }
 0x1d0   :  { %v11528_v40 = vpop.f32.mrf.mxu1  ;;  %11871 = vmatmul.mubr.msk.f32.gmra.mxu1 %vm33_vm1, %v5258_v50  ;;  %v2237_v22 = vpop.f32.mrf.mxu0 }
 0x1d1   :  { %v14011_v33 = vadd.f32 %v11528_v40, %v2385_v37  ;;  %11873 = vmatprep.mubr.msk.f32.mxu1 %vm33_vm1, %v5259_v29  ;;  %v2388_v28 = vadd.f32 %v2237_v22, %v13697_v5  ;;  %v4556_v37 = vld [vmem:[#allocation2 + $0xe0] sm:$0xff]  ;;  %v5262_v5 = vld [vmem:[#allocation2 + $0xb1] sm:$0xff] }
 0x1d2   :  { %v2927_v26 = vpop.f32.mrf.mxu1  ;;  %v11439_v63 = vpop.f32.mrf.mxu0  ;;  %11782 = vmatmul.mubr.msk.f32.gmra.mxu0 %vm33_vm1, %v4554_v35  ;;  %v4557_v40 = vld [vmem:[#allocation2 + $0xf0] sm:$0xff] }
 0x1d3   :  { %v14015_v9 = vadd.f32 %v2927_v26, %v2384_v7  ;;  %v2391_v50 = vadd.f32 %v11439_v63, %v13704_v57  ;;  %11784 = vmatprep.mubr.msk.f32.mxu0 %vm33_vm1, %v4555_v56  ;;  %v5263_v26 = vld [vmem:[#allocation2 + $0xc1] sm:$0xff] }
 0x1d4   :  { %v11531_v19 = vpop.f32.mrf.mxu1  ;;  %11874 = vmatmul.mubr.msk.f32.gmra.mxu1 %vm33_vm1, %v5260_v48  ;;  %v2247_v39 = vpop.f32.mrf.mxu0 }
 0x1d5   :  { %v14021_v29 = vadd.f32 %v11531_v19, %v2387_v42  ;;  %11876 = vmatprep.mubr.msk.f32.mxu1 %vm33_vm1, %v5261_v43  ;;  %v2390_v7 = vadd.f32 %v2247_v39, %v13709_v44  ;;  %v4558_v42 = vld [vmem:[#allocation2 + $0xf8] sm:$0xff]  ;;  %v5264_v44 = vld [vmem:[#allocation2 + $0xc9] sm:$0xff] }
 0x1d6   :  { %v2937_v22 = vpop.f32.mrf.mxu1  ;;  %v11442_v57 = vpop.f32.mrf.mxu0  ;;  %11785 = vmatmul.mubr.msk.f32.gmra.mxu0 %vm33_vm1, %v4556_v37  ;;  %v4559_v19 = vld [vmem:[#allocation2 + $0x108] sm:$0xff] }
 0x1d7   :  { %v14025_v35 = vadd.f32 %v2937_v22, %v2386_v52  ;;  %v2393_v48 = vadd.f32 %v11442_v57, %v13716_v25  ;;  %11787 = vmatprep.mubr.msk.f32.mxu0 %vm33_vm1, %v4557_v40  ;;  %v5265_v22 = vld [vmem:[#allocation2 + $0xd9] sm:$0xff] }
 0x1d8   :  { %v11534_v56 = vpop.f32.mrf.mxu1  ;;  %11877 = vmatmul.mubr.msk.f32.gmra.mxu1 %vm33_vm1, %v5262_v5  ;;  %v2257_v63 = vpop.f32.mrf.mxu0 }
 0x1d9   :  { %v14031_v43 = vadd.f32 %v11534_v56, %v2389_v47  ;;  %11879 = vmatprep.mubr.msk.f32.mxu1 %vm33_vm1, %v5263_v26  ;;  %v2392_v52 = vadd.f32 %v2257_v63, %v13721_v30  ;;  %v4560_v47 = vld [vmem:[#allocation2 + $0x110] sm:$0xff]  ;;  %v5266_v30 = vld [vmem:[#allocation2 + $0xe1] sm:$0xff] }
 0x1da   :  { %v2947_v39 = vpop.f32.mrf.mxu1  ;;  %v11445_v25 = vpop.f32.mrf.mxu0  ;;  %11788 = vmatmul.mubr.msk.f32.gmra.mxu0 %vm33_vm1, %v4558_v42  ;;  %v4561_v56 = vld [vmem:[#allocation2 + $0x120] sm:$0xff] }
 0x1db   :  { %v14035_v37 = vadd.f32 %v2947_v39, %v2388_v28  ;;  %v2395_v5 = vadd.f32 %v11445_v25, %v13728_v11  ;;  %11790 = vmatprep.mubr.msk.f32.mxu0 %vm33_vm1, %v4559_v19  ;;  %v5267_v39 = vld [vmem:[#allocation2 + $0xf1] sm:$0xff] }
 0x1dc   :  { %v11537_v40 = vpop.f32.mrf.mxu1  ;;  %11880 = vmatmul.mubr.msk.f32.gmra.mxu1 %vm33_vm1, %v5264_v44  ;;  %v2267_v57 = vpop.f32.mrf.mxu0 }
 0x1dd   :  { %v14041_v26 = vadd.f32 %v11537_v40, %v2391_v50  ;;  %11882 = vmatprep.mubr.msk.f32.mxu1 %vm33_vm1, %v5265_v22  ;;  %v2394_v28 = vadd.f32 %v2267_v57, %v13733_v34  ;;  %v4562_v50 = vld [vmem:[#allocation2 + $0x128] sm:$0xff]  ;;  %v5268_v34 = vld [vmem:[#allocation2 + $0xf9] sm:$0xff] }
 0x1de   :  { %v2957_v63 = vpop.f32.mrf.mxu1  ;;  %v11448_v11 = vpop.f32.mrf.mxu0  ;;  %11791 = vmatmul.mubr.msk.f32.gmra.mxu0 %vm33_vm1, %v4560_v47  ;;  %v4563_v40 = vld [vmem:[#allocation2 + $0x138] sm:$0xff] }
 0x1df   :  { %v14045_v42 = vadd.f32 %v2957_v63, %v2390_v7  ;;  %v2397_v44 = vadd.f32 %v11448_v11, %v13740_v1  ;;  %11793 = vmatprep.mubr.msk.f32.mxu0 %vm33_vm1, %v4561_v56  ;;  %v5269_v63 = vld [vmem:[#allocation2 + $0x109] sm:$0xff] }
 0x1e0   :  { %v11540_v19 = vpop.f32.mrf.mxu1  ;;  %11883 = vmatmul.mubr.msk.f32.gmra.mxu1 %vm33_vm1, %v5266_v30  ;;  %v2277_v25 = vpop.f32.mrf.mxu0  ;;  %v15874_v30 = vld [vmem:[#allocation19_spill] sm:$0xff] }
 0x1e1   :  { %v14051_v22 = vadd.f32 %v11540_v19, %v2393_v48  ;;  %11885 = vmatprep.mubr.msk.f32.mxu1 %vm33_vm1, %v5267_v39  ;;  %v2396_v7 = vadd.f32 %v2277_v25, %v13745_v38  ;;  %v4564_v48 = vld [vmem:[#allocation2 + $0x140] sm:$0xff]  ;;  %v5270_v38 = vld [vmem:[#allocation2 + $0x111] sm:$0xff] }
 0x1e2   :  { %v2967_v57 = vpop.f32.mrf.mxu1  ;;  %v11451_v1 = vpop.f32.mrf.mxu0  ;;  %11794 = vmatmul.mubr.msk.f32.gmra.mxu0 %vm33_vm1, %v4562_v50  ;;  %v4565_v25 = vld [vmem:[#allocation2 + $0x150] sm:$0xff] }
 0x1e3   :  { %15872 = vst [vmem:[#allocation12_spill] sm:$0xff] %v14051_v22  ;;  %v14055_v47 = vadd.f32 %v2967_v57, %v2392_v52  ;;  %v2399_v11 = vadd.f32 %v11451_v1, %v15874_v30  ;;  %11796 = vmatprep.mubr.msk.f32.mxu0 %vm33_vm1, %v4563_v40  ;;  %v15876_v52 = vld [vmem:[#allocation20_spill] sm:$0xff] }
 0x1e4   :  { %v11543_v56 = vpop.f32.mrf.mxu1  ;;  %11886 = vmatmul.mubr.msk.f32.gmra.mxu1 %vm33_vm1, %v5268_v34  ;;  %v2287_v19 = vpop.f32.mrf.mxu0  ;;  %v5271_v22 = vld [vmem:[#allocation2 + $0x121] sm:$0xff] }
 0x1e5   :  { %15873 = vst [vmem:[#allocation17_spill] sm:$0xff] %v14055_v47  ;;  %v14061_v39 = vadd.f32 %v11543_v56, %v2395_v5  ;;  %11888 = vmatprep.mubr.msk.f32.mxu1 %vm33_vm1, %v5269_v63  ;;  %v2398_v57 = vadd.f32 %v2287_v19, %v15876_v52  ;;  %v15878_v34 = vld [vmem:[#allocation21_spill] sm:$0xff]  ;;  %v4566_v5 = vld [vmem:[#allocation2 + $0x158] sm:$0xff] }
 0x1e6   :  { %v2977_v47 = vpop.f32.mrf.mxu1  ;;  %v11454_v1 = vpop.f32.mrf.mxu0  ;;  %11797 = vmatmul.mubr.msk.f32.gmra.mxu0 %vm33_vm1, %v4564_v48  ;;  %v5272_v19 = vld [vmem:[#allocation2 + $0x129] sm:$0xff] }
 0x1e7   :  { %15875 = vst [vmem:[#allocation18_spill] sm:$0xff] %v14061_v39  ;;  %v14065_v50 = vadd.f32 %v2977_v47, %v2394_v28  ;;  %v2401_v30 = vadd.f32 %v11454_v1, %v15878_v34  ;;  %11799 = vmatprep.mubr.msk.f32.mxu0 %vm33_vm1, %v4565_v25  ;;  %v4567_v52 = vld [vmem:[#allocation2 + $0x168] sm:$0xff]  ;;  %v5273_v39 = vld [vmem:[#allocation2 + $0x139] sm:$0xff] }
 0x1e8   :  { %v11546_v40 = vpop.f32.mrf.mxu1  ;;  %11889 = vmatmul.mubr.msk.f32.gmra.mxu1 %vm33_vm1, %v5270_v38  ;;  %v2297_v56 = vpop.f32.mrf.mxu0  ;;  %v15880_v28 = vld [vmem:[#allocation22_spill] sm:$0xff]  ;;  %v15882_v38 = vld [vmem:[#allocation23_spill] sm:$0xff] }
 0x1e9   :  { %15877 = vst [vmem:[#allocation19_spill] sm:$0xff] %v14065_v50  ;;  %v14071_v63 = vadd.f32 %v11546_v40, %v2397_v44  ;;  %11891 = vmatprep.mubr.msk.f32.mxu1 %vm33_vm1, %v5271_v22  ;;  %v2400_v47 = vadd.f32 %v2297_v56, %v15880_v28  ;;  %v4568_v44 = vld [vmem:[#allocation2 + $0x170] sm:$0xff]  ;;  %v5274_v56 = vld [vmem:[#allocation2 + $0x141] sm:$0xff] }
 0x1ea   :  { %v2987_v50 = vpop.f32.mrf.mxu1  ;;  %v11457_v1 = vpop.f32.mrf.mxu0  ;;  %11800 = vmatmul.mubr.msk.f32.gmra.mxu0 %vm33_vm1, %v4566_v5  ;;  %v4569_v28 = vld [vmem:[#allocation2 + $0x180] sm:$0xff] }
 0x1eb   :  { %15879 = vst [vmem:[#allocation20_spill] sm:$0xff] %v14071_v63  ;;  %v14075_v48 = vadd.f32 %v2987_v50, %v2396_v7  ;;  %v2403_v34 = vadd.f32 %v11457_v1, %v15882_v38  ;;  %11802 = vmatprep.mubr.msk.f32.mxu0 %vm33_vm1, %v4567_v52  ;;  %v15883_v7 = vld [vmem:[#allocation24_spill] sm:$0xff]  ;;  %v5275_v63 = vld [vmem:[#allocation2 + $0x151] sm:$0xff] }
 0x1ec   :  { %v11549_v25 = vpop.f32.mrf.mxu1  ;;  %11892 = vmatmul.mubr.msk.f32.gmra.mxu1 %vm33_vm1, %v5272_v19  ;;  %v2307_v40 = vpop.f32.mrf.mxu0 }
 0x1ed   :  { %15881 = vst [vmem:[#allocation21_spill] sm:$0xff] %v14075_v48  ;;  %v14081_v22 = vadd.f32 %v11549_v25, %v2399_v11  ;;  %11894 = vmatprep.mubr.msk.f32.mxu1 %vm33_vm1, %v5273_v39  ;;  %v2402_v50 = vadd.f32 %v2307_v40, %v15883_v7  ;;  %v4570_v11 = vld [vmem:[#allocation2 + $0x188] sm:$0xff]  ;;  %v5276_v25 = vld [vmem:[#allocation2 + $0x159] sm:$0xff] }
 0x1ee   :  { %v2997_v48 = vpop.f32.mrf.mxu1  ;;  %v11460_v1 = vpop.f32.mrf.mxu0  ;;  %11803 = vmatmul.mubr.msk.f32.gmra.mxu0 %vm33_vm1, %v4568_v44  ;;  %v4571_v40 = vld [vmem:[#allocation2 + $0x198] sm:$0xff] }
 0x1ef   :  { %v14085_v5 = vadd.f32 %v2997_v48, %v2398_v57  ;;  %v2405_v19 = vadd.f32 %v11460_v1, %v13784_v13  ;;  %11805 = vmatprep.mubr.msk.f32.mxu0 %vm33_vm1, %v4569_v28  ;;  %v15885_v57 = vld [vmem:[#allocation25_spill] sm:$0xff] }
 0x1f0   :  { %v11552_v52 = vpop.f32.mrf.mxu1  ;;  %11895 = vmatmul.mubr.msk.f32.gmra.mxu1 %vm33_vm1, %v5274_v56  ;;  %v2317_v38 = vpop.f32.mrf.mxu0 }
 0x1f1   :  { %15884 = vst [vmem:[#allocation22_spill] sm:$0xff] %v14085_v5  ;;  %v14091_v39 = vadd.f32 %v11552_v52, %v2401_v30  ;;  %11897 = vmatprep.mubr.msk.f32.mxu1 %vm33_vm1, %v5275_v63  ;;  %v2404_v48 = vadd.f32 %v2317_v38, %v15885_v57  ;;  %v5277_v5 = vld [vmem:[#allocation2 + $0x169] sm:$0xff]  ;;  %v4572_v30 = vld [vmem:[#allocation2 + $0x1a0] sm:$0xff]  ;;  %v5278_v52 = vld [vmem:[#allocation2 + $0x171] sm:$0xff] }
 0x1f2   :  { %v3007_v7 = vpop.f32.mrf.mxu1  ;;  %v11463_v13 = vpop.f32.mrf.mxu0  ;;  %11806 = vmatmul.mubr.msk.f32.gmra.mxu0 %vm33_vm1, %v4570_v11  ;;  %v4573_v38 = vld [vmem:[#allocation2 + $0x1e0] sm:$0xff] }
 0x1f3   :  { %v14095_v44 = vadd.f32 %v3007_v7, %v2400_v47  ;;  %v2407_v56 = vadd.f32 %v11463_v13, %v13795_v32  ;;  %11808 = vmatprep.mubr.msk.f32.mxu0 %vm33_vm1, %v4571_v40  ;;  %v15887_v47 = vld [vmem:[#allocation26_spill] sm:$0xff] }
 0x1f4   :  { %v11555_v28 = vpop.f32.mrf.mxu1  ;;  %11898 = vmatmul.mubr.msk.f32.gmra.mxu1 %vm33_vm1, %v5276_v25  ;;  %v2327_v1 = vpop.f32.mrf.mxu0 }
 0x1f5   :  { %15886 = vst [vmem:[#allocation23_spill] sm:$0xff] %v14095_v44  ;;  %v14101_v63 = vadd.f32 %v11555_v28, %v2403_v34  ;;  %11900 = vmatprep.mubr.msk.f32.mxu1 %vm33_vm1, %v5277_v5  ;;  %v2406_v57 = vadd.f32 %v2327_v1, %v15887_v47  ;;  %v5279_v44 = vld [vmem:[#allocation2 + $0x181] sm:$0xff]  ;;  %v5280_v28 = vld [vmem:[#allocation2 + $0x189] sm:$0xff]  ;;  %v4575_v1 = vld [vmem:[#allocation2 + $0x1f8] sm:$0xff] }
 0x1f6   :  { %v3017_v7 = vpop.f32.mrf.mxu1  ;;  %v11466_v32 = vpop.f32.mrf.mxu0  ;;  %11809 = vmatmul.mubr.msk.f32.gmra.mxu0 %vm33_vm1, %v4572_v30  ;;  %v4574_v34 = vld [vmem:[#allocation2 + $0x1e8] sm:$0xff] }
 0x1f7   :  { %v14105_v11 = vadd.f32 %v3017_v7, %v2402_v50  ;;  %v2409_v25 = vadd.f32 %v11466_v32, %v13809_v53  ;;  %11811 = vmatprep.mubr.msk.f32.mxu0 %vm33_vm1, %v4573_v38  ;;  %v5281_v7 = vld [vmem:[#allocation2 + $0x199] sm:$0xff] }
 0x1f8   :  { %v11558_v40 = vpop.f32.mrf.mxu1  ;;  %11901 = vmatmul.mubr.msk.f32.gmra.mxu1 %vm33_vm1, %v5278_v52  ;;  %v2337_v13 = vpop.f32.mrf.mxu0 }
 0x1f9   :  { %v14111_v5 = vadd.f32 %v11558_v40, %v2405_v19  ;;  %11903 = vmatprep.mubr.msk.f32.mxu1 %vm33_vm1, %v5279_v44  ;;  %v2408_v50 = vadd.f32 %v2337_v13, %v13813_v15  ;;  %v4576_v19 = vld [vmem:[#allocation2 + $0x200] sm:$0xff]  ;;  %v4577_v40 = vld [vmem:[#allocation2 + $0x210] sm:$0xff] }
 0x1fa   :  { %v3027_v47 = vpop.f32.mrf.mxu1  ;;  %v11569_v53 = vpop.f32.mrf.mxu0  ;;  %11812 = vmatmul.mubr.msk.f32.gmra.mxu0 %vm33_vm1, %v4574_v34  ;;  %v5282_v15 = vld [vmem:[#allocation2 + $0x1a1] sm:$0xff] }
 0x1fb   :  { %v14115_v30 = vadd.f32 %v3027_v47, %v2404_v48  ;;  %v3767_v52 = vadd.f32 %v11569_v53, %v13819_v8  ;;  %11814 = vmatprep.mubr.msk.f32.mxu0 %vm33_vm1, %v4575_v1  ;;  %v5283_v47 = vld [vmem:[#allocation2 + $0x1e1] sm:$0xff] }
 0x1fc   :  { %v11561_v38 = vpop.f32.mrf.mxu1  ;;  %11904 = vmatmul.mubr.msk.f32.gmra.mxu1 %vm33_vm1, %v5280_v28  ;;  %v3447_v32 = vpop.f32.mrf.mxu0 }
 0x1fd   :  { %v14121_v44 = vadd.f32 %v11561_v38, %v2407_v56  ;;  %11906 = vmatprep.mubr.msk.f32.mxu1 %vm33_vm1, %v5281_v7  ;;  %v3766_v48 = vadd.f32 %v3447_v32, %v13823_v21  ;;  %v4578_v56 = vld [vmem:[#allocation2 + $0x218] sm:$0xff]  ;;  %v5284_v21 = vld [vmem:[#allocation2 + $0x1e9] sm:$0xff] }
 0x1fe   :  { %v3037_v13 = vpop.f32.mrf.mxu1  ;;  %v11572_v8 = vpop.f32.mrf.mxu0  ;;  %11815 = vmatmul.mubr.msk.f32.gmra.mxu0 %vm33_vm1, %v4576_v19  ;;  %v4579_v38 = vld [vmem:[#allocation2 + $0x228] sm:$0xff] }
 0x1ff   :  { %v14125_v34 = vadd.f32 %v3037_v13, %v2406_v57  ;;  %v3769_v28 = vadd.f32 %v11572_v8, %v13829_v61  ;;  %11817 = vmatprep.mubr.msk.f32.mxu0 %vm33_vm1, %v4577_v40  ;;  %v5285_v13 = vld [vmem:[#allocation2 + $0x1f9] sm:$0xff] }
 0x200   :  { %v11564_v1 = vpop.f32.mrf.mxu1  ;;  %11907 = vmatmul.mubr.msk.f32.gmra.mxu1 %vm33_vm1, %v5282_v15  ;;  %v3457_v53 = vpop.f32.mrf.mxu0 }
 0x201   :  { %v14131_v7 = vadd.f32 %v11564_v1, %v2409_v25  ;;  %11909 = vmatprep.mubr.msk.f32.mxu1 %vm33_vm1, %v5283_v47  ;;  %v3768_v57 = vadd.f32 %v3457_v53, %v13833_v17  ;;  %v4580_v25 = vld [vmem:[#allocation2 + $0x230] sm:$0xff]  ;;  %v5286_v17 = vld [vmem:[#allocation2 + $0x201] sm:$0xff] }
 0x202   :  { %v3047_v32 = vpop.f32.mrf.mxu1  ;;  %v11575_v61 = vpop.f32.mrf.mxu0  ;;  %11818 = vmatmul.mubr.msk.f32.gmra.mxu0 %vm33_vm1, %v4578_v56  ;;  %v4581_v1 = vld [vmem:[#allocation2 + $0x240] sm:$0xff] }
 0x203   :  { %v14135_v19 = vadd.f32 %v3047_v32, %v2408_v50  ;;  %v3771_v15 = vadd.f32 %v11575_v61, %v13839_v20  ;;  %11820 = vmatprep.mubr.msk.f32.mxu0 %vm33_vm1, %v4579_v38  ;;  %v5287_v32 = vld [vmem:[#allocation2 + $0x211] sm:$0xff] }
 0x204   :  { %v11667_v40 = vpop.f32.mrf.mxu1  ;;  %11910 = vmatmul.mubr.msk.f32.gmra.mxu1 %vm33_vm1, %v5284_v21  ;;  %v3467_v8 = vpop.f32.mrf.mxu0 }
 0x205   :  { %v14141_v47 = vadd.f32 %v11667_v40, %v3767_v52  ;;  %11912 = vmatprep.mubr.msk.f32.mxu1 %vm33_vm1, %v5285_v13  ;;  %v3770_v50 = vadd.f32 %v3467_v8, %v13843_v10  ;;  %v4582_v52 = vld [vmem:[#allocation2 + $0x248] sm:$0xff]  ;;  %v5288_v10 = vld [vmem:[#allocation2 + $0x219] sm:$0xff] }
 0x206   :  { %v4157_v53 = vpop.f32.mrf.mxu1  ;;  %v11578_v20 = vpop.f32.mrf.mxu0  ;;  %11821 = vmatmul.mubr.msk.f32.gmra.mxu0 %vm33_vm1, %v4580_v25  ;;  %v4583_v40 = vld [vmem:[#allocation2 + $0x258] sm:$0xff] }
 0x207   :  { %v14145_v56 = vadd.f32 %v4157_v53, %v3766_v48  ;;  %v3773_v21 = vadd.f32 %v11578_v20, %v13849_v12  ;;  %11823 = vmatprep.mubr.msk.f32.mxu0 %vm33_vm1, %v4581_v1  ;;  %v5289_v53 = vld [vmem:[#allocation2 + $0x229] sm:$0xff] }
 0x208   :  { %v11670_v38 = vpop.f32.mrf.mxu1  ;;  %11913 = vmatmul.mubr.msk.f32.gmra.mxu1 %vm33_vm1, %v5286_v17  ;;  %v3477_v61 = vpop.f32.mrf.mxu0 }
 0x209   :  { %v14151_v13 = vadd.f32 %v11670_v38, %v3769_v28  ;;  %11915 = vmatprep.mubr.msk.f32.mxu1 %vm33_vm1, %v5287_v32  ;;  %v3772_v48 = vadd.f32 %v3477_v61, %v13853_v4  ;;  %v4584_v28 = vld [vmem:[#allocation2 + $0x260] sm:$0xff]  ;;  %v5290_v4 = vld [vmem:[#allocation2 + $0x231] sm:$0xff] }
 0x20a   :  { %v4167_v8 = vpop.f32.mrf.mxu1  ;;  %v11581_v12 = vpop.f32.mrf.mxu0  ;;  %11824 = vmatmul.mubr.msk.f32.gmra.mxu0 %vm33_vm1, %v4582_v52  ;;  %v4585_v38 = vld [vmem:[#allocation2 + $0x270] sm:$0xff] }
 0x20b   :  { %v14155_v25 = vadd.f32 %v4167_v8, %v3768_v57  ;;  %v3775_v17 = vadd.f32 %v11581_v12, %v13859_v41  ;;  %11826 = vmatprep.mubr.msk.f32.mxu0 %vm33_vm1, %v4583_v40  ;;  %v5291_v8 = vld [vmem:[#allocation2 + $0x241] sm:$0xff] }
 0x20c   :  { %v11673_v1 = vpop.f32.mrf.mxu1  ;;  %11916 = vmatmul.mubr.msk.f32.gmra.mxu1 %vm33_vm1, %v5288_v10  ;;  %v3487_v20 = vpop.f32.mrf.mxu0 }
 0x20d   :  { %v14161_v32 = vadd.f32 %v11673_v1, %v3771_v15  ;;  %11918 = vmatprep.mubr.msk.f32.mxu1 %vm33_vm1, %v5289_v53  ;;  %v3774_v57 = vadd.f32 %v3487_v20, %v13863_v6  ;;  %v4586_v15 = vld [vmem:[#allocation2 + $0x278] sm:$0xff]  ;;  %v5292_v6 = vld [vmem:[#allocation2 + $0x249] sm:$0xff] }
 0x20e   :  { %v4177_v61 = vpop.f32.mrf.mxu1  ;;  %v11584_v41 = vpop.f32.mrf.mxu0  ;;  %11827 = vmatmul.mubr.msk.f32.gmra.mxu0 %vm33_vm1, %v4584_v28  ;;  %v4587_v1 = vld [vmem:[#allocation2 + $0x288] sm:$0xff] }
 0x20f   :  { %v14165_v52 = vadd.f32 %v4177_v61, %v3770_v50  ;;  %v3777_v10 = vadd.f32 %v11584_v41, %v13869_v58  ;;  %11829 = vmatprep.mubr.msk.f32.mxu0 %vm33_vm1, %v4585_v38  ;;  %v5293_v61 = vld [vmem:[#allocation2 + $0x259] sm:$0xff] }
 0x210   :  { %v11676_v40 = vpop.f32.mrf.mxu1  ;;  %11919 = vmatmul.mubr.msk.f32.gmra.mxu1 %vm33_vm1, %v5290_v4  ;;  %v3497_v12 = vpop.f32.mrf.mxu0 }
 0x211   :  { %v14171_v53 = vadd.f32 %v11676_v40, %v3773_v21  ;;  %11921 = vmatprep.mubr.msk.f32.mxu1 %vm33_vm1, %v5291_v8  ;;  %v3776_v50 = vadd.f32 %v3497_v12, %v13873_v23  ;;  %v4588_v21 = vld [vmem:[#allocation2 + $0x290] sm:$0xff]  ;;  %v5294_v23 = vld [vmem:[#allocation2 + $0x261] sm:$0xff] }
 0x212   :  { %v4187_v20 = vpop.f32.mrf.mxu1  ;;  %v11587_v58 = vpop.f32.mrf.mxu0  ;;  %11830 = vmatmul.mubr.msk.f32.gmra.mxu0 %vm33_vm1, %v4586_v15  ;;  %v4589_v40 = vld [vmem:[#allocation2 + $0x2a0] sm:$0xff] }
 0x213   :  { %v14175_v28 = vadd.f32 %v4187_v20, %v3772_v48  ;;  %v3779_v4 = vadd.f32 %v11587_v58, %v13879_v54  ;;  %11832 = vmatprep.mubr.msk.f32.mxu0 %vm33_vm1, %v4587_v1  ;;  %v5295_v20 = vld [vmem:[#allocation2 + $0x271] sm:$0xff] }
 0x214   :  { %v11679_v38 = vpop.f32.mrf.mxu1  ;;  %11922 = vmatmul.mubr.msk.f32.gmra.mxu1 %vm33_vm1, %v5292_v6  ;;  %v3507_v41 = vpop.f32.mrf.mxu0 }
 0x215   :  { %v14181_v8 = vadd.f32 %v11679_v38, %v3775_v17  ;;  %11924 = vmatprep.mubr.msk.f32.mxu1 %vm33_vm1, %v5293_v61  ;;  %v3778_v48 = vadd.f32 %v3507_v41, %v13883_v62  ;;  %v4590_v17 = vld [vmem:[#allocation2 + $0x2a8] sm:$0xff]  ;;  %v5296_v62 = vld [vmem:[#allocation2 + $0x279] sm:$0xff] }
 0x216   :  { %v4197_v12 = vpop.f32.mrf.mxu1  ;;  %v11590_v54 = vpop.f32.mrf.mxu0  ;;  %11833 = vmatmul.mubr.msk.f32.gmra.mxu0 %vm33_vm1, %v4588_v21  ;;  %v4591_v38 = vld [vmem:[#allocation2 + $0x2b8] sm:$0xff] }
 0x217   :  { %v14185_v15 = vadd.f32 %v4197_v12, %v3774_v57  ;;  %v3781_v6 = vadd.f32 %v11590_v54, %v13889_v18  ;;  %11835 = vmatprep.mubr.msk.f32.mxu0 %vm33_vm1, %v4589_v40  ;;  %v15890_v57 = vld [vmem:[#allocation13_spill] sm:$0xff] }
 0x218   :  { %v11682_v1 = vpop.f32.mrf.mxu1  ;;  %11925 = vmatmul.mubr.msk.f32.gmra.mxu1 %vm33_vm1, %v5294_v23  ;;  %v3517_v58 = vpop.f32.mrf.mxu0  ;;  %v15892_v23 = vld [vmem:[#allocation14_spill] sm:$0xff] }
 0x219   :  { %15888 = vst [vmem:[#allocation24_spill] sm:$0xff] %v14185_v15  ;;  %v14191_v61 = vadd.f32 %v11682_v1, %v3777_v10  ;;  %11927 = vmatprep.mubr.msk.f32.mxu1 %vm33_vm1, %v5295_v20  ;;  %v3780_v41 = vadd.f32 %v3517_v58, %v15890_v57  ;;  %v5297_v15 = vld [vmem:[#allocation2 + $0x289] sm:$0xff]  ;;  %v4592_v10 = vld [vmem:[#allocation2 + $0x2c0] sm:$0xff]  ;;  %v5298_v58 = vld [vmem:[#allocation2 + $0x291] sm:$0xff] }
 0x21a   :  { %v4207_v12 = vpop.f32.mrf.mxu1  ;;  %v11593_v18 = vpop.f32.mrf.mxu0  ;;  %11836 = vmatmul.mubr.msk.f32.gmra.mxu0 %vm33_vm1, %v4590_v17  ;;  %v4593_v57 = vld [vmem:[#allocation2 + $0x2d0] sm:$0xff]  ;;  %v5299_v17 = vld [vmem:[#allocation2 + $0x2a1] sm:$0xff] }
 0x21b   :  { %15889 = vst [vmem:[#allocation25_spill] sm:$0xff] %v14191_v61  ;;  %v14195_v21 = vadd.f32 %v4207_v12, %v3776_v50  ;;  %v3783_v54 = vadd.f32 %v11593_v18, %v15892_v23  ;;  %11838 = vmatprep.mubr.msk.f32.mxu0 %vm33_vm1, %v4591_v38  ;;  %v15893_v50 = vld [vmem:[#allocation15_spill] sm:$0xff] }
 0x21c   :  { %v11685_v40 = vpop.f32.mrf.mxu1  ;;  %11928 = vmatmul.mubr.msk.f32.gmra.mxu1 %vm33_vm1, %v5296_v62  ;;  %v3527_v1 = vpop.f32.mrf.mxu0  ;;  %v15896_v62 = vld [vmem:[#allocation16_spill] sm:$0xff] }
 0x21d   :  { %15891 = vst [vmem:[#allocation26_spill] sm:$0xff] %v14195_v21  ;;  %v14201_v20 = vadd.f32 %v11685_v40, %v3779_v4  ;;  %11930 = vmatprep.mubr.msk.f32.mxu1 %vm33_vm1, %v5297_v15  ;;  %v14205_v12 = vadd.f32 %v3527_v1, %v15893_v50  ;;  %v4594_v4 = vld [vmem:[#allocation2 + $0x2d8] sm:$0xff]  ;;  %v5300_v1 = vld [vmem:[#allocation2 + $0x2a9] sm:$0xff] }
 0x21e   :  { %v4217_v21 = vpop.f32.mrf.mxu1  ;;  %v11596_v18 = vpop.f32.mrf.mxu0  ;;  %11839 = vmatmul.mubr.msk.f32.gmra.mxu0 %vm33_vm1, %v4592_v10  ;;  %v4595_v50 = vld [vmem:[#allocation2 + $0x2e8] sm:$0xff]  ;;  %v5301_v10 = vld [vmem:[#allocation2 + $0x2b9] sm:$0xff] }
 0x21f   :  { %15894 = vst [vmem:[#allocation13_spill] sm:$0xff] %v14205_v12  ;;  %v14207_v61 = vadd.f32 %v4217_v21, %v3778_v48  ;;  %v3785_v38 = vadd.f32 %v11596_v18, %v15896_v62  ;;  %11841 = vmatprep.mubr.msk.f32.mxu0 %vm33_vm1, %v4593_v57  ;;  %v15897_v48 = vld [vmem:[#allocation9_spill] sm:$0xff] }
 0x220   :  { %v11688_v23 = vpop.f32.mrf.mxu1  ;;  %11931 = vmatmul.mubr.msk.f32.gmra.mxu1 %vm33_vm1, %v5298_v58  ;;  %v3537_v40 = vpop.f32.mrf.mxu0  ;;  %v15899_v58 = vld [vmem:[#allocation10_spill] sm:$0xff] }
 0x221   :  { %15895 = vst [vmem:[#allocation14_spill] sm:$0xff] %v14207_v61  ;;  %v14213_v15 = vadd.f32 %v11688_v23, %v3781_v6  ;;  %11933 = vmatprep.mubr.msk.f32.mxu1 %vm33_vm1, %v5299_v17  ;;  %v14217_v21 = vadd.f32 %v3537_v40, %v15897_v48  ;;  %v4596_v6 = vld [vmem:[#allocation2 + $0x2f0] sm:$0xff]  ;;  %v5302_v40 = vld [vmem:[#allocation2 + $0x2c1] sm:$0xff] }
 0x222   :  { %v4227_v12 = vpop.f32.mrf.mxu1  ;;  %v11599_v18 = vpop.f32.mrf.mxu0  ;;  %11842 = vmatmul.mubr.msk.f32.gmra.mxu0 %vm33_vm1, %v4594_v4  ;;  %v4597_v48 = vld [vmem:[#allocation2 + $0x300] sm:$0xff]  ;;  %v5303_v4 = vld [vmem:[#allocation2 + $0x2d1] sm:$0xff] }
 0x223   :  { %15898 = vst [vmem:[#allocation15_spill] sm:$0xff] %v14217_v21  ;;  %v14219_v61 = vadd.f32 %v4227_v12, %v3780_v41  ;;  %v3787_v57 = vadd.f32 %v11599_v18, %v15899_v58  ;;  %11844 = vmatprep.mubr.msk.f32.mxu0 %vm33_vm1, %v4595_v50  ;;  %v15900_v41 = vld [vmem:[#allocation11_spill] sm:$0xff] }
 0x224   :  { %v11691_v62 = vpop.f32.mrf.mxu1  ;;  %11934 = vmatmul.mubr.msk.f32.gmra.mxu1 %vm33_vm1, %v5300_v1  ;;  %v3547_v23 = vpop.f32.mrf.mxu0 }
 0x225   :  { %v14225_v17 = vadd.f32 %v11691_v62, %v3783_v54  ;;  %11936 = vmatprep.mubr.msk.f32.mxu1 %vm33_vm1, %v5301_v10  ;;  %v14229_v12 = vadd.f32 %v3547_v23, %v15900_v41  ;;  %v4598_v54 = vld [vmem:[#allocation2 + $0x308] sm:$0xff]  ;;  %v5304_v62 = vld [vmem:[#allocation2 + $0x2d9] sm:$0xff] }
 0x226   :  { %v14231_v21 = vpop.f32.mrf.mxu1  ;;  %v11602_v18 = vpop.f32.mrf.mxu0  ;;  %11845 = vmatmul.mubr.msk.f32.gmra.mxu0 %vm33_vm1, %v4596_v6  ;;  %v4599_v23 = vld [vmem:[#allocation2 + $0x318] sm:$0xff]  ;;  %v5305_v6 = vld [vmem:[#allocation2 + $0x2e9] sm:$0xff] }
 0x227   :  { %15901 = vst [vmem:[#allocation16_spill] sm:$0xff] %v14229_v12  ;;  %v3789_v1 = vadd.f32 %v11602_v18, %v13929_v16  ;;  %11847 = vmatprep.mubr.msk.f32.mxu0 %vm33_vm1, %v4597_v48 }
 0x228   :  { %v11694_v50 = vpop.f32.mrf.mxu1  ;;  %11937 = vmatmul.mubr.msk.f32.gmra.mxu1 %vm33_vm1, %v5302_v40  ;;  %v3557_v58 = vpop.f32.mrf.mxu0 }
 0x229   :  { %v14237_v10 = vadd.f32 %v11694_v50, %v3785_v38  ;;  %11939 = vmatprep.mubr.msk.f32.mxu1 %vm33_vm1, %v5303_v4  ;;  %v14241_v41 = vadd.f32 %v3557_v58, %v13933_v51  ;;  %v4600_v38 = vld [vmem:[#allocation2 + $0x320] sm:$0xff]  ;;  %v5306_v51 = vld [vmem:[#allocation2 + $0x2f1] sm:$0xff] }
 0x22a   :  { %v14243_v12 = vpop.f32.mrf.mxu1  ;;  %v11605_v16 = vpop.f32.mrf.mxu0  ;;  %11848 = vmatmul.mubr.msk.f32.gmra.mxu0 %vm33_vm1, %v4598_v54  ;;  %v4601_v50 = vld [vmem:[#allocation2 + $0x330] sm:$0xff]  ;;  %v5307_v54 = vld [vmem:[#allocation2 + $0x301] sm:$0xff] }
 0x22b   :  { %15902 = vst [vmem:[#allocation9_spill] sm:$0xff] %v14241_v41  ;;  %15903 = vst [vmem:[#allocation10_spill] sm:$0xff] %v14243_v12  ;;  %v3791_v40 = vadd.f32 %v11605_v16, %v13939_v3  ;;  %11850 = vmatprep.mubr.msk.f32.mxu0 %vm33_vm1, %v4599_v23 }
 0x22c   :  { %v11697_v48 = vpop.f32.mrf.mxu1  ;;  %11940 = vmatmul.mubr.msk.f32.gmra.mxu1 %vm33_vm1, %v5304_v62  ;;  %v3567_v18 = vpop.f32.mrf.mxu0 }
 0x22d   :  { %v14249_v4 = vadd.f32 %v11697_v48, %v3787_v57  ;;  %11942 = vmatprep.mubr.msk.f32.mxu1 %vm33_vm1, %v5305_v6  ;;  %v14253_v58 = vadd.f32 %v3567_v18, %v13943_v0  ;;  %v4602_v57 = vld [vmem:[#allocation2 + $0x338] sm:$0xff]  ;;  %v5308_v0 = vld [vmem:[#allocation2 + $0x309] sm:$0xff] }
 0x22e   :  { %v14255_v41 = vpop.f32.mrf.mxu1  ;;  %v11608_v3 = vpop.f32.mrf.mxu0  ;;  %11851 = vmatmul.mubr.msk.f32.gmra.mxu0 %vm33_vm1, %v4600_v38  ;;  %v4603_v48 = vld [vmem:[#allocation2 + $0x348] sm:$0xff]  ;;  %v5309_v38 = vld [vmem:[#allocation2 + $0x319] sm:$0xff] }
 0x22f   :  { %15904 = vst [vmem:[#allocation11_spill] sm:$0xff] %v14253_v58  ;;  %15905 = vst [vmem:[#allocation27_spill] sm:$0xff] %v14255_v41  ;;  %v3793_v62 = vadd.f32 %v11608_v3, %v13949_v49  ;;  %11853 = vmatprep.mubr.msk.f32.mxu0 %vm33_vm1, %v4601_v50  ;;  %v6017_v41 = vld [vmem:[#allocation2 + $0x302] sm:$0xff] }
 0x230   :  { %v11700_v23 = vpop.f32.mrf.mxu1  ;;  %11943 = vmatmul.mubr.msk.f32.gmra.mxu1 %vm33_vm1, %v5306_v51  ;;  %v3577_v16 = vpop.f32.mrf.mxu0 }
 0x231   :  { %v14261_v6 = vadd.f32 %v11700_v23, %v3789_v1  ;;  %11945 = vmatprep.mubr.msk.f32.mxu1 %vm33_vm1, %v5307_v54  ;;  %v14265_v18 = vadd.f32 %v3577_v16, %v13953_v60  ;;  %v4604_v1 = vld [vmem:[#allocation2 + $0x350] sm:$0xff]  ;;  %v5310_v60 = vld [vmem:[#allocation2 + $0x321] sm:$0xff] }
 0x232   :  { %v14267_v58 = vpop.f32.mrf.mxu1  ;;  %v11611_v49 = vpop.f32.mrf.mxu0  ;;  %11854 = vmatmul.mubr.msk.f32.gmra.mxu0 %vm33_vm1, %v4602_v57  ;;  %v5961_v23 = vld [vmem:[#allocation2 + $0x32] sm:$0xff] }
 0x233   :  { %15906 = vst [vmem:[#allocation28_spill] sm:$0xff] %v14265_v18  ;;  %15907 = vst [vmem:[#allocation29_spill] sm:$0xff] %v14267_v58  ;;  %v3795_v51 = vadd.f32 %v11611_v49, %v13960_v31  ;;  %11856 = vmatprep.mubr.msk.f32.mxu0 %vm33_vm1, %v4603_v48  ;;  %v5311_v57 = vld [vmem:[#allocation2 + $0x331] sm:$0xff] }
 0x234   :  { %v11703_v50 = vpop.f32.mrf.mxu1  ;;  %11946 = vmatmul.mubr.msk.f32.gmra.mxu1 %vm33_vm1, %v5308_v0  ;;  %v3587_v3 = vpop.f32.mrf.mxu0 }
 0x235   :  { %v14273_v54 = vadd.f32 %v11703_v50, %v3791_v40  ;;  %11948 = vmatprep.mubr.msk.f32.mxu1 %vm33_vm1, %v5309_v38  ;;  %v14277_v16 = vadd.f32 %v3587_v3, %v13965_v36  ;;  %v5962_v40 = vld [vmem:[#allocation2 + $0x3a] sm:$0xff]  ;;  %v5963_v50 = vld [vmem:[#allocation2 + $0x4a] sm:$0xff] }
 0x236   :  { %v14279_v18 = vpop.f32.mrf.mxu1  ;;  %v11614_v31 = vpop.f32.mrf.mxu0  ;;  %11857 = vmatmul.mubr.msk.f32.gmra.mxu0 %vm33_vm1, %v4604_v1  ;;  %v5312_v36 = vld [vmem:[#allocation2 + $0x339] sm:$0xff]  ;;  %v5313_v1 = vld [vmem:[#allocation2 + $0x349] sm:$0xff] }
 0x237   :  { %15908 = vst [vmem:[#allocation30_spill] sm:$0xff] %v14277_v16  ;;  %15909 = vst [vmem:[#allocation31_spill] sm:$0xff] %v14279_v18  ;;  %v3797_v0 = vadd.f32 %v11614_v31, %v13971_v45  ;;  %11959 = vmatprep.mubr.msk.f32.mxu0 %vm33_vm1, %v5961_v23 }
 0x238   :  { %v11706_v48 = vpop.f32.mrf.mxu1  ;;  %11949 = vmatmul.mubr.msk.f32.gmra.mxu1 %vm33_vm1, %v5310_v60  ;;  %v3597_v49 = vpop.f32.mrf.mxu0 }
 0x239   :  { %v14285_v38 = vadd.f32 %v11706_v48, %v3793_v62  ;;  %11951 = vmatprep.mubr.msk.f32.mxu1 %vm33_vm1, %v5311_v57  ;;  %v14289_v3 = vadd.f32 %v3597_v49, %v13975_v46  ;;  %v5964_v62 = vld [vmem:[#allocation2 + $0x52] sm:$0xff]  ;;  %v5965_v48 = vld [vmem:[#allocation2 + $0x62] sm:$0xff] }
 0x23a   :  { %v14291_v16 = vpop.f32.mrf.mxu1  ;;  %v11617_v45 = vpop.f32.mrf.mxu0  ;;  %11960 = vmatmul.mubr.msk.f32.vlgmr.msra.gmra.mxu0 %vm33_vm1, %v5962_v40  ;;  %v5314_v46 = vld [vmem:[#allocation2 + $0x351] sm:$0xff] }
 0x23b   :  { %15910 = vst [vmem:[#allocation32_spill] sm:$0xff] %v14289_v3  ;;  %15911 = vst [vmem:[#allocation33_spill] sm:$0xff] %v14291_v16  ;;  %v3799_v60 = vadd.f32 %v11617_v45, %v13981_v2  ;;  %11962 = vmatprep.mubr.msk.f32.mxu0 %vm33_vm1, %v5963_v50  ;;  %v5967_v45 = vld [vmem:[#allocation2 + $0x7a] sm:$0xff] }
 0x23c   :  { %v11709_v23 = vpop.f32.mrf.mxu1  ;;  %11952 = vmatmul.mubr.msk.f32.gmra.mxu1 %vm33_vm1, %v5312_v36  ;;  %v3607_v31 = vpop.f32.mrf.mxu0  ;;  %v6011_v16 = vld [vmem:[#allocation2 + $0x2ba] sm:$0xff] }
 0x23d   :  { %v14297_v57 = vadd.f32 %v11709_v23, %v3795_v51  ;;  %11954 = vmatprep.mubr.msk.f32.mxu1 %vm33_vm1, %v5313_v1  ;;  %v14301_v49 = vadd.f32 %v3607_v31, %v13985_v14  ;;  %v5966_v51 = vld [vmem:[#allocation2 + $0x6a] sm:$0xff] }
 0x23e   :  { %v14303_v3 = vpop.f32.mrf.mxu1  ;;  %v11620_v40 = vpop.f32.mrf.mxu0  ;;  %11963 = vmatmul.mubr.msk.f32.gmra.mxu0 %vm33_vm1, %v5964_v62 }
 0x23f   :  { %15912 = vst [vmem:[#allocation34_spill] sm:$0xff] %v14301_v49  ;;  %15913 = vst [vmem:[#allocation35_spill] sm:$0xff] %v14303_v3  ;;  %v3801_v2 = vadd.f32 %v11620_v40, %v13991_v59  ;;  %11965 = vmatprep.mubr.msk.f32.mxu0 %vm33_vm1, %v5965_v48  ;;  %v5969_v40 = vld [vmem:[#allocation2 + $0x92] sm:$0xff]  ;;  %v15957_v49 = vld [vmem:[#allocation26_spill] sm:$0xff] }
 0x240   :  { %v11712_v36 = vpop.f32.mrf.mxu1  ;;  %11955 = vmatmul.mubr.msk.f32.gmra.mxu1 %vm33_vm1, %v5314_v46  ;;  %v3617_v1 = vpop.f32.mrf.mxu0  ;;  %v5968_v46 = vld [vmem:[#allocation2 + $0x82] sm:$0xff] }
 0x241   :  { %v14309_v50 = vadd.f32 %v11712_v36, %v3797_v0  ;;  %v14312_v14 = vadd.f32 %v3617_v1, %v13995_v24 }
 0x242   :  { %v14314_v23 = vpop.f32.mrf.mxu1  ;;  %v11623_v31 = vpop.f32.mrf.mxu0  ;;  %11966 = vmatmul.mubr.msk.f32.gmra.mxu0 %vm33_vm1, %v5966_v51 }
 0x243   :  { %15914 = vst [vmem:[#allocation36_spill] sm:$0xff] %v14312_v14  ;;  %15915 = vst [vmem:[#allocation37_spill] sm:$0xff] %v14314_v23  ;;  %v3803_v59 = vadd.f32 %v11623_v31, %v14001_v55  ;;  %11968 = vmatprep.mubr.msk.f32.mxu0 %vm33_vm1, %v5967_v45  ;;  %v5970_v55 = vld [vmem:[#allocation2 + $0x9a] sm:$0xff]  ;;  %v5971_v31 = vld [vmem:[#allocation2 + $0xaa] sm:$0xff] }
 0x244   :  { %v11715_v62 = vpop.f32.mrf.mxu1  ;;  %v3627_v0 = vpop.f32.mrf.mxu0 }
 0x245   :  { %v14319_v48 = vadd.f32 %v11715_v62, %v3799_v60  ;;  %v14322_v36 = vadd.f32 %v3627_v0, %v14005_v27 }
 0x246   :  { %v14324_v24 = vpop.f32.mrf.mxu1  ;;  %v11626_v1 = vpop.f32.mrf.mxu0  ;;  %11969 = vmatmul.mubr.msk.f32.gmra.mxu0 %vm33_vm1, %v5968_v46 }
 0x247   :  { %15916 = vst [vmem:[#allocation38_spill] sm:$0xff] %v14322_v36  ;;  %15917 = vst [vmem:[#allocation39_spill] sm:$0xff] %v14324_v24  ;;  %v3805_v51 = vadd.f32 %v11626_v1, %v14011_v33  ;;  %11971 = vmatprep.mubr.msk.f32.mxu0 %vm33_vm1, %v5969_v40  ;;  %v5972_v33 = vld [vmem:[#allocation2 + $0xb2] sm:$0xff] }
 0x248   :  { %v11718_v14 = vpop.f32.mrf.mxu1  ;;  %v3637_v60 = vpop.f32.mrf.mxu0 }
 0x249   :  { %v14329_v45 = vadd.f32 %v11718_v14, %v3801_v2  ;;  %v14332_v62 = vadd.f32 %v3637_v60, %v14015_v9  ;;  %v5973_v14 = vld [vmem:[#allocation2 + $0xc2] sm:$0xff] }
 0x24a   :  { %v14334_v27 = vpop.f32.mrf.mxu1  ;;  %v11629_v0 = vpop.f32.mrf.mxu0  ;;  %11972 = vmatmul.mubr.msk.f32.gmra.mxu0 %vm33_vm1, %v5970_v55 }
 0x24b   :  { %15918 = vst [vmem:[#allocation40_spill] sm:$0xff] %v14332_v62  ;;  %15919 = vst [vmem:[#allocation41_spill] sm:$0xff] %v14334_v27  ;;  %v3807_v46 = vadd.f32 %v11629_v0, %v14021_v29  ;;  %11974 = vmatprep.mubr.msk.f32.mxu0 %vm33_vm1, %v5971_v31  ;;  %v5974_v29 = vld [vmem:[#allocation2 + $0xca] sm:$0xff] }
 0x24c   :  { %v11721_v36 = vpop.f32.mrf.mxu1  ;;  %v3647_v2 = vpop.f32.mrf.mxu0 }
 0x24d   :  { %v14339_v40 = vadd.f32 %v11721_v36, %v3803_v59  ;;  %v14342_v1 = vadd.f32 %v3647_v2, %v14025_v35  ;;  %v5975_v36 = vld [vmem:[#allocation2 + $0xda] sm:$0xff] }
 0x24e   :  { %v14344_v9 = vpop.f32.mrf.mxu1  ;;  %v11632_v60 = vpop.f32.mrf.mxu0  ;;  %11975 = vmatmul.mubr.msk.f32.gmra.mxu0 %vm33_vm1, %v5972_v33 }
 0x24f   :  { %15920 = vst [vmem:[#allocation42_spill] sm:$0xff] %v14342_v1  ;;  %15921 = vst [vmem:[#allocation43_spill] sm:$0xff] %v14344_v9  ;;  %v3809_v55 = vadd.f32 %v11632_v60, %v14031_v43  ;;  %11977 = vmatprep.mubr.msk.f32.mxu0 %vm33_vm1, %v5973_v14  ;;  %v5976_v43 = vld [vmem:[#allocation2 + $0xe2] sm:$0xff] }
 0x250   :  { %v11724_v62 = vpop.f32.mrf.mxu1  ;;  %v3657_v59 = vpop.f32.mrf.mxu0 }
 0x251   :  { %v14349_v31 = vadd.f32 %v11724_v62, %v3805_v51  ;;  %v14352_v0 = vadd.f32 %v3657_v59, %v14035_v37  ;;  %v5977_v62 = vld [vmem:[#allocation2 + $0xf2] sm:$0xff] }
 0x252   :  { %v14354_v35 = vpop.f32.mrf.mxu1  ;;  %v11635_v2 = vpop.f32.mrf.mxu0  ;;  %11978 = vmatmul.mubr.msk.f32.gmra.mxu0 %vm33_vm1, %v5974_v29 }
 0x253   :  { %15922 = vst [vmem:[#allocation44_spill] sm:$0xff] %v14352_v0  ;;  %15923 = vst [vmem:[#allocation45_spill] sm:$0xff] %v14354_v35  ;;  %v3811_v33 = vadd.f32 %v11635_v2, %v14041_v26  ;;  %11980 = vmatprep.mubr.msk.f32.mxu0 %vm33_vm1, %v5975_v36  ;;  %v15926_v0 = vld [vmem:[#allocation12_spill] sm:$0xff]  ;;  %v15927_v2 = vld [vmem:[#allocation17_spill] sm:$0xff] }
 0x254   :  { %v11727_v1 = vpop.f32.mrf.mxu1  ;;  %v3667_v51 = vpop.f32.mrf.mxu0  ;;  %v5978_v26 = vld [vmem:[#allocation2 + $0xfa] sm:$0xff] }
 0x255   :  { %v14359_v14 = vadd.f32 %v11727_v1, %v3807_v46  ;;  %v14362_v60 = vadd.f32 %v3667_v51, %v14045_v42  ;;  %v5979_v1 = vld [vmem:[#allocation2 + $0x10a] sm:$0xff] }
 0x256   :  { %v14364_v37 = vpop.f32.mrf.mxu1  ;;  %v11638_v59 = vpop.f32.mrf.mxu0  ;;  %11981 = vmatmul.mubr.msk.f32.gmra.mxu0 %vm33_vm1, %v5976_v43 }
 0x257   :  { %15924 = vst [vmem:[#allocation46_spill] sm:$0xff] %v14362_v60  ;;  %15925 = vst [vmem:[#allocation47_spill] sm:$0xff] %v14364_v37  ;;  %v3813_v29 = vadd.f32 %v11638_v59, %v15926_v0  ;;  %11983 = vmatprep.mubr.msk.f32.mxu0 %vm33_vm1, %v5977_v62  ;;  %v15930_v60 = vld [vmem:[#allocation18_spill] sm:$0xff]  ;;  %v5980_v0 = vld [vmem:[#allocation2 + $0x112] sm:$0xff] }
 0x258   :  { %v11730_v35 = vpop.f32.mrf.mxu1  ;;  %v3677_v46 = vpop.f32.mrf.mxu0  ;;  %v15931_v59 = vld [vmem:[#allocation19_spill] sm:$0xff] }
 0x259   :  { %v14369_v36 = vadd.f32 %v11730_v35, %v3809_v55  ;;  %v14372_v9 = vadd.f32 %v3677_v46, %v15927_v2  ;;  %v5981_v35 = vld [vmem:[#allocation2 + $0x122] sm:$0xff] }
 0x25a   :  { %v14374_v42 = vpop.f32.mrf.mxu1  ;;  %v11641_v51 = vpop.f32.mrf.mxu0  ;;  %11984 = vmatmul.mubr.msk.f32.gmra.mxu0 %vm33_vm1, %v5978_v26 }
 0x25b   :  { %15928 = vst [vmem:[#allocation12_spill] sm:$0xff] %v14372_v9  ;;  %15929 = vst [vmem:[#allocation17_spill] sm:$0xff] %v14374_v42  ;;  %v3815_v43 = vadd.f32 %v11641_v51, %v15930_v60  ;;  %11986 = vmatprep.mubr.msk.f32.mxu0 %vm33_vm1, %v5979_v1  ;;  %v15934_v9 = vld [vmem:[#allocation20_spill] sm:$0xff]  ;;  %v5982_v60 = vld [vmem:[#allocation2 + $0x12a] sm:$0xff] }
 0x25c   :  { %v11733_v37 = vpop.f32.mrf.mxu1  ;;  %v3687_v55 = vpop.f32.mrf.mxu0  ;;  %v15935_v51 = vld [vmem:[#allocation21_spill] sm:$0xff] }
 0x25d   :  { %v14379_v62 = vadd.f32 %v11733_v37, %v3811_v33  ;;  %v14382_v27 = vadd.f32 %v3687_v55, %v15931_v59  ;;  %v5983_v37 = vld [vmem:[#allocation2 + $0x13a] sm:$0xff] }
 0x25e   :  { %v14384_v46 = vpop.f32.mrf.mxu1  ;;  %v11644_v2 = vpop.f32.mrf.mxu0  ;;  %11987 = vmatmul.mubr.msk.f32.gmra.mxu0 %vm33_vm1, %v5980_v0 }
 0x25f   :  { %15932 = vst [vmem:[#allocation18_spill] sm:$0xff] %v14382_v27  ;;  %15933 = vst [vmem:[#allocation19_spill] sm:$0xff] %v14384_v46  ;;  %v3817_v26 = vadd.f32 %v11644_v2, %v15934_v9  ;;  %11989 = vmatprep.mubr.msk.f32.mxu0 %vm33_vm1, %v5981_v35  ;;  %v5984_v9 = vld [vmem:[#allocation2 + $0x142] sm:$0xff]  ;;  %v15938_v2 = vld [vmem:[#allocation22_spill] sm:$0xff] }
 0x260   :  { %v11736_v42 = vpop.f32.mrf.mxu1  ;;  %v3697_v33 = vpop.f32.mrf.mxu0 }
 0x261   :  { %v14389_v1 = vadd.f32 %v11736_v42, %v3813_v29  ;;  %v14392_v24 = vadd.f32 %v3697_v33, %v15935_v51  ;;  %v5985_v42 = vld [vmem:[#allocation2 + $0x152] sm:$0xff] }
 0x262   :  { %v14394_v55 = vpop.f32.mrf.mxu1  ;;  %v11647_v59 = vpop.f32.mrf.mxu0  ;;  %11990 = vmatmul.mubr.msk.f32.gmra.mxu0 %vm33_vm1, %v5982_v60 }
 0x263   :  { %15936 = vst [vmem:[#allocation20_spill] sm:$0xff] %v14392_v24  ;;  %15937 = vst [vmem:[#allocation21_spill] sm:$0xff] %v14394_v55  ;;  %v3819_v0 = vadd.f32 %v11647_v59, %v14081_v22  ;;  %11992 = vmatprep.mubr.msk.f32.mxu0 %vm33_vm1, %v5983_v37  ;;  %v5986_v22 = vld [vmem:[#allocation2 + $0x15a] sm:$0xff]  ;;  %v15941_v59 = vld [vmem:[#allocation23_spill] sm:$0xff] }
 0x264   :  { %v11739_v27 = vpop.f32.mrf.mxu1  ;;  %v3707_v29 = vpop.f32.mrf.mxu0 }
 0x265   :  { %v14399_v35 = vadd.f32 %v11739_v27, %v3815_v43  ;;  %v14402_v46 = vadd.f32 %v3707_v29, %v15938_v2  ;;  %v5987_v43 = vld [vmem:[#allocation2 + $0x16a] sm:$0xff] }
 0x266   :  { %v14404_v33 = vpop.f32.mrf.mxu1  ;;  %v11650_v51 = vpop.f32.mrf.mxu0  ;;  %11993 = vmatmul.mubr.msk.f32.gmra.mxu0 %vm33_vm1, %v5984_v9 }
 0x267   :  { %15939 = vst [vmem:[#allocation22_spill] sm:$0xff] %v14402_v46  ;;  %15940 = vst [vmem:[#allocation48_spill] sm:$0xff] %v14404_v33  ;;  %v3821_v60 = vadd.f32 %v11650_v51, %v14091_v39  ;;  %11995 = vmatprep.mubr.msk.f32.mxu0 %vm33_vm1, %v5985_v42  ;;  %v5988_v39 = vld [vmem:[#allocation2 + $0x172] sm:$0xff]  ;;  %v6007_v33 = vld [vmem:[#allocation2 + $0x28a] sm:$0xff] }
 0x268   :  { %v11742_v24 = vpop.f32.mrf.mxu1  ;;  %v3717_v27 = vpop.f32.mrf.mxu0 }
 0x269   :  { %v14409_v37 = vadd.f32 %v11742_v24, %v3817_v26  ;;  %v14412_v55 = vadd.f32 %v3717_v27, %v15941_v59  ;;  %v5989_v26 = vld [vmem:[#allocation2 + $0x182] sm:$0xff] }
 0x26a   :  { %v14414_v29 = vpop.f32.mrf.mxu1  ;;  %v11653_v2 = vpop.f32.mrf.mxu0  ;;  %11996 = vmatmul.mubr.msk.f32.gmra.mxu0 %vm33_vm1, %v5986_v22 }
 0x26b   :  { %15942 = vst [vmem:[#allocation23_spill] sm:$0xff] %v14412_v55  ;;  %15943 = vst [vmem:[#allocation49_spill] sm:$0xff] %v14414_v29  ;;  %v3823_v9 = vadd.f32 %v11653_v2, %v14101_v63  ;;  %11998 = vmatprep.mubr.msk.f32.mxu0 %vm33_vm1, %v5987_v43  ;;  %v7089_v63 = vld [vmem:[%s15813_s3] sm:$0xff] }
 0x26c   :  { %v11745_v46 = vpop.f32.mrf.mxu1  ;;  %v3727_v24 = vpop.f32.mrf.mxu0  ;;  %12055 = vmatprep.subr.mxu1 %v7089_v63  ;;  %v5991_v2 = vld [vmem:[#allocation2 + $0x19a] sm:$0xff]  ;;  %v15956_v29 = vld [vmem:[#allocation25_spill] sm:$0xff] }
 0x26d   :  { %v14419_v42 = vadd.f32 %v11745_v46, %v3819_v0  ;;  %v14422_v51 = vadd.f32 %v3727_v24, %v14105_v11  ;;  %v5990_v46 = vld [vmem:[#allocation2 + $0x18a] sm:$0xff]  ;;  %12056 = vmatpush3.msra.mxu1 %v7089_v63 }
 0x26e   :  { %v14424_v27 = vpop.f32.mrf.mxu1  ;;  %v11656_v59 = vpop.f32.mrf.mxu0  ;;  %11999 = vmatmul.mubr.msk.f32.gmra.mxu0 %vm33_vm1, %v5988_v39 }
 0x26f   :  { %15944 = vst [vmem:[#allocation50_spill] sm:$0xff] %v14422_v51  ;;  %15945 = vst [vmem:[#allocation51_spill] sm:$0xff] %v14424_v27  ;;  %v3825_v22 = vadd.f32 %v11656_v59, %v14111_v5  ;;  %12001 = vmatprep.mubr.msk.f32.mxu0 %vm33_vm1, %v5989_v26  ;;  %v5992_v26 = vld [vmem:[#allocation2 + $0x1a2] sm:$0xff] }
 0x270   :  { %v11748_v43 = vpop.f32.mrf.mxu1  ;;  %v3737_v11 = vpop.f32.mrf.mxu0 }
 0x271   :  { %v14432_v0 = vadd.f32 %v11748_v43, %v3821_v60  ;;  %v14435_v24 = vadd.f32 %v3737_v11, %v14115_v30  ;;  %v5993_v43 = vld [vmem:[#allocation2 + $0x1e2] sm:$0xff] }
 0x272   :  { %v14437_v39 = vpop.f32.mrf.mxu1  ;;  %v11659_v51 = vpop.f32.mrf.mxu0  ;;  %12002 = vmatmul.mubr.msk.f32.gmra.mxu0 %vm33_vm1, %v5990_v46 }
 0x273   :  { %15946 = vst [vmem:[#allocation52_spill] sm:$0xff] %v14435_v24  ;;  %15947 = vst [vmem:[#allocation53_spill] sm:$0xff] %v14437_v39  ;;  %v3827_v5 = vadd.f32 %v11659_v51, %v14121_v44  ;;  %12004 = vmatprep.mubr.msk.f32.mxu0 %vm33_vm1, %v5991_v2  ;;  %v5994_v44 = vld [vmem:[#allocation2 + $0x1ea] sm:$0xff]  ;;  %v5995_v2 = vld [vmem:[#allocation2 + $0x1fa] sm:$0xff] }
 0x274   :  { %v11751_v59 = vpop.f32.mrf.mxu1  ;;  %v3747_v60 = vpop.f32.mrf.mxu0  ;;  %v15955_v39 = vld [vmem:[#allocation24_spill] sm:$0xff] }
 0x275   :  { %v14442_v55 = vadd.f32 %v11751_v59, %v3823_v9  ;;  %v14445_v63 = vadd.f32 %v3747_v60, %v14125_v34 }
 0x276   :  { %v14447_v30 = vpop.f32.mrf.mxu1  ;;  %v11662_v11 = vpop.f32.mrf.mxu0  ;;  %12005 = vmatmul.mubr.msk.f32.gmra.mxu0 %vm33_vm1, %v5992_v26 }
 0x277   :  { %15948 = vst [vmem:[#allocation54_spill] sm:$0xff] %v14445_v63  ;;  %15949 = vst [vmem:[#allocation55_spill] sm:$0xff] %v14447_v30  ;;  %v3829_v46 = vadd.f32 %v11662_v11, %v14131_v7  ;;  %12007 = vmatprep.mubr.msk.f32.mxu0 %vm33_vm1, %v5993_v43  ;;  %v5996_v43 = vld [vmem:[#allocation2 + $0x202] sm:$0xff]  ;;  %v6005_v30 = vld [vmem:[#allocation2 + $0x272] sm:$0xff] }
 0x278   :  { %v11754_v24 = vpop.f32.mrf.mxu1  ;;  %v3757_v9 = vpop.f32.mrf.mxu0 }
 0x279   :  { %v14452_v51 = vadd.f32 %v11754_v24, %v3825_v22  ;;  %v14455_v59 = vadd.f32 %v3757_v9, %v14135_v19  ;;  %v5997_v24 = vld [vmem:[#allocation2 + $0x212] sm:$0xff] }
 0x27a   :  { %v14457_v34 = vpop.f32.mrf.mxu1  ;;  %v11765_v60 = vpop.f32.mrf.mxu0  ;;  %12008 = vmatmul.mubr.msk.f32.gmra.mxu0 %vm33_vm1, %v5994_v44  ;;  %v15953_v44 = vmov 0.0  }
 0x27b   :  { %15950 = vst [vmem:[#allocation56_spill] sm:$0xff] %v14455_v59  ;;  %15951 = vst [vmem:[#allocation57_spill] sm:$0xff] %v14457_v34  ;;  %v14461_v26 = vadd.f32 %v11765_v60, %v14141_v47  ;;  %12010 = vmatprep.mubr.msk.f32.mxu0 %vm33_vm1, %v5995_v2 }
 0x27c   :  { %v11757_v7 = vpop.f32.mrf.mxu1  ;;  %v4868_v22 = vpop.f32.mrf.mxu0  ;;  %7007 = vst.msk [vmem:[#allocation4] sm:$0xff] %vm6735_vm3, %v15953_v44  ;;  %7010 = vst.msk [vmem:[#allocation4 + $0x10] sm:$0xff] %vm6735_vm3, %v15953_v44 }
 0x27d   :  { %v14464_v11 = vadd.f32 %v11757_v7, %v3827_v5  ;;  %v14467_v63 = vadd.f32 %v4868_v22, %v14145_v56  ;;  %7012 = vst.msk [vmem:[#allocation4 + $0x20] sm:$0xff] %vm6735_vm3, %v15953_v44  ;;  %7014 = vst.msk [vmem:[#allocation4 + $0x30] sm:$0xff] %vm6735_vm3, %v15953_v44  ;;  %v5998_v5 = vld [vmem:[#allocation2 + $0x21a] sm:$0xff]  ;;  %v5999_v7 = vld [vmem:[#allocation2 + $0x22a] sm:$0xff] }
 0x27e   :  { %v14469_v19 = vpop.f32.mrf.mxu1  ;;  %v11768_v9 = vpop.f32.mrf.mxu0  ;;  %12011 = vmatmul.mubr.msk.f32.gmra.mxu0 %vm33_vm1, %v5996_v43  ;;  %7016 = vst.msk [vmem:[#allocation4 + $0x40] sm:$0xff] %vm6735_vm3, %v15953_v44  ;;  %7018 = vst.msk [vmem:[#allocation4 + $0x50] sm:$0xff] %vm6735_vm3, %v15953_v44 }
 0x27f   :  { %15952 = vst [vmem:[#allocation58_spill] sm:$0xff] %v14469_v19  ;;  %7020 = vst.msk [vmem:[#allocation4 + $0x60] sm:$0xff] %vm6735_vm3, %v15953_v44  ;;  %v14513_v47 = vadd.f32 %v11768_v9, %v14151_v13  ;;  %12013 = vmatprep.mubr.msk.f32.mxu0 %vm33_vm1, %v5997_v24  ;;  %v6000_v24 = vld [vmem:[#allocation2 + $0x232] sm:$0xff]  ;;  %v6001_v9 = vld [vmem:[#allocation2 + $0x242] sm:$0xff] }
 0x280   :  { %7022 = vst.msk [vmem:[#allocation4 + $0x70] sm:$0xff] %vm6735_vm3, %v15953_v44  ;;  %7024 = vst.msk [vmem:[#allocation4 + $0x80] sm:$0xff] %vm6735_vm3, %v15953_v44  ;;  %v11760_v56 = vpop.f32.mrf.mxu1  ;;  %v4878_v60 = vpop.f32.mrf.mxu0 }
 0x281   :  { %7026 = vst.msk [vmem:[#allocation4 + $0x90] sm:$0xff] %vm6735_vm3, %v15953_v44  ;;  %7028 = vst.msk [vmem:[#allocation4 + $0xa0] sm:$0xff] %vm6735_vm3, %v15953_v44  ;;  %v14516_v2 = vadd.f32 %v11760_v56, %v3829_v46  ;;  %v14519_v43 = vadd.f32 %v4878_v60, %v14155_v25 }
 0x282   :  { %7030 = vst.msk [vmem:[#allocation4 + $0xb0] sm:$0xff] %vm6735_vm3, %v15953_v44  ;;  %7032 = vst.msk [vmem:[#allocation4 + $0xc0] sm:$0xff] %vm6735_vm3, %v15953_v44  ;;  %v14521_v22 = vpop.f32.mrf.mxu1  ;;  %v11771_v59 = vpop.f32.mrf.mxu0  ;;  %12014 = vmatmul.mubr.msk.f32.gmra.mxu0 %vm33_vm1, %v5998_v5 }
 0x283   :  { %7034 = vst.msk [vmem:[#allocation4 + $0xd0] sm:$0xff] %vm6735_vm3, %v15953_v44  ;;  %7036 = vst.msk [vmem:[#allocation4 + $0xe0] sm:$0xff] %vm6735_vm3, %v15953_v44  ;;  %v14525_v19 = vadd.f32 %v11771_v59, %v14161_v32  ;;  %12016 = vmatprep.mubr.msk.f32.mxu0 %vm33_vm1, %v5999_v7  ;;  %v6002_v59 = vld [vmem:[#allocation2 + $0x24a] sm:$0xff] }
 0x284   :  { %7038 = vst.msk [vmem:[#allocation4 + $0xf0] sm:$0xff] %vm6735_vm3, %v15953_v44  ;;  %7040 = vst.msk [vmem:[#allocation4 + $0x100] sm:$0xff] %vm6735_vm3, %v15953_v44  ;;  %v14527_v13 = vpop.f32.mrf.mxu1  ;;  %v4888_v46 = vpop.f32.mrf.mxu0 }
 0x285   :  { %7042 = vst.msk [vmem:[#allocation4 + $0x110] sm:$0xff] %vm6735_vm3, %v15953_v44  ;;  %7044 = vst.msk [vmem:[#allocation4 + $0x120] sm:$0xff] %vm6735_vm3, %v15953_v44  ;;  %v14531_v56 = vadd.f32 %v4888_v46, %v14165_v52 }
 0x286   :  { %7046 = vst.msk [vmem:[#allocation4 + $0x130] sm:$0xff] %vm6735_vm3, %v15953_v44  ;;  %15954 = vst [vmem:[#allocation59_spill] sm:$0xff] %v14521_v22  ;;  %v14533_v25 = vpop.f32.mrf.mxu1  ;;  %v11774_v60 = vpop.f32.mrf.mxu0  ;;  %12017 = vmatmul.mubr.msk.f32.gmra.mxu0 %vm33_vm1, %v6000_v24  ;;  %v6003_v22 = vld [vmem:[#allocation2 + $0x25a] sm:$0xff] }
 0x287   :  { %v14537_v5 = vadd.f32 %v11774_v60, %v14171_v53  ;;  %12019 = vmatprep.mubr.msk.f32.mxu0 %vm33_vm1, %v6001_v9  ;;  %v6004_v60 = vld [vmem:[#allocation2 + $0x262] sm:$0xff]  ;;  %7011 = vst.msk [vmem:[#allocation4 + $0x18] sm:$0x3] %vm7008_vm4, %v15953_v44  ;;  %7009 = vst.msk [vmem:[#allocation4 + $0x8] sm:$0x3] %vm7008_vm4, %v15953_v44 }
 0x288   :  { %v14539_v32 = vpop.f32.mrf.mxu1  ;;  %v4898_v7 = vpop.f32.mrf.mxu0  ;;  %7013 = vst.msk [vmem:[#allocation4 + $0x28] sm:$0x3] %vm7008_vm4, %v15953_v44  ;;  %7015 = vst.msk [vmem:[#allocation4 + $0x38] sm:$0x3] %vm7008_vm4, %v15953_v44 }
 0x289   :  { %v14543_v34 = vadd.f32 %v4898_v7, %v14175_v28  ;;  %7017 = vst.msk [vmem:[#allocation4 + $0x48] sm:$0x3] %vm7008_vm4, %v15953_v44  ;;  %7019 = vst.msk [vmem:[#allocation4 + $0x58] sm:$0x3] %vm7008_vm4, %v15953_v44 }
 0x28a   :  { %v14545_v52 = vpop.f32.mrf.mxu1  ;;  %v11777_v46 = vpop.f32.mrf.mxu0  ;;  %12020 = vmatmul.mubr.msk.f32.gmra.mxu0 %vm33_vm1, %v6002_v59  ;;  %7021 = vst.msk [vmem:[#allocation4 + $0x68] sm:$0x3] %vm7008_vm4, %v15953_v44  ;;  %7023 = vst.msk [vmem:[#allocation4 + $0x78] sm:$0x3] %vm7008_vm4, %v15953_v44 }
 0x28b   :  { %v14549_v24 = vadd.f32 %v11777_v46, %v14181_v8  ;;  %12022 = vmatprep.mubr.msk.f32.mxu0 %vm33_vm1, %v6003_v22  ;;  %v6006_v46 = vld [vmem:[#allocation2 + $0x27a] sm:$0xff]  ;;  %7025 = vst.msk [vmem:[#allocation4 + $0x88] sm:$0x3] %vm7008_vm4, %v15953_v44  ;;  %7027 = vst.msk [vmem:[#allocation4 + $0x98] sm:$0x3] %vm7008_vm4, %v15953_v44 }
 0x28c   :  { %v14551_v53 = vpop.f32.mrf.mxu1  ;;  %v4908_v9 = vpop.f32.mrf.mxu0  ;;  %7029 = vst.msk [vmem:[#allocation4 + $0xa8] sm:$0x3] %vm7008_vm4, %v15953_v44  ;;  %7031 = vst.msk [vmem:[#allocation4 + $0xb8] sm:$0x3] %vm7008_vm4, %v15953_v44 }
 0x28d   :  { %v14555_v27 = vadd.f32 %v4908_v9, %v15955_v39  ;;  %7033 = vst.msk [vmem:[#allocation4 + $0xc8] sm:$0x3] %vm7008_vm4, %v15953_v44  ;;  %7035 = vst.msk [vmem:[#allocation4 + $0xd8] sm:$0x3] %vm7008_vm4, %v15953_v44  ;;  %v6009_v9 = vld [vmem:[#allocation2 + $0x2a2] sm:$0xff] }
 0x28e   :  { %v14557_v28 = vpop.f32.mrf.mxu1  ;;  %v11780_v7 = vpop.f32.mrf.mxu0  ;;  %12023 = vmatmul.mubr.msk.f32.gmra.mxu0 %vm33_vm1, %v6004_v60  ;;  %7037 = vst.msk [vmem:[#allocation4 + $0xe8] sm:$0x3] %vm7008_vm4, %v15953_v44  ;;  %7039 = vst.msk [vmem:[#allocation4 + $0xf8] sm:$0x3] %vm7008_vm4, %v15953_v44 }
 0x28f   :  { %v14561_v59 = vadd.f32 %v11780_v7, %v15956_v29  ;;  %12025 = vmatprep.mubr.msk.f32.mxu0 %vm33_vm1, %v6005_v30  ;;  %7041 = vst.msk [vmem:[#allocation4 + $0x108] sm:$0x3] %vm7008_vm4, %v15953_v44  ;;  %7043 = vst.msk [vmem:[#allocation4 + $0x118] sm:$0x3] %vm7008_vm4, %v15953_v44  ;;  %v6008_v30 = vld [vmem:[#allocation2 + $0x292] sm:$0xff]  ;;  %v15958_v7 = vld [vmem:[#allocation14_spill] sm:$0xff] }
 0x290   :  { %v14563_v8 = vpop.f32.mrf.mxu1  ;;  %v4918_v22 = vpop.f32.mrf.mxu0  ;;  %7045 = vst.msk [vmem:[#allocation4 + $0x128] sm:$0x3] %vm7008_vm4, %v15953_v44  ;;  %7047 = vst.msk [vmem:[#allocation4 + $0x138] sm:$0x3] %vm7008_vm4, %v15953_v44 }
 0x291   :  { %v14567_v23 = vadd.f32 %v4918_v22, %v15957_v49 }
 0x292   :  { %v11783_v49 = vpop.f32.mrf.mxu0  ;;  %12026 = vmatmul.mubr.msk.f32.gmra.mxu0 %vm33_vm1, %v6006_v46  ;;  %v14610_v29 = vpop.f32.mrf.mxu1 }
 0x293   :  { %v14613_v39 = vadd.f32 %v11783_v49, %v14201_v20  ;;  %12028 = vmatprep.mubr.msk.f32.mxu0 %vm33_vm1, %v6007_v33  ;;  %v6010_v20 = vld [vmem:[#allocation2 + $0x2aa] sm:$0xff]  ;;  %v7073_v33 = vld [vmem:[#allocation4] sm:$0xff] }
 0x294   :  { %v4928_v60 = vpop.f32.mrf.mxu0  ;;  %v14620_v44 = vpop.f32.mrf.mxu1  ;;  %12057 = vmatprep.mubr.msk.f32.mxu1 %vm6735_vm3, %v7073_v33  ;;  %v6015_v33 = vld [vmem:[#allocation2 + $0x2ea] sm:$0xff] }
 0x295   :  { %v14617_v22 = vadd.f32 %v4928_v60, %v15958_v7 }
 0x296   :  { %v11786_v3 = vpop.f32.mrf.mxu0  ;;  %12029 = vmatmul.mubr.msk.f32.gmra.mxu0 %vm33_vm1, %v6008_v30  ;;  %v14631_v30 = vpop.f32.mrf.mxu1 }
 0x297   :  { %v14623_v46 = vadd.f32 %v11786_v3, %v14213_v15  ;;  %12031 = vmatprep.mubr.msk.f32.mxu0 %vm33_vm1, %v6009_v9  ;;  %v6012_v15 = vld [vmem:[#allocation2 + $0x2c2] sm:$0xff]  ;;  %v6013_v9 = vld [vmem:[#allocation2 + $0x2d2] sm:$0xff] }
 0x298   :  { %v4938_v49 = vpop.f32.mrf.mxu0 }
 0x299   :  { %v14627_v18 = vadd.f32 %v4938_v49, %v14219_v61  ;;  %v14640_v61 = vpop.f32.mrf.mxu1 }
 0x29a   :  { %v11789_v60 = vpop.f32.mrf.mxu0  ;;  %12032 = vmatmul.mubr.msk.f32.gmra.mxu0 %vm33_vm1, %v6010_v20  ;;  %v6014_v20 = vld [vmem:[#allocation2 + $0x2da] sm:$0xff] }
 0x29b   :  { %v14634_v7 = vadd.f32 %v11789_v60, %v14225_v17  ;;  %12034 = vmatprep.mubr.msk.f32.mxu0 %vm33_vm1, %v6011_v16  ;;  %v10320_v17 = vld [vmem:[%s15813_s3 + $0x20] sm:$0xff] }
 0x29c   :  { %v14637_v3 = vpop.f32.mrf.mxu0  ;;  %12159 = vmatprep.subr.mxu0 %v10320_v17 }
 0x29d   :  { %12160 = vmatpush3.msra.mxu0 %v10320_v17 }
 0x29e   :  { %v11792_v58 = vpop.f32.mrf.mxu0  ;;  %12035 = vmatmul.mubr.msk.f32.gmra.mxu0 %vm33_vm1, %v6012_v15  ;;  %v14652_v15 = vpop.f32.mrf.mxu1 }
 0x29f   :  { %v14643_v49 = vadd.f32 %v11792_v58, %v14237_v10  ;;  %12037 = vmatprep.mubr.msk.f32.mxu0 %vm33_vm1, %v6013_v9  ;;  %v6016_v58 = vld [vmem:[#allocation2 + $0x2f2] sm:$0xff] }
 0x2a0   :  { %v14649_v16 = vpop.f32.mrf.mxu0 }
 0x2a1   :  { %15959 = vst [vmem:[#allocation24_spill] sm:$0xff] %v14643_v49  ;;  %15960 = vst [vmem:[#allocation25_spill] sm:$0xff] %v14649_v16  ;;  %v14661_v16 = vpop.f32.mrf.mxu1 }
 0x2a2   :  { %v11795_v60 = vpop.f32.mrf.mxu0  ;;  %12038 = vmatmul.mubr.msk.f32.gmra.mxu0 %vm33_vm1, %v6014_v20  ;;  %v6018_v20 = vld [vmem:[#allocation2 + $0x30a] sm:$0xff] }
 0x2a3   :  { %v14655_v10 = vadd.f32 %v11795_v60, %v14249_v4  ;;  %12040 = vmatprep.mubr.msk.f32.mxu0 %vm33_vm1, %v6015_v33  ;;  %v6019_v4 = vld [vmem:[#allocation2 + $0x31a] sm:$0xff]  ;;  %v14670_v33 = vpop.f32.mrf.mxu1 }
 0x2a4   :  { %v14658_v9 = vpop.f32.mrf.mxu0 }
 0x2a5   :  { %15961 = vst [vmem:[#allocation26_spill] sm:$0xff] %v14655_v10  ;;  %15962 = vst [vmem:[#allocation14_spill] sm:$0xff] %v14658_v9 }
 0x2a6   :  { %v11798_v49 = vpop.f32.mrf.mxu0  ;;  %12041 = vmatmul.mubr.msk.f32.gmra.mxu0 %vm33_vm1, %v6016_v58  ;;  %v6020_v58 = vld [vmem:[#allocation2 + $0x322] sm:$0xff] }
 0x2a7   :  { %v14664_v17 = vadd.f32 %v11798_v49, %v14261_v6  ;;  %12043 = vmatprep.mubr.msk.f32.mxu0 %vm33_vm1, %v6017_v41  ;;  %v6021_v6 = vld [vmem:[#allocation2 + $0x332] sm:$0xff]  ;;  %v14679_v41 = vpop.f32.mrf.mxu1 }
 0x2a8   :  { %v14667_v12 = vpop.f32.mrf.mxu0 }
 0x2a9   :  { %15963 = vst [vmem:[#allocation60_spill] sm:$0xff] %v14664_v17  ;;  %15964 = vst [vmem:[#allocation61_spill] sm:$0xff] %v14667_v12 }
 0x2aa   :  { %v11801_v60 = vpop.f32.mrf.mxu0  ;;  %12044 = vmatmul.mubr.msk.f32.gmra.mxu0 %vm33_vm1, %v6018_v20  ;;  %v6022_v20 = vld [vmem:[#allocation2 + $0x33a] sm:$0xff] }
 0x2ab   :  { %v14673_v10 = vadd.f32 %v11801_v60, %v14273_v54  ;;  %12046 = vmatprep.mubr.msk.f32.mxu0 %vm33_vm1, %v6019_v4  ;;  %v6023_v54 = vld [vmem:[#allocation2 + $0x34a] sm:$0xff]  ;;  %v14688_v4 = vpop.f32.mrf.mxu1 }
 0x2ac   :  { %v14676_v9 = vpop.f32.mrf.mxu0 }
 0x2ad   :  { %15965 = vst [vmem:[#allocation62_spill] sm:$0xff] %v14673_v10  ;;  %15966 = vst [vmem:[#allocation63_spill] sm:$0xff] %v14676_v9 }
 0x2ae   :  { %v11804_v49 = vpop.f32.mrf.mxu0  ;;  %12047 = vmatmul.mubr.msk.f32.gmra.mxu0 %vm33_vm1, %v6020_v58  ;;  %v6024_v58 = vld [vmem:[#allocation2 + $0x352] sm:$0xff] }
 0x2af   :  { %v14682_v17 = vadd.f32 %v11804_v49, %v14285_v38  ;;  %12049 = vmatprep.mubr.msk.f32.mxu0 %vm33_vm1, %v6021_v6  ;;  %v14697_v6 = vpop.f32.mrf.mxu1 }
 0x2b0   :  { %v14685_v12 = vpop.f32.mrf.mxu0 }
 0x2b1   :  { %15967 = vst [vmem:[#allocation64_spill] sm:$0xff] %v14682_v17  ;;  %15968 = vst [vmem:[#allocation65_spill] sm:$0xff] %v14685_v12  ;;  %v14704_v12 = vpop.f32.mrf.mxu1 }
 0x2b2   :  { %v11807_v60 = vpop.f32.mrf.mxu0  ;;  %12050 = vmatmul.mubr.msk.f32.gmra.mxu0 %vm33_vm1, %v6022_v20 }
 0x2b3   :  { %v14691_v10 = vadd.f32 %v11807_v60, %v14297_v57  ;;  %12052 = vmatprep.mubr.msk.f32.mxu0 %vm33_vm1, %v6023_v54 }
 0x2b4   :  { %v14694_v9 = vpop.f32.mrf.mxu0 }
 0x2b5   :  { %15969 = vst [vmem:[#allocation66_spill] sm:$0xff] %v14691_v10  ;;  %15970 = vst [vmem:[#allocation67_spill] sm:$0xff] %v14694_v9  ;;  %v14711_v10 = vpop.f32.mrf.mxu1 }
 0x2b6   :  { %v11810_v38 = vpop.f32.mrf.mxu0  ;;  %12053 = vmatmul.mubr.msk.f32.gmra.mxu0 %vm33_vm1, %v6024_v58 }
 0x2b7   :  { %v14700_v49 = vadd.f32 %v11810_v38, %v14309_v50  ;;  %v14718_v38 = vpop.f32.mrf.mxu1 }
 0x2b8   :  { %v14702_v17 = vpop.f32.mrf.mxu0 }
 0x2b9   :  { %15971 = vst [vmem:[#allocation68_spill] sm:$0xff] %v14700_v49  ;;  %15972 = vst [vmem:[#allocation69_spill] sm:$0xff] %v14702_v17 }
 0x2ba   :  { %v11813_v20 = vpop.f32.mrf.mxu0 }
 0x2bb   :  { %v14707_v57 = vadd.f32 %v11813_v20, %v14319_v48  ;;  %v14725_v20 = vpop.f32.mrf.mxu1 }
 0x2bc   :  { %v14709_v54 = vpop.f32.mrf.mxu0 }
 0x2bd   :  { %15973 = vst [vmem:[#allocation70_spill] sm:$0xff] %v14707_v57  ;;  %15974 = vst [vmem:[#allocation71_spill] sm:$0xff] %v14709_v54 }
 0x2be   :  { %v11816_v60 = vpop.f32.mrf.mxu0 }
 0x2bf   :  { %v14714_v58 = vadd.f32 %v11816_v60, %v14329_v45  ;;  %v14732_v60 = vpop.f32.mrf.mxu1 }
 0x2c0   :  { %v14716_v9 = vpop.f32.mrf.mxu0 }
 0x2c1   :  { %15975 = vst [vmem:[#allocation72_spill] sm:$0xff] %v14714_v58  ;;  %15976 = vst [vmem:[#allocation73_spill] sm:$0xff] %v14716_v9 }
 0x2c2   :  { %v11819_v50 = vpop.f32.mrf.mxu0 }
 0x2c3   :  { %v14721_v49 = vadd.f32 %v11819_v50, %v14339_v40  ;;  %v14739_v50 = vpop.f32.mrf.mxu1 }
 0x2c4   :  { %v14723_v17 = vpop.f32.mrf.mxu0 }
 0x2c5   :  { %15977 = vst [vmem:[#allocation74_spill] sm:$0xff] %v14721_v49  ;;  %15978 = vst [vmem:[#allocation75_spill] sm:$0xff] %v14723_v17 }
 0x2c6   :  { %v11822_v48 = vpop.f32.mrf.mxu0 }
 0x2c7   :  { %v14728_v57 = vadd.f32 %v11822_v48, %v14349_v31  ;;  %v14746_v48 = vpop.f32.mrf.mxu1 }
 0x2c8   :  { %v14730_v54 = vpop.f32.mrf.mxu0 }
 0x2c9   :  { %15979 = vst [vmem:[#allocation76_spill] sm:$0xff] %v14728_v57  ;;  %15980 = vst [vmem:[#allocation77_spill] sm:$0xff] %v14730_v54 }
 0x2ca   :  { %v11825_v45 = vpop.f32.mrf.mxu0 }
 0x2cb   :  { %v14735_v58 = vadd.f32 %v11825_v45, %v14359_v14  ;;  %v14753_v45 = vpop.f32.mrf.mxu1 }
 0x2cc   :  { %v14737_v9 = vpop.f32.mrf.mxu0 }
 0x2cd   :  { %15981 = vst [vmem:[#allocation78_spill] sm:$0xff] %v14735_v58  ;;  %15982 = vst [vmem:[#allocation79_spill] sm:$0xff] %v14737_v9 }
 0x2ce   :  { %v11828_v40 = vpop.f32.mrf.mxu0 }
 0x2cf   :  { %v14742_v49 = vadd.f32 %v11828_v40, %v14369_v36  ;;  %v14760_v40 = vpop.f32.mrf.mxu1 }
 0x2d0   :  { %v14744_v17 = vpop.f32.mrf.mxu0 }
 0x2d1   :  { %15983 = vst [vmem:[#allocation80_spill] sm:$0xff] %v14742_v49  ;;  %15984 = vst [vmem:[#allocation81_spill] sm:$0xff] %v14744_v17 }
 0x2d2   :  { %v11831_v31 = vpop.f32.mrf.mxu0 }
 0x2d3   :  { %v14749_v57 = vadd.f32 %v11831_v31, %v14379_v62  ;;  %v14767_v31 = vpop.f32.mrf.mxu1 }
 0x2d4   :  { %v14751_v54 = vpop.f32.mrf.mxu0 }
 0x2d5   :  { %15985 = vst [vmem:[#allocation82_spill] sm:$0xff] %v14749_v57  ;;  %15986 = vst [vmem:[#allocation83_spill] sm:$0xff] %v14751_v54 }
 0x2d6   :  { %v11834_v14 = vpop.f32.mrf.mxu0 }
 0x2d7   :  { %v14756_v58 = vadd.f32 %v11834_v14, %v14389_v1  ;;  %v14774_v14 = vpop.f32.mrf.mxu1 }
 0x2d8   :  { %v14758_v9 = vpop.f32.mrf.mxu0 }
 0x2d9   :  { %15987 = vst [vmem:[#allocation84_spill] sm:$0xff] %v14756_v58  ;;  %15988 = vst [vmem:[#allocation85_spill] sm:$0xff] %v14758_v9 }
 0x2da   :  { %v11837_v36 = vpop.f32.mrf.mxu0 }
 0x2db   :  { %v14763_v49 = vadd.f32 %v11837_v36, %v14399_v35  ;;  %v14781_v36 = vpop.f32.mrf.mxu1 }
 0x2dc   :  { %v14765_v17 = vpop.f32.mrf.mxu0 }
 0x2dd   :  { %15989 = vst [vmem:[#allocation86_spill] sm:$0xff] %v14763_v49  ;;  %15990 = vst [vmem:[#allocation87_spill] sm:$0xff] %v14765_v17 }
 0x2de   :  { %v11840_v62 = vpop.f32.mrf.mxu0 }
 0x2df   :  { %v14770_v57 = vadd.f32 %v11840_v62, %v14409_v37  ;;  %v14788_v62 = vpop.f32.mrf.mxu1 }
 0x2e0   :  { %v14772_v54 = vpop.f32.mrf.mxu0 }
 0x2e1   :  { %15991 = vst [vmem:[#allocation88_spill] sm:$0xff] %v14770_v57  ;;  %15992 = vst [vmem:[#allocation89_spill] sm:$0xff] %v14772_v54 }
 0x2e2   :  { %v11843_v1 = vpop.f32.mrf.mxu0 }
 0x2e3   :  { %v14777_v58 = vadd.f32 %v11843_v1, %v14419_v42  ;;  %v14795_v1 = vpop.f32.mrf.mxu1 }
 0x2e4   :  { %v14779_v9 = vpop.f32.mrf.mxu0 }
 0x2e5   :  { %15993 = vst [vmem:[#allocation90_spill] sm:$0xff] %v14777_v58  ;;  %15994 = vst [vmem:[#allocation91_spill] sm:$0xff] %v14779_v9 }
 0x2e6   :  { %v11846_v35 = vpop.f32.mrf.mxu0 }
 0x2e7   :  { %v14784_v49 = vadd.f32 %v11846_v35, %v14432_v0  ;;  %v14802_v35 = vpop.f32.mrf.mxu1 }
 0x2e8   :  { %v14786_v17 = vpop.f32.mrf.mxu0 }
 0x2e9   :  { %15995 = vst [vmem:[#allocation92_spill] sm:$0xff] %v14784_v49  ;;  %15996 = vst [vmem:[#allocation93_spill] sm:$0xff] %v14786_v17 }
 0x2ea   :  { %v11849_v37 = vpop.f32.mrf.mxu0 }
 0x2eb   :  { %v14791_v57 = vadd.f32 %v11849_v37, %v14442_v55  ;;  %v14809_v37 = vpop.f32.mrf.mxu1 }
 0x2ec   :  { %v14793_v54 = vpop.f32.mrf.mxu0 }
 0x2ed   :  { %15997 = vst [vmem:[#allocation94_spill] sm:$0xff] %v14791_v57  ;;  %15998 = vst [vmem:[#allocation95_spill] sm:$0xff] %v14793_v54 }
 0x2ee   :  { %v11852_v42 = vpop.f32.mrf.mxu0 }
 0x2ef   :  { %v14798_v58 = vadd.f32 %v11852_v42, %v14452_v51  ;;  %v5898_v51 = vadd.f32 %v14527_v13, %v14461_v26 }
 0x2f0   :  { %v14800_v9 = vpop.f32.mrf.mxu0 }
 0x2f1   :  { %15999 = vst [vmem:[#allocation96_spill] sm:$0xff] %v14798_v58  ;;  %16000 = vst [vmem:[#allocation97_spill] sm:$0xff] %v14800_v9  ;;  %v5897_v58 = vadd.f32 %v14533_v25, %v14467_v63  ;;  %v14820_v9 = vpop.f32.mrf.mxu1  ;;  %v5899_v63 = vadd.f32 %v14545_v52, %v14519_v43 }
 0x2f2   :  { %v11855_v0 = vpop.f32.mrf.mxu0 }
 0x2f3   :  { %v14805_v49 = vadd.f32 %v11855_v0, %v14464_v11  ;;  %v14825_v0 = vld [vmem:[%s15813_s3 + $0x8] sm:$0xff]  ;;  %v14832_v25 = vpop.f32.mrf.mxu1 }
 0x2f4   :  { %v14807_v17 = vpop.f32.mrf.mxu0  ;;  %12081 = vmatprep.subr.mxu1 %v14825_v0 }
 0x2f5   :  { %16001 = vst [vmem:[#allocation98_spill] sm:$0xff] %v14805_v49  ;;  %16002 = vst [vmem:[#allocation99_spill] sm:$0xff] %v14807_v17 }
 0x2f6   :  { %v11858_v55 = vpop.f32.mrf.mxu0 }
 0x2f7   :  { %v14812_v57 = vadd.f32 %v11858_v55, %v14516_v2  ;;  %v5900_v2 = vadd.f32 %v14539_v32, %v14513_v47 }
 0x2f8   :  { %v14814_v54 = vpop.f32.mrf.mxu0 }
 0x2f9   :  { %16003 = vst [vmem:[#allocation100_spill] sm:$0xff] %v14812_v57  ;;  %16004 = vst [vmem:[#allocation101_spill] sm:$0xff] %v14814_v54  ;;  %v5902_v54 = vadd.f32 %v14551_v53, %v14525_v19 }
 0x2fa   :  { %v11961_v42 = vpop.f32.mrf.mxu0 }
 0x2fb   :  { %v6608_v11 = vadd.f32 %v11961_v42, %v5898_v51 }
 0x2fc   :  { %v6288_v49 = vpop.f32.mrf.mxu0 }
 0x2fd   :  { %v6672_v55 = vmax.f32 %v6608_v11, 0.0  ;;  %v6607_v26 = vadd.f32 %v6288_v49, %v5897_v58  ;;  %v5901_v49 = vadd.f32 %v14557_v28, %v14531_v56  ;;  %v14840_v58 = vpop.f32.mrf.mxu1 }
 0x2fe   :  { %v11964_v13 = vpop.f32.mrf.mxu0 }
 0x2ff   :  { %6737 = vst.msk [vmem:[#allocation3 + $0x8] sm:$0xff] %vm6735_vm3, %v6672_v55  ;;  %v6671_v51 = vmax.f32 %v6607_v26, 0.0  ;;  %v6610_v42 = vadd.f32 %v11964_v13, %v5900_v2  ;;  %v5904_v2 = vadd.f32 %v14563_v8, %v14537_v5  ;;  %v14848_v26 = vpop.f32.mrf.mxu1  ;;  %v5906_v5 = vadd.f32 %v14620_v44, %v14549_v24 }
 0x300   :  { %v6298_v57 = vpop.f32.mrf.mxu0  ;;  %v5908_v44 = vadd.f32 %v14640_v61, %v14561_v59 }
 0x301   :  { %6736 = vst.msk [vmem:[#allocation3] sm:$0xff] %vm6735_vm3, %v6671_v51  ;;  %v6674_v17 = vmax.f32 %v6610_v42, 0.0  ;;  %v6609_v47 = vadd.f32 %v6298_v57, %v5899_v63  ;;  %v5903_v57 = vadd.f32 %v14610_v29, %v14543_v34  ;;  %v5905_v34 = vadd.f32 %v14631_v30, %v14555_v27  ;;  %v14856_v29 = vpop.f32.mrf.mxu1 }
 0x302   :  { %v11967_v32 = vpop.f32.mrf.mxu0  ;;  %v5907_v27 = vadd.f32 %v14652_v15, %v14567_v23 }
 0x303   :  { %6739 = vst.msk [vmem:[#allocation3 + $0x18] sm:$0xff] %vm6735_vm3, %v6674_v17  ;;  %v6673_v43 = vmax.f32 %v6609_v47, 0.0  ;;  %v6612_v52 = vadd.f32 %v11967_v32, %v5902_v54 }
 0x304   :  { %v6308_v11 = vpop.f32.mrf.mxu0 }
 0x305   :  { %6738 = vst.msk [vmem:[#allocation3 + $0x10] sm:$0xff] %vm6735_vm3, %v6673_v43  ;;  %v6676_v19 = vmax.f32 %v6612_v52, 0.0  ;;  %v6611_v53 = vadd.f32 %v6308_v11, %v5901_v49 }
 0x306   :  { %v11970_v55 = vpop.f32.mrf.mxu0 }
 0x307   :  { %6741 = vst.msk [vmem:[#allocation3 + $0x28] sm:$0xff] %vm6735_vm3, %v6676_v19  ;;  %v6675_v56 = vmax.f32 %v6611_v53, 0.0  ;;  %v6614_v28 = vadd.f32 %v11970_v55, %v5904_v2  ;;  %v14864_v19 = vpop.f32.mrf.mxu1 }
 0x308   :  { %v6800_v17 = vld [vmem:[#allocation3] ss:$2 sm:$0xff]  ;;  %v6864_v54 = vld [vmem:[#allocation3 + $0x1] ss:$2 sm:$0xff]  ;;  %v6318_v13 = vpop.f32.mrf.mxu0 }
 0x309   :  { %6740 = vst.msk [vmem:[#allocation3 + $0x20] sm:$0xff] %vm6735_vm3, %v6675_v56  ;;  %v6678_v8 = vmax.f32 %v6614_v28, 0.0  ;;  %v6613_v63 = vadd.f32 %v6318_v13, %v5903_v57  ;;  %v6927_v42 = vmax.f32 %v6800_v17, %v6864_v54  ;;  %v5910_v54 = vadd.f32 %v14661_v16, %v14613_v39  ;;  %v14881_v39 = vld [vmem:[%s15813_s3 + $0x30] sm:$0xff] }
 0x30a   :  { %v11973_v51 = vpop.f32.mrf.mxu0  ;;  %12211 = vmatprep.subr.mxu0 %v14881_v39 }
 0x30b   :  { %6743 = vst.msk [vmem:[#allocation3 + $0x38] sm:$0xff] %vm6735_vm3, %v6678_v8  ;;  %v6677_v47 = vmax.f32 %v6613_v63, 0.0  ;;  %v6616_v32 = vadd.f32 %v11973_v51, %v5906_v5  ;;  %v6959_v53 = vsel %vm6735_vm3, %v6927_v42, -inf  ;;  %v5909_v5 = vadd.f32 %v14670_v33, %v14617_v22  ;;  %v14875_v8 = vpop.f32.mrf.mxu1 }
 0x30c   :  { %v6802_v49 = vld [vmem:[#allocation3 + $0x10] ss:$2 sm:$0xff]  ;;  %v6866_v43 = vld [vmem:[#allocation3 + $0x11] ss:$2 sm:$0xff]  ;;  %v6328_v52 = vpop.f32.mrf.mxu0  ;;  %v5912_v22 = vadd.f32 %v14679_v41, %v14623_v46 }
 0x30d   :  { %v6928_v24 = vmax.f32 %v6802_v49, %v6866_v43  ;;  %6742 = vst.msk [vmem:[#allocation3 + $0x30] sm:$0xff] %vm6735_vm3, %v6677_v47  ;;  %v6680_v11 = vmax.f32 %v6616_v32, 0.0  ;;  %v6615_v2 = vadd.f32 %v6328_v52, %v5905_v34  ;;  %v16005_v43 = vld [vmem:[#allocation13_spill] sm:$0xff] }
 0x30e   :  { %v11976_v30 = vpop.f32.mrf.mxu0  ;;  %v4492_v52 = vadd.f32 %v14231_v21, %v16005_v43  ;;  %v16011_v43 = vld [vmem:[#allocation27_spill] sm:$0xff] }
 0x30f   :  { %v6960_v55 = vsel %vm6735_vm3, %v6928_v24, -inf  ;;  %6745 = vst.msk [vmem:[#allocation3 + $0x48] sm:$0xff] %vm6735_vm3, %v6680_v11  ;;  %v6679_v57 = vmax.f32 %v6615_v2, 0.0  ;;  %v6618_v56 = vadd.f32 %v11976_v30, %v5908_v44  ;;  %v5911_v44 = vadd.f32 %v14688_v4, %v14627_v18  ;;  %v14891_v11 = vpop.f32.mrf.mxu1 }
 0x310   :  { %v6961_v59 = vmax.f32 %v6959_v53, %v6960_v55  ;;  %v6804_v61 = vld [vmem:[#allocation3 + $0x20] ss:$2 sm:$0xff]  ;;  %v6868_v28 = vld [vmem:[#allocation3 + $0x21] ss:$2 sm:$0xff]  ;;  %v6338_v17 = vpop.f32.mrf.mxu0  ;;  %v5203_v21 = vadd.f32 %v14637_v3, %v4492_v52  ;;  %v5914_v18 = vadd.f32 %v14697_v6, %v14634_v7 }
 0x311   :  { %6744 = vst.msk [vmem:[#allocation3 + $0x40] sm:$0xff] %vm6735_vm3, %v6679_v57  ;;  %v6682_v23 = vmax.f32 %v6618_v56, 0.0  ;;  %v6617_v15 = vadd.f32 %v6338_v17, %v5907_v27  ;;  %v6929_v63 = vmax.f32 %v6804_v61, %v6868_v28  ;;  %v10286_v28 = vld [vmem:[%s15813_s3 + $0x10] sm:$0xff]  ;;  %v14909_v3 = vpop.f32.mrf.mxu1 }
 0x312   :  { %v11979_v13 = vpop.f32.mrf.mxu0  ;;  %7049 = vst.msk [vmem:[#allocation4 + $0x11] sm:$0xff] %vm6735_vm3, %v6961_v59  ;;  %v16006_v17 = vld [vmem:[#allocation15_spill] sm:$0xff]  ;;  %v5913_v7 = vadd.f32 %v14704_v12, %v5203_v21 }
 0x313   :  { %6747 = vst.msk [vmem:[#allocation3 + $0x58] sm:$0xff] %vm6735_vm3, %v6682_v23  ;;  %v6681_v51 = vmax.f32 %v6617_v15, 0.0  ;;  %v6620_v34 = vadd.f32 %v11979_v13, %v5910_v54  ;;  %v6962_v2 = vsel %vm6735_vm3, %v6929_v63, -inf  ;;  %v16007_v54 = vld [vmem:[#allocation10_spill] sm:$0xff]  ;;  %v16008_v63 = vld [vmem:[#allocation25_spill] sm:$0xff] }
 0x314   :  { %v6806_v16 = vld [vmem:[#allocation3 + $0x30] ss:$2 sm:$0xff]  ;;  %v6870_v42 = vld [vmem:[#allocation3 + $0x31] ss:$2 sm:$0xff]  ;;  %v6348_v47 = vpop.f32.mrf.mxu0  ;;  %v4494_v23 = vadd.f32 %v16007_v54, %v16006_v17  ;;  %v16015_v17 = vld [vmem:[#allocation29_spill] sm:$0xff] }
 0x315   :  { %v6930_v33 = vmax.f32 %v6806_v16, %v6870_v42  ;;  %6746 = vst.msk [vmem:[#allocation3 + $0x50] sm:$0xff] %vm6735_vm3, %v6681_v51  ;;  %v6684_v32 = vmax.f32 %v6620_v34, 0.0  ;;  %v6619_v49 = vadd.f32 %v6348_v47, %v5909_v5  ;;  %v16009_v47 = vld [vmem:[#allocation24_spill] sm:$0xff] }
 0x316   :  { %v11982_v24 = vpop.f32.mrf.mxu0  ;;  %v5205_v51 = vadd.f32 %v16008_v63, %v4494_v23 }
 0x317   :  { %v6963_v27 = vsel %vm6735_vm3, %v6930_v33, -inf  ;;  %6749 = vst.msk [vmem:[#allocation3 + $0x68] sm:$0xff] %vm6735_vm3, %v6684_v32  ;;  %v6683_v46 = vmax.f32 %v6619_v49, 0.0  ;;  %v6622_v41 = vadd.f32 %v11982_v24, %v5912_v22  ;;  %v5916_v22 = vadd.f32 %v14711_v10, %v16009_v47  ;;  %v16010_v49 = vld [vmem:[#allocation16_spill] sm:$0xff]  ;;  %v14920_v24 = vpop.f32.mrf.mxu1 }
 0x318   :  { %v6964_v30 = vmax.f32 %v6962_v2, %v6963_v27  ;;  %v6808_v53 = vld [vmem:[#allocation3 + $0x40] ss:$2 sm:$0xff]  ;;  %v6872_v55 = vld [vmem:[#allocation3 + $0x41] ss:$2 sm:$0xff]  ;;  %v6358_v57 = vpop.f32.mrf.mxu0  ;;  %v4496_v52 = vadd.f32 %v16011_v43, %v16010_v49 }
 0x319   :  { %6748 = vst.msk [vmem:[#allocation3 + $0x60] sm:$0xff] %vm6735_vm3, %v6683_v46  ;;  %v6686_v4 = vmax.f32 %v6622_v41, 0.0  ;;  %v6621_v56 = vadd.f32 %v6358_v57, %v5911_v44  ;;  %v7074_v59 = vld [vmem:[#allocation4 + $0x10] sm:$0xff]  ;;  %v6931_v6 = vmax.f32 %v6808_v53, %v6872_v55  ;;  %v5915_v44 = vadd.f32 %v14718_v38, %v5205_v51 }
 0x31a   :  { %v7980_v61 = vld [vmem:[#allocation4 + $0x11] sm:$0xff]  ;;  %v11985_v15 = vpop.f32.mrf.mxu0  ;;  %12058 = vmatmul.mubr.msk.f32.vlgmr.msra.gmra.mxu1 %vm6735_vm3, %v7074_v59  ;;  %7050 = vst.msk [vmem:[#allocation4 + $0x21] sm:$0xff] %vm6735_vm3, %v6964_v30 }
 0x31b   :  { %12161 = vmatprep.mubr.msk.f32.mxu0 %vm6735_vm3, %v7980_v61  ;;  %6751 = vst.msk [vmem:[#allocation3 + $0x78] sm:$0xff] %vm6735_vm3, %v6686_v4  ;;  %v6685_v13 = vmax.f32 %v6621_v56, 0.0  ;;  %v6624_v5 = vadd.f32 %v11985_v15, %v5914_v18  ;;  %12082 = vmatpush3.msra.mxu1 %v14825_v0  ;;  %v6965_v2 = vsel %vm6735_vm3, %v6931_v6, -inf  ;;  %v16012_v57 = vld [vmem:[#allocation14_spill] sm:$0xff]  ;;  %v14941_v15 = vpop.f32.mrf.mxu1 }
 0x31c   :  { %v6810_v34 = vld [vmem:[#allocation3 + $0x50] ss:$2 sm:$0xff]  ;;  %v6874_v16 = vld [vmem:[#allocation3 + $0x51] ss:$2 sm:$0xff]  ;;  %v6368_v42 = vpop.f32.mrf.mxu0  ;;  %12107 = vmatprep.subr.mxu1 %v10286_v28  ;;  %v5207_v21 = vadd.f32 %v16012_v57, %v4496_v52  ;;  %v16014_v28 = vld [vmem:[#allocation9_spill] sm:$0xff] }
 0x31d   :  { %v6932_v33 = vmax.f32 %v6810_v34, %v6874_v16  ;;  %6750 = vst.msk [vmem:[#allocation3 + $0x70] sm:$0xff] %vm6735_vm3, %v6685_v13  ;;  %v6688_v12 = vmax.f32 %v6624_v5, 0.0  ;;  %v6623_v32 = vadd.f32 %v6368_v42, %v5913_v7  ;;  %v16013_v18 = vld [vmem:[#allocation26_spill] sm:$0xff]  ;;  %v4498_v54 = vadd.f32 %v16015_v17, %v16014_v28  ;;  %v16016_v5 = vld [vmem:[#allocation61_spill] sm:$0xff]  ;;  %v16017_v42 = vld [vmem:[#allocation60_spill] sm:$0xff] }
 0x31e   :  { %v11988_v0 = vpop.f32.mrf.mxu0  ;;  %v5918_v38 = vadd.f32 %v14725_v20, %v16013_v18  ;;  %v5917_v20 = vadd.f32 %v14732_v60, %v5207_v21  ;;  %v5920_v47 = vadd.f32 %v14739_v50, %v16017_v42 }
 0x31f   :  { %v6966_v27 = vsel %vm6735_vm3, %v6932_v33, -inf  ;;  %6753 = vst.msk [vmem:[#allocation3 + $0x88] sm:$0xff] %vm6735_vm3, %v6688_v12  ;;  %v6687_v10 = vmax.f32 %v6623_v32, 0.0  ;;  %v6626_v46 = vadd.f32 %v11988_v0, %v5916_v22  ;;  %v5209_v63 = vadd.f32 %v16016_v5, %v4498_v54  ;;  %v16018_v12 = vld [vmem:[#allocation11_spill] sm:$0xff] }
 0x320   :  { %v6967_v41 = vmax.f32 %v6965_v2, %v6966_v27  ;;  %v6812_v30 = vld [vmem:[#allocation3 + $0x60] ss:$2 sm:$0xff]  ;;  %v6876_v53 = vld [vmem:[#allocation3 + $0x61] ss:$2 sm:$0xff]  ;;  %v6378_v55 = vpop.f32.mrf.mxu0  ;;  %v16019_v32 = vld [vmem:[#allocation31_spill] sm:$0xff] }
 0x321   :  { %6752 = vst.msk [vmem:[#allocation3 + $0x80] sm:$0xff] %vm6735_vm3, %v6687_v10  ;;  %v6690_v4 = vmax.f32 %v6626_v46, 0.0  ;;  %v6625_v56 = vadd.f32 %v6378_v55, %v5915_v44  ;;  %v14929_v59 = vld [vmem:[#allocation4 + $0x20] sm:$0xff]  ;;  %v6933_v7 = vmax.f32 %v6812_v30, %v6876_v53  ;;  %v4500_v49 = vadd.f32 %v16019_v32, %v16018_v12  ;;  %v16020_v30 = vld [vmem:[#allocation63_spill] sm:$0xff]  ;;  %v16021_v55 = vld [vmem:[#allocation62_spill] sm:$0xff] }
 0x322   :  { %v14931_v61 = vld [vmem:[#allocation4 + $0x21] sm:$0xff]  ;;  %7051 = vst.msk [vmem:[#allocation4 + $0x31] sm:$0xff] %vm6735_vm3, %v6967_v41  ;;  %v11991_v23 = vpop.f32.mrf.mxu0  ;;  %12060 = vmatprep.mubr.msk.f32.mxu1 %vm6735_vm3, %v14929_v59  ;;  %v5919_v43 = vadd.f32 %v14746_v48, %v5209_v63  ;;  %v5922_v48 = vadd.f32 %v14753_v45, %v16021_v55 }
 0x323   :  { %12162 = vmatmul.mubr.msk.f32.vlgmr.msra.gmra.mxu0 %vm6735_vm3, %v14931_v61  ;;  %6755 = vst.msk [vmem:[#allocation3 + $0x98] sm:$0xff] %vm6735_vm3, %v6690_v4  ;;  %v6689_v6 = vmax.f32 %v6625_v56, 0.0  ;;  %v6628_v13 = vadd.f32 %v11991_v23, %v5918_v38  ;;  %v6968_v44 = vsel %vm6735_vm3, %v6933_v7, -inf  ;;  %v5211_v53 = vadd.f32 %v16020_v30, %v4500_v49  ;;  %v16022_v4 = vld [vmem:[#allocation28_spill] sm:$0xff]  ;;  %v16023_v56 = vld [vmem:[#allocation33_spill] sm:$0xff] }
 0x324   :  { %12212 = vmatpush3.msra.mxu0 %v14881_v39  ;;  %v6814_v51 = vld [vmem:[#allocation3 + $0x70] ss:$2 sm:$0xff]  ;;  %v6878_v34 = vld [vmem:[#allocation3 + $0x71] ss:$2 sm:$0xff]  ;;  %v6388_v16 = vpop.f32.mrf.mxu0  ;;  %v14952_v39 = vpop.f32.mrf.mxu1  ;;  %v4502_v28 = vadd.f32 %v16023_v56, %v16022_v4 }
 0x325   :  { %v6934_v22 = vmax.f32 %v6814_v51, %v6878_v34  ;;  %6754 = vst.msk [vmem:[#allocation3 + $0x90] sm:$0xff] %vm6735_vm3, %v6689_v6  ;;  %v6692_v60 = vmax.f32 %v6628_v13, 0.0  ;;  %v6627_v33 = vadd.f32 %v6388_v16, %v5917_v20  ;;  %v5921_v45 = vadd.f32 %v14760_v40, %v5211_v53  ;;  %v16024_v6 = vld [vmem:[#allocation65_spill] sm:$0xff]  ;;  %v16025_v34 = vld [vmem:[#allocation64_spill] sm:$0xff] }
 0x326   :  { %v11994_v52 = vpop.f32.mrf.mxu0  ;;  %v14973_v54 = vpop.f32.mrf.mxu1  ;;  %v5213_v13 = vadd.f32 %v16024_v6, %v4502_v28  ;;  %v5924_v16 = vadd.f32 %v14767_v31, %v16025_v34 }
 0x327   :  { %v6969_v0 = vsel %vm6735_vm3, %v6934_v22, -inf  ;;  %6757 = vst.msk [vmem:[#allocation3 + $0xa8] sm:$0xff] %vm6735_vm3, %v6692_v60  ;;  %v6691_v50 = vmax.f32 %v6627_v33, 0.0  ;;  %v6630_v2 = vadd.f32 %v11994_v52, %v5920_v47  ;;  %v16026_v22 = vld [vmem:[#allocation30_spill] sm:$0xff]  ;;  %v16027_v60 = vld [vmem:[#allocation35_spill] sm:$0xff] }
 0x328   :  { %v6970_v27 = vmax.f32 %v6968_v44, %v6969_v0  ;;  %v6816_v10 = vld [vmem:[#allocation3 + $0x80] ss:$2 sm:$0xff]  ;;  %v6880_v46 = vld [vmem:[#allocation3 + $0x81] ss:$2 sm:$0xff]  ;;  %v6398_v41 = vpop.f32.mrf.mxu0  ;;  %v4504_v33 = vadd.f32 %v16027_v60, %v16026_v22  ;;  %v5923_v12 = vadd.f32 %v14774_v14, %v5213_v13  ;;  %v14983_v49 = vpop.f32.mrf.mxu1 }
 0x329   :  { %6756 = vst.msk [vmem:[#allocation3 + $0xa0] sm:$0xff] %vm6735_vm3, %v6691_v50  ;;  %v6694_v57 = vmax.f32 %v6630_v2, 0.0  ;;  %v6629_v21 = vadd.f32 %v6398_v41, %v5919_v43  ;;  %v14961_v18 = vld [vmem:[#allocation4 + $0x30] sm:$0xff]  ;;  %v6935_v23 = vmax.f32 %v6816_v10, %v6880_v46 }
 0x32a   :  { %v14963_v38 = vld [vmem:[#allocation4 + $0x31] sm:$0xff]  ;;  %7052 = vst.msk [vmem:[#allocation4 + $0x41] sm:$0xff] %vm6735_vm3, %v6970_v27  ;;  %v11997_v17 = vpop.f32.mrf.mxu0  ;;  %12061 = vmatmul.mubr.msk.f32.gmra.mxu1 %vm6735_vm3, %v14961_v18  ;;  %v15004_v28 = vpop.f32.mrf.mxu1 }
 0x32b   :  { %12164 = vmatprep.mubr.msk.f32.mxu0 %vm6735_vm3, %v14963_v38  ;;  %6759 = vst.msk [vmem:[#allocation3 + $0xb8] sm:$0xff] %vm6735_vm3, %v6694_v57  ;;  %v6693_v20 = vmax.f32 %v6629_v21, 0.0  ;;  %v6632_v7 = vadd.f32 %v11997_v17, %v5922_v48  ;;  %v6971_v43 = vsel %vm6735_vm3, %v6935_v23, -inf  ;;  %v16028_v10 = vld [vmem:[#allocation67_spill] sm:$0xff]  ;;  %v16029_v41 = vld [vmem:[#allocation66_spill] sm:$0xff]  ;;  %v16030_v57 = vld [vmem:[#allocation32_spill] sm:$0xff] }
 0x32c   :  { %v6818_v5 = vld [vmem:[#allocation3 + $0x90] ss:$2 sm:$0xff]  ;;  %v6882_v63 = vld [vmem:[#allocation3 + $0x91] ss:$2 sm:$0xff]  ;;  %v6408_v51 = vpop.f32.mrf.mxu0  ;;  %v5215_v46 = vadd.f32 %v16028_v10, %v4504_v33  ;;  %v5926_v14 = vadd.f32 %v14781_v36, %v16029_v41  ;;  %v16031_v21 = vld [vmem:[#allocation37_spill] sm:$0xff] }
 0x32d   :  { %v6936_v42 = vmax.f32 %v6818_v5, %v6882_v63  ;;  %6758 = vst.msk [vmem:[#allocation3 + $0xb0] sm:$0xff] %vm6735_vm3, %v6693_v20  ;;  %v6696_v47 = vmax.f32 %v6632_v7, 0.0  ;;  %v6631_v40 = vadd.f32 %v6408_v51, %v5921_v45  ;;  %v4506_v4 = vadd.f32 %v16031_v21, %v16030_v57  ;;  %v15010_v20 = vld [vmem:[%s15813_s3 + $0x40] sm:$0xff]  ;;  %v16037_v10 = vld [vmem:[#allocation70_spill] sm:$0xff] }
 0x32e   :  { %v12000_v32 = vpop.f32.mrf.mxu0  ;;  %v5925_v36 = vadd.f32 %v14788_v62, %v5215_v46  ;;  %v16032_v7 = vld [vmem:[#allocation69_spill] sm:$0xff]  ;;  %12263 = vmatprep.subr.mxu0 %v15010_v20  ;;  %v16033_v62 = vld [vmem:[#allocation68_spill] sm:$0xff] }
 0x32f   :  { %v6972_v52 = vsel %vm6735_vm3, %v6936_v42, -inf  ;;  %6761 = vst.msk [vmem:[#allocation3 + $0xc8] sm:$0xff] %vm6735_vm3, %v6696_v47  ;;  %v6695_v31 = vmax.f32 %v6631_v40, 0.0  ;;  %v6634_v44 = vadd.f32 %v12000_v32, %v5924_v16  ;;  %v5217_v6 = vadd.f32 %v16032_v7, %v4506_v4  ;;  %v16034_v47 = vld [vmem:[#allocation34_spill] sm:$0xff]  ;;  %v16035_v40 = vld [vmem:[#allocation39_spill] sm:$0xff]  ;;  %v16039_v57 = vld [vmem:[#allocation41_spill] sm:$0xff] }
 0x330   :  { %v6973_v0 = vmax.f32 %v6971_v43, %v6972_v52  ;;  %v6820_v50 = vld [vmem:[#allocation3 + $0xa0] ss:$2 sm:$0xff]  ;;  %v6884_v2 = vld [vmem:[#allocation3 + $0xa1] ss:$2 sm:$0xff]  ;;  %v6418_v27 = vpop.f32.mrf.mxu0  ;;  %v5928_v51 = vadd.f32 %v14795_v1, %v16033_v62  ;;  %v4508_v22 = vadd.f32 %v16035_v40, %v16034_v47 }
 0x331   :  { %6760 = vst.msk [vmem:[#allocation3 + $0xc0] sm:$0xff] %vm6735_vm3, %v6695_v31  ;;  %v6698_v30 = vmax.f32 %v6634_v44, 0.0  ;;  %v6633_v53 = vadd.f32 %v6418_v27, %v5923_v12  ;;  %v14992_v55 = vld [vmem:[#allocation4 + $0x40] sm:$0xff]  ;;  %v6937_v17 = vmax.f32 %v6820_v50, %v6884_v2  ;;  %v5927_v60 = vadd.f32 %v14802_v35, %v5217_v6  ;;  %v15020_v12 = vpop.f32.mrf.mxu1  ;;  %v16036_v2 = vld [vmem:[#allocation71_spill] sm:$0xff] }
 0x332   :  { %v14994_v48 = vld [vmem:[#allocation4 + $0x41] sm:$0xff]  ;;  %7053 = vst.msk [vmem:[#allocation4 + $0x51] sm:$0xff] %vm6735_vm3, %v6973_v0  ;;  %v12003_v56 = vpop.f32.mrf.mxu0  ;;  %12063 = vmatprep.mubr.msk.f32.mxu1 %vm6735_vm3, %v14992_v55  ;;  %v5219_v27 = vadd.f32 %v16036_v2, %v4508_v22  ;;  %v5930_v35 = vadd.f32 %v14809_v37, %v16037_v10  ;;  %v16045_v2 = vld [vmem:[#allocation74_spill] sm:$0xff] }
 0x333   :  { %12165 = vmatmul.mubr.msk.f32.gmra.mxu0 %vm6735_vm3, %v14994_v48  ;;  %6763 = vst.msk [vmem:[#allocation3 + $0xd8] sm:$0xff] %vm6735_vm3, %v6698_v30  ;;  %v6697_v45 = vmax.f32 %v6633_v53, 0.0  ;;  %v6636_v23 = vadd.f32 %v12003_v56, %v5926_v14  ;;  %v6974_v32 = vsel %vm6735_vm3, %v6937_v17, -inf  ;;  %v16038_v53 = vld [vmem:[#allocation36_spill] sm:$0xff]  ;;  %v15041_v56 = vpop.f32.mrf.mxu1 }
 0x334   :  { %v6822_v13 = vld [vmem:[#allocation3 + $0xb0] ss:$2 sm:$0xff]  ;;  %v6886_v5 = vld [vmem:[#allocation3 + $0xb1] ss:$2 sm:$0xff]  ;;  %v6428_v63 = vpop.f32.mrf.mxu0  ;;  %v4510_v21 = vadd.f32 %v16039_v57, %v16038_v53  ;;  %v5929_v37 = vadd.f32 %v14820_v9, %v5219_v27  ;;  %v16047_v53 = vld [vmem:[#allocation45_spill] sm:$0xff] }
 0x335   :  { %v6938_v34 = vmax.f32 %v6822_v13, %v6886_v5  ;;  %6762 = vst.msk [vmem:[#allocation3 + $0xd0] sm:$0xff] %vm6735_vm3, %v6697_v45  ;;  %v6700_v16 = vmax.f32 %v6636_v23, 0.0  ;;  %v6635_v42 = vadd.f32 %v6428_v63, %v5925_v36  ;;  %v16040_v23 = vld [vmem:[#allocation73_spill] sm:$0xff]  ;;  %v16041_v63 = vld [vmem:[#allocation72_spill] sm:$0xff] }
 0x336   :  { %v12006_v33 = vpop.f32.mrf.mxu0  ;;  %v5221_v7 = vadd.f32 %v16040_v23, %v4510_v21  ;;  %v5932_v62 = vadd.f32 %v14832_v25, %v16041_v63 }
 0x337   :  { %v6975_v43 = vsel %vm6735_vm3, %v6938_v34, -inf  ;;  %6765 = vst.msk [vmem:[#allocation3 + $0xe8] sm:$0xff] %vm6735_vm3, %v6700_v16  ;;  %v6699_v1 = vmax.f32 %v6635_v42, 0.0  ;;  %v6638_v52 = vadd.f32 %v12006_v33, %v5928_v51  ;;  %v16042_v16 = vld [vmem:[#allocation38_spill] sm:$0xff]  ;;  %v16043_v42 = vld [vmem:[#allocation43_spill] sm:$0xff] }
 0x338   :  { %v6976_v31 = vmax.f32 %v6974_v32, %v6975_v43  ;;  %v6824_v44 = vld [vmem:[#allocation3 + $0xc0] ss:$2 sm:$0xff]  ;;  %v6888_v0 = vld [vmem:[#allocation3 + $0xc1] ss:$2 sm:$0xff]  ;;  %v6438_v50 = vpop.f32.mrf.mxu0  ;;  %v4512_v47 = vadd.f32 %v16043_v42, %v16042_v16  ;;  %v5931_v40 = vadd.f32 %v14840_v58, %v5221_v7  ;;  %v5934_v58 = vadd.f32 %v14848_v26, %v16045_v2 }
 0x339   :  { %6764 = vst.msk [vmem:[#allocation3 + $0xe0] sm:$0xff] %vm6735_vm3, %v6699_v1  ;;  %v6702_v46 = vmax.f32 %v6638_v52, 0.0  ;;  %v6637_v41 = vadd.f32 %v6438_v50, %v5927_v60  ;;  %v15029_v14 = vld [vmem:[#allocation4 + $0x50] sm:$0xff]  ;;  %v6939_v36 = vmax.f32 %v6824_v44, %v6888_v0  ;;  %v15051_v60 = vpop.f32.mrf.mxu1 }
 0x33a   :  { %v15031_v30 = vld [vmem:[#allocation4 + $0x51] sm:$0xff]  ;;  %7054 = vst.msk [vmem:[#allocation4 + $0x61] sm:$0xff] %vm6735_vm3, %v6976_v31  ;;  %v12009_v4 = vpop.f32.mrf.mxu0  ;;  %12064 = vmatmul.mubr.msk.f32.gmra.mxu1 %vm6735_vm3, %v15029_v14 }
 0x33b   :  { %12167 = vmatprep.mubr.msk.f32.mxu0 %vm6735_vm3, %v15031_v30  ;;  %6767 = vst.msk [vmem:[#allocation3 + $0xf8] sm:$0xff] %vm6735_vm3, %v6702_v46  ;;  %v6701_v17 = vmax.f32 %v6637_v41, 0.0  ;;  %v6640_v45 = vadd.f32 %v12009_v4, %v5930_v35  ;;  %v6977_v33 = vsel %vm6735_vm3, %v6939_v36, -inf  ;;  %v16044_v0 = vld [vmem:[#allocation75_spill] sm:$0xff]  ;;  %v16046_v41 = vld [vmem:[#allocation40_spill] sm:$0xff]  ;;  %v15072_v4 = vpop.f32.mrf.mxu1 }
 0x33c   :  { %v6826_v6 = vld [vmem:[#allocation3 + $0xd0] ss:$2 sm:$0xff]  ;;  %v6890_v13 = vld [vmem:[#allocation3 + $0xd1] ss:$2 sm:$0xff]  ;;  %v6448_v5 = vpop.f32.mrf.mxu0  ;;  %v5223_v50 = vadd.f32 %v16044_v0, %v4512_v47  ;;  %v4514_v57 = vadd.f32 %v16047_v53, %v16046_v41  ;;  %v16055_v53 = vld [vmem:[#allocation17_spill] sm:$0xff] }
 0x33d   :  { %v6940_v51 = vmax.f32 %v6826_v6, %v6890_v13  ;;  %6766 = vst.msk [vmem:[#allocation3 + $0xf0] sm:$0xff] %vm6735_vm3, %v6701_v17  ;;  %v6704_v34 = vmax.f32 %v6640_v45, 0.0  ;;  %v6639_v9 = vadd.f32 %v6448_v5, %v5929_v37  ;;  %v16048_v45 = vld [vmem:[#allocation77_spill] sm:$0xff]  ;;  %v16049_v5 = vld [vmem:[#allocation76_spill] sm:$0xff] }
 0x33e   :  { %v12012_v22 = vpop.f32.mrf.mxu0  ;;  %v5933_v26 = vadd.f32 %v14856_v29, %v5223_v50  ;;  %v5225_v23 = vadd.f32 %v16048_v45, %v4514_v57  ;;  %v5936_v63 = vadd.f32 %v14864_v19, %v16049_v5  ;;  %v16053_v50 = vld [vmem:[#allocation78_spill] sm:$0xff]  ;;  %v16054_v41 = vld [vmem:[#allocation44_spill] sm:$0xff]  ;;  %v16056_v45 = vld [vmem:[#allocation81_spill] sm:$0xff] }
 0x33f   :  { %v6978_v32 = vsel %vm6735_vm3, %v6940_v51, -inf  ;;  %6769 = vst.msk [vmem:[#allocation3 + $0x108] sm:$0xff] %vm6735_vm3, %v6704_v34  ;;  %v6703_v25 = vmax.f32 %v6639_v9, 0.0  ;;  %v6642_v43 = vadd.f32 %v12012_v22, %v5932_v62  ;;  %v16050_v34 = vld [vmem:[#allocation42_spill] sm:$0xff]  ;;  %v16051_v9 = vld [vmem:[#allocation47_spill] sm:$0xff]  ;;  %v4518_v57 = vadd.f32 %v16055_v53, %v16054_v41  ;;  %v16057_v5 = vld [vmem:[#allocation80_spill] sm:$0xff] }
 0x340   :  { %v6979_v1 = vmax.f32 %v6977_v33, %v6978_v32  ;;  %v6828_v52 = vld [vmem:[#allocation3 + $0xe0] ss:$2 sm:$0xff]  ;;  %v6892_v31 = vld [vmem:[#allocation3 + $0xe1] ss:$2 sm:$0xff]  ;;  %v6458_v44 = vpop.f32.mrf.mxu0  ;;  %v4516_v16 = vadd.f32 %v16051_v9, %v16050_v34  ;;  %v5935_v42 = vadd.f32 %v14875_v8, %v5225_v23  ;;  %v5938_v8 = vadd.f32 %v14891_v11, %v16053_v50  ;;  %v16059_v34 = vld [vmem:[#allocation19_spill] sm:$0xff] }
 0x341   :  { %6768 = vst.msk [vmem:[#allocation3 + $0x100] sm:$0xff] %vm6735_vm3, %v6703_v25  ;;  %v6706_v27 = vmax.f32 %v6642_v43, 0.0  ;;  %v6641_v10 = vadd.f32 %v6458_v44, %v5931_v40  ;;  %v15060_v35 = vld [vmem:[#allocation4 + $0x60] sm:$0xff]  ;;  %v6941_v37 = vmax.f32 %v6828_v52, %v6892_v31  ;;  %v15082_v40 = vpop.f32.mrf.mxu1  ;;  %v16052_v44 = vld [vmem:[#allocation79_spill] sm:$0xff]  ;;  %v5229_v23 = vadd.f32 %v16056_v45, %v4518_v57 }
 0x342   :  { %v15062_v46 = vld [vmem:[#allocation4 + $0x61] sm:$0xff]  ;;  %7055 = vst.msk [vmem:[#allocation4 + $0x71] sm:$0xff] %vm6735_vm3, %v6979_v1  ;;  %v12015_v21 = vpop.f32.mrf.mxu0  ;;  %12066 = vmatprep.mubr.msk.f32.mxu1 %vm6735_vm3, %v15060_v35  ;;  %v5227_v0 = vadd.f32 %v16052_v44, %v4516_v16  ;;  %v16061_v44 = vld [vmem:[#allocation82_spill] sm:$0xff] }
 0x343   :  { %12168 = vmatmul.mubr.msk.f32.gmra.mxu0 %vm6735_vm3, %v15062_v46  ;;  %6771 = vst.msk [vmem:[#allocation3 + $0x118] sm:$0xff] %vm6735_vm3, %v6706_v27  ;;  %v6705_v36 = vmax.f32 %v6641_v10, 0.0  ;;  %v6644_v17 = vadd.f32 %v12015_v21, %v5934_v58  ;;  %v6980_v22 = vsel %vm6735_vm3, %v6941_v37, -inf  ;;  %v7081_v31 = vld [vmem:[#allocation4 + $0xa0] sm:$0xff]  ;;  %v5939_v16 = vadd.f32 %v14941_v15, %v5229_v23 }
 0x344   :  { %v6830_v7 = vld [vmem:[#allocation3 + $0xf0] ss:$2 sm:$0xff]  ;;  %v6894_v6 = vld [vmem:[#allocation3 + $0xf1] ss:$2 sm:$0xff]  ;;  %v6468_v13 = vpop.f32.mrf.mxu0  ;;  %v5937_v11 = vadd.f32 %v14909_v3, %v5227_v0  ;;  %v5942_v15 = vadd.f32 %v14952_v39, %v16061_v44 }
 0x345   :  { %v6942_v62 = vmax.f32 %v6830_v7, %v6894_v6  ;;  %6770 = vst.msk [vmem:[#allocation3 + $0x110] sm:$0xff] %vm6735_vm3, %v6705_v36  ;;  %v6708_v51 = vmax.f32 %v6644_v17, 0.0  ;;  %v6643_v29 = vadd.f32 %v6468_v13, %v5933_v26  ;;  %v15103_v26 = vpop.f32.mrf.mxu1 }
 0x346   :  { %v12018_v47 = vpop.f32.mrf.mxu0 }
 0x347   :  { %v6981_v33 = vsel %vm6735_vm3, %v6942_v62, -inf  ;;  %6773 = vst.msk [vmem:[#allocation3 + $0x128] sm:$0xff] %vm6735_vm3, %v6708_v51  ;;  %v6707_v19 = vmax.f32 %v6643_v29, 0.0  ;;  %v6646_v32 = vadd.f32 %v12018_v47, %v5936_v63  ;;  %v5940_v63 = vadd.f32 %v14920_v24, %v16057_v5  ;;  %v16058_v29 = vld [vmem:[#allocation46_spill] sm:$0xff]  ;;  %v15114_v47 = vpop.f32.mrf.mxu1 }
 0x348   :  { %v6982_v25 = vmax.f32 %v6980_v22, %v6981_v33  ;;  %v6832_v43 = vld [vmem:[#allocation3 + $0x100] ss:$2 sm:$0xff]  ;;  %v6896_v1 = vld [vmem:[#allocation3 + $0x101] ss:$2 sm:$0xff]  ;;  %v6478_v52 = vpop.f32.mrf.mxu0  ;;  %v4520_v9 = vadd.f32 %v16059_v34, %v16058_v29 }
 0x349   :  { %6772 = vst.msk [vmem:[#allocation3 + $0x120] sm:$0xff] %vm6735_vm3, %v6707_v19  ;;  %v6710_v2 = vmax.f32 %v6646_v32, 0.0  ;;  %v6645_v58 = vadd.f32 %v6478_v52, %v5935_v42  ;;  %v15091_v27 = vld [vmem:[#allocation4 + $0x70] sm:$0xff]  ;;  %v6943_v37 = vmax.f32 %v6832_v43, %v6896_v1 }
 0x34a   :  { %v15093_v10 = vld [vmem:[#allocation4 + $0x71] sm:$0xff]  ;;  %7056 = vst.msk [vmem:[#allocation4 + $0x81] sm:$0xff] %vm6735_vm3, %v6982_v25  ;;  %v12021_v21 = vpop.f32.mrf.mxu0  ;;  %12067 = vmatmul.mubr.msk.f32.gmra.mxu1 %vm6735_vm3, %v15091_v27 }
 0x34b   :  { %12170 = vmatprep.mubr.msk.f32.mxu0 %vm6735_vm3, %v15093_v10  ;;  %6775 = vst.msk [vmem:[#allocation3 + $0x138] sm:$0xff] %vm6735_vm3, %v6710_v2  ;;  %v6709_v36 = vmax.f32 %v6645_v58, 0.0  ;;  %v6648_v17 = vadd.f32 %v12021_v21, %v5938_v8  ;;  %12069 = vmatprep.mubr.msk.f32.mxu1 %vm6735_vm3, %v7081_v31  ;;  %v6983_v22 = vsel %vm6735_vm3, %v6943_v37, -inf  ;;  %v16060_v52 = vld [vmem:[#allocation83_spill] sm:$0xff]  ;;  %v16062_v2 = vld [vmem:[#allocation12_spill] sm:$0xff]  ;;  %v16063_v58 = vld [vmem:[#allocation21_spill] sm:$0xff]  ;;  %v15131_v21 = vpop.f32.mrf.mxu1 }
 0x34c   :  { %v6834_v7 = vld [vmem:[#allocation3 + $0x110] ss:$2 sm:$0xff]  ;;  %v6898_v6 = vld [vmem:[#allocation3 + $0x111] ss:$2 sm:$0xff]  ;;  %v6488_v13 = vpop.f32.mrf.mxu0  ;;  %v5231_v31 = vadd.f32 %v16060_v52, %v4520_v9  ;;  %v4522_v41 = vadd.f32 %v16063_v58, %v16062_v2 }
 0x34d   :  { %v6944_v62 = vmax.f32 %v6834_v7, %v6898_v6  ;;  %6774 = vst.msk [vmem:[#allocation3 + $0x130] sm:$0xff] %vm6735_vm3, %v6709_v36  ;;  %v6712_v3 = vmax.f32 %v6648_v17, 0.0  ;;  %v6647_v51 = vadd.f32 %v6488_v13, %v5937_v11  ;;  %v16064_v36 = vld [vmem:[#allocation85_spill] sm:$0xff]  ;;  %v16065_v6 = vld [vmem:[#allocation84_spill] sm:$0xff]  ;;  %v15141_v9 = vpop.f32.mrf.mxu1 }
 0x34e   :  { %v12024_v42 = vpop.f32.mrf.mxu0  ;;  %v5941_v57 = vadd.f32 %v14973_v54, %v5231_v31  ;;  %v5233_v17 = vadd.f32 %v16064_v36, %v4522_v41  ;;  %v5944_v13 = vadd.f32 %v14983_v49, %v16065_v6 }
 0x34f   :  { %v6984_v33 = vsel %vm6735_vm3, %v6944_v62, -inf  ;;  %6777 = vst.msk [vmem:[#allocation3 + $0x148] sm:$0xff] %vm6735_vm3, %v6712_v3  ;;  %v6711_v24 = vmax.f32 %v6647_v51, 0.0  ;;  %v6650_v19 = vadd.f32 %v12024_v42, %v5940_v63  ;;  %v16066_v62 = vld [vmem:[#allocation18_spill] sm:$0xff]  ;;  %v16067_v3 = vld [vmem:[#allocation48_spill] sm:$0xff]  ;;  %v15162_v41 = vpop.f32.mrf.mxu1 }
 0x350   :  { %v6985_v32 = vmax.f32 %v6983_v22, %v6984_v33  ;;  %v6836_v25 = vld [vmem:[#allocation3 + $0x120] ss:$2 sm:$0xff]  ;;  %v6900_v43 = vld [vmem:[#allocation3 + $0x121] ss:$2 sm:$0xff]  ;;  %v6498_v1 = vpop.f32.mrf.mxu0  ;;  %v4524_v51 = vadd.f32 %v16067_v3, %v16066_v62  ;;  %v5943_v29 = vadd.f32 %v15004_v28, %v5233_v17 }
 0x351   :  { %6776 = vst.msk [vmem:[#allocation3 + $0x140] sm:$0xff] %vm6735_vm3, %v6711_v24  ;;  %v6714_v0 = vmax.f32 %v6650_v19, 0.0  ;;  %v6649_v50 = vadd.f32 %v6498_v1, %v5939_v16  ;;  %v15123_v8 = vld [vmem:[#allocation4 + $0x81] sm:$0xff]  ;;  %v6945_v39 = vmax.f32 %v6836_v25, %v6900_v43  ;;  %v16068_v25 = vld [vmem:[#allocation87_spill] sm:$0xff]  ;;  %v16069_v1 = vld [vmem:[#allocation86_spill] sm:$0xff] }
 0x352   :  { %7057 = vst.msk [vmem:[#allocation4 + $0xb1] sm:$0xff] %vm6735_vm3, %v6985_v32  ;;  %v12027_v53 = vpop.f32.mrf.mxu0  ;;  %12171 = vmatmul.mubr.msk.f32.gmra.mxu0 %vm6735_vm3, %v15123_v8  ;;  %v5235_v43 = vadd.f32 %v16068_v25, %v4524_v51  ;;  %v5946_v28 = vadd.f32 %v15020_v12, %v16069_v1  ;;  %v15172_v51 = vpop.f32.mrf.mxu1 }
 0x353   :  { %6779 = vst.msk [vmem:[#allocation3 + $0x158] sm:$0xff] %vm6735_vm3, %v6714_v0  ;;  %v6713_v11 = vmax.f32 %v6649_v50, 0.0  ;;  %v6652_v37 = vadd.f32 %v12027_v53, %v5942_v15  ;;  %v6986_v16 = vsel %vm6735_vm3, %v6945_v39, -inf  ;;  %v16070_v0 = vld [vmem:[#allocation20_spill] sm:$0xff]  ;;  %v16071_v50 = vld [vmem:[#allocation49_spill] sm:$0xff] }
 0x354   :  { %v6838_v45 = vld [vmem:[#allocation3 + $0x130] ss:$2 sm:$0xff]  ;;  %v6902_v23 = vld [vmem:[#allocation3 + $0x131] ss:$2 sm:$0xff]  ;;  %v6508_v7 = vpop.f32.mrf.mxu0  ;;  %v4526_v2 = vadd.f32 %v16071_v50, %v16070_v0  ;;  %v5945_v12 = vadd.f32 %v15041_v56, %v5235_v43 }
 0x355   :  { %v6946_v5 = vmax.f32 %v6838_v45, %v6902_v23  ;;  %6778 = vst.msk [vmem:[#allocation3 + $0x150] sm:$0xff] %vm6735_vm3, %v6713_v11  ;;  %v6716_v63 = vmax.f32 %v6652_v37, 0.0  ;;  %v6651_v54 = vadd.f32 %v6508_v7, %v5941_v57  ;;  %v16072_v11 = vld [vmem:[#allocation89_spill] sm:$0xff]  ;;  %v16073_v23 = vld [vmem:[#allocation88_spill] sm:$0xff] }
 0x356   :  { %v12030_v34 = vpop.f32.mrf.mxu0  ;;  %v5237_v37 = vadd.f32 %v16072_v11, %v4526_v2  ;;  %v5948_v7 = vadd.f32 %v15051_v60, %v16073_v23  ;;  %v5868_v2 = vpop.f32.mrf.mxu1 }
 0x357   :  { %v6987_v42 = vsel %vm6735_vm3, %v6946_v5, -inf  ;;  %6781 = vst.msk [vmem:[#allocation3 + $0x168] sm:$0xff] %vm6735_vm3, %v6716_v63  ;;  %v6715_v49 = vmax.f32 %v6651_v54, 0.0  ;;  %v6654_v22 = vadd.f32 %v12030_v34, %v5944_v13  ;;  %v16074_v5 = vld [vmem:[#allocation22_spill] sm:$0xff]  ;;  %v16075_v63 = vld [vmem:[#allocation51_spill] sm:$0xff] }
 0x358   :  { %v6988_v33 = vmax.f32 %v6986_v16, %v6987_v42  ;;  %v6840_v24 = vld [vmem:[#allocation3 + $0x140] ss:$2 sm:$0xff]  ;;  %v6904_v19 = vld [vmem:[#allocation3 + $0x141] ss:$2 sm:$0xff]  ;;  %v6518_v32 = vpop.f32.mrf.mxu0  ;;  %v4528_v54 = vadd.f32 %v16075_v63, %v16074_v5  ;;  %v5947_v62 = vadd.f32 %v15072_v4, %v5237_v37 }
 0x359   :  { %6780 = vst.msk [vmem:[#allocation3 + $0x160] sm:$0xff] %vm6735_vm3, %v6715_v49  ;;  %v6718_v52 = vmax.f32 %v6654_v22, 0.0  ;;  %v6653_v31 = vadd.f32 %v6518_v32, %v5943_v29  ;;  %v15150_v44 = vld [vmem:[#allocation4 + $0xb0] sm:$0xff]  ;;  %v6947_v53 = vmax.f32 %v6840_v24, %v6904_v19 }
 0x35a   :  { %v15152_v15 = vld [vmem:[#allocation4 + $0xb1] sm:$0xff]  ;;  %7058 = vst.msk [vmem:[#allocation4 + $0xc1] sm:$0xff] %vm6735_vm3, %v6988_v33  ;;  %v12033_v58 = vpop.f32.mrf.mxu0  ;;  %12070 = vmatmul.mubr.msk.f32.gmra.mxu1 %vm6735_vm3, %v15150_v44 }
 0x35b   :  { %12173 = vmatprep.mubr.msk.f32.mxu0 %vm6735_vm3, %v15152_v15  ;;  %6783 = vst.msk [vmem:[#allocation3 + $0x178] sm:$0xff] %vm6735_vm3, %v6718_v52  ;;  %v6717_v57 = vmax.f32 %v6653_v31, 0.0  ;;  %v6656_v39 = vadd.f32 %v12033_v58, %v5946_v28  ;;  %v6989_v29 = vsel %vm6735_vm3, %v6947_v53, -inf  ;;  %v16076_v24 = vld [vmem:[#allocation91_spill] sm:$0xff]  ;;  %v16077_v32 = vld [vmem:[#allocation90_spill] sm:$0xff]  ;;  %v16079_v31 = vld [vmem:[#allocation53_spill] sm:$0xff] }
 0x35c   :  { %v6842_v36 = vld [vmem:[#allocation3 + $0x150] ss:$2 sm:$0xff]  ;;  %v6906_v17 = vld [vmem:[#allocation3 + $0x151] ss:$2 sm:$0xff]  ;;  %v6528_v45 = vpop.f32.mrf.mxu0  ;;  %v5239_v19 = vadd.f32 %v16076_v24, %v4528_v54  ;;  %v5950_v4 = vadd.f32 %v15082_v40, %v16077_v32  ;;  %v11953_v54 = vpop.f32.mrf.mxu1 }
 0x35d   :  { %v6948_v6 = vmax.f32 %v6842_v36, %v6906_v17  ;;  %6782 = vst.msk [vmem:[#allocation3 + $0x170] sm:$0xff] %vm6735_vm3, %v6717_v57  ;;  %v6720_v13 = vmax.f32 %v6656_v39, 0.0  ;;  %v6655_v56 = vadd.f32 %v6528_v45, %v5945_v12  ;;  %v16078_v52 = vld [vmem:[#allocation23_spill] sm:$0xff]  ;;  %v16080_v57 = vld [vmem:[#allocation93_spill] sm:$0xff]  ;;  %v16081_v17 = vld [vmem:[#allocation92_spill] sm:$0xff] }
 0x35e   :  { %v12036_v3 = vpop.f32.mrf.mxu0  ;;  %v4530_v0 = vadd.f32 %v16079_v31, %v16078_v52  ;;  %v5949_v40 = vadd.f32 %v15103_v26, %v5239_v19  ;;  %v5952_v45 = vadd.f32 %v15114_v47, %v16081_v17  ;;  %v16082_v26 = vld [vmem:[#allocation50_spill] sm:$0xff] }
 0x35f   :  { %v6990_v34 = vsel %vm6735_vm3, %v6948_v6, -inf  ;;  %6785 = vst.msk [vmem:[#allocation3 + $0x188] sm:$0xff] %vm6735_vm3, %v6720_v13  ;;  %v6719_v60 = vmax.f32 %v6655_v56, 0.0  ;;  %v6658_v16 = vadd.f32 %v12036_v3, %v5948_v7  ;;  %v16083_v13 = vld [vmem:[#allocation55_spill] sm:$0xff] }
 0x360   :  { %v6991_v42 = vmax.f32 %v6989_v29, %v6990_v34  ;;  %v6844_v49 = vld [vmem:[#allocation3 + $0x160] ss:$2 sm:$0xff]  ;;  %v6908_v22 = vld [vmem:[#allocation3 + $0x161] ss:$2 sm:$0xff]  ;;  %v6538_v33 = vpop.f32.mrf.mxu0  ;;  %v5241_v39 = vadd.f32 %v16080_v57, %v4530_v0  ;;  %v4532_v56 = vadd.f32 %v16083_v13, %v16082_v26  ;;  %v5878_v0 = vpop.f32.mrf.mxu1 }
 0x361   :  { %6784 = vst.msk [vmem:[#allocation3 + $0x180] sm:$0xff] %vm6735_vm3, %v6719_v60  ;;  %v6722_v25 = vmax.f32 %v6658_v16, 0.0  ;;  %v6657_v43 = vadd.f32 %v6538_v33, %v5947_v62  ;;  %v15181_v1 = vld [vmem:[#allocation4 + $0xc0] sm:$0xff]  ;;  %v6949_v58 = vmax.f32 %v6844_v49, %v6908_v22  ;;  %v16084_v49 = vld [vmem:[#allocation95_spill] sm:$0xff]  ;;  %v16085_v33 = vld [vmem:[#allocation94_spill] sm:$0xff] }
 0x362   :  { %v15183_v28 = vld [vmem:[#allocation4 + $0xc1] sm:$0xff]  ;;  %7059 = vst.msk [vmem:[#allocation4 + $0xd1] sm:$0xff] %vm6735_vm3, %v6991_v42  ;;  %v12039_v50 = vpop.f32.mrf.mxu0  ;;  %12072 = vmatprep.mubr.msk.f32.mxu1 %vm6735_vm3, %v15181_v1  ;;  %v5951_v5 = vadd.f32 %v15131_v21, %v5241_v39  ;;  %v5243_v22 = vadd.f32 %v16084_v49, %v4532_v56  ;;  %v5954_v24 = vadd.f32 %v15141_v9, %v16085_v33  ;;  %v11956_v56 = vpop.f32.mrf.mxu1 }
 0x363   :  { %12174 = vmatmul.mubr.msk.f32.gmra.mxu0 %vm6735_vm3, %v15183_v28  ;;  %6787 = vst.msk [vmem:[#allocation3 + $0x198] sm:$0xff] %vm6735_vm3, %v6722_v25  ;;  %v6721_v12 = vmax.f32 %v6657_v43, 0.0  ;;  %v6660_v53 = vadd.f32 %v12039_v50, %v5950_v4  ;;  %v6992_v62 = vsel %vm6735_vm3, %v6949_v58, -inf  ;;  %v16086_v25 = vld [vmem:[#allocation52_spill] sm:$0xff]  ;;  %v16087_v43 = vld [vmem:[#allocation57_spill] sm:$0xff] }
 0x364   :  { %v6846_v11 = vld [vmem:[#allocation3 + $0x170] ss:$2 sm:$0xff]  ;;  %v6910_v37 = vld [vmem:[#allocation3 + $0x171] ss:$2 sm:$0xff]  ;;  %v6548_v36 = vpop.f32.mrf.mxu0  ;;  %v4534_v52 = vadd.f32 %v16087_v43, %v16086_v25  ;;  %v5953_v9 = vadd.f32 %v15162_v41, %v5243_v22 }
 0x365   :  { %v6950_v23 = vmax.f32 %v6846_v11, %v6910_v37  ;;  %6786 = vst.msk [vmem:[#allocation3 + $0x190] sm:$0xff] %vm6735_vm3, %v6721_v12  ;;  %v6724_v7 = vmax.f32 %v6660_v53, 0.0  ;;  %v6659_v6 = vadd.f32 %v6548_v36, %v5949_v40  ;;  %v16088_v12 = vld [vmem:[#allocation97_spill] sm:$0xff]  ;;  %v16089_v37 = vld [vmem:[#allocation96_spill] sm:$0xff]  ;;  %v16090_v41 = vld [vmem:[#allocation54_spill] sm:$0xff] }
 0x366   :  { %v12042_v63 = vpop.f32.mrf.mxu0  ;;  %v5245_v53 = vadd.f32 %v16088_v12, %v4534_v52  ;;  %v5956_v36 = vadd.f32 %v15172_v51, %v16089_v37  ;;  %v5888_v52 = vpop.f32.mrf.mxu1 }
 0x367   :  { %v6993_v3 = vsel %vm6735_vm3, %v6950_v23, -inf  ;;  %6789 = vst.msk [vmem:[#allocation3 + $0x1a8] sm:$0xff] %vm6735_vm3, %v6724_v7  ;;  %v6723_v29 = vmax.f32 %v6659_v6, 0.0  ;;  %v6662_v47 = vadd.f32 %v12042_v63, %v5952_v45  ;;  %v16091_v7 = vld [vmem:[#allocation58_spill] sm:$0xff] }
 0x368   :  { %v6994_v34 = vmax.f32 %v6992_v62, %v6993_v3  ;;  %v6848_v60 = vld [vmem:[#allocation3 + $0x180] ss:$2 sm:$0xff]  ;;  %v6912_v16 = vld [vmem:[#allocation3 + $0x181] ss:$2 sm:$0xff]  ;;  %v6558_v42 = vpop.f32.mrf.mxu0  ;;  %v4536_v6 = vadd.f32 %v16091_v7, %v16090_v41  ;;  %v5955_v26 = vadd.f32 %v5868_v2, %v5245_v53 }
 0x369   :  { %6788 = vst.msk [vmem:[#allocation3 + $0x1a0] sm:$0xff] %vm6735_vm3, %v6723_v29  ;;  %v6726_v21 = vmax.f32 %v6662_v47, 0.0  ;;  %v6661_v19 = vadd.f32 %v6558_v42, %v5951_v5  ;;  %v15208_v32 = vld [vmem:[#allocation4 + $0xd0] sm:$0xff]  ;;  %v6951_v50 = vmax.f32 %v6848_v60, %v6912_v16 }
 0x36a   :  { %v15210_v4 = vld [vmem:[#allocation4 + $0xd1] sm:$0xff]  ;;  %7060 = vst.msk [vmem:[#allocation4 + $0xe1] sm:$0xff] %vm6735_vm3, %v6994_v34  ;;  %v12045_v31 = vpop.f32.mrf.mxu0  ;;  %12073 = vmatmul.mubr.msk.f32.gmra.mxu1 %vm6735_vm3, %v15208_v32 }
 0x36b   :  { %12176 = vmatprep.mubr.msk.f32.mxu0 %vm6735_vm3, %v15210_v4  ;;  %6791 = vst.msk [vmem:[#allocation3 + $0x1b8] sm:$0xff] %vm6735_vm3, %v6726_v21  ;;  %v6725_v40 = vmax.f32 %v6661_v19, 0.0  ;;  %v6664_v58 = vadd.f32 %v12045_v31, %v5954_v24  ;;  %v6995_v5 = vsel %vm6735_vm3, %v6951_v50, -inf  ;;  %v16092_v60 = vld [vmem:[#allocation99_spill] sm:$0xff]  ;;  %v16093_v42 = vld [vmem:[#allocation98_spill] sm:$0xff]  ;;  %v16094_v21 = vld [vmem:[#allocation56_spill] sm:$0xff] }
 0x36c   :  { %v6850_v57 = vld [vmem:[#allocation3 + $0x190] ss:$2 sm:$0xff]  ;;  %v6914_v39 = vld [vmem:[#allocation3 + $0x191] ss:$2 sm:$0xff]  ;;  %v6568_v11 = vpop.f32.mrf.mxu0  ;;  %v5247_v16 = vadd.f32 %v16092_v60, %v4536_v6  ;;  %v5958_v49 = vadd.f32 %v11953_v54, %v16093_v42 }
 0x36d   :  { %v6952_v17 = vmax.f32 %v6850_v57, %v6914_v39  ;;  %6790 = vst.msk [vmem:[#allocation3 + $0x1b0] sm:$0xff] %vm6735_vm3, %v6725_v40  ;;  %v6728_v45 = vmax.f32 %v6664_v58, 0.0  ;;  %v6663_v23 = vadd.f32 %v6568_v11, %v5953_v9  ;;  %v16095_v19 = vld [vmem:[#allocation59_spill] sm:$0xff]  ;;  %v16096_v40 = vld [vmem:[#allocation101_spill] sm:$0xff]  ;;  %v16097_v39 = vld [vmem:[#allocation100_spill] sm:$0xff] }
 0x36e   :  { %v12048_v13 = vpop.f32.mrf.mxu0  ;;  %v4538_v25 = vadd.f32 %v16095_v19, %v16094_v21  ;;  %v5957_v54 = vadd.f32 %v5878_v0, %v5247_v16  ;;  %v5960_v11 = vadd.f32 %v11956_v56, %v16097_v39  ;;  %v12333_v39 = vld [vmem:[#allocation4 + $0x11] sm:$0xff] }
 0x36f   :  { %v6996_v63 = vsel %vm6735_vm3, %v6952_v17, -inf  ;;  %6793 = vst.msk [vmem:[#allocation3 + $0x1c8] sm:$0xff] %vm6735_vm3, %v6728_v45  ;;  %v6727_v62 = vmax.f32 %v6663_v23, 0.0  ;;  %v6666_v3 = vadd.f32 %v12048_v13, %v5956_v36 }
 0x370   :  { %v6997_v51 = vmax.f32 %v6995_v5, %v6996_v63  ;;  %v6852_v29 = vld [vmem:[#allocation3 + $0x1a0] ss:$2 sm:$0xff]  ;;  %v6916_v47 = vld [vmem:[#allocation3 + $0x1a1] ss:$2 sm:$0xff]  ;;  %v6578_v34 = vpop.f32.mrf.mxu0  ;;  %v5249_v58 = vadd.f32 %v16096_v40, %v4538_v25 }
 0x371   :  { %6792 = vst.msk [vmem:[#allocation3 + $0x1c0] sm:$0xff] %vm6735_vm3, %v6727_v62  ;;  %v6730_v2 = vmax.f32 %v6666_v3, 0.0  ;;  %v6665_v22 = vadd.f32 %v6578_v34, %v5955_v26  ;;  %v15233_v33 = vld [vmem:[#allocation4 + $0xe0] sm:$0xff]  ;;  %v6953_v31 = vmax.f32 %v6852_v29, %v6916_v47 }
 0x372   :  { %v15235_v24 = vld [vmem:[#allocation4 + $0xe1] sm:$0xff]  ;;  %7061 = vst.msk [vmem:[#allocation4 + $0xf1] sm:$0xff] %vm6735_vm3, %v6997_v51  ;;  %v12051_v43 = vpop.f32.mrf.mxu0  ;;  %12075 = vmatprep.mubr.msk.f32.mxu1 %vm6735_vm3, %v15233_v33  ;;  %v5959_v45 = vadd.f32 %v5888_v52, %v5249_v58 }
 0x373   :  { %12177 = vmatmul.mubr.msk.f32.gmra.mxu0 %vm6735_vm3, %v15235_v24  ;;  %6795 = vst.msk [vmem:[#allocation3 + $0x1d8] sm:$0xff] %vm6735_vm3, %v6730_v2  ;;  %v6729_v9 = vmax.f32 %v6665_v22, 0.0  ;;  %v6668_v50 = vadd.f32 %v12051_v43, %v5958_v49  ;;  %v6998_v23 = vsel %vm6735_vm3, %v6953_v31, -inf  ;;  %v7299_v58 = vld [vmem:[#allocation4 + $0x1] sm:$0xff] }
 0x374   :  { %v6854_v12 = vld [vmem:[#allocation3 + $0x1b0] ss:$2 sm:$0xff]  ;;  %v6918_v53 = vld [vmem:[#allocation3 + $0x1b1] ss:$2 sm:$0xff]  ;;  %v6588_v57 = vpop.f32.mrf.mxu0 }
 0x375   :  { %v6954_v37 = vmax.f32 %v6854_v12, %v6918_v53  ;;  %6794 = vst.msk [vmem:[#allocation3 + $0x1d0] sm:$0xff] %vm6735_vm3, %v6729_v9  ;;  %v6732_v36 = vmax.f32 %v6668_v50, 0.0  ;;  %v6667_v17 = vadd.f32 %v6588_v57, %v5957_v54  ;;  %v10303_v57 = vld [vmem:[%s15813_s3 + $0x18] sm:$0xff] }
 0x376   :  { %v12054_v0 = vpop.f32.mrf.mxu0 }
 0x377   :  { %v6999_v41 = vsel %vm6735_vm3, %v6954_v37, -inf  ;;  %6797 = vst.msk [vmem:[#allocation3 + $0x1e8] sm:$0xff] %vm6735_vm3, %v6732_v36  ;;  %v6731_v7 = vmax.f32 %v6667_v17, 0.0  ;;  %v6670_v6 = vadd.f32 %v12054_v0, %v5960_v11  ;;  %v12334_v11 = vld [vmem:[%s15813_s3 + $0x10] sm:$0xff]  ;;  %v15375_v0 = vld [vmem:[#allocation4 + $0x42] sm:$0xff] }
 0x378   :  { %v7000_v26 = vmax.f32 %v6998_v23, %v6999_v41  ;;  %v6856_v13 = vld [vmem:[#allocation3 + $0x1c0] ss:$2 sm:$0xff]  ;;  %v6920_v5 = vld [vmem:[#allocation3 + $0x1c1] ss:$2 sm:$0xff]  ;;  %v6598_v63 = vpop.f32.mrf.mxu0  ;;  %v8450_v17 = vld [vmem:[#allocation4 + $0x130] sm:$0xff] }
 0x379   :  { %6796 = vst.msk [vmem:[#allocation3 + $0x1e0] sm:$0xff] %vm6735_vm3, %v6731_v7  ;;  %v6734_v56 = vmax.f32 %v6670_v6, 0.0  ;;  %v6669_v62 = vadd.f32 %v6598_v63, %v5959_v45  ;;  %v15252_v3 = vld [vmem:[#allocation4 + $0xf0] sm:$0xff]  ;;  %v6955_v29 = vmax.f32 %v6856_v13, %v6920_v5  ;;  %v15387_v41 = vld [vmem:[#allocation4 + $0x62] sm:$0xff] }
 0x37a   :  { %v15254_v51 = vld [vmem:[#allocation4 + $0xf1] sm:$0xff]  ;;  %7062 = vst.msk [vmem:[#allocation4 + $0x101] sm:$0xff] %vm6735_vm3, %v7000_v26  ;;  %12076 = vmatmul.mubr.msk.f32.gmra.mxu1 %vm6735_vm3, %v15252_v3  ;;  %v7534_v7 = vld [vmem:[#allocation4 + $0xa2] sm:$0xff] }
 0x37b   :  { %12179 = vmatprep.mubr.msk.f32.mxu0 %vm6735_vm3, %v15254_v51  ;;  %6799 = vst.msk [vmem:[#allocation3 + $0x1f8] sm:$0xff] %vm6735_vm3, %v6734_v56  ;;  %v6733_v47 = vmax.f32 %v6669_v62, 0.0  ;;  %v7001_v42 = vsel %vm6735_vm3, %v6955_v29, -inf  ;;  %v15370_v45 = vld [vmem:[#allocation4 + $0x32] sm:$0xff]  ;;  %v7536_v13 = vld [vmem:[#allocation4 + $0xc2] sm:$0xff] }
 0x37c   :  { %v6858_v34 = vld [vmem:[#allocation3 + $0x1d0] ss:$2 sm:$0xff]  ;;  %v6922_v60 = vld [vmem:[#allocation3 + $0x1d1] ss:$2 sm:$0xff]  ;;  %v8895_v5 = vld [vmem:[#allocation4 + $0x82] sm:$0xff] }
 0x37d   :  { %v6956_v16 = vmax.f32 %v6858_v34, %v6922_v60  ;;  %6798 = vst.msk [vmem:[#allocation3 + $0x1f0] sm:$0xff] %vm6735_vm3, %v6733_v47  ;;  %v15381_v23 = vld [vmem:[#allocation4 + $0x52] sm:$0xff]  ;;  %v7538_v62 = vld [vmem:[#allocation4 + $0xe2] sm:$0xff] }
 0x37e   :  { %v15393_v6 = vld [vmem:[#allocation4 + $0x72] sm:$0xff] }
 0x37f   :  { %v7002_v49 = vsel %vm6735_vm3, %v6956_v16, -inf  ;;  %v7535_v26 = vld [vmem:[#allocation4 + $0xb2] sm:$0xff] }
 0x380   :  { %v7003_v2 = vmax.f32 %v7001_v42, %v7002_v49  ;;  %v6860_v22 = vld [vmem:[#allocation3 + $0x1e0] ss:$2 sm:$0xff]  ;;  %v6924_v21 = vld [vmem:[#allocation3 + $0x1e1] ss:$2 sm:$0xff]  ;;  %v8896_v63 = vld [vmem:[#allocation4 + $0x92] sm:$0xff] }
 0x381   :  { %v15265_v19 = vld [vmem:[#allocation4 + $0x100] sm:$0xff]  ;;  %v6957_v43 = vmax.f32 %v6860_v22, %v6924_v21  ;;  %v7537_v56 = vld [vmem:[#allocation4 + $0xd2] sm:$0xff] }
 0x382   :  { %v15267_v25 = vld [vmem:[#allocation4 + $0x101] sm:$0xff]  ;;  %7063 = vst.msk [vmem:[#allocation4 + $0x111] sm:$0xff] %vm6735_vm3, %v7003_v2  ;;  %12078 = vmatprep.mubr.msk.f32.mxu1 %vm6735_vm3, %v15265_v19  ;;  %v7539_v29 = vld [vmem:[#allocation4 + $0xf2] sm:$0xff] }
 0x383   :  { %12180 = vmatmul.mubr.msk.f32.gmra.mxu0 %vm6735_vm3, %v15267_v25  ;;  %v7004_v9 = vsel %vm6735_vm3, %v6957_v43, -inf  ;;  %v7540_v47 = vld [vmem:[#allocation4 + $0x102] sm:$0xff]  ;;  %v7753_v60 = vld [vmem:[#allocation4 + $0x10] sm:$0xff]  ;;  %v10371_v16 = vld [vmem:[%s15813_s3 + $0x38] sm:$0xff] }
 0x384   :  { %v6862_v54 = vld [vmem:[#allocation3 + $0x1f0] ss:$2 sm:$0xff]  ;;  %v6926_v52 = vld [vmem:[#allocation3 + $0x1f1] ss:$2 sm:$0xff]  ;;  %v12335_v42 = vld [vmem:[#allocation4 + $0x20] sm:$0xff] }
 0x385   :  { %v6958_v31 = vmax.f32 %v6862_v54, %v6926_v52  ;;  %v12336_v49 = vld [vmem:[#allocation4 + $0x30] sm:$0xff] }
 0x386   :  { %v8904_v22 = vld [vmem:[#allocation4 + $0x132] sm:$0xff] }
 0x387   :  { %v7005_v50 = vsel %vm6735_vm3, %v6958_v31, -inf  ;;  %v10252_v31 = vld [vmem:[%s15814_s4] ss:$0 sm:$0xff]  ;;  %s12361_s4 = smov [#allocation6]  }
 0x388   :  { %v7006_v40 = vmax.f32 %v7004_v9, %v7005_v50  ;;  %s9650_s26 = sshll.u32 %s12361_s4, 4  ;;  %s9651_s26 = int_to_ptr.vmem [resolvable:$true] %s9650_s26 }
 0x389   :  { %v15276_v12 = vld [vmem:[#allocation4 + $0x110] sm:$0xff]  ;;  %p12342_p1 = scmp.lt.s32.totalorder %s9651_s26, %s9651_s26 }
 0x38a   :  { %v15278_v53 = vld [vmem:[#allocation4 + $0x111] sm:$0xff]  ;;  %7064 = vst.msk [vmem:[#allocation4 + $0x121] sm:$0xff] %vm6735_vm3, %v7006_v40  ;;  %12079 = vmatmul.mubr.msk.f32.gmra.mxu1 %vm6735_vm3, %v15276_v12 }
 0x38b   :  { %12182 = vmatprep.mubr.msk.f32.mxu0 %vm6735_vm3, %v15278_v53  ;;  %12083 = vmatprep.mubr.msk.f32.mxu1 %vm6735_vm3, %v7299_v58  ;;  %v7541_v34 = vld [vmem:[#allocation4 + $0x112] sm:$0xff] }
 0x38e   :  { %12084 = vmatmul.mubr.msk.f32.vlgmr.msra.gmra.mxu1 %vm6735_vm3, %v12333_v39 }
 0x38f   :  { %12108 = vmatpush3.msra.mxu1 %v12334_v11  ;;  %12086 = vmatprep.mubr.msk.f32.mxu1 %vm6735_vm3, %v14931_v61  ;;  %v7307_v61 = vld [vmem:[#allocation4 + $0xa1] sm:$0xff] }
 0x390   :  { %12133 = vmatprep.subr.mxu1 %v10303_v57 }
 0x391   :  { %v15295_v37 = vld [vmem:[#allocation4 + $0x121] sm:$0xff] }
 0x392   :  { %12087 = vmatmul.mubr.msk.f32.gmra.mxu1 %vm6735_vm3, %v14963_v38  ;;  %12183 = vmatmul.mubr.msk.f32.gmra.mxu0 %vm6735_vm3, %v15295_v37  ;;  %v7526_v38 = vld [vmem:[#allocation4 + $0x2] sm:$0xff] }
 0x393   :  { %12089 = vmatprep.mubr.msk.f32.mxu1 %vm6735_vm3, %v14994_v48  ;;  %12213 = vmatprep.mubr.msk.f32.mxu0 %vm6735_vm3, %v14929_v59  ;;  %v15325_v59 = vld [vmem:[#allocation4 + $0x80] sm:$0xff]  ;;  %v15353_v48 = vld [vmem:[#allocation4 + $0x12] sm:$0xff] }
 0x394   :  { %v15366_v36 = vld [vmem:[#allocation4 + $0x120] sm:$0xff] }
 0x395   :  { %v8903_v2 = vld [vmem:[#allocation4 + $0x122] sm:$0xff] }
 0x396   :  { %12090 = vmatmul.mubr.msk.f32.gmra.mxu1 %vm6735_vm3, %v15031_v30  ;;  %12214 = vmatmul.mubr.msk.f32.vlgmr.msra.gmra.mxu0 %vm6735_vm3, %v14961_v18  ;;  %v8442_v18 = vld [vmem:[#allocation4 + $0x90] sm:$0xff] }
 0x397   :  { %12092 = vmatprep.mubr.msk.f32.mxu1 %vm6735_vm3, %v15062_v46  ;;  %12216 = vmatprep.mubr.msk.f32.mxu0 %vm6735_vm3, %v14992_v55 }
 0x398   :  { %12264 = vmatpush3.msra.mxu0 %v15010_v20  ;;  %v10337_v20 = vld [vmem:[%s15813_s3 + $0x28] sm:$0xff] }
 0x39a   :  { %12093 = vmatmul.mubr.msk.f32.gmra.mxu1 %vm6735_vm3, %v15093_v10  ;;  %12217 = vmatmul.mubr.msk.f32.gmra.mxu0 %vm6735_vm3, %v15029_v14 }
 0x39b   :  { %12219 = vmatprep.mubr.msk.f32.mxu0 %vm6735_vm3, %v15060_v35  ;;  %12095 = vmatprep.mubr.msk.f32.mxu1 %vm6735_vm3, %v7307_v61 }
 0x39e   :  { %12096 = vmatmul.mubr.msk.f32.gmra.mxu1 %vm6735_vm3, %v15152_v15  ;;  %12220 = vmatmul.mubr.msk.f32.gmra.mxu0 %vm6735_vm3, %v15091_v27  ;;  %v15362_v15 = vld [vmem:[#allocation4 + $0x22] sm:$0xff] }
 0x39f   :  { %12098 = vmatprep.mubr.msk.f32.mxu1 %vm6735_vm3, %v15183_v28  ;;  %12222 = vmatprep.mubr.msk.f32.mxu0 %vm6735_vm3, %v15325_v59 }
 0x3a2   :  { %12099 = vmatmul.mubr.msk.f32.gmra.mxu1 %vm6735_vm3, %v15210_v4  ;;  %12223 = vmatmul.mubr.msk.f32.gmra.mxu0 %vm6735_vm3, %v8442_v18 }
 0x3a3   :  { %12101 = vmatprep.mubr.msk.f32.mxu1 %vm6735_vm3, %v15235_v24  ;;  %12225 = vmatprep.mubr.msk.f32.mxu0 %vm6735_vm3, %v15181_v1 }
 0x3a6   :  { %12102 = vmatmul.mubr.msk.f32.gmra.mxu1 %vm6735_vm3, %v15254_v51  ;;  %12226 = vmatmul.mubr.msk.f32.gmra.mxu0 %vm6735_vm3, %v15208_v32 }
 0x3a7   :  { %12104 = vmatprep.mubr.msk.f32.mxu1 %vm6735_vm3, %v15267_v25  ;;  %12228 = vmatprep.mubr.msk.f32.mxu0 %vm6735_vm3, %v15233_v33 }
 0x3aa   :  { %12105 = vmatmul.mubr.msk.f32.gmra.mxu1 %vm6735_vm3, %v15278_v53  ;;  %12229 = vmatmul.mubr.msk.f32.gmra.mxu0 %vm6735_vm3, %v15252_v3 }
 0x3ab   :  { %12231 = vmatprep.mubr.msk.f32.mxu0 %vm6735_vm3, %v15265_v19  ;;  %12109 = vmatprep.mubr.msk.f32.mxu1 %vm6735_vm3, %v7526_v38 }
 0x3ae   :  { %12110 = vmatmul.mubr.msk.f32.vlgmr.msra.gmra.mxu1 %vm6735_vm3, %v15353_v48  ;;  %12232 = vmatmul.mubr.msk.f32.gmra.mxu0 %vm6735_vm3, %v15276_v12 }
 0x3af   :  { %12134 = vmatpush3.msra.mxu1 %v10303_v57  ;;  %12112 = vmatprep.mubr.msk.f32.mxu1 %vm6735_vm3, %v15362_v15 }
 0x3b0   :  { %12234 = vmatprep.mubr.msk.f32.mxu0 %vm6735_vm3, %v15366_v36  ;;  %12185 = vmatprep.subr.mxu1 %v10337_v20 }
 0x3b2   :  { %12113 = vmatmul.mubr.msk.f32.gmra.mxu1 %vm6735_vm3, %v15370_v45  ;;  %12235 = vmatmul.mubr.msk.f32.gmra.mxu0 %vm6735_vm3, %v8450_v17 }
 0x3b3   :  { %12115 = vmatprep.mubr.msk.f32.mxu1 %vm6735_vm3, %v15375_v0  ;;  %12265 = vmatprep.mubr.msk.f32.mxu0 %vm6735_vm3, %v15362_v15 }
 0x3b6   :  { %12116 = vmatmul.mubr.msk.f32.gmra.mxu1 %vm6735_vm3, %v15381_v23  ;;  %12266 = vmatmul.mubr.msk.f32.vlgmr.msra.gmra.mxu0 %vm6735_vm3, %v15370_v45 }
 0x3b7   :  { %12118 = vmatprep.mubr.msk.f32.mxu1 %vm6735_vm3, %v15387_v41  ;;  %12268 = vmatprep.mubr.msk.f32.mxu0 %vm6735_vm3, %v15375_v0 }
 0x3ba   :  { %12119 = vmatmul.mubr.msk.f32.gmra.mxu1 %vm6735_vm3, %v15393_v6  ;;  %12269 = vmatmul.mubr.msk.f32.gmra.mxu0 %vm6735_vm3, %v15381_v23 }
 0x3bb   :  { %12271 = vmatprep.mubr.msk.f32.mxu0 %vm6735_vm3, %v15387_v41  ;;  %12121 = vmatprep.mubr.msk.f32.mxu1 %vm6735_vm3, %v7534_v7 }
 0x3be   :  { %12122 = vmatmul.mubr.msk.f32.gmra.mxu1 %vm6735_vm3, %v7535_v26  ;;  %12272 = vmatmul.mubr.msk.f32.gmra.mxu0 %vm6735_vm3, %v15393_v6 }
 0x3bf   :  { %12124 = vmatprep.mubr.msk.f32.mxu1 %vm6735_vm3, %v7536_v13  ;;  %12274 = vmatprep.mubr.msk.f32.mxu0 %vm6735_vm3, %v8895_v5 }
 0x3c2   :  { %12125 = vmatmul.mubr.msk.f32.gmra.mxu1 %vm6735_vm3, %v7537_v56  ;;  %12275 = vmatmul.mubr.msk.f32.gmra.mxu0 %vm6735_vm3, %v8896_v63 }
 0x3c3   :  { %12127 = vmatprep.mubr.msk.f32.mxu1 %vm6735_vm3, %v7538_v62  ;;  %12277 = vmatprep.mubr.msk.f32.mxu0 %vm6735_vm3, %v7536_v13 }
 0x3c6   :  { %12128 = vmatmul.mubr.msk.f32.gmra.mxu1 %vm6735_vm3, %v7539_v29  ;;  %12278 = vmatmul.mubr.msk.f32.gmra.mxu0 %vm6735_vm3, %v7537_v56 }
 0x3c7   :  { %12130 = vmatprep.mubr.msk.f32.mxu1 %vm6735_vm3, %v7540_v47  ;;  %12280 = vmatprep.mubr.msk.f32.mxu0 %vm6735_vm3, %v7538_v62 }
 0x3ca   :  { %12131 = vmatmul.mubr.msk.f32.gmra.mxu1 %vm6735_vm3, %v7541_v34  ;;  %12281 = vmatmul.mubr.msk.f32.gmra.mxu0 %vm6735_vm3, %v7539_v29 }
 0x3cb   :  { %12135 = vmatprep.mubr.msk.f32.mxu1 %vm6735_vm3, %v7753_v60  ;;  %12283 = vmatprep.mubr.msk.f32.mxu0 %vm6735_vm3, %v7540_v47 }
 0x3ce   :  { %12136 = vmatmul.mubr.msk.f32.vlgmr.msra.gmra.mxu1 %vm6735_vm3, %v12335_v42  ;;  %12284 = vmatmul.mubr.msk.f32.gmra.mxu0 %vm6735_vm3, %v7541_v34 }
 0x3cf   :  { %12186 = vmatpush3.msra.mxu1 %v10337_v20  ;;  %12138 = vmatprep.mubr.msk.f32.mxu1 %vm6735_vm3, %v12336_v49 }
 0x3d0   :  { %12286 = vmatprep.mubr.msk.f32.mxu0 %vm6735_vm3, %v8903_v2  ;;  %12237 = vmatprep.subr.mxu1 %v10371_v16 }
 0x3d2   :  { %12139 = vmatmul.mubr.msk.f32.gmra.mxu1 %vm6735_vm3, %v14992_v55  ;;  %12287 = vmatmul.mubr.msk.f32.gmra.mxu0 %vm6735_vm3, %v8904_v22  ;;  %v16098_v55 = vmov 0.0  }
 0x3d3   :  { %12141 = vmatprep.mubr.msk.f32.mxu1 %vm6735_vm3, %v15029_v14  ;;  %v8662_v14 = vld [vmem:[#allocation4 + $0x21] sm:$0xff] }
 0x3d6   :  { %12142 = vmatmul.mubr.msk.f32.gmra.mxu1 %vm6735_vm3, %v15060_v35  ;;  %v8663_v35 = vld [vmem:[#allocation4 + $0x31] sm:$0xff] }
 0x3d7   :  { %12144 = vmatprep.mubr.msk.f32.mxu1 %vm6735_vm3, %v15091_v27  ;;  %v8664_v27 = vld [vmem:[#allocation4 + $0x41] sm:$0xff] }
 0x3da   :  { %12145 = vmatmul.mubr.msk.f32.gmra.mxu1 %vm6735_vm3, %v15325_v59 }
 0x3db   :  { %12147 = vmatprep.mubr.msk.f32.mxu1 %vm6735_vm3, %v15150_v44  ;;  %v8669_v44 = vld [vmem:[#allocation4 + $0x91] sm:$0xff] }
 0x3de   :  { %12148 = vmatmul.mubr.msk.f32.gmra.mxu1 %vm6735_vm3, %v15181_v1 }
 0x3df   :  { %12150 = vmatprep.mubr.msk.f32.mxu1 %vm6735_vm3, %v15208_v32 }
 0x3e2   :  { %12151 = vmatmul.mubr.msk.f32.gmra.mxu1 %vm6735_vm3, %v15233_v33 }
 0x3e3   :  { %12153 = vmatprep.mubr.msk.f32.mxu1 %vm6735_vm3, %v15252_v3  ;;  %v15504_v21 = vpop.f32.mrf.mxu0 }
 0x3e5   :  { %v15506_v43 = vpop.f32.mrf.mxu0 }
 0x3e6   :  { %12154 = vmatmul.mubr.msk.f32.gmra.mxu1 %vm6735_vm3, %v15265_v19 }
 0x3e7   :  { %12156 = vmatprep.mubr.msk.f32.mxu1 %vm6735_vm3, %v15276_v12 }
 0x3ea   :  { %12157 = vmatmul.mubr.msk.f32.gmra.mxu1 %vm6735_vm3, %v15366_v36 }
 0x3eb   :  { %12187 = vmatprep.mubr.msk.f32.mxu1 %vm6735_vm3, %v15353_v48 }
 0x3ee   :  { %12188 = vmatmul.mubr.msk.f32.vlgmr.msra.gmra.mxu1 %vm6735_vm3, %v15362_v15 }
 0x3ef   :  { %12238 = vmatpush3.msra.mxu1 %v10371_v16  ;;  %12190 = vmatprep.mubr.msk.f32.mxu1 %vm6735_vm3, %v15370_v45 }
 0x3f0   :  { %12289 = vmatprep.subr.mxu1 %v16098_v55 }
 0x3f2   :  { %12191 = vmatmul.mubr.msk.f32.gmra.mxu1 %vm6735_vm3, %v15375_v0 }
 0x3f3   :  { %12193 = vmatprep.mubr.msk.f32.mxu1 %vm6735_vm3, %v15381_v23  ;;  %v15508_v54 = vpop.f32.mrf.mxu0 }
 0x3f5   :  { %v15513_v50 = vpop.f32.mrf.mxu0 }
 0x3f6   :  { %12194 = vmatmul.mubr.msk.f32.gmra.mxu1 %vm6735_vm3, %v15387_v41 }
 0x3f7   :  { %12196 = vmatprep.mubr.msk.f32.mxu1 %vm6735_vm3, %v15393_v6 }
 0x3fa   :  { %12197 = vmatmul.mubr.msk.f32.gmra.mxu1 %vm6735_vm3, %v8895_v5 }
 0x3fb   :  { %12199 = vmatprep.mubr.msk.f32.mxu1 %vm6735_vm3, %v7535_v26 }
 0x3fe   :  { %12200 = vmatmul.mubr.msk.f32.gmra.mxu1 %vm6735_vm3, %v7536_v13 }
 0x3ff   :  { %12202 = vmatprep.mubr.msk.f32.mxu1 %vm6735_vm3, %v7537_v56 }
 0x402   :  { %12203 = vmatmul.mubr.msk.f32.gmra.mxu1 %vm6735_vm3, %v7538_v62 }
 0x403   :  { %12205 = vmatprep.mubr.msk.f32.mxu1 %vm6735_vm3, %v7539_v29  ;;  %v15515_v12 = vpop.f32.mrf.mxu0 }
 0x405   :  { %v15517_v59 = vpop.f32.mrf.mxu0 }
 0x406   :  { %12206 = vmatmul.mubr.msk.f32.gmra.mxu1 %vm6735_vm3, %v7540_v47 }
 0x407   :  { %12208 = vmatprep.mubr.msk.f32.mxu1 %vm6735_vm3, %v7541_v34 }
 0x40a   :  { %12209 = vmatmul.mubr.msk.f32.gmra.mxu1 %vm6735_vm3, %v8903_v2 }
 0x40b   :  { %12239 = vmatprep.mubr.msk.f32.mxu1 %vm6735_vm3, %v8662_v14 }
 0x40e   :  { %12240 = vmatmul.mubr.msk.f32.vlgmr.msra.gmra.mxu1 %vm6735_vm3, %v8663_v35 }
 0x40f   :  { %12242 = vmatprep.mubr.msk.f32.mxu1 %vm6735_vm3, %v8664_v27 }
 0x412   :  { %12243 = vmatmul.mubr.msk.f32.gmra.mxu1 %vm6735_vm3, %v15031_v30  ;;  %v12059_v30 = vpop.f32.mrf.mxu1  ;;  %v15519_v20 = vpop.f32.mrf.mxu0 }
 0x413   :  { %12245 = vmatprep.mubr.msk.f32.mxu1 %vm6735_vm3, %v15062_v46  ;;  %v7284_v58 = vadd.f32 %v12059_v30, %v10252_v31 }
 0x414   :  { %v7204_v46 = vpop.f32.mrf.mxu1  ;;  %v15521_v41 = vpop.f32.mrf.mxu0 }
 0x415   :  { %v7283_v57 = vadd.f32 %v10252_v31, %v7204_v46 }
 0x416   :  { %12246 = vmatmul.mubr.msk.f32.gmra.mxu1 %vm6735_vm3, %v15093_v10  ;;  %v12062_v10 = vpop.f32.mrf.mxu1 }
 0x417   :  { %12248 = vmatprep.mubr.msk.f32.mxu1 %vm6735_vm3, %v15123_v8  ;;  %v8677_v8 = vld [vmem:[#allocation4 + $0x131] sm:$0xff] }
 0x418   :  { %v7214_v1 = vpop.f32.mrf.mxu1 }
 0x419   :  { %v7285_v38 = vadd.f32 %v10252_v31, %v7214_v1 }
 0x41a   :  { %12249 = vmatmul.mubr.msk.f32.gmra.mxu1 %vm6735_vm3, %v8669_v44 }
 0x41b   :  { %12251 = vmatprep.mubr.msk.f32.mxu1 %vm6735_vm3, %v15183_v28  ;;  %v12065_v28 = vpop.f32.mrf.mxu1 }
 0x41c   :  { %v7288_v36 = vadd.f32 %v12065_v28, %v10252_v31 }
 0x41d   :  { %v7224_v32 = vpop.f32.mrf.mxu1 }
 0x41e   :  { %12252 = vmatmul.mubr.msk.f32.gmra.mxu1 %vm6735_vm3, %v15210_v4  ;;  %v7287_v0 = vadd.f32 %v10252_v31, %v7224_v32 }
 0x41f   :  { %12254 = vmatprep.mubr.msk.f32.mxu1 %vm6735_vm3, %v15235_v24  ;;  %v12068_v4 = vpop.f32.mrf.mxu1 }
 0x420   :  { %v7290_v6 = vadd.f32 %v12068_v4, %v10252_v31 }
 0x421   :  { %v7234_v33 = vpop.f32.mrf.mxu1 }
 0x422   :  { %12255 = vmatmul.mubr.msk.f32.gmra.mxu1 %vm6735_vm3, %v15254_v51  ;;  %v7289_v63 = vadd.f32 %v10252_v31, %v7234_v33 }
 0x423   :  { %12257 = vmatprep.mubr.msk.f32.mxu1 %vm6735_vm3, %v15267_v25  ;;  %v12071_v24 = vpop.f32.mrf.mxu1  ;;  %v15523_v13 = vpop.f32.mrf.mxu0 }
 0x424   :  { %v7292_v29 = vadd.f32 %v12071_v24, %v10252_v31 }
 0x425   :  { %v7244_v3 = vpop.f32.mrf.mxu1  ;;  %v15525_v34 = vpop.f32.mrf.mxu0 }
 0x426   :  { %12258 = vmatmul.mubr.msk.f32.gmra.mxu1 %vm6735_vm3, %v15278_v53  ;;  %v7291_v16 = vadd.f32 %v10252_v31, %v7244_v3 }
 0x427   :  { %12260 = vmatprep.mubr.msk.f32.mxu1 %vm6735_vm3, %v15295_v37  ;;  %v7286_v37 = vadd.f32 %v12062_v10, %v10252_v31 }
 0x42a   :  { %12261 = vmatmul.mubr.msk.f32.gmra.mxu1 %vm6735_vm3, %v8677_v8  ;;  %v12074_v51 = vpop.f32.mrf.mxu1 }
 0x42b   :  { %v7294_v22 = vadd.f32 %v12074_v51, %v10252_v31  ;;  %12293 = vmatprep.mubr.msk.f32.mxu1 %vm12360_vm5, %v16098_v55 }
 0x42c   :  { %v7254_v19 = vpop.f32.mrf.mxu1 }
 0x42d   :  { %v7293_v27 = vadd.f32 %v10252_v31, %v7254_v19  ;;  %v9241_v19 = vld [vmem:[%s15815_s5 + $0x8] sm:$0xff] }
 0x42e   :  { %12290 = vmatpush3.msra.mxu1 %v9241_v19 }
 0x42f   :  { %12291 = vmatprep.subr.mxu1 %v16098_v55 }
 0x433   :  { %v15527_v49 = vpop.f32.mrf.mxu0 }
 0x434   :  { %16099 = vst [vmem:[#allocation13_spill] sm:$0xff] %v15527_v49 }
 0x435   :  { %v15529_v30 = vpop.f32.mrf.mxu0 }
 0x436   :  { %16100 = vst [vmem:[#allocation15_spill] sm:$0xff] %v15529_v30 }
 0x43a   :  { %v12077_v25 = vpop.f32.mrf.mxu1 }
 0x43b   :  { %v7296_v10 = vadd.f32 %v12077_v25, %v10252_v31 }
 0x43c   :  { %v7264_v52 = vpop.f32.mrf.mxu1 }
 0x43d   :  { %v7295_v32 = vadd.f32 %v10252_v31, %v7264_v52 }
 0x443   :  { %v15531_v1 = vpop.f32.mrf.mxu0 }
 0x444   :  { %16101 = vst [vmem:[#allocation10_spill] sm:$0xff] %v15531_v1 }
 0x44a   :  { %v12080_v9 = vpop.f32.mrf.mxu1 }
 0x44b   :  { %v7298_v24 = vadd.f32 %v12080_v9, %v10252_v31 }
 0x44c   :  { %v7274_v40 = vpop.f32.mrf.mxu1 }
 0x44e   :  { %v12085_v53 = vpop.f32.mrf.mxu1 }
 0x44f   :  { %v7511_v39 = vadd.f32 %v12085_v53, %v7284_v58  ;;  %v15533_v58 = vpop.f32.mrf.mxu0  ;;  %v7297_v53 = vadd.f32 %v10252_v31, %v7274_v40 }
 0x450   :  { %v7431_v11 = vpop.f32.mrf.mxu1  ;;  %16102 = vst [vmem:[#allocation25_spill] sm:$0xff] %v15533_v58 }
 0x451   :  { %v7510_v61 = vadd.f32 %v7431_v11, %v7283_v57 }
 0x452   :  { %v12088_v18 = vpop.f32.mrf.mxu1  ;;  %v15538_v11 = vpop.f32.mrf.mxu0 }
 0x453   :  { %v7513_v48 = vadd.f32 %v12088_v18, %v7286_v37  ;;  %16103 = vst [vmem:[#allocation24_spill] sm:$0xff] %v15538_v11 }
 0x454   :  { %v7441_v15 = vpop.f32.mrf.mxu1  ;;  %v15543_v9 = vpop.f32.mrf.mxu0 }
 0x455   :  { %v7512_v17 = vadd.f32 %v7441_v15, %v7285_v38  ;;  %16104 = vst [vmem:[#allocation16_spill] sm:$0xff] %v15543_v9 }
 0x456   :  { %v12091_v45 = vpop.f32.mrf.mxu1 }
 0x457   :  { %v7515_v23 = vadd.f32 %v12091_v45, %v7288_v36  ;;  %v9240_v36 = vld [vmem:[%s15815_s5] sm:$0xff]  ;;  %v15552_v45 = vpop.f32.mrf.mxu0 }
 0x458   :  { %v7451_v7 = vpop.f32.mrf.mxu1  ;;  %12292 = vmatpush3.msra.mxu1 %v9240_v36 }
 0x459   :  { %v7514_v26 = vadd.f32 %v7451_v7, %v7287_v0  ;;  %12296 = vmatprep.subr.mxu1 %v16098_v55 }
 0x45a   :  { %v12094_v5 = vpop.f32.mrf.mxu1 }
 0x45b   :  { %v7517_v56 = vadd.f32 %v12094_v5, %v7290_v6 }
 0x45c   :  { %v7461_v62 = vpop.f32.mrf.mxu1 }
 0x45d   :  { %v7516_v47 = vadd.f32 %v7461_v62, %v7289_v63 }
 0x45e   :  { %v12097_v60 = vpop.f32.mrf.mxu1 }
 0x45f   :  { %v7519_v42 = vadd.f32 %v12097_v60, %v7292_v29 }
 0x460   :  { %v7471_v2 = vpop.f32.mrf.mxu1 }
 0x461   :  { %v7518_v14 = vadd.f32 %v7471_v2, %v7291_v16 }
 0x462   :  { %v12100_v35 = vpop.f32.mrf.mxu1 }
 0x463   :  { %v7521_v44 = vadd.f32 %v12100_v35, %v7294_v22 }
 0x464   :  { %v7481_v46 = vpop.f32.mrf.mxu1 }
 0x465   :  { %v7520_v8 = vadd.f32 %v7481_v46, %v7293_v27 }
 0x466   :  { %v12103_v28 = vpop.f32.mrf.mxu1 }
 0x467   :  { %v7523_v4 = vadd.f32 %v12103_v28, %v7296_v10 }
 0x468   :  { %v7491_v33 = vpop.f32.mrf.mxu1 }
 0x469   :  { %v7522_v3 = vadd.f32 %v7491_v33, %v7295_v32 }
 0x46a   :  { %v12106_v51 = vpop.f32.mrf.mxu1 }
 0x46b   :  { %v7525_v57 = vadd.f32 %v12106_v51, %v7298_v24 }
 0x46c   :  { %v7501_v25 = vpop.f32.mrf.mxu1 }
 0x46d   :  { %v7524_v37 = vadd.f32 %v7501_v25, %v7297_v53 }
 0x46e   :  { %v12111_v52 = vpop.f32.mrf.mxu1 }
 0x46f   :  { %v15541_v18 = vadd.f32 %v12111_v52, %v7511_v39 }
 0x470   :  { %v7658_v38 = vpop.f32.mrf.mxu1 }
 0x471   :  { %v15545_v15 = vadd.f32 %v7658_v38, %v7510_v61 }
 0x472   :  { %v12114_v31 = vpop.f32.mrf.mxu1 }
 0x473   :  { %v15547_v40 = vadd.f32 %v12114_v31, %v7513_v48  ;;  %v15561_v48 = vpop.f32.mrf.mxu0 }
 0x474   :  { %v7668_v0 = vpop.f32.mrf.mxu1 }
 0x475   :  { %v15556_v39 = vadd.f32 %v7668_v0, %v7512_v17  ;;  %v15567_v29 = vpop.f32.mrf.mxu0 }
 0x476   :  { %v12117_v61 = vpop.f32.mrf.mxu1 }
 0x477   :  { %v15559_v7 = vadd.f32 %v12117_v61, %v7515_v23  ;;  %v15573_v22 = vpop.f32.mrf.mxu0 }
 0x478   :  { %v7678_v6 = vpop.f32.mrf.mxu1 }
 0x479   :  { %v15563_v5 = vadd.f32 %v7678_v6, %v7514_v26  ;;  %v15579_v26 = vpop.f32.mrf.mxu0 }
 0x47a   :  { %v12120_v63 = vpop.f32.mrf.mxu1 }
 0x47b   :  { %v15565_v62 = vadd.f32 %v12120_v63, %v7517_v56 }
 0x47c   :  { %v7688_v60 = vpop.f32.mrf.mxu1 }
 0x47d   :  { %v15569_v16 = vadd.f32 %v7688_v60, %v7516_v47  ;;  %v15585_v47 = vpop.f32.mrf.mxu0 }
 0x47e   :  { %v12123_v17 = vpop.f32.mrf.mxu1 }
 0x47f   :  { %v15571_v2 = vadd.f32 %v12123_v17, %v7519_v42 }
 0x480   :  { %v7698_v23 = vpop.f32.mrf.mxu1 }
 0x481   :  { %v15575_v35 = vadd.f32 %v7698_v23, %v7518_v14  ;;  %v15591_v14 = vpop.f32.mrf.mxu0 }
 0x482   :  { %v12126_v27 = vpop.f32.mrf.mxu1  ;;  %16108 = vst [vmem:[#allocation9_spill] sm:$0xff] %v15591_v14 }
 0x483   :  { %v15577_v46 = vadd.f32 %v12126_v27, %v7521_v44  ;;  %v15595_v25 = vpop.f32.mrf.mxu0 }
 0x484   :  { %v7708_v56 = vpop.f32.mrf.mxu1  ;;  %16110 = vst [vmem:[#allocation61_spill] sm:$0xff] %v15595_v25 }
 0x485   :  { %v15581_v10 = vadd.f32 %v7708_v56, %v7520_v8 }
 0x486   :  { %v12129_v28 = vpop.f32.mrf.mxu1 }
 0x487   :  { %v15583_v32 = vadd.f32 %v12129_v28, %v7523_v4  ;;  %v15597_v4 = vpop.f32.mrf.mxu0 }
 0x488   :  { %v7718_v42 = vpop.f32.mrf.mxu1  ;;  %16111 = vst [vmem:[#allocation60_spill] sm:$0xff] %v15597_v4 }
 0x489   :  { %16105 = vst [vmem:[#allocation27_spill] sm:$0xff] %v15583_v32  ;;  %v15587_v33 = vadd.f32 %v7718_v42, %v7522_v3  ;;  %v15599_v36 = vpop.f32.mrf.mxu0 }
 0x48a   :  { %v12132_v24 = vpop.f32.mrf.mxu1  ;;  %16112 = vst [vmem:[#allocation11_spill] sm:$0xff] %v15599_v36 }
 0x48b   :  { %16106 = vst [vmem:[#allocation14_spill] sm:$0xff] %v15587_v33  ;;  %v15589_v51 = vadd.f32 %v12132_v24, %v7525_v57  ;;  %v15601_v57 = vpop.f32.mrf.mxu0 }
 0x48c   :  { %v7728_v44 = vpop.f32.mrf.mxu1  ;;  %16113 = vst [vmem:[#allocation31_spill] sm:$0xff] %v15601_v57 }
 0x48d   :  { %16107 = vst [vmem:[#allocation26_spill] sm:$0xff] %v15589_v51  ;;  %v15593_v53 = vadd.f32 %v7728_v44, %v7524_v37  ;;  %v15605_v37 = vpop.f32.mrf.mxu0 }
 0x48e   :  { %v12137_v19 = vpop.f32.mrf.mxu1  ;;  %16114 = vst [vmem:[#allocation63_spill] sm:$0xff] %v15605_v37 }
 0x48f   :  { %16109 = vst [vmem:[#allocation29_spill] sm:$0xff] %v15593_v53  ;;  %v15611_v17 = vpop.f32.mrf.mxu0 }
 0x490   :  { %v7885_v8 = vpop.f32.mrf.mxu1  ;;  %16115 = vst [vmem:[#allocation62_spill] sm:$0xff] %v15611_v17 }
 0x491   :  { %v15617_v56 = vpop.f32.mrf.mxu0  ;;  %v7964_v33 = vadd.f32 %v7885_v8, %v15545_v15 }
 0x492   :  { %v12140_v52 = vpop.f32.mrf.mxu1  ;;  %16117 = vst [vmem:[#allocation33_spill] sm:$0xff] %v15617_v56 }
 0x493   :  { %v15623_v24 = vpop.f32.mrf.mxu0  ;;  %v7967_v49 = vadd.f32 %v12140_v52, %v15547_v40 }
 0x494   :  { %v7895_v38 = vpop.f32.mrf.mxu1  ;;  %16120 = vst [vmem:[#allocation30_spill] sm:$0xff] %v15623_v24 }
 0x495   :  { %v15627_v9 = vpop.f32.mrf.mxu0  ;;  %v8194_v8 = vadd.f32 %v15508_v54, %v7967_v49 }
 0x496   :  { %v12143_v31 = vpop.f32.mrf.mxu1  ;;  %16122 = vst [vmem:[#allocation67_spill] sm:$0xff] %v15627_v9  ;;  %v7965_v9 = vadd.f32 %v12137_v19, %v15541_v18  ;;  %v8191_v18 = vadd.f32 %v15506_v43, %v7964_v33 }
 0x497   :  { %v12267_v17 = vpop.f32.mrf.mxu0  ;;  %v7969_v19 = vadd.f32 %v12143_v31, %v15559_v7 }
 0x498   :  { %v7905_v3 = vpop.f32.mrf.mxu1 }
 0x499   :  { %v9021_v53 = vpop.f32.mrf.mxu0 }
 0x49a   :  { %v12146_v0 = vpop.f32.mrf.mxu1 }
 0x49b   :  { %v12270_v56 = vpop.f32.mrf.mxu0  ;;  %v7971_v43 = vadd.f32 %v12146_v0, %v15565_v62 }
 0x49c   :  { %v7915_v61 = vpop.f32.mrf.mxu1 }
 0x49d   :  { %v8198_v0 = vadd.f32 %v15519_v20, %v7971_v43  ;;  %v16131_v43 = vld [vmem:[#allocation13_spill] sm:$0xff] }
 0x49e   :  { %v15603_v6 = vpop.f32.mrf.mxu1 }
 0x4a0   :  { %v15607_v63 = vpop.f32.mrf.mxu1 }
 0x4a2   :  { %v15609_v60 = vpop.f32.mrf.mxu1 }
 0x4a4   :  { %v15613_v23 = vpop.f32.mrf.mxu1 }
 0x4a6   :  { %v15615_v27 = vpop.f32.mrf.mxu1 }
 0x4a7   :  { %16116 = vst [vmem:[#allocation28_spill] sm:$0xff] %v15615_v27  ;;  %v8192_v27 = vadd.f32 %v15504_v21, %v7965_v9  ;;  %v7968_v21 = vadd.f32 %v7905_v3, %v15563_v5  ;;  %v7970_v5 = vadd.f32 %v7915_v61, %v15569_v16 }
 0x4a8   :  { %v15619_v28 = vpop.f32.mrf.mxu1 }
 0x4a9   :  { %16118 = vst [vmem:[#allocation65_spill] sm:$0xff] %v15619_v28 }
 0x4aa   :  { %v15621_v42 = vpop.f32.mrf.mxu1 }
 0x4ab   :  { %16119 = vst [vmem:[#allocation64_spill] sm:$0xff] %v15621_v42  ;;  %v15633_v42 = vpop.f32.mrf.mxu0 }
 0x4ac   :  { %v15625_v44 = vpop.f32.mrf.mxu1 }
 0x4ad   :  { %16121 = vst [vmem:[#allocation35_spill] sm:$0xff] %v15625_v44  ;;  %v15640_v30 = vpop.f32.mrf.mxu0 }
 0x4ae   :  { %v12189_v55 = vpop.f32.mrf.mxu1 }
 0x4af   :  { %v15649_v32 = vpop.f32.mrf.mxu0 }
 0x4b0   :  { %v8339_v37 = vpop.f32.mrf.mxu1 }
 0x4b1   :  { %v8418_v15 = vadd.f32 %v8339_v37, %v8191_v18 }
 0x4b2   :  { %v12192_v11 = vpop.f32.mrf.mxu1 }
 0x4b3   :  { %v8421_v40 = vadd.f32 %v12192_v11, %v8194_v8  ;;  %v8646_v54 = vadd.f32 %v15561_v48, %v8418_v15  ;;  %v8195_v11 = vadd.f32 %v15517_v59, %v7968_v21  ;;  %v7972_v59 = vadd.f32 %v15607_v63, %v15575_v35  ;;  %v16127_v15 = vld [vmem:[#allocation9_spill] sm:$0xff]  ;;  %v16128_v21 = vld [vmem:[#allocation27_spill] sm:$0xff] }
 0x4b4   :  { %v8349_v57 = vpop.f32.mrf.mxu1 }
 0x4b6   :  { %v12195_v58 = vpop.f32.mrf.mxu1 }
 0x4b8   :  { %v8359_v36 = vpop.f32.mrf.mxu1 }
 0x4b9   :  { %v8422_v62 = vadd.f32 %v8359_v36, %v8195_v11 }
 0x4ba   :  { %v12198_v1 = vpop.f32.mrf.mxu1 }
 0x4bb   :  { %v8425_v36 = vadd.f32 %v12198_v1, %v8198_v0  ;;  %v8650_v18 = vadd.f32 %v15585_v47, %v8422_v62 }
 0x4bc   :  { %v15629_v51 = vpop.f32.mrf.mxu1 }
 0x4bd   :  { %v8653_v8 = vadd.f32 %v16127_v15, %v8425_v36 }
 0x4be   :  { %v15631_v4 = vpop.f32.mrf.mxu1 }
 0x4c0   :  { %v15635_v24 = vpop.f32.mrf.mxu1 }
 0x4c1   :  { %16123 = vst [vmem:[#allocation66_spill] sm:$0xff] %v15635_v24  ;;  %v8419_v24 = vadd.f32 %v12189_v55, %v8192_v27 }
 0x4c2   :  { %v15637_v44 = vpop.f32.mrf.mxu1 }
 0x4c3   :  { %16124 = vst [vmem:[#allocation32_spill] sm:$0xff] %v15637_v44  ;;  %v7966_v44 = vadd.f32 %v7895_v38, %v15556_v39  ;;  %v8647_v55 = vadd.f32 %v15552_v45, %v8419_v24  ;;  %v8196_v39 = vadd.f32 %v15515_v12, %v7969_v19  ;;  %v8649_v45 = vadd.f32 %v15567_v29, %v8421_v40 }
 0x4c4   :  { %v15642_v28 = vpop.f32.mrf.mxu1  ;;  %v7973_v12 = vadd.f32 %v15603_v6, %v15571_v2  ;;  %v8197_v29 = vadd.f32 %v15521_v41, %v7970_v5 }
 0x4c5   :  { %16125 = vst [vmem:[#allocation37_spill] sm:$0xff] %v15642_v28  ;;  %v8193_v52 = vadd.f32 %v15513_v50, %v7966_v44  ;;  %v8423_v31 = vadd.f32 %v12195_v58, %v8196_v39 }
 0x4c6   :  { %v15645_v25 = vpop.f32.mrf.mxu1  ;;  %v8424_v35 = vadd.f32 %v15629_v51, %v8197_v29  ;;  %v16141_v29 = vld [vmem:[#allocation11_spill] sm:$0xff] }
 0x4c7   :  { %16126 = vst [vmem:[#allocation69_spill] sm:$0xff] %v15645_v25  ;;  %v15659_v25 = vpop.f32.mrf.mxu0  ;;  %v8420_v33 = vadd.f32 %v8349_v57, %v8193_v52  ;;  %v8651_v2 = vadd.f32 %v15579_v26, %v8423_v31  ;;  %v16135_v31 = vld [vmem:[#allocation15_spill] sm:$0xff] }
 0x4c8   :  { %v15651_v14 = vpop.f32.mrf.mxu1  ;;  %v16130_v52 = vld [vmem:[#allocation66_spill] sm:$0xff] }
 0x4c9   :  { %v15669_v49 = vpop.f32.mrf.mxu0  ;;  %v8648_v58 = vadd.f32 %v15573_v22, %v8420_v33  ;;  %v8200_v22 = vadd.f32 %v15523_v13, %v7973_v12 }
 0x4ca   :  { %v15656_v28 = vpop.f32.mrf.mxu1 }
 0x4cb   :  { %v15678_v16 = vpop.f32.mrf.mxu0  ;;  %v8427_v19 = vadd.f32 %v15631_v4, %v8200_v22  ;;  %v16143_v22 = vld [vmem:[#allocation29_spill] sm:$0xff] }
 0x4cc   :  { %v15662_v9 = vpop.f32.mrf.mxu1 }
 0x4cd   :  { %v9061_v63 = vpop.f32.mrf.mxu0 }
 0x4ce   :  { %v12241_v7 = vpop.f32.mrf.mxu1 }
 0x4cf   :  { %v8874_v38 = vadd.f32 %v12241_v7, %v8647_v55  ;;  %v16132_v7 = vld [vmem:[#allocation61_spill] sm:$0xff] }
 0x4d0   :  { %v8794_v3 = vpop.f32.mrf.mxu1  ;;  %v8652_v33 = vadd.f32 %v16132_v7, %v8424_v35 }
 0x4d1   :  { %v9101_v50 = vadd.f32 %v12267_v17, %v8874_v38  ;;  %v8873_v37 = vadd.f32 %v8794_v3, %v8646_v54  ;;  %v16133_v38 = vld [vmem:[#allocation14_spill] sm:$0xff]  ;;  %v16134_v54 = vld [vmem:[#allocation65_spill] sm:$0xff] }
 0x4d2   :  { %v12244_v48 = vpop.f32.mrf.mxu1  ;;  %v7976_v5 = vadd.f32 %v16134_v54, %v16133_v38 }
 0x4d3   :  { %v9117_v57 = vmax.f32 %v9101_v50, 0.0  ;;  %v9100_v27 = vadd.f32 %v9021_v53, %v8873_v37  ;;  %v8876_v24 = vadd.f32 %v12244_v48, %v8649_v45  ;;  %v7975_v53 = vadd.f32 %v15609_v60, %v15577_v46  ;;  %v16136_v50 = vld [vmem:[#allocation60_spill] sm:$0xff]  ;;  %v16138_v48 = vld [vmem:[#allocation26_spill] sm:$0xff] }
 0x4d4   :  { %v8804_v61 = vpop.f32.mrf.mxu1  ;;  %v8199_v46 = vadd.f32 %v15525_v34, %v7972_v59  ;;  %v8655_v37 = vadd.f32 %v16136_v50, %v8427_v19  ;;  %v16137_v45 = vld [vmem:[#allocation32_spill] sm:$0xff] }
 0x4d5   :  { %9134 = vst.msk [vmem:[#allocation5 + $0x8] sm:$0xff] %vm9132_vm6, %v9117_v57  ;;  %v9116_v20 = vmax.f32 %v9100_v27, 0.0  ;;  %v9103_v6 = vadd.f32 %v12270_v56, %v8876_v24  ;;  %v8875_v17 = vadd.f32 %v8804_v61, %v8648_v58  ;;  %v7974_v56 = vadd.f32 %v15613_v23, %v15581_v10  ;;  %v16139_v57 = vld [vmem:[#allocation64_spill] sm:$0xff]  ;;  %v16140_v24 = vld [vmem:[#allocation10_spill] sm:$0xff] }
 0x4d6   :  { %v12247_v44 = vpop.f32.mrf.mxu1  ;;  %v8426_v55 = vadd.f32 %v16130_v52, %v8199_v46  ;;  %v8202_v10 = vadd.f32 %v16131_v43, %v7975_v53  ;;  %v7979_v27 = vadd.f32 %v16139_v57, %v16138_v48  ;;  %v16150_v43 = vld [vmem:[#allocation16_spill] sm:$0xff] }
 0x4d7   :  { %9133 = vst.msk [vmem:[#allocation5] sm:$0xff] %vm9132_vm6, %v9116_v20  ;;  %v9119_v41 = vmax.f32 %v9103_v6, 0.0  ;;  %v9102_v1 = vadd.f32 %v15633_v42, %v8875_v17  ;;  %v8878_v26 = vadd.f32 %v12247_v44, %v8651_v2  ;;  %v16129_v42 = vld [vmem:[#allocation28_spill] sm:$0xff]  ;;  %v8201_v11 = vadd.f32 %v16135_v31, %v7974_v56  ;;  %v16142_v2 = vld [vmem:[#allocation37_spill] sm:$0xff] }
 0x4d8   :  { %v8814_v13 = vpop.f32.mrf.mxu1  ;;  %v7977_v40 = vadd.f32 %v16129_v42, %v16128_v21  ;;  %v8429_v12 = vadd.f32 %v16137_v45, %v8202_v10  ;;  %v8654_v61 = vadd.f32 %v16141_v29, %v8426_v55 }
 0x4d9   :  { %9136 = vst.msk [vmem:[#allocation5 + $0x18] sm:$0xff] %vm9132_vm6, %v9119_v41  ;;  %v9118_v47 = vmax.f32 %v9102_v1, 0.0  ;;  %v9105_v51 = vadd.f32 %v15640_v30, %v8878_v26  ;;  %v8877_v60 = vadd.f32 %v8814_v13, %v8650_v18  ;;  %v12282_v30 = vpop.f32.mrf.mxu0  ;;  %v8428_v36 = vadd.f32 %v16142_v2, %v8201_v11  ;;  %v16145_v18 = vld [vmem:[#allocation69_spill] sm:$0xff]  ;;  %v16147_v13 = vld [vmem:[#allocation31_spill] sm:$0xff] }
 0x4da   :  { %v12250_v23 = vpop.f32.mrf.mxu1  ;;  %v8204_v58 = vadd.f32 %v16140_v24, %v7977_v40  ;;  %v16146_v41 = vld [vmem:[#allocation25_spill] sm:$0xff]  ;;  %v16149_v40 = vld [vmem:[#allocation63_spill] sm:$0xff] }
 0x4db   :  { %9135 = vst.msk [vmem:[#allocation5 + $0x10] sm:$0xff] %vm9132_vm6, %v9118_v47  ;;  %v9121_v34 = vmax.f32 %v9105_v51, 0.0  ;;  %v9104_v4 = vadd.f32 %v15649_v32, %v8877_v60  ;;  %v8880_v39 = vadd.f32 %v12250_v23, %v8653_v8  ;;  %v9071_v53 = vpop.f32.mrf.mxu0  ;;  %v8203_v1 = vadd.f32 %v16146_v41, %v7976_v5  ;;  %v16148_v51 = vld [vmem:[#allocation24_spill] sm:$0xff] }
 0x4dc   :  { %v8824_v3 = vpop.f32.mrf.mxu1  ;;  %v8431_v35 = vadd.f32 %v16145_v18, %v8204_v58  ;;  %v8657_v47 = vadd.f32 %v16147_v13, %v8429_v12  ;;  %v8206_v60 = vadd.f32 %v16148_v51, %v7979_v27  ;;  %v8656_v52 = vadd.f32 %v16149_v40, %v8428_v36  ;;  %v16154_v58 = vld [vmem:[#allocation67_spill] sm:$0xff] }
 0x4dd   :  { %9138 = vst.msk [vmem:[#allocation5 + $0x28] sm:$0xff] %vm9132_vm6, %v9121_v34  ;;  %v9120_v62 = vmax.f32 %v9104_v4, 0.0  ;;  %v9107_v0 = vadd.f32 %v15659_v25, %v8880_v39  ;;  %v8879_v32 = vadd.f32 %v8824_v3, %v8652_v33  ;;  %v16144_v25 = vld [vmem:[#allocation35_spill] sm:$0xff]  ;;  %v12285_v55 = vpop.f32.mrf.mxu0 }
 0x4de   :  { %v12253_v59 = vpop.f32.mrf.mxu1  ;;  %v7978_v44 = vadd.f32 %v16144_v25, %v16143_v22  ;;  %v8433_v4 = vadd.f32 %v15656_v28, %v8206_v60 }
 0x4df   :  { %9137 = vst.msk [vmem:[#allocation5 + $0x20] sm:$0xff] %vm9132_vm6, %v9120_v62  ;;  %v9123_v20 = vmax.f32 %v9107_v0, 0.0  ;;  %v9106_v6 = vadd.f32 %v15669_v49, %v8879_v32  ;;  %v8882_v17 = vadd.f32 %v12253_v59, %v8655_v37  ;;  %v8430_v49 = vadd.f32 %v15651_v14, %v8203_v1  ;;  %v9081_v37 = vpop.f32.mrf.mxu0  ;;  %v16153_v0 = vld [vmem:[#allocation30_spill] sm:$0xff] }
 0x4e0   :  { %v8834_v26 = vpop.f32.mrf.mxu1  ;;  %v8205_v10 = vadd.f32 %v16150_v43, %v7978_v44  ;;  %v8661_v32 = vadd.f32 %v16153_v0, %v8433_v4  ;;  %v16155_v0 = vmov 0.0  }
 0x4e1   :  { %9140 = vst.msk [vmem:[#allocation5 + $0x38] sm:$0xff] %vm9132_vm6, %v9123_v20  ;;  %v9122_v56 = vmax.f32 %v9106_v6, 0.0  ;;  %v9109_v19 = vadd.f32 %v15678_v16, %v8882_v17  ;;  %v8881_v46 = vadd.f32 %v8834_v26, %v8654_v61  ;;  %v16151_v16 = vld [vmem:[#allocation62_spill] sm:$0xff]  ;;  %v12288_v57 = vpop.f32.mrf.mxu0 }
 0x4e2   :  { %v12256_v15 = vpop.f32.mrf.mxu1  ;;  %v8659_v34 = vadd.f32 %v16151_v16, %v8431_v35  ;;  %v9149_v33 = vld [vmem:[#allocation5] ss:$4 sm:$0xff]  ;;  %v9157_v38 = vld [vmem:[#allocation5 + $0x1] ss:$4 sm:$0xff]  ;;  %v8432_v31 = vadd.f32 %v15662_v9, %v8205_v10  ;;  %v9169_v29 = vld [vmem:[#allocation5 + $0x2] ss:$4 sm:$0xff] }
 0x4e3   :  { %9139 = vst.msk [vmem:[#allocation5 + $0x30] sm:$0xff] %vm9132_vm6, %v9122_v56  ;;  %v9125_v8 = vmax.f32 %v9109_v19, 0.0  ;;  %v9108_v21 = vadd.f32 %v9061_v63, %v8881_v46  ;;  %v8884_v42 = vadd.f32 %v12256_v15, %v8657_v47  ;;  %v16152_v63 = vld [vmem:[#allocation33_spill] sm:$0xff]  ;;  %v9164_v28 = vmax.f32 %v9149_v33, %v9157_v38  ;;  %v9091_v17 = vpop.f32.mrf.mxu0 }
 0x4e4   :  { %v8844_v23 = vpop.f32.mrf.mxu1  ;;  %v8658_v5 = vadd.f32 %v16152_v63, %v8430_v49  ;;  %v8660_v59 = vadd.f32 %v16154_v58, %v8432_v31  ;;  %v9181_v18 = vld [vmem:[#allocation5 + $0x3] ss:$4 sm:$0xff] }
 0x4e5   :  { %9142 = vst.msk [vmem:[#allocation5 + $0x48] sm:$0xff] %vm9132_vm6, %v9125_v8  ;;  %v9124_v14 = vmax.f32 %v9108_v21, 0.0  ;;  %v9111_v39 = vadd.f32 %v12282_v30, %v8884_v42  ;;  %v8883_v7 = vadd.f32 %v8844_v23, %v8656_v52  ;;  %v9176_v2 = vmax.f32 %v9164_v28, %v9169_v29  ;;  %v10410_v29 = vld [vmem:[%s15815_s5 + $0x20] sm:$0xff] }
 0x4e6   :  { %v12259_v54 = vpop.f32.mrf.mxu1 }
 0x4e7   :  { %9141 = vst.msk [vmem:[#allocation5 + $0x40] sm:$0xff] %vm9132_vm6, %v9124_v14  ;;  %v9127_v11 = vmax.f32 %v9111_v39, 0.0  ;;  %v9110_v3 = vadd.f32 %v9071_v53, %v8883_v7  ;;  %v8886_v50 = vadd.f32 %v12259_v54, %v8659_v34  ;;  %v9188_v35 = vmax.f32 %v9176_v2, %v9181_v18  ;;  %v9557_v18 = vld [vmem:[%s15817_s7] sm:$0xff] }
 0x4e8   :  { %v8854_v45 = vpop.f32.mrf.mxu1 }
 0x4e9   :  { %9144 = vst.msk [vmem:[#allocation5 + $0x58] sm:$0xff] %vm9132_vm6, %v9127_v11  ;;  %v9126_v12 = vmax.f32 %v9110_v3, 0.0  ;;  %v9113_v30 = vadd.f32 %v12285_v55, %v8886_v50  ;;  %v8885_v62 = vadd.f32 %v8854_v45, %v8658_v5  ;;  %v9196_v13 = vrot.slane %v9188_v35, 2 }
 0x4ea   :  { %v12262_v48 = vpop.f32.mrf.mxu1  ;;  %v9151_v53 = vld [vmem:[#allocation5 + $0x20] ss:$4 sm:$0xff]  ;;  %v9159_v22 = vld [vmem:[#allocation5 + $0x21] ss:$4 sm:$0xff]  ;;  %v9171_v47 = vld [vmem:[#allocation5 + $0x22] ss:$4 sm:$0xff] }
 0x4eb   :  { %9143 = vst.msk [vmem:[#allocation5 + $0x50] sm:$0xff] %vm9132_vm6, %v9126_v12  ;;  %v9129_v9 = vmax.f32 %v9113_v30, 0.0  ;;  %v9112_v27 = vadd.f32 %v9081_v37, %v8885_v62  ;;  %v8888_v24 = vadd.f32 %v12262_v48, %v8661_v32  ;;  %v9165_v1 = vmax.f32 %v9151_v53, %v9159_v22  ;;  %v9183_v21 = vld [vmem:[#allocation5 + $0x23] ss:$4 sm:$0xff] }
 0x4ec   :  { %v8864_v61 = vpop.f32.mrf.mxu1  ;;  %v9204_v8 = vmax.f32 %v9188_v35, %v9196_v13  ;;  %v9208_v52 = vrot.slane %v9188_v35, 4  ;;  %v9220_v54 = vrot.slane %v9188_v35, 6  ;;  %v10408_v37 = vld [vmem:[%s15815_s5 + $0x18] sm:$0xff]  ;;  %v10407_v62 = vld [vmem:[%s15815_s5 + $0x10] sm:$0xff] }
 0x4ed   :  { %9146 = vst.msk [vmem:[#allocation5 + $0x68] sm:$0xff] %vm9132_vm6, %v9129_v9  ;;  %v9128_v36 = vmax.f32 %v9112_v27, 0.0  ;;  %v9115_v20 = vadd.f32 %v12288_v57, %v8888_v24  ;;  %v8887_v6 = vadd.f32 %v8864_v61, %v8660_v59  ;;  %v9177_v51 = vmax.f32 %v9165_v1, %v9171_v47  ;;  %v10411_v27 = vld [vmem:[%s15815_s5 + $0x28] sm:$0xff]  ;;  %v9560_v22 = vld [vmem:[%s15817_s7 + $0x18] sm:$0xff]  ;;  %v10405_v1 = vld [vmem:[%s15816_s6] ss:$0 sm:$0xff] }
 0x4ee   :  { %v9216_v34 = vmax.f32 %v9204_v8, %v9208_v52  ;;  %s12337_s6 = scalar_lea.vmem %s9651_s26, 32 }
 0x4ef   :  { %9145 = vst.msk [vmem:[#allocation5 + $0x60] sm:$0xff] %vm9132_vm6, %v9128_v36  ;;  %v9131_v25 = vmax.f32 %v9115_v20, 0.0  ;;  %v9114_v44 = vadd.f32 %v9091_v17, %v8887_v6  ;;  %v9189_v40 = vmax.f32 %v9177_v51, %v9183_v21  ;;  %v10414_v36 = vld [vmem:[%s15815_s5 + $0x38] sm:$0xff]  ;;  %v10413_v6 = vld [vmem:[%s15815_s5 + $0x30] sm:$0xff]  ;;  %v10416_v21 = vld [vmem:[%s15818_s8] ss:$0 sm:$0xff]  ;;  %p12338_p0 = scmp.ne.s32.totalorder %s9651_s26, %s12337_s6  ;;  %p12343_p2 = scmp.lt.s32.totalorder %s12337_s6, %s12337_s6 }
 0x4f0   :  { %v9228_v31 = vmax.f32 %v9216_v34, %v9220_v54 }
 0x4f1   :  { %9148 = vst.msk [vmem:[#allocation5 + $0x78] sm:$0xff] %vm9132_vm6, %v9131_v25  ;;  %v9130_v41 = vmax.f32 %v9114_v44, 0.0  ;;  %v9197_v33 = vrot.slane %v9189_v40, 2  ;;  %v9209_v12 = vrot.slane %v9189_v40, 4  ;;  %v9221_v58 = vrot.slane %v9189_v40, 6  ;;  %v9559_v25 = vld [vmem:[%s15817_s7 + $0x10] sm:$0xff]  ;;  %p12344_p3 = por %p12343_p2, %p12342_p1 }
 0x4f2   :  { %v9153_v26 = vld [vmem:[#allocation5 + $0x40] ss:$4 sm:$0xff]  ;;  %v9161_v56 = vld [vmem:[#allocation5 + $0x41] ss:$4 sm:$0xff]  ;;  %v9173_v46 = vld [vmem:[#allocation5 + $0x42] ss:$4 sm:$0xff] }
 0x4f3   :  { %9147 = vst.msk [vmem:[#allocation5 + $0x70] sm:$0xff] %vm9132_vm6, %v9130_v41  ;;  %v9166_v19 = vmax.f32 %v9153_v26, %v9161_v56  ;;  %v9185_v60 = vld [vmem:[#allocation5 + $0x43] ss:$4 sm:$0xff]  ;;  %v9205_v50 = vmax.f32 %v9189_v40, %v9197_v33  ;;  %v9323_v32 = vrot.slane %v9228_v31, 1  ;;  %p12345_p4 = pnand %p12344_p3, %p12338_p0 }
 0x4f4   :  { %v9558_v44 = vld [vmem:[%s15817_s7 + $0x8] sm:$0xff] }
 0x4f5   :  { %v9178_v49 = vmax.f32 %v9166_v19, %v9173_v46  ;;  %v9217_v48 = vmax.f32 %v9205_v50, %v9209_v12 }
 0x4f7   :  { %v9190_v15 = vmax.f32 %v9178_v49, %v9185_v60  ;;  %v9229_v61 = vmax.f32 %v9217_v48, %v9221_v58 }
 0x4f9   :  { %v9198_v42 = vrot.slane %v9190_v15, 2  ;;  %v9210_v23 = vrot.slane %v9190_v15, 4  ;;  %v9222_v39 = vrot.slane %v9190_v15, 6  ;;  %v9481_v17 = vrot.slane %v9229_v61, 1 }
 0x4fa   :  { %v9155_v55 = vld [vmem:[#allocation5 + $0x60] ss:$4 sm:$0xff]  ;;  %v9163_v43 = vld [vmem:[#allocation5 + $0x61] ss:$4 sm:$0xff]  ;;  %v9175_v4 = vld [vmem:[#allocation5 + $0x62] ss:$4 sm:$0xff] }
 0x4fb   :  { %v9206_v10 = vmax.f32 %v9190_v15, %v9198_v42  ;;  %v9167_v16 = vmax.f32 %v9155_v55, %v9163_v43  ;;  %v9187_v38 = vld [vmem:[#allocation5 + $0x63] ss:$4 sm:$0xff] }
 0x4fd   :  { %v9218_v14 = vmax.f32 %v9206_v10, %v9210_v23  ;;  %v9179_v7 = vmax.f32 %v9167_v16, %v9175_v4 }
 0x4ff   :  { %v9230_v63 = vmax.f32 %v9218_v14, %v9222_v39  ;;  %v9191_v5 = vmax.f32 %v9179_v7, %v9187_v38 }
 0x501   :  { %v9244_v11 = vrot.slane %v9230_v63, 7  ;;  %v9199_v3 = vrot.slane %v9191_v5, 2  ;;  %v9211_v30 = vrot.slane %v9191_v5, 4  ;;  %v9223_v9 = vrot.slane %v9191_v5, 6 }
 0x502   :  { %v9324_v24 = vsel %vm9245_vm7, %v9230_v63, %v9323_v32 }
 0x503   :  { %v9246_v45 = vsel %vm9245_vm7, %v9244_v11, %v9228_v31  ;;  %v9207_v28 = vmax.f32 %v9191_v5, %v9199_v3 }
 0x504   :  { %12294 = vmatmul.mubr.msk.f32.vlgmr.msra.gmra.mxu1 %vm9132_vm6, %v9246_v45 }
 0x505   :  { %12297 = vmatpush3.msra.mxu1 %v10408_v37  ;;  %12300 = vmatprep.mubr.msk.f32.mxu1 %vm12360_vm5, %v16155_v0  ;;  %v9219_v57 = vmax.f32 %v9207_v28, %v9211_v30 }
 0x506   :  { %12298 = vmatprep.subr.mxu1 %v16155_v0 }
 0x507   :  { %12299 = vmatpush3.msra.mxu1 %v10407_v62  ;;  %v9231_v59 = vmax.f32 %v9219_v57, %v9223_v9 }
 0x508   :  { %12303 = vmatprep.subr.mxu1 %v16155_v0  ;;  %12301 = vmatmul.mubr.msk.f32.vlgmr.msra.gmra.mxu1 %vm9132_vm6, %v9324_v24 }
 0x509   :  { %12304 = vmatpush3.msra.mxu1 %v10411_v27  ;;  %12307 = vmatprep.mubr.msk.f32.mxu1 %vm12360_vm5, %v16155_v0  ;;  %v9403_v2 = vrot.slane %v9231_v59, 7  ;;  %v9482_v53 = vsel %vm9245_vm7, %v9231_v59, %v9481_v17 }
 0x50a   :  { %12305 = vmatprep.subr.mxu1 %v16155_v0 }
 0x50b   :  { %12306 = vmatpush3.msra.mxu1 %v10410_v29  ;;  %v9404_v20 = vsel %vm9245_vm7, %v9403_v2, %v9229_v61 }
 0x50c   :  { %12310 = vmatprep.subr.mxu1 %v16155_v0  ;;  %12308 = vmatmul.mubr.msk.f32.vlgmr.msra.gmra.mxu1 %vm9132_vm6, %v9404_v20 }
 0x50d   :  { %12311 = vmatpush3.msra.mxu1 %v10414_v36  ;;  %12314 = vmatprep.mubr.msk.f32.mxu1 %vm12360_vm5, %v16155_v0 }
 0x50e   :  { %12312 = vmatprep.subr.mxu1 %v16155_v0 }
 0x50f   :  { %12313 = vmatpush3.msra.mxu1 %v10413_v6 }
 0x510   :  { %12315 = vmatmul.mubr.msk.f32.vlgmr.msra.gmra.mxu1 %vm9132_vm6, %v9482_v53  ;;  %12317 = vmatprep.subr.mxu1 %v16155_v0 }
 0x511   :  { %12325 = vmatprep.mubr.msk.f32.mxu1 %vm12360_vm5, %v16155_v0  ;;  %12318 = vmatpush3.msra.mxu1 %v9560_v22 }
 0x512   :  { %12319 = vmatprep.subr.mxu1 %v16155_v0 }
 0x513   :  { %12320 = vmatpush3.msra.mxu1 %v9559_v25 }
 0x514   :  { %12321 = vmatprep.subr.mxu1 %v16155_v0 }
 0x515   :  { %12322 = vmatpush3.msra.mxu1 %v9558_v44 }
 0x516   :  { %12323 = vmatprep.subr.mxu1 %v16155_v0 }
 0x517   :  { %12324 = vmatpush3.msra.mxu1 %v9557_v18 }
 0x5c4   :  { %v9315_v35 = vpop.f32.mrf.mxu1 }
 0x5c5   :  { %v9319_v19 = vadd.f32 %v10405_v1, %v9315_v35 }
 0x5c6   :  { %v12295_v41 = vpop.f32.mrf.mxu1 }
 0x5c8   :  { %v9393_v26 = vpop.f32.mrf.mxu1 }
 0x5c9   :  { %v9397_v13 = vadd.f32 %v9393_v26, %v9319_v19 }
 0x5ca   :  { %v12302_v56 = vpop.f32.mrf.mxu1 }
 0x5cc   :  { %v9473_v46 = vpop.f32.mrf.mxu1 }
 0x5cd   :  { %v9477_v49 = vadd.f32 %v9473_v46, %v9397_v13 }
 0x5ce   :  { %v12309_v47 = vpop.f32.mrf.mxu1 }
 0x5d0   :  { %v9551_v51 = vpop.f32.mrf.mxu1 }
 0x5d1   :  { %v9555_v60 = vadd.f32 %v9551_v51, %v9477_v49 }
 0x5d2   :  { %v12316_v15 = vpop.f32.mrf.mxu1 }
 0x5d3   :  { %v9556_v8 = vmax.f32 %v9555_v60, 0.0 }
 0x5d5   :  { %12326 = vmatmul.mubr.msk.f32.vlgmr.msra.gmra.mxu1 %vm9568_vm8, %v9556_v8 }
 0x695   :  { %v9638_v42 = vpop.f32.mrf.mxu1 }
 0x696   :  { %v9639_v40 = vadd.f32 %v10416_v21, %v9638_v42 }
 0x697   :  { %v12327_v52 = vpop.f32.mrf.mxu1 }
 0x698   :  { %9643 = vst.msk [vmem:[#allocation6] sm:$0x3] %vm9642_vm9, %v9639_v40 }
 0x699   :  { %12348 = shalt.err (!%p12345_p4)
}
 0x69a   :  { %9653 = dma.vmem_to_hbm [thread:$0]  %s9651_s26, 32, %s15819_s9, [#allocation7]  }
 0x69b   :  { %12357 = dma.done.wait [#allocation7], 32  }
 0x69c   :  { %12358 = vsyncadd [#allocation7], 4294967264 }
 0x69d   :  { %9657 = vsyncpa [#allocation7], 1 }

</bundles_post_ra>
